<compile_context>
chip_gen: v7x
topology: tpu7x:2x2x1
jax: 0.10.0
libtpu: 0.0.40
codegen_flags: <defaults>
</compile_context>

<pallas_src>
import functools

import jax
import jax.numpy as jnp
import numpy as np
from jax.experimental import pallas as pl
from jax.experimental.pallas import tpu as pltpu

W0 = 30.0


def _round_up(x, m):
    return ((x + m - 1) // m) * m


# --------------------------------------------------------------------------
# Kernel
# --------------------------------------------------------------------------
def siren_kernel(num_mid, in_dim, sin_dtype, x_ref, w0_ref, b0_ref, *rest):
    """Fused SIREN forward in feature-major layout.

    x_ref:    (in_dim, tile_n)      f32  (batch on the lane axis)
    w0_ref:   (H, in_dim)           f32  (w0 folded in)
    b0_ref:   (H, 1)                f32  (w0 folded in)
    wmid_ref: (num_mid, H, H)       matmul dtype (w0 folded in)   [if num_mid>0]
    bmid_ref: (num_mid, H, 1)       f32          (w0 folded in)   [if num_mid>0]
    wl_ref:   (out_dim, H)          matmul dtype (no w0: last layer)
    bl_ref:   (out_dim, 1)          f32
    out_ref:  (out_dim, tile_n)     f32  (lane-dense store)
    """
    if num_mid > 0:
        wmid_ref, bmid_ref, wl_ref, bl_ref, out_ref = rest
    else:
        wl_ref, bl_ref, out_ref = rest

    x = x_ref[...]          # (in_dim, tile_n) f32
    w0 = w0_ref[...]        # (H, in_dim)      f32
    b0 = b0_ref[...]        # (H, 1)           f32

    # First layer: K = in_dim (tiny) -> VPU broadcast FMAs instead of an MXU
    # matmul.  acc = sum_k w0[:, k] (outer) x[k, :]  + b0
    acc = b0 + w0[:, 0:1] * x[0:1, :]                      # (H, tile_n) f32
    for k in range(1, in_dim):
        acc = acc + w0[:, k:k + 1] * x[k:k + 1, :]
    h = jnp.sin(acc.astype(sin_dtype))                     # w0 already folded in

    # Middle layers: feature-major MXU matmuls, f32 accumulation.
    for l in range(num_mid):
        w = wmid_ref[l]                                    # (H, H) matmul dtype
        b = bmid_ref[l]                                    # (H, 1) f32
        z = jnp.dot(w, h.astype(w.dtype),
                    preferred_element_type=jnp.float32) + b
        h = jnp.sin(z.astype(sin_dtype))

    # Last layer: linear only (is_last=True in the PyTorch module).
    wl = wl_ref[...]                                       # (out_dim, H)
    bl = bl_ref[...]                                       # (out_dim, 1)
    out = jnp.dot(wl, h.astype(wl.dtype),
                  preferred_element_type=jnp.float32) + bl
    out_ref[...] = out.astype(out_ref.dtype)               # lane-dense store


# --------------------------------------------------------------------------
# Parameter packing (one-time; do NOT call per forward pass)
# --------------------------------------------------------------------------
def pack_siren_params(weights, biases, *, matmul_dtype=jnp.bfloat16):
    """weights[i]: (out_f, in_f) PyTorch orientation; biases[i]: (out_f,).

    Folds w0 into every non-final layer and stacks the hidden layers into a
    single weight/bias slab.  bf16 MXU inputs are fine on v5e/v6e/v7x alike
    (all three MXUs are natively bf16); bias/accumulation/sin stay f32.
    """
    L = len(weights)
    assert L >= 2, "SIREN needs at least 2 layers"
    scaled_w = [w * W0 if i < L - 1 else w for i, w in enumerate(weights)]
    scaled_b = [b * W0 if i < L - 1 else b for i, b in enumerate(biases)]

    packed = {
        "w_first": scaled_w[0].astype(jnp.float32),                 # (H, in_dim)
        "b_first": scaled_b[0].reshape(-1, 1).astype(jnp.float32),  # (H, 1)
        "w_last": scaled_w[-1].astype(matmul_dtype),                # (out, H)
        "b_last": scaled_b[-1].reshape(-1, 1).astype(jnp.float32),  # (out, 1)
        "w_mid": None,
        "b_mid": None,
    }
    if L > 2:
        packed["w_mid"] = jnp.stack(scaled_w[1:-1]).astype(matmul_dtype)
        packed["b_mid"] = jnp.stack(
            [b.reshape(-1, 1) for b in scaled_b[1:-1]]).astype(jnp.float32)
    return packed


# --------------------------------------------------------------------------
# Forward wrappers
# --------------------------------------------------------------------------
def _choose_tile_n(n, tile_n=None, *, min_steps=2, max_tile=16384):
    """Pick a lane tile: multiple of 128, >=min_steps (even) grid steps when
    possible (v7x has 2 TCs), tiles capped at max_tile, padding waste bounded."""
    n128 = _round_up(max(n, 1), 128)
    if tile_n is None:
        steps = max(min_steps, pl.cdiv(n128, max_tile))
        if steps > 1 and steps % 2:
            steps += 1                      # even step count balances 2 TCs
        tile_n = _round_up(pl.cdiv(n128, steps), 128)
    tile_n = max(128, min(_round_up(tile_n, 128), n128))
    return tile_n


def siren_forward_fm(x_fm, packed, *, tile_n=None, sin_dtype=jnp.float32):
    """Feature-major forward (primary, layout-shuffle-free path).

    x_fm: (in_dim, N) f32, batch on the lane axis.  Returns (out_dim, N) f32.
    """
    in_dim, n = x_fm.shape
    out_dim = packed["w_last"].shape[0]
    num_mid = 0 if packed["w_mid"] is None else packed["w_mid"].shape[0]

    tile_n = _choose_tile_n(n, tile_n)
    n_pad = _round_up(n, tile_n)
    grid = (n_pad // tile_n,)

    x_fm = x_fm.astype(jnp.float32)
    if n_pad != n:
        x_fm = jnp.pad(x_fm, ((0, 0), (0, n_pad - n)))

    in_specs = [
        pl.BlockSpec((in_dim, tile_n), lambda i: (0, i)),
        pl.BlockSpec(packed["w_first"].shape, lambda i: (0, 0)),
        pl.BlockSpec(packed["b_first"].shape, lambda i: (0, 0)),
    ]
    args = [x_fm, packed["w_first"], packed["b_first"]]
    if num_mid > 0:
        in_specs += [
            pl.BlockSpec(packed["w_mid"].shape, lambda i: (0, 0, 0)),
            pl.BlockSpec(packed["b_mid"].shape, lambda i: (0, 0, 0)),
        ]
        args += [packed["w_mid"], packed["b_mid"]]
    in_specs += [
        pl.BlockSpec(packed["w_last"].shape, lambda i: (0, 0)),
        pl.BlockSpec(packed["b_last"].shape, lambda i: (0, 0)),
    ]
    args += [packed["w_last"], packed["b_last"]]

    out_spec = pl.BlockSpec((out_dim, tile_n), lambda i: (0, i))

    out_fm = pl.pallas_call(
        functools.partial(siren_kernel, num_mid, in_dim, sin_dtype),
        out_shape=jax.ShapeDtypeStruct((out_dim, n_pad), jnp.float32),
        grid_spec=pltpu.PrefetchScalarGridSpec(
            num_scalar_prefetch=0,
            grid=grid,
            in_specs=in_specs,
            out_specs=out_spec,
        ),
        compiler_params=pltpu.CompilerParams(
            dimension_semantics=("parallel",),
            # Large lane tiles + double-buffered blocks + (H, tile_n) f32
            # temporaries can exceed the v5e default 16 MiB scoped limit;
            # 48 MiB is safe on all generations (v7x physical VMEM = 64 MiB).
            vmem_limit_bytes=48 << 20,
        ),
    )(*args)

    if n_pad != n:
        out_fm = out_fm[:, :n]
    return out_fm


def siren_forward(x, packed, *, tile_n=None, sin_dtype=jnp.float32):
    """PyTorch-layout compatibility shim: x (N, in_dim) -> (N, out_dim).

    Prefer siren_forward_fm to avoid the two wrapper transposes entirely.
    """
    out_fm = siren_forward_fm(x.T, packed, tile_n=tile_n, sin_dtype=sin_dtype)
    return out_fm.T


# --------------------------------------------------------------------------
# Init + reference (match the PyTorch module)
# --------------------------------------------------------------------------
def init_siren_params(key, params):
    """Deterministic init matching SirenLayer.init_weights + PyTorch bias default.

    Returns weights in PyTorch orientation (out_f, in_f) and biases (out_f,).
    """
    depth = params["network_depth"]
    hidden = params["network_width"]
    in_dim = params["network_input_size"]
    out_dim = params["network_output_size"]

    dims = [in_dim] + [hidden] * (depth - 1) + [out_dim]
    weights, biases = [], []
    for i in range(depth):
        in_f, out_f = dims[i], dims[i + 1]
        is_first = i == 0
        key, kw, kb = jax.random.split(key, 3)
        wb = (1.0 / in_f) if is_first else (np.sqrt(6.0 / in_f) / W0)
        w = jax.random.uniform(kw, (out_f, in_f), jnp.float32, -wb, wb)
        bb = 1.0 / np.sqrt(in_f)  # PyTorch nn.Linear default bias init
        b = jax.random.uniform(kb, (out_f,), jnp.float32, -bb, bb)
        weights.append(w)
        biases.append(b)
    return weights, biases


def siren_reference(x, weights, biases):
    """Pure-JAX reference of the PyTorch forward pass."""
    h = x
    L = len(weights)
    for i, (w, b) in enumerate(zip(weights, biases)):
        h = h @ w.T + b
        if i < L - 1:
            h = jnp.sin(W0 * h)
    return h


if __name__ == "__main__":
    params = {
        "network_depth": 4,
        "network_width": 32,
        "network_input_size": 2,
        "network_output_size": 3,
    }
    key = jax.random.PRNGKey(0)
    key, kx = jax.random.split(key)

    N = 1000  # not a multiple of the tile -> exercises padding + 2-step grid
    x = jax.random.uniform(kx, (N, params["network_input_size"]),
                           jnp.float32, -1.0, 1.0)

    weights, biases = init_siren_params(key, params)
    ref = siren_reference(x, weights, biases)

    # f32 MXU inputs, PyTorch-layout shim: tight tolerance vs. the reference.
    packed_f32 = pack_siren_params(weights, biases, matmul_dtype=jnp.float32)
    out_f32 = jax.block_until_ready(siren_forward(x, packed_f32))
    np.testing.assert_allclose(np.asarray(out_f32), np.asarray(ref),
                               rtol=1e-4, atol=1e-4)

    # Primary path: feature-major API (no wrapper transposes) + bf16 MXU
    # inputs (fast on v5e/v6e/v7x).  sin + accumulation stay f32, so only the
    # matmul-input rounding differs -> looser tolerance.
    # TODO(synk): flip sin_dtype to bf16 on v6e/v7x once a bundle dump
    # confirms the VALU sin polynomial is the binding slot (keep f32 on v5e).
    packed_bf16 = pack_siren_params(weights, biases, matmul_dtype=jnp.bfloat16)
    out_fm = jax.block_until_ready(siren_forward_fm(x.T, packed_bf16))
    np.testing.assert_allclose(np.asarray(out_fm.T), np.asarray(ref),
                               rtol=0.0, atol=5e-2)

    print("KERNEL_OK")
</pallas_src>

<mosaic_0001>
module attributes {stable_mosaic.version = 11 : i64} {
  func.func @siren_kernel(%arg0: i32, %arg1: memref<2x512xf32, #tpu.memory_space<vmem>>, %arg2: memref<32x2xf32, #tpu.memory_space<vmem>>, %arg3: memref<32x1xf32, #tpu.memory_space<vmem>>, %arg4: memref<2x32x32xf32, #tpu.memory_space<vmem>>, %arg5: memref<2x32x1xf32, #tpu.memory_space<vmem>>, %arg6: memref<3x32xf32, #tpu.memory_space<vmem>>, %arg7: memref<3x1xf32, #tpu.memory_space<vmem>>, %arg8: memref<3x512xf32, #tpu.memory_space<vmem>>) attributes {dimension_semantics = [#tpu.dimension_semantics<parallel>], iteration_bounds = array<i64: 2>, scalar_prefetch = 0 : i64, scratch_operands = 0 : i64, tpu.core_type = #tpu.core_type<tc>, window_params = [{transform_indices = @transform_0, window_bounds = array<i64: 2, 512>}, {pipeline_mode = #tpu.pipeline_mode<synchronous>, transform_indices = @transform_1, window_bounds = array<i64: 32, 2>}, {pipeline_mode = #tpu.pipeline_mode<synchronous>, transform_indices = @transform_2, window_bounds = array<i64: 32, 1>}, {pipeline_mode = #tpu.pipeline_mode<synchronous>, transform_indices = @transform_3, window_bounds = array<i64: 2, 32, 32>}, {pipeline_mode = #tpu.pipeline_mode<synchronous>, transform_indices = @transform_4, window_bounds = array<i64: 2, 32, 1>}, {pipeline_mode = #tpu.pipeline_mode<synchronous>, transform_indices = @transform_5, window_bounds = array<i64: 3, 32>}, {pipeline_mode = #tpu.pipeline_mode<synchronous>, transform_indices = @transform_6, window_bounds = array<i64: 3, 1>}, {transform_indices = @transform_7, window_bounds = array<i64: 3, 512>}]} {
    %c0 = arith.constant 0 : index
    %c0_0 = arith.constant 0 : index
    %0 = vector.load %arg1[%c0, %c0_0] : memref<2x512xf32, #tpu.memory_space<vmem>>, vector<2x512xf32>
    %c0_1 = arith.constant 0 : index
    %c0_2 = arith.constant 0 : index
    %1 = vector.load %arg2[%c0_1, %c0_2] : memref<32x2xf32, #tpu.memory_space<vmem>>, vector<32x2xf32>
    %c0_3 = arith.constant 0 : index
    %c0_4 = arith.constant 0 : index
    %2 = vector.load %arg3[%c0_3, %c0_4] : memref<32x1xf32, #tpu.memory_space<vmem>>, vector<32x1xf32>
    %3 = vector.extract_strided_slice %1 {offsets = [0, 0], sizes = [32, 1], strides = [1, 1]} : vector<32x2xf32> to vector<32x1xf32>
    %4 = vector.extract_strided_slice %0 {offsets = [0, 0], sizes = [1, 512], strides = [1, 1]} : vector<2x512xf32> to vector<1x512xf32>
    %5 = vector.broadcast %3 : vector<32x1xf32> to vector<32x512xf32>
    %6 = vector.broadcast %4 : vector<1x512xf32> to vector<32x512xf32>
    %7 = arith.mulf %5, %6 : vector<32x512xf32>
    %8 = vector.broadcast %2 : vector<32x1xf32> to vector<32x512xf32>
    %9 = arith.addf %8, %7 : vector<32x512xf32>
    %10 = vector.extract_strided_slice %1 {offsets = [0, 1], sizes = [32, 1], strides = [1, 1]} : vector<32x2xf32> to vector<32x1xf32>
    %11 = vector.extract_strided_slice %0 {offsets = [1, 0], sizes = [1, 512], strides = [1, 1]} : vector<2x512xf32> to vector<1x512xf32>
    %12 = vector.broadcast %10 : vector<32x1xf32> to vector<32x512xf32>
    %13 = vector.broadcast %11 : vector<1x512xf32> to vector<32x512xf32>
    %14 = arith.mulf %12, %13 : vector<32x512xf32>
    %15 = arith.addf %9, %14 : vector<32x512xf32>
    %16 = math.sin %15 : vector<32x512xf32>
    %c0_5 = arith.constant 0 : index
    %c0_6 = arith.constant 0 : index
    %c0_7 = arith.constant 0 : index
    %17 = vector.load %arg4[%c0_5, %c0_6, %c0_7] : memref<2x32x32xf32, #tpu.memory_space<vmem>>, vector<1x32x32xf32>
    %18 = vector.shape_cast %17 : vector<1x32x32xf32> to vector<32x32xf32>
    %c0_8 = arith.constant 0 : index
    %c0_9 = arith.constant 0 : index
    %c0_10 = arith.constant 0 : index
    %19 = vector.load %arg5[%c0_8, %c0_9, %c0_10] : memref<2x32x1xf32, #tpu.memory_space<vmem>>, vector<1x32x1xf32>
    %20 = vector.shape_cast %19 : vector<1x32x1xf32> to vector<32x1xf32>
    %cst = arith.constant dense<0.000000e+00> : vector<32x512xf32>
    %21 = tpu.matmul %18, %16, %cst {dimension_numbers = #tpu.dot_dimension_numbers<[1], [0], [0], [1], [0, 0, 1, 1], [], []>} : vector<32x32xf32>, vector<32x512xf32>, vector<32x512xf32> -> vector<32x512xf32>
    %22 = vector.broadcast %20 : vector<32x1xf32> to vector<32x512xf32>
    %23 = arith.addf %21, %22 : vector<32x512xf32>
    %24 = math.sin %23 : vector<32x512xf32>
    %c1 = arith.constant 1 : index
    %c0_11 = arith.constant 0 : index
    %c0_12 = arith.constant 0 : index
    %25 = vector.load %arg4[%c1, %c0_11, %c0_12] : memref<2x32x32xf32, #tpu.memory_space<vmem>>, vector<1x32x32xf32>
    %26 = vector.shape_cast %25 : vector<1x32x32xf32> to vector<32x32xf32>
    %c1_13 = arith.constant 1 : index
    %c0_14 = arith.constant 0 : index
    %c0_15 = arith.constant 0 : index
    %27 = vector.load %arg5[%c1_13, %c0_14, %c0_15] : memref<2x32x1xf32, #tpu.memory_space<vmem>>, vector<1x32x1xf32>
    %28 = vector.shape_cast %27 : vector<1x32x1xf32> to vector<32x1xf32>
    %cst_16 = arith.constant dense<0.000000e+00> : vector<32x512xf32>
    %29 = tpu.matmul %26, %24, %cst_16 {dimension_numbers = #tpu.dot_dimension_numbers<[1], [0], [0], [1], [0, 0, 1, 1], [], []>} : vector<32x32xf32>, vector<32x512xf32>, vector<32x512xf32> -> vector<32x512xf32>
    %30 = vector.broadcast %28 : vector<32x1xf32> to vector<32x512xf32>
    %31 = arith.addf %29, %30 : vector<32x512xf32>
    %32 = math.sin %31 : vector<32x512xf32>
    %c0_17 = arith.constant 0 : index
    %c0_18 = arith.constant 0 : index
    %33 = vector.load %arg6[%c0_17, %c0_18] : memref<3x32xf32, #tpu.memory_space<vmem>>, vector<3x32xf32>
    %c0_19 = arith.constant 0 : index
    %c0_20 = arith.constant 0 : index
    %34 = vector.load %arg7[%c0_19, %c0_20] : memref<3x1xf32, #tpu.memory_space<vmem>>, vector<3x1xf32>
    %cst_21 = arith.constant dense<0.000000e+00> : vector<3x512xf32>
    %35 = tpu.matmul %33, %32, %cst_21 {dimension_numbers = #tpu.dot_dimension_numbers<[1], [0], [0], [1], [0, 0, 1, 1], [], []>} : vector<3x32xf32>, vector<32x512xf32>, vector<3x512xf32> -> vector<3x512xf32>
    %36 = vector.broadcast %34 : vector<3x1xf32> to vector<3x512xf32>
    %37 = arith.addf %35, %36 : vector<3x512xf32>
    %c0_22 = arith.constant 0 : index
    %c0_23 = arith.constant 0 : index
    %38 = vector.load %arg8[%c0_22, %c0_23] : memref<3x512xf32, #tpu.memory_space<vmem>>, vector<3x512xf32>
    tpu.vector_store %arg8[%c0_22, %c0_23], %37 {strides = array<i32>} : memref<3x512xf32, #tpu.memory_space<vmem>>, vector<3x512xf32>,
    return
  }
  func.func @transform_0(%arg0: i32) -> (i32, i32) {
    %c0_i32 = arith.constant 0 : i32
    %c0_i32_0 = arith.constant 0 : i32
    return %c0_i32, %arg0 : i32, i32
  }
  func.func @transform_1(%arg0: i32) -> (i32, i32) {
    %c0_i32 = arith.constant 0 : i32
    %c0_i32_0 = arith.constant 0 : i32
    %c0_i32_1 = arith.constant 0 : i32
    return %c0_i32, %c0_i32_0 : i32, i32
  }
  func.func @transform_2(%arg0: i32) -> (i32, i32) {
    %c0_i32 = arith.constant 0 : i32
    %c0_i32_0 = arith.constant 0 : i32
    %c0_i32_1 = arith.constant 0 : i32
    return %c0_i32, %c0_i32_0 : i32, i32
  }
  func.func @transform_3(%arg0: i32) -> (i32, i32, i32) {
    %c0_i32 = arith.constant 0 : i32
    %c0_i32_0 = arith.constant 0 : i32
    %c0_i32_1 = arith.constant 0 : i32
    %c0_i32_2 = arith.constant 0 : i32
    return %c0_i32, %c0_i32_0, %c0_i32_1 : i32, i32, i32
  }
  func.func @transform_4(%arg0: i32) -> (i32, i32, i32) {
    %c0_i32 = arith.constant 0 : i32
    %c0_i32_0 = arith.constant 0 : i32
    %c0_i32_1 = arith.constant 0 : i32
    %c0_i32_2 = arith.constant 0 : i32
    return %c0_i32, %c0_i32_0, %c0_i32_1 : i32, i32, i32
  }
  func.func @transform_5(%arg0: i32) -> (i32, i32) {
    %c0_i32 = arith.constant 0 : i32
    %c0_i32_0 = arith.constant 0 : i32
    %c0_i32_1 = arith.constant 0 : i32
    return %c0_i32, %c0_i32_0 : i32, i32
  }
  func.func @transform_6(%arg0: i32) -> (i32, i32) {
    %c0_i32 = arith.constant 0 : i32
    %c0_i32_0 = arith.constant 0 : i32
    %c0_i32_1 = arith.constant 0 : i32
    return %c0_i32, %c0_i32_0 : i32, i32
  }
  func.func @transform_7(%arg0: i32) -> (i32, i32) {
    %c0_i32 = arith.constant 0 : i32
    %c0_i32_0 = arith.constant 0 : i32
    return %c0_i32, %arg0 : i32, i32
  }
}

</mosaic_0001>

<bundles_post_ra>
// kernel: tpu_custom_call.1
= control target key start
LH: loop header
LB: loop body
LE: loop exit
PB: predicated region body
PF: predicated region fallthrough
CT: control target
= control target key end

     0   :  { %12 = vsyncpa [#allocation3], 0  ;;  %s12014_s0 = inlined_call_operand.vmem [shape: f32[2,1024], index: 0, kind: input, shape index: {}]   ;;  %s12015_s1 = inlined_call_operand.vmem [shape: f32[32,2], index: 1, kind: input, shape index: {}]   ;;  %s12016_s2 = inlined_call_operand.vmem [shape: f32[32,1], index: 2, kind: input, shape index: {}]   ;;  %s12017_s3 = inlined_call_operand.vmem [shape: f32[2,32,32], index: 3, kind: input, shape index: {}]   ;;  %s12018_s4 = inlined_call_operand.vmem [shape: f32[2,32,1], index: 4, kind: input, shape index: {}]   ;;  %s12019_s5 = inlined_call_operand.vmem [shape: f32[3,32], index: 5, kind: input, shape index: {}]   ;;  %s12020_s6 = inlined_call_operand.vmem [shape: f32[3,1], index: 6, kind: input, shape index: {}]   ;;  %s12021_s7 = inlined_call_operand.hbm [shape: f32[3,1024], index: 7, kind: output, shape index: {}]  }
   0x1   :  { %14 = vsyncpa [#allocation3 + $0x1], 0  ;;  %s6982_s24 = smov 0   ;;  %s6984_s25 = smov 0  }
   0x2   :  { %s6986_s26 = smov 0   ;;  %s6988_s27 = smov 0  }
   0x3 LB: > { %s7003_s28 = sadd.s32 4294967295, %s6930_s27   ;;  %s6149_s29 = sadd.s32 4294967294, %s6930_s27   ;;  %s6930_s27 = sphi %s6988_s27, %s12517_s27   ;;  %s6926_s26 = sphi %s6986_s26, %s12516_s26   ;;  %s6922_s25 = sphi %s6984_s25, %s12515_s25   ;;  %s6918_s24 = sphi %s6982_s24, %s12514_s24  }
   0x4   : > { %s7007_s30 = sadd.s32 1, %s6930_s27   ;;  %s179_s8 = sadd.s32 1, %s6926_s26 }
   0x5   : > { %s176_s9 = ssub.s32 %s6930_s27, %s7007_s30  ;;  %p189_p0 = scmp.ne.s32.totalorder %s6926_s26, %s6922_s25 }
   0x6   : > { %p177_p1 = scmp.eq.s32.totalorder %s176_s9, 0  ;;  %p190_p2 = scmp.eq.s32.totalorder %s7003_s28, 1 }
   0x7   : > { %p195_p3 = scmp.ne.s32.totalorder %s6922_s25, %s6918_s24  ;;  %p196_p4 = scmp.eq.s32.totalorder %s6149_s29, 1 }
   0x8   : > { %s7018_s10 = scalar_select %p177_p1, %s6926_s26, %s179_s8  }
   0x9   : > { %p7020_p5 = por %p190_p2, %p189_p0  ;;  %p7024_p6 = por %p196_p4, %p195_p3 }
   0xa   : > { %p6152_p7 = scmp.ge.s32.totalorder %s6930_s27, 1  ;;  %p241_p8 = scmp.lt.s32.totalorder %s6930_s27, 3 }
   0xc   : > { %p242_p9 = pnand %p6152_p7, %p241_p8 }
   0xe   : > { %245 = sbr.rel (%p242_p9) target bundleno = 2044 (0x7fc), region = 48 }
  0x15   : > { %v285_v0 = vld [vmem:[%s12016_s2] sm:$0xff]  ;;  %v310_v2 = vlaneseq  ;;  %s6154_s17 = sshll.u32 %s7003_s28, 2  ;;  %v6932_v3 = vmov 0   ;;  %v286_v5 = vld [vmem:[%s12016_s2 + $0x8] sm:$0xff]  ;;  %v284_v11 = vld [vmem:[%s12015_s1 + $0x18] sm:$0xff]  ;;  %v6933_v17 = vmov 1  }
  0x16   : > { %v281_v1 = vld [vmem:[%s12015_s1] sm:$0xff]  ;;  %6669 = vset.pattern.permute.xlu1 %v6932_v3  ;;  %6668 = vset.pattern.permute.xlu0 %v6932_v3  ;;  %p274_p10 = scmp.lt.s32.totalorder %s6154_s17, 7  ;;  %v282_v6 = vld [vmem:[%s12015_s1 + $0x8] sm:$0xff]  ;;  %v283_v22 = vld [vmem:[%s12015_s1 + $0x10] sm:$0xff]  ;;  %s270_s14 = sand.u32 1, %s6922_s25  }
  0x17   : > { %364 = vperm.xlu1 %6669, %v285_v0   ;;  %291 = vperm.xlu0 %6668, %v281_v1   ;;  %v7037_v4 = vshrl.u32 %v310_v2, 7  ;;  %v287_v23 = vld [vmem:[%s12016_s2 + $0x10] sm:$0xff]  ;;  %v288_v24 = vld [vmem:[%s12016_s2 + $0x18] sm:$0xff]  ;;  %s6153_s15 = sshll.u32 %s270_s14, 4 }
  0x18   : > { %s12519_s17 = smov (!%p274_p10, %s6154_s17), 7  ;;  %s272_s16 = scalar_lea.vmem [#allocation2], %s6153_s15 }
  0x19   : > { %v312_v7 = vsub.s32 0, %v7037_v4  ;;  %v320_v8 = vsub.s32 4, %v7037_v4  ;;  %s6155_s22 = sshll.u32 %s12519_s17, 1  ;;  %v7048_v9 = vsub.s32 1, %v7037_v4  ;;  %v424_v10 = vsub.s32 5, %v7037_v4  ;;  %s6379_s17 = sshll.u32 %s7003_s28, 8 }
  0x1a   : > { %s277_s8 = scalar_lea.vmem %s12014_s0, %s6155_s22  ;;  %v316_v25 = vsub.s32 2, %v7037_v4  ;;  %v324_v26 = vsub.s32 6, %v7037_v4  ;;  %v420_v39 = vsub.s32 3, %v7037_v4  ;;  %v428_v40 = vsub.s32 7, %v7037_v4  ;;  %s6090_s18 = sshll.u32 %s272_s16, 4  ;;  %s11974_s18 = int_to_ptr.vmem [resolvable:$true] %s6090_s18 }
  0x1b   : > { %369 = vperm.xlu1 %6669, %v286_v5   ;;  %296 = vperm.xlu0 %6668, %v282_v6   ;;  %v280_v12 = vld [vmem:[%s277_s8] sm:$0xff]  ;;  %s11972_s21 = scalar_lea.hbm %s12021_s7, %s6379_s17  ;;  %s6076_s22 = scalar_lea.sflag [#allocation3], %s270_s14 }
  0x1c   : > { %v313_v13 = vrot.slane %v280_v12, %v312_v7  ;;  %v321_v14 = vrot.slane %v280_v12, %v320_v8  ;;  %v417_v15 = vrot.slane %v280_v12, %v7048_v9  ;;  %v425_v16 = vrot.slane %v280_v12, %v424_v10  ;;  %s6868_s23 = scalar_lea.vmem %s11974_s18, 256  ;;  %s6941_s28 = smov [#allocation2]  }
  0x1d   : > { %v317_v31 = vrot.slane %v280_v12, %v316_v25  ;;  %v325_v32 = vrot.slane %v280_v12, %v324_v26  ;;  %v421_v51 = vrot.slane %v280_v12, %v420_v39  ;;  %v429_v54 = vrot.slane %v280_v12, %v428_v40  ;;  %p6869_p11 = scmp.ne.s32.totalorder %s11974_s18, %s6868_s23  ;;  %s6872_s29 = sshll.u32 %s6941_s28, 4  ;;  %s6873_s29 = int_to_ptr.vmem [resolvable:$false] %s6872_s29 }
  0x1e   : > { %v7058_v18 = vrot.slane %v313_v13, %v312_v7  ;;  %v7060_v19 = vrot.slane %v321_v14, %v312_v7  ;;  %v7063_v20 = vrot.slane %v417_v15, %v7048_v9  ;;  %v7066_v21 = vrot.slane %v425_v16, %v7048_v9  ;;  %s6874_s8 = scalar_lea.vmem %s6873_s29, 512  ;;  %p6875_p0 = scmp.lt.s32.totalorder %s11974_s18, %s6873_s29 }
  0x1f   : > { %6670 = vset.pattern.permute.xlu1 %v6933_v17  ;;  %306 = vperm.xlu0 %6668, %v284_v11   ;;  %v337_v41 = vrot.slane %v317_v31, %v312_v7  ;;  %v345_v42 = vrot.slane %v325_v32, %v312_v7  ;;  %v7106_v58 = vrot.slane %v421_v51, %v7048_v9  ;;  %p6870_p12 = pnand %p6869_p11, %p7020_p5  ;;  %p6876_p1 = scmp.lt.s32.totalorder %s6874_s8, %s6868_s23 }
  0x20   : > { %403 = vperm.xlu1 %6670, %v282_v6   ;;  %v7109_v59 = vrot.slane %v429_v54, %v7048_v9 }
  0x21   : > { %p6871_p13 = pneg %p6870_p12  ;;  %p6877_p2 = por %p6876_p1, %p6875_p0 }
  0x23   : > { %6672 = vset.pattern.permute.xlu0 %v6933_v17  ;;  %p6878_p3 = pnand %p6877_p2, %p6871_p13 }
  0x24   : > { %6671 = vset.pattern.permute.xlu1 %v6932_v3  ;;  %399 = vperm.xlu0 %6672, %v281_v1  }
  0x25   : > { %301 = vperm.xlu1 %6671, %v283_v22  }
  0x28   : > { %407 = vperm.xlu0 %6672, %v283_v22  }
  0x29   : > { %374 = vperm.xlu1 %6671, %v287_v23  }
  0x2c   : > { %6675 = vset.pattern.permute.xlu0 %v6932_v3 }
  0x2d   : > { %379 = vperm.xlu1 %6671, %v288_v24  }
  0x31   : > { %6673 = vset.pattern.permute.xlu1 %v6933_v17 }
  0x32   : > { %411 = vperm.xlu1 %6673, %v284_v11  }
  0x36   : > { %6674 = vset.pattern.permute.xlu1 %v6932_v3 }
  0x96   : > { %v7079_v27 = vpop.permute.xlu1 %364  ;;  %v292_v28 = vpop.permute.xlu0 %291 }
  0x97   : > { %v346_v29 = vmul.f32 %v7058_v18, %v292_v28  ;;  %v348_v30 = vmul.f32 %v7060_v19, %v292_v28  ;;  %v347_v2 = vmul.f32 %v337_v41, %v292_v28  ;;  %v349_v17 = vmul.f32 %v345_v42, %v292_v28 }
  0x99   : > { %v382_v33 = vadd.f32 %v7079_v27, %v346_v29  ;;  %v384_v34 = vadd.f32 %v7079_v27, %v348_v30  ;;  %v383_v9 = vadd.f32 %v7079_v27, %v347_v2 }
  0x9a   : > { %v370_v35 = vpop.permute.xlu1 %369  ;;  %v297_v36 = vpop.permute.xlu0 %296 }
  0x9b   : > { %v350_v37 = vmul.f32 %v7058_v18, %v297_v36  ;;  %v352_v38 = vmul.f32 %v7060_v19, %v297_v36  ;;  %v351_v62 = vmul.f32 %v337_v41, %v297_v36  ;;  %v353_v63 = vmul.f32 %v345_v42, %v297_v36 }
  0x9d   : > { %v386_v43 = vadd.f32 %v370_v35, %v350_v37  ;;  %v388_v44 = vadd.f32 %v370_v35, %v352_v38  ;;  %v387_v6 = vadd.f32 %v370_v35, %v351_v62  ;;  %v389_v8 = vadd.f32 %v370_v35, %v353_v63 }
  0x9e   : > { %v307_v45 = vpop.permute.xlu0 %306 }
  0x9f   : > { %v404_v46 = vpop.permute.xlu1 %403  ;;  %v7090_v47 = vmul.f32 %v7058_v18, %v307_v45  ;;  %v7092_v48 = vmul.f32 %v337_v41, %v307_v45  ;;  %v7095_v49 = vmul.f32 %v7060_v19, %v307_v45  ;;  %v7097_v50 = vmul.f32 %v345_v42, %v307_v45 }
  0xa0   : > { %v454_v52 = vmul.f32 %v7063_v20, %v404_v46  ;;  %v456_v53 = vmul.f32 %v7066_v21, %v404_v46  ;;  %v455_v3 = vmul.f32 %v7106_v58, %v404_v46  ;;  %v457_v5 = vmul.f32 %v7109_v59, %v404_v46 }
  0xa2   : > { %v7101_v55 = vadd.f32 %v454_v52, %v386_v43  ;;  %v7103_v56 = vadd.f32 %v456_v53, %v388_v44  ;;  %v7121_v10 = vadd.f32 %v455_v3, %v387_v6  ;;  %v7123_v11 = vadd.f32 %v457_v5, %v389_v8 }
  0xa3   : > { %v400_v57 = vpop.permute.xlu0 %399 }
  0xa4   : > { %12166 = vst [vmem:[#allocation5_spill] sm:$0xff] %v7103_v56  ;;  %v450_v60 = vmul.f32 %v7063_v20, %v400_v57  ;;  %v452_v61 = vmul.f32 %v7066_v21, %v400_v57  ;;  %v302_v4 = vpop.permute.xlu1 %301  ;;  %v451_v7 = vmul.f32 %v7106_v58, %v400_v57  ;;  %v901_v14 = vand.u32 2139095040, %v7101_v55 }
  0xa5   : > { %v1005_v15 = vand.u32 2139095040, %v7121_v10  ;;  %v1109_v16 = vand.u32 2139095040, %v7103_v56  ;;  %v1213_v22 = vand.u32 2139095040, %v7123_v11  ;;  %v354_v24 = vmul.f32 %v7058_v18, %v302_v4 }
  0xa6   : > { %v7113_v0 = vadd.f32 %v450_v60, %v382_v33  ;;  %v7115_v1 = vadd.f32 %v452_v61, %v384_v34  ;;  %v7125_v12 = vadd.f32 %v451_v7, %v383_v9  ;;  %v453_v25 = vmul.f32 %v7109_v59, %v400_v57 }
  0xa7   : > { %v356_v26 = vmul.f32 %v7060_v19, %v302_v4  ;;  %v902_v29 = vshrl.u32 %v901_v14, 23  ;;  %v1006_v30 = vshrl.u32 %v1005_v15, 23  ;;  %v1110_v31 = vshrl.u32 %v1109_v16, 23  ;;  %v408_v38 = vpop.permute.xlu0 %407 }
  0xa8   : > { %12167 = vst [vmem:[#allocation6_spill] sm:$0xff] %v7115_v1  ;;  %v375_v13 = vpop.permute.xlu1 %374  ;;  %v589_v23 = vand.u32 2139095040, %v7125_v12  ;;  %v385_v34 = vadd.f32 %v7079_v27, %v349_v17  ;;  %v1214_v35 = vshrl.u32 %v1213_v22, 23  ;;  %v355_v36 = vmul.f32 %v337_v41, %v302_v4 }
  0xa9   : > { %v390_v32 = vadd.f32 %v375_v13, %v354_v24  ;;  %v357_v37 = vmul.f32 %v345_v42, %v302_v4  ;;  %v485_v18 = vand.u32 2139095040, %v7113_v0  ;;  %v392_v43 = vadd.f32 %v375_v13, %v356_v26 }
  0xaa   : > { %v590_v28 = vshrl.u32 %v589_v23, 23  ;;  %v7136_v39 = vadd.f32 %v453_v25, %v385_v34  ;;  %v391_v40 = vadd.f32 %v375_v13, %v355_v36  ;;  %v6172_v44 = vadd.s32 4294967169, %v902_v29 }
  0xab   : > { %v6176_v19 = vadd.s32 4294967169, %v1006_v30  ;;  %v6180_v45 = vadd.s32 4294967169, %v1110_v31  ;;  %v393_v46 = vadd.f32 %v375_v13, %v357_v37  ;;  %v6184_v51 = vadd.s32 4294967169, %v1214_v35 }
  0xac   : > { %v380_v33 = vpop.permute.xlu1 %379  ;;  %v693_v52 = vand.u32 2139095040, %v7115_v1  ;;  %v458_v27 = vmul.f32 %v7063_v20, %v408_v38  ;;  %v459_v41 = vmul.f32 %v7106_v58, %v408_v38  ;;  %v6160_v53 = vadd.s32 4294967169, %v590_v28 }
  0xad   : > { %v460_v42 = vmul.f32 %v7066_v21, %v408_v38  ;;  %v461_v54 = vmul.f32 %v7109_v59, %v408_v38  ;;  %v394_v57 = vadd.f32 %v380_v33, %v7090_v47  ;;  %v486_v61 = vshrl.u32 %v485_v18, 23 }
  0xae   : > { %v797_v62 = vand.u32 2139095040, %v7136_v39  ;;  %v7146_v63 = vadd.f32 %v458_v27, %v390_v32  ;;  %v7148_v2 = vadd.f32 %v459_v41, %v391_v40  ;;  %v908_v3 = vadd.s32 1, %v6172_v44 }
  0xaf   : > { %v7150_v4 = vadd.f32 %v460_v42, %v392_v43  ;;  %v7152_v5 = vadd.f32 %v461_v54, %v393_v46  ;;  %v396_v6 = vadd.f32 %v380_v33, %v7095_v49  ;;  %v1012_v7 = vadd.s32 1, %v6176_v19 }
  0xb0   : > { %12168 = vst [vmem:[#allocation7_spill] sm:$0xff] %v7146_v63  ;;  %12169 = vst [vmem:[#allocation8_spill] sm:$0xff] %v7148_v2  ;;  %v395_v8 = vadd.f32 %v380_v33, %v7092_v48  ;;  %v596_v13 = vadd.s32 1, %v6160_v53  ;;  %v397_v14 = vadd.f32 %v380_v33, %v7097_v50  ;;  %v1116_v17 = vadd.s32 1, %v6180_v45 }
  0xb1   : > { %v412_v60 = vpop.permute.xlu1 %411  ;;  %12170 = vst [vmem:[#allocation9_spill] sm:$0xff] %v7150_v4  ;;  %12171 = vst [vmem:[#allocation10_spill] sm:$0xff] %v7152_v5  ;;  %v6156_v22 = vadd.s32 4294967169, %v486_v61  ;;  %v694_v49 = vshrl.u32 %v693_v52, 23  ;;  %v798_v25 = vshrl.u32 %v797_v62, 23  ;;  %vm909_vm1 = vcmp.gt.s32.totalorder %v908_v3, 0 }
  0xb2   : > { %v462_v47 = vmul.f32 %v7063_v20, %v412_v60  ;;  %v463_v9 = vmul.f32 %v7106_v58, %v412_v60  ;;  %v464_v15 = vmul.f32 %v7066_v21, %v412_v60  ;;  %v465_v16 = vmul.f32 %v7109_v59, %v412_v60 }
  0xb3   : > { %v1220_v58 = vadd.s32 1, %v6184_v51  ;;  %vm597_vm0 = vcmp.gt.s32.totalorder %v596_v13, 0  ;;  %v492_v50 = vadd.s32 1, %v6156_v22  ;;  %vm1013_vm2 = vcmp.gt.s32.totalorder %v1012_v7, 0 }
  0xb4   : > { %v7161_v23 = vadd.f32 %v462_v47, %v394_v57  ;;  %v7163_v24 = vadd.f32 %v463_v9, %v395_v8  ;;  %v7165_v48 = vadd.f32 %v464_v15, %v396_v6  ;;  %v7167_v20 = vadd.f32 %v465_v16, %v397_v14 }
  0xb5   : > { %vm1117_vm3 = vcmp.gt.s32.totalorder %v1116_v17, 0  ;;  %v6164_v21 = vadd.s32 4294967169, %v694_v49  ;;  %v6168_v59 = vadd.s32 4294967169, %v798_v25  ;;  %vm1221_vm4 = vcmp.gt.s32.totalorder %v1220_v58, 0 }
  0xb6   : > { %v598_v26 = vsel %vm597_vm0, %v596_v13, 0  ;;  %v910_v29 = vsel %vm909_vm1, %v908_v3, 0  ;;  %v1014_v30 = vsel %vm1013_vm2, %v1012_v7, 0  ;;  %v1118_v31 = vsel %vm1117_vm3, %v1116_v17, 0 }
  0xb7   : > { %vm493_vm5 = vcmp.gt.s32.totalorder %v492_v50, 0  ;;  %v1222_v32 = vsel %vm1221_vm4, %v1220_v58, 0  ;;  %v600_v33 = vand.u32 31, %v598_v26  ;;  %v700_v34 = vadd.s32 1, %v6164_v21 }
  0xb8   : > { %v804_v35 = vadd.s32 1, %v6168_v59  ;;  %v7169_v36 = vand.u32 31, %v910_v29  ;;  %v7171_v28 = vand.u32 31, %v1014_v30  ;;  %v494_v37 = vsel %vm493_vm5, %v492_v50, 0 }
  0xb9   : > { %v7173_v38 = vand.u32 31, %v1118_v31  ;;  %v7175_v18 = vand.u32 31, %v1222_v32  ;;  %v601_v40 = vsub.s32 32, %v600_v33  ;;  %vm701_vm6 = vcmp.gt.s32.totalorder %v700_v34, 0 }
  0xba   : > { %12172 = vst [vmem:[#allocation11_spill] sm:$0xff] %v7169_v36  ;;  %vm805_vm7 = vcmp.gt.s32.totalorder %v804_v35, 0  ;;  %v7177_v43 = vshrl.u32 %v910_v29, 5  ;;  %v7179_v44 = vshrl.u32 %v1014_v30, 5  ;;  %v7181_v19 = vand.u32 31, %v494_v37 }
  0xbb   : > { %12173 = vst [vmem:[#allocation12_spill] sm:$0xff] %v7173_v38  ;;  %v12022_v45 = vand.u32 2147483647, %v7125_v12  ;;  %v7185_v46 = vsub.s32 32, %v7169_v36  ;;  %v7188_v51 = vsub.s32 32, %v7171_v28  ;;  %v7190_v52 = vshrl.u32 %v1118_v31, 5 }
  0xbc   : > { %12174 = vst [vmem:[#allocation13_spill] sm:$0xff] %v7177_v43  ;;  %v7192_v27 = vshrl.u32 %v1222_v32, 5  ;;  %v7195_v41 = vsub.s32 32, %v7173_v38  ;;  %v7198_v53 = vsub.s32 32, %v7175_v18  ;;  %v702_v42 = vsel %vm701_vm6, %v700_v34, 0 }
  0xbd   : > { %12175 = vst [vmem:[#allocation14_spill] sm:$0xff] %v7190_v52  ;;  %v7200_v54 = vsel %vm805_vm7, %v804_v35, 0  ;;  %v7202_v57 = vshrl.u32 %v494_v37, 5  ;;  %v599_v60 = vshrl.u32 %v598_v26, 5  ;;  %v593_v61 = vand.u32 8388607, %v12022_v45 }
  0xbe   : > { %12176 = vst [vmem:[#allocation15_spill] sm:$0xff] %v7195_v41  ;;  %v12030_v62 = vmov 2475754826   ;;  %v7208_v6 = vsub.s32 32, %v7181_v19  ;;  %v12032_v7 = vmov 683565275  }
  0xbf   : > { %v604_v3 = vshrl.u32 %v12030_v62, %v601_v40  ;;  %v603_v8 = vshll.u32 %v12032_v7, %v600_v33  ;;  %v606_v47 = vshll.u32 %v12030_v62, %v600_v33  ;;  %v12025_v9 = vmov 2131351028  }
  0xc0   : > { %v607_v13 = vshrl.u32 %v12025_v9, %v601_v40  ;;  %v7213_v14 = vshrl.u32 %v702_v42, 5  ;;  %v7215_v15 = vand.u32 31, %v702_v42  ;;  %v7218_v16 = vand.u32 31, %v7200_v54 }
  0xc1   : > { %v1317_v17 = vand.u32 2139095040, %v7146_v63  ;;  %v1421_v22 = vand.u32 2139095040, %v7148_v2  ;;  %v594_v49 = vor.u32 8388608, %v593_v61  ;;  %v605_v25 = vor.u32 %v604_v3, %v603_v8 }
  0xc2   : > { %12177 = vst [vmem:[#allocation16_spill] sm:$0xff] %v7213_v14  ;;  %12178 = vst [vmem:[#allocation17_spill] sm:$0xff] %v7215_v15  ;;  %v608_v58 = vor.u32 %v607_v13, %v606_v47  ;;  %v609_v50 = vshll.u32 %v12025_v9, %v600_v33  ;;  %v12023_v21 = vmov 2102212464   ;;  %v12027_v29 = vmov 920167782  }
  0xc3   : > { %v610_v59 = vshrl.u32 %v12023_v21, %v601_v40  ;;  %v612_v26 = vshll.u32 %v12023_v21, %v600_v33  ;;  %v613_v30 = vshrl.u32 %v12027_v29, %v601_v40  ;;  %v602_v31 = vshrl.u32 %v12032_v7, %v601_v40 }
  0xc4   : > { %v615_v32 = vshll.u32 %v12027_v29, %v600_v33  ;;  %v12038_v34 = vmov 1326507024   ;;  %vm618_vm8 = vcmp.lt.s32.totalorder %v599_v60, 1  ;;  %vm619_vm9 = vcmp.lt.s32.totalorder %v599_v60, 2 }
  0xc5   : > { %v616_v35 = vshrl.u32 %v12038_v34, %v601_v40  ;;  %v611_v37 = vor.u32 %v610_v59, %v609_v50  ;;  %v614_v42 = vor.u32 %v613_v30, %v612_v26  ;;  %vm620_vm10 = vcmp.lt.s32.totalorder %v599_v60, 3 }
  0xc6   : > { %vm621_vm11 = vcmp.lt.s32.totalorder %v599_v60, 4  ;;  %v622_v3 = vsel %vm618_vm8, %v602_v31, %v605_v25  ;;  %v626_v8 = vsel %vm618_vm8, %v605_v25, %v608_v58  ;;  %v634_v21 = vshll.u32 %v594_v49, 8 }
  0xc7   : > { %v617_v61 = vor.u32 %v616_v35, %v615_v32  ;;  %v623_v47 = vsel %vm621_vm11, %v611_v37, 2102212464  ;;  %v627_v13 = vsel %vm621_vm11, %v614_v42, 920167782  ;;  %v630_v45 = vsel %vm618_vm8, %v608_v58, %v611_v37 }
  0xc8   : > { %v624_v9 = vsel %vm620_vm10, %v608_v58, %v623_v47  ;;  %v628_v33 = vsel %vm620_vm10, %v611_v37, %v627_v13  ;;  %v12029_v40 = vand.u32 2147483647, %v7121_v10  ;;  %v1525_v50 = vand.u32 2139095040, %v7150_v4 }
  0xc9   : > { %v631_v29 = vsel %vm621_vm11, %v617_v61, 1326507024  ;;  %v625_v59 = vsel %vm619_vm9, %v622_v3, %v624_v9  ;;  %v629_v26 = vsel %vm619_vm9, %v626_v8, %v628_v33  ;;  %v1629_v25 = vand.u32 2139095040, %v7152_v5 }
  0xca   : > { %v632_v30 = vsel %vm620_vm10, %v614_v42, %v631_v29  ;;  %v7238_v49 = vmul.u32.u64.low %v634_v21, %v629_v26  ;;  %v7239_v32 = vmul.u32.u64.high %v634_v21, %v629_v26, %v7238_v49  ;;  %v1318_v58 = vshrl.u32 %v1317_v17, 23 }
  0xcb   : > { %v633_v31 = vsel %vm619_vm9, %v630_v45, %v632_v30  ;;  %v1009_v61 = vand.u32 8388607, %v12029_v40  ;;  %v1422_v9 = vshrl.u32 %v1421_v22, 23  ;;  %v641_v3 = vmul.u32 %v634_v21, %v625_v59 }
  0xcc   : > { %v7242_v35 = vmul.u32.u64.low %v634_v21, %v633_v31  ;;  %v7243_v37 = vmul.u32.u64.high %v634_v21, %v633_v31, %v7242_v35  ;;  %v1019_v29 = vshll.u32 %v12032_v7, %v7171_v28  ;;  %v1020_v60 = vshrl.u32 %v12030_v62, %v7188_v51 }
  0xcd   : > { %v1022_v45 = vshll.u32 %v12030_v62, %v7171_v28  ;;  %v12179_v42 = vmov 2131351028   ;;  %v12180_v47 = vmov 2102212464   ;;  %v644_v22 = vadd.s32 1, %v7239_v32 }
  0xce   : > { %v1023_v17 = vshrl.u32 %v12179_v42, %v7188_v51  ;;  %v1025_v8 = vshll.u32 %v12179_v42, %v7171_v28  ;;  %v1026_v13 = vshrl.u32 %v12180_v47, %v7188_v51  ;;  %v1021_v21 = vor.u32 %v1020_v60, %v1019_v29 }
  0xcf   : > { %v1028_v33 = vshll.u32 %v12180_v47, %v7171_v28  ;;  %v12181_v59 = vmov 920167782   ;;  %vm643_vm12 = vc.u32 %v7243_v37, %v7238_v49  ;;  %v1010_v30 = vor.u32 8388608, %v1009_v61 }
  0xd0   : > { %v1029_v26 = vshrl.u32 %v12181_v59, %v7188_v51  ;;  %v1024_v31 = vor.u32 %v1023_v17, %v1022_v45  ;;  %v1027_v35 = vor.u32 %v1026_v13, %v1025_v8  ;;  %v645_v40 = vsel %vm643_vm12, %v644_v22, %v7239_v32 }
  0xd1   : > { %v1031_v7 = vshll.u32 %v12181_v59, %v7171_v28  ;;  %v1032_v29 = vshrl.u32 %v12038_v34, %v7188_v51  ;;  %v646_v60 = vadd.s32 %v645_v40, %v641_v3  ;;  %v12182_v4 = vmov 683565275  }
  0xd2   : > { %v1030_v62 = vor.u32 %v1029_v26, %v1028_v33  ;;  %v1018_v63 = vshrl.u32 %v12182_v4, %v7188_v51  ;;  %vm1034_vm13 = vcmp.lt.s32.totalorder %v7179_v44, 1  ;;  %vm1035_vm14 = vcmp.lt.s32.totalorder %v7179_v44, 2 }
  0xd3   : > { %v1033_v61 = vor.u32 %v1032_v29, %v1031_v7  ;;  %vm1036_vm15 = vcmp.lt.s32.totalorder %v7179_v44, 3  ;;  %vm1037_vm0 = vcmp.lt.s32.totalorder %v7179_v44, 4  ;;  %v1042_v32 = vsel %vm1034_vm13, %v1021_v21, %v1024_v31 }
  0xd4   : > { %v647_v45 = vadd.s32 536870912, %v646_v60  ;;  %v1039_v17 = vsel %vm1037_vm0, %v1027_v35, 2102212464  ;;  %v1043_v28 = vsel %vm1037_vm0, %v1030_v62, 920167782  ;;  %v1046_v8 = vsel %vm1034_vm13, %v1024_v31, %v1027_v35 }
  0xd5   : > { %v1038_v13 = vsel %vm1034_vm13, %v1018_v63, %v1021_v21  ;;  %v1044_v22 = vsel %vm1036_vm15, %v1027_v35, %v1043_v28  ;;  %v1047_v40 = vsel %vm1037_vm0, %v1033_v61, 1326507024  ;;  %v1050_v3 = vshll.u32 %v1010_v30, 8 }
  0xd6   : > { %v648_v33 = vshrl.u32 %v647_v45, 30  ;;  %v1040_v51 = vsel %vm1036_vm15, %v1024_v31, %v1039_v17  ;;  %v1045_v26 = vsel %vm1035_vm14, %v1042_v32, %v1044_v22  ;;  %v1048_v34 = vsel %vm1036_vm15, %v1030_v62, %v1047_v40 }
  0xd7   : > { %v7280_v7 = vshrl.u32 %v7200_v54, 5  ;;  %v1049_v29 = vsel %vm1035_vm14, %v1046_v8, %v1048_v34  ;;  %v7284_v5 = vmul.u32.u64.low %v1050_v3, %v1045_v26  ;;  %v7285_v2 = vmul.u32.u64.high %v1050_v3, %v1045_v26, %v7284_v5 }
  0xd8   : > { %v1526_v63 = vshrl.u32 %v1525_v50, 23  ;;  %v649_v21 = vshll.u32 %v648_v33, 30  ;;  %v7288_v35 = vmul.u32.u64.low %v1050_v3, %v1049_v29  ;;  %v7289_v30 = vmul.u32.u64.high %v1050_v3, %v1049_v29, %v7288_v35 }
  0xd9   : > { %v7292_v31 = vsub.s32 32, %v7215_v15  ;;  %v809_v62 = vsub.s32 32, %v7218_v16  ;;  %v1630_v61 = vshrl.u32 %v1629_v25, 23  ;;  %v1041_v54 = vsel %vm1035_vm14, %v1038_v13, %v1040_v51 }
  0xda   : > { %v7297_v32 = vadd.s32 4294967169, %v1318_v58  ;;  %v7299_v34 = vadd.s32 4294967169, %v1422_v9  ;;  %v7302_v50 = vsub.s32 %v646_v60, %v649_v21  ;;  %v672_v28 = vsub.s32 4, %v648_v33 }
  0xdb   : > { %12183 = vst [vmem:[#allocation18_spill] sm:$0xff] %v7292_v31  ;;  %v1060_v8 = vadd.s32 1, %v7285_v2  ;;  %v12044_v22 = vand.u32 2147483647, %v7136_v39  ;;  %v7307_v40 = vadd.s32 4294967169, %v1526_v63  ;;  %v1057_v25 = vmul.u32 %v1050_v3, %v1041_v54 }
  0xdc   : > { %v652_v44 = vsub.s32 0, %v7302_v50  ;;  %vm1059_vm1 = vc.u32 %v7289_v30, %v7284_v5  ;;  %v7312_v58 = vadd.s32 4294967169, %v1630_v61  ;;  %v12184_v51 = vand.u32 2147483647, %v7125_v12 }
  0xdd   : > { %v1061_v13 = vsel %vm1059_vm1, %v1060_v8, %v7285_v2  ;;  %vm588_vm3 = vcmp.lt.s32.totalorder %v7125_v12, 0  ;;  %v642_v63 = vadd.s32 %v7238_v49, %v7243_v37  ;;  %vm1004_vm4 = vcmp.lt.s32.totalorder %v7121_v10, 0 }
  0xde   : > { %vm7319_vm2 = vcmp.le.f32.partialorder %v12184_v51, 0.7853982  ;;  %v6161_v3 = vmin.u32 %v652_v44, %v7302_v50  ;;  %v1062_v29 = vadd.s32 %v1061_v13, %v1057_v25  ;;  %v673_v21 = vsel %vm588_vm3, %v672_v28, %v648_v33 }
  0xdf   : > { %v801_v2 = vand.u32 8388607, %v12044_v22  ;;  %v821_v35 = vshrl.u32 %v12181_v59, %v809_v62  ;;  %v810_v54 = vshrl.u32 %v12182_v4, %v809_v62  ;;  %v12187_v8 = vmov 2475754826  }
  0xe0   : > { %v654_v61 = vclz %v6161_v3  ;;  %v812_v51 = vshrl.u32 %v12187_v8, %v809_v62  ;;  %v815_v44 = vshrl.u32 %v12179_v42, %v809_v62  ;;  %v1063_v25 = vadd.s32 536870912, %v1062_v29 }
  0xe1   : > { %v811_v49 = vshll.u32 %v12182_v4, %v7218_v16  ;;  %v818_v37 = vshrl.u32 %v12180_v47, %v809_v62  ;;  %v820_v33 = vshll.u32 %v12180_v47, %v7218_v16  ;;  %v675_v13 = vsel %vm7319_vm2, 0, %v673_v21 }
  0xe2   : > { %v6162_v28 = vadd.s32 4294967294, %v654_v61  ;;  %v12188_v3 = vand.u32 2147483647, %v7121_v10  ;;  %v814_v9 = vshll.u32 %v12187_v8, %v7218_v16  ;;  %v12191_v17 = vmov 1326507024  }
  0xe3   : > { %v824_v22 = vshrl.u32 %v12191_v17, %v809_v62  ;;  %v1064_v45 = vshrl.u32 %v1063_v25, 30  ;;  %v802_v52 = vor.u32 8388608, %v801_v2  ;;  %v817_v38 = vshll.u32 %v12179_v42, %v7218_v16 }
  0xe4   : > { %vm7345_vm5 = vcmp.le.f32.partialorder %v12188_v3, 0.7853982  ;;  %v822_v61 = vor.u32 %v821_v35, %v820_v33  ;;  %vm6163_vm6 = vcmp.lt.s32.totalorder %v6162_v28, 0  ;;  %v813_v41 = vor.u32 %v812_v51, %v811_v49 }
  0xe5   : > { %v816_v21 = vor.u32 %v815_v44, %v814_v9  ;;  %v823_v3 = vshll.u32 %v12181_v59, %v7218_v16  ;;  %v657_v56 = vsel %vm6163_vm6, 0, %v6162_v28  ;;  %v1065_v14 = vshll.u32 %v1064_v45, 30 }
  0xe6   : > { %v1088_v15 = vsub.s32 4, %v1064_v45  ;;  %v819_v31 = vor.u32 %v818_v37, %v817_v38  ;;  %v658_v1 = vsub.s32 32, %v657_v56  ;;  %v662_v43 = vsub.s32 4294967266, %v657_v56 }
  0xe7   : > { %v825_v36 = vor.u32 %v824_v22, %v823_v3  ;;  %vm829_vm7 = vcmp.lt.s32.totalorder %v7280_v7, 4  ;;  %v7357_v62 = vsub.s32 %v1062_v29, %v1065_v14  ;;  %vm826_vm8 = vcmp.lt.s32.totalorder %v7280_v7, 1 }
  0xe8   : > { %vm828_vm9 = vcmp.lt.s32.totalorder %v7280_v7, 3  ;;  %v835_v9 = vsel %vm829_vm7, %v822_v61, 920167782  ;;  %v659_v16 = vshll.u32 %v7302_v50, %v657_v56  ;;  %v660_v2 = vshrl.u32 %v642_v63, %v658_v1 }
  0xe9   : > { %v663_v35 = vadd.s32 127, %v662_v43  ;;  %v1089_v38 = vsel %vm1004_vm4, %v1088_v15, %v1064_v45  ;;  %v1068_v22 = vsub.s32 0, %v7357_v62  ;;  %v834_v14 = vsel %vm826_vm8, %v813_v41, %v816_v21 }
  0xea   : > { %v836_v29 = vsel %vm828_vm9, %v819_v31, %v835_v9  ;;  %v838_v51 = vsel %vm826_vm8, %v816_v21, %v819_v31  ;;  %v661_v44 = vor.u32 %v660_v2, %v659_v16  ;;  %v831_v56 = vsel %vm829_vm7, %v819_v31, 2102212464 }
  0xeb   : > { %v664_v25 = vshll.u32 %v663_v35, 23  ;;  %v839_v1 = vsel %vm829_vm7, %v825_v36, 1326507024  ;;  %v6177_v43 = vmin.u32 %v1068_v22, %v7357_v62  ;;  %v1091_v15 = vsel %vm7345_vm5, 0, %v1089_v38 }
  0xec   : > { %vm827_vm10 = vcmp.lt.s32.totalorder %v7280_v7, 2  ;;  %v840_v45 = vsel %vm828_vm9, %v822_v61, %v839_v1  ;;  %v842_v49 = vshll.u32 %v802_v52, 8  ;;  %v679_v37 = vadd.s32 3, %v675_v13 }
  0xed   : > { %v665_v50 = vor.u32 4788187, %v664_v25  ;;  %v837_v63 = vsel %vm827_vm10, %v834_v14, %v836_v29  ;;  %v841_v31 = vsel %vm827_vm10, %v838_v51, %v840_v45  ;;  %v1070_v36 = vclz %v6177_v43 }
  0xee   : > { %v830_v33 = vsel %vm826_vm8, %v810_v54, %v813_v41  ;;  %v832_v28 = vsel %vm828_vm9, %v816_v21, %v831_v56  ;;  %v668_v9 = vcvt.s32.f32 %v661_v44  ;;  %v1095_v35 = vadd.s32 3, %v1091_v15 }
  0xef   : > { %v666_v3 = vand.u32 2147483647, %v665_v50  ;;  %v7391_v16 = vmul.u32.u64.low %v842_v49, %v841_v31  ;;  %v7392_v61 = vmul.u32.u64.high %v842_v49, %v841_v31, %v7391_v16  ;;  %v6178_v2 = vadd.s32 4294967294, %v1070_v36 }
  0xf0   : > { %v7394_v38 = vmul.u32.u64.low %v842_v49, %v837_v63  ;;  %v7395_v22 = vmul.u32.u64.high %v842_v49, %v837_v63, %v7394_v38  ;;  %v7399_v52 = vadd.s32 1, %v7297_v32  ;;  %v7402_v13 = vadd.s32 1, %v7299_v34 }
  0xf1   : > { %v669_v41 = vmul.f32 %v668_v9, %v666_v3  ;;  %v1210_v54 = vand.u32 2147483647, %v7123_v11  ;;  %v12192_v21 = vand.u32 2139095040, %v7161_v23  ;;  %v1058_v29 = vadd.s32 %v7284_v5, %v7289_v30 }
  0xf2   : > { %vm6179_vm11 = vcmp.lt.s32.totalorder %v6178_v2, 0  ;;  %v833_v51 = vsel %vm827_vm10, %v830_v33, %v832_v28  ;;  %v7413_v32 = vand.u32 3, %v679_v37  ;;  %vm851_vm12 = vc.u32 %v7392_v61, %v7394_v38 }
  0xf3   : > { %v7407_v14 = vshrl.u32 %v12192_v21, 23  ;;  %v670_v44 = vxor.u32 2147483648, %v669_v41  ;;  %v1073_v25 = vsel %vm6179_vm11, 0, %v6178_v2  ;;  %v7417_v1 = vand.u32 3, %v1095_v35 }
  0xf4   : > { %v1074_v34 = vsub.s32 32, %v1073_v25  ;;  %v1078_v56 = vsub.s32 4294967266, %v1073_v25  ;;  %v852_v43 = vadd.s32 1, %v7395_v22  ;;  %v1075_v30 = vshll.u32 %v7357_v62, %v1073_v25 }
  0xf5   : > { %v671_v5 = vsel %vm588_vm3, %v670_v44, %v669_v41  ;;  %v849_v7 = vmul.u32 %v842_v49, %v833_v51  ;;  %v7425_v15 = vand.u32 8388607, %v1210_v54  ;;  %v1228_v36 = vshrl.u32 %v12187_v8, %v7198_v53 }
  0xf6   : > { %v674_v45 = vsel %vm7319_vm2, %v7125_v12, %v671_v5  ;;  %v1076_v50 = vshrl.u32 %v1058_v29, %v1074_v34  ;;  %v1079_v63 = vadd.s32 127, %v1078_v56  ;;  %v853_v31 = vsel %vm851_vm12, %v852_v43, %v7395_v22 }
  0xf7   : > { %6676 = vcosq.f32 %v674_v45  ;;  %v854_v37 = vadd.s32 %v853_v31, %v849_v7  ;;  %v1231_v62 = vshrl.u32 %v12179_v42, %v7198_v53  ;;  %v1234_v28 = vshrl.u32 %v12180_v47, %v7198_v53 }
  0xf8   : > { %6678 = vsinq.f32 %v674_v45  ;;  %v1077_v49 = vor.u32 %v1076_v50, %v1075_v30  ;;  %v1080_v33 = vshll.u32 %v1079_v63, 23  ;;  %v1233_v3 = vshll.u32 %v12179_v42, %v7175_v18 }
  0xf9   : > { %v855_v26 = vadd.s32 536870912, %v854_v37  ;;  %v1236_v9 = vshll.u32 %v12180_v47, %v7175_v18  ;;  %v1237_v16 = vshrl.u32 %v12181_v59, %v7198_v53  ;;  %vm796_vm13 = vcmp.lt.s32.totalorder %v7136_v39, 0 }
  0xfa   : > { %v1081_v2 = vor.u32 4788187, %v1080_v33  ;;  %v1227_v35 = vshll.u32 %v12182_v4, %v7175_v18  ;;  %v1230_v22 = vshll.u32 %v12187_v8, %v7175_v18  ;;  %v1240_v41 = vshrl.u32 %v12191_v17, %v7198_v53 }
  0xfb   : > { %vm685_vm14 = vcmp.eq.s32.totalorder %v7413_v32, 2  ;;  %v856_v21 = vshrl.u32 %v855_v26, 30  ;;  %v1235_v29 = vor.u32 %v1234_v28, %v1233_v3  ;;  %v1238_v51 = vor.u32 %v1237_v16, %v1236_v9 }
  0xfc   : > { %v1239_v44 = vshll.u32 %v12181_v59, %v7175_v18  ;;  %vm682_vm15 = vcmp.eq.s32.totalorder %v7413_v32, 0  ;;  %v1082_v25 = vand.u32 2147483647, %v1081_v2  ;;  %v1084_v34 = vcvt.s32.f32 %v1077_v49 }
  0xfd   : > { %v1229_v56 = vor.u32 %v1228_v36, %v1227_v35  ;;  %v1232_v43 = vor.u32 %v1231_v62, %v1230_v22  ;;  %vm681_vm0 = vcmp.lt.s32.totalorder %v7413_v32, 2  ;;  %v12193_v5 = vand.u32 2147483647, %v7136_v39 }
  0xfe   : > { %v857_v7 = vshll.u32 %v856_v21, 30  ;;  %v1226_v45 = vshrl.u32 %v12182_v4, %v7198_v53  ;;  %v1241_v50 = vor.u32 %v1240_v41, %v1239_v44  ;;  %vm1245_vm2 = vcmp.lt.s32.totalorder %v7192_v27, 4 }
  0xff   : > { %vm7457_vm1 = vcmp.le.f32.partialorder %v12193_v5, 0.7853982  ;;  %v1085_v18 = vmul.f32 %v1084_v34, %v1082_v25  ;;  %v1218_v63 = vor.u32 8388608, %v7425_v15  ;;  %vm1242_vm3 = vcmp.lt.s32.totalorder %v7192_v27, 1 }
 0x100   : > { %v1251_v31 = vsel %vm1245_vm2, %v1238_v51, 920167782  ;;  %v7468_v36 = vsub.s32 %v854_v37, %v857_v7  ;;  %v880_v62 = vsub.s32 4, %v856_v21  ;;  %vm1243_vm6 = vcmp.lt.s32.totalorder %v7192_v27, 2 }
 0x101   : > { %v1247_v49 = vsel %vm1245_vm2, %v1235_v29, 2102212464  ;;  %v1086_v53 = vxor.u32 2147483648, %v1085_v18  ;;  %vm1244_vm7 = vcmp.lt.s32.totalorder %v7192_v27, 3  ;;  %v1246_v33 = vsel %vm1242_vm3, %v1226_v45, %v1229_v56  ;;  %v6677_v26 = vpop.eup %6676 }
 0x102   : > { %v1250_v28 = vsel %vm1242_vm3, %v1229_v56, %v1232_v43  ;;  %v860_v15 = vsub.s32 0, %v7468_v36  ;;  %v1252_v3 = vsel %vm1244_vm7, %v1235_v29, %v1251_v31  ;;  %v1254_v9 = vsel %vm1242_vm3, %v1232_v43, %v1235_v29  ;;  %v6679_v16 = vpop.eup %6678 }
 0x103   : > { %v1255_v37 = vsel %vm1245_vm2, %v1241_v50, 1326507024  ;;  %v686_v2 = vxor.u32 2147483648, %v6677_v26  ;;  %v1087_v35 = vsel %vm1004_vm4, %v1086_v53, %v1085_v18  ;;  %v1248_v22 = vsel %vm1244_vm7, %v1232_v43, %v1247_v49 }
 0x104   : > { %v1256_v41 = vsel %vm1244_vm7, %v1238_v51, %v1255_v37  ;;  %v683_v44 = vxor.u32 2147483648, %v6679_v16  ;;  %v1090_v25 = vsel %vm7345_vm5, %v7121_v10, %v1087_v35  ;;  %v6169_v34 = vmin.u32 %v860_v15, %v7468_v36 }
 0x105   : > { %v881_v29 = vsel %vm796_vm13, %v880_v62, %v856_v21  ;;  %v687_v56 = vsel %vm685_vm14, %v686_v2, %v6679_v16  ;;  %6680 = vcosq.f32 %v1090_v25  ;;  %v1253_v5 = vsel %vm1243_vm6, %v1250_v28, %v1252_v3 }
 0x106   : > { %v1257_v51 = vsel %vm1243_vm6, %v1254_v9, %v1256_v41  ;;  %v684_v43 = vsel %vm682_vm15, %v6677_v26, %v683_v44  ;;  %6682 = vsinq.f32 %v1090_v25  ;;  %v862_v60 = vclz %v6169_v34 }
 0x107   : > { %v1258_v7 = vshll.u32 %v1218_v63, 8  ;;  %v12196_v45 = vand.u32 2139095040, %v7163_v24  ;;  %v688_v21 = vsel %vm681_vm0, %v684_v43, %v687_v56  ;;  %v883_v18 = vsel %vm7457_vm1, 0, %v881_v29 }
 0x108   : > { %v1249_v31 = vsel %vm1243_vm6, %v1246_v33, %v1248_v22  ;;  %v6170_v62 = vadd.s32 4294967294, %v862_v60  ;;  %v482_v28 = vand.u32 2147483647, %v7113_v0  ;;  %v7508_v63 = vadd.s32 1, %v7307_v40 }
 0x109   : > { %v7495_v50 = vshrl.u32 %v12196_v45, 23  ;;  %v7503_v49 = vmul.u32.u64.low %v1258_v7, %v1257_v51  ;;  %v7504_v53 = vmul.u32.u64.high %v1258_v7, %v1257_v51, %v7503_v49  ;;  %vm678_vm4 = vweird.f32 %v7125_v12 }
 0x10a   : > { %v7511_v26 = vmul.u32.u64.low %v1258_v7, %v1253_v5  ;;  %v7512_v32 = vmul.u32.u64.high %v1258_v7, %v1253_v5, %v7511_v26  ;;  %vm1098_vm5 = vcmp.eq.s32.totalorder %v7417_v1, 0  ;;  %vm1101_vm8 = vcmp.eq.s32.totalorder %v7417_v1, 2 }
 0x10b   : > { %v850_v27 = vadd.s32 %v7394_v38, %v7392_v61  ;;  %vm6171_vm9 = vcmp.lt.s32.totalorder %v6170_v62, 0  ;;  %v689_v33 = vsel %vm678_vm4, nan, %v688_v21  ;;  %vm1097_vm10 = vcmp.lt.s32.totalorder %v7417_v1, 2 }
 0x10c   : > { %v865_v15 = vsel %vm6171_vm9, 0, %v6170_v62  ;;  %v7520_v40 = vadd.s32 3, %v883_v18  ;;  %v1265_v3 = vmul.u32 %v1258_v7, %v1249_v31  ;;  %vm1094_vm11 = vweird.f32 %v7121_v10 }
 0x10d   : > { %v866_v12 = vsub.s32 32, %v865_v15  ;;  %v870_v9 = vsub.s32 4294967266, %v865_v15  ;;  %v7525_v37 = vand.u32 8388607, %v482_v28  ;;  %v498_v16 = vshrl.u32 %v12182_v4, %v7208_v6 }
 0x10e   : > { %vm1267_vm12 = vc.u32 %v7504_v53, %v7511_v26  ;;  %v1268_v61 = vadd.s32 1, %v7512_v32  ;;  %v499_v38 = vshll.u32 %v12182_v4, %v7181_v19  ;;  %v500_v2 = vshrl.u32 %v12187_v8, %v7208_v6 }
 0x10f   : > { %v867_v35 = vshll.u32 %v7468_v36, %v865_v15  ;;  %v868_v22 = vshrl.u32 %v850_v27, %v866_v12  ;;  %v871_v41 = vadd.s32 127, %v870_v9  ;;  %v502_v44 = vshll.u32 %v12187_v8, %v7181_v19  ;;  %v6681_v25 = vpop.eup %6680 }
 0x110   : > { %v1269_v34 = vsel %vm1267_vm12, %v1268_v61, %v7512_v32  ;;  %v505_v29 = vshll.u32 %v12179_v42, %v7181_v19  ;;  %v506_v56 = vshrl.u32 %v12180_v47, %v7208_v6  ;;  %v509_v5 = vshrl.u32 %v12181_v59, %v7208_v6  ;;  %v6683_v51 = vpop.eup %6682 }
 0x111   : > { %v1102_v43 = vxor.u32 2147483648, %v6681_v25  ;;  %v869_v36 = vor.u32 %v868_v22, %v867_v35  ;;  %v872_v60 = vshll.u32 %v871_v41, 23  ;;  %v1270_v7 = vadd.s32 %v1269_v34, %v1265_v3 }
 0x112   : > { %v1099_v45 = vxor.u32 2147483648, %v6683_v51  ;;  %vm1212_vm14 = vcmp.lt.s32.totalorder %v7123_v11, 0  ;;  %v501_v21 = vor.u32 %v500_v2, %v499_v38  ;;  %v503_v18 = vshrl.u32 %v12179_v42, %v7208_v6 }
 0x113   : > { %v508_v31 = vshll.u32 %v12180_v47, %v7181_v19  ;;  %v1103_v62 = vsel %vm1101_vm8, %v1102_v43, %v6683_v51  ;;  %v873_v49 = vor.u32 4788187, %v872_v60  ;;  %v1271_v32 = vadd.s32 536870912, %v1270_v7 }
 0x114   : > { %v507_v27 = vor.u32 %v506_v56, %v505_v29  ;;  %v1100_v15 = vsel %vm1098_vm5, %v6681_v25, %v1099_v45  ;;  %v511_v12 = vshll.u32 %v12181_v59, %v7181_v19  ;;  %v512_v9 = vshrl.u32 %v12191_v17, %v7208_v6 }
 0x115   : > { %v510_v3 = vor.u32 %v509_v5, %v508_v31  ;;  %v1104_v61 = vsel %vm1097_vm10, %v1100_v15, %v1103_v62  ;;  %v874_v38 = vand.u32 2147483647, %v873_v49  ;;  %v876_v2 = vcvt.s32.f32 %v869_v36 }
 0x116   : > { %v1272_v35 = vshrl.u32 %v1271_v32, 30  ;;  %v1105_v22 = vsel %vm1094_vm11, nan, %v1104_v61  ;;  %v504_v41 = vor.u32 %v503_v18, %v502_v44  ;;  %v513_v34 = vor.u32 %v512_v9, %v511_v12 }
 0x117   : > { %vm517_vm15 = vcmp.lt.s32.totalorder %v7202_v57, 4  ;;  %v6380_v25 = vpack.c.bf16 %v1105_v22, %v689_v33  ;;  %v877_v29 = vmul.f32 %v876_v2, %v874_v38  ;;  %v490_v5 = vor.u32 8388608, %v7525_v37 }
 0x118   : > { %v1273_v56 = vshll.u32 %v1272_v35, 30  ;;  %v1296_v19 = vsub.s32 4, %v1272_v35  ;;  %vm514_vm0 = vcmp.lt.s32.totalorder %v7202_v57, 1  ;;  %vm515_vm2 = vcmp.lt.s32.totalorder %v7202_v57, 2 }
 0x119   : > { %v523_v6 = vsel %vm517_vm15, %v510_v3, 920167782  ;;  %6381 = vmatprep.subr.bf16.mxu0 %v6380_v25  ;;  %v878_v10 = vxor.u32 2147483648, %v877_v29  ;;  %vm516_vm3 = vcmp.lt.s32.totalorder %v7202_v57, 3  ;;  %v519_v33 = vsel %vm517_vm15, %v507_v27, 2102212464 }
 0x11a   : > { %v7569_v1 = vsub.s32 %v1270_v7, %v1273_v56  ;;  %v522_v44 = vsel %vm514_vm0, %v501_v21, %v504_v41  ;;  %v524_v51 = vsel %vm516_vm3, %v507_v27, %v523_v6  ;;  %v526_v43 = vsel %vm514_vm0, %v504_v41, %v507_v27 }
 0x11b   : > { %v527_v37 = vsel %vm517_vm15, %v513_v34, 1326507024  ;;  %v879_v36 = vsel %vm796_vm13, %v878_v10, %v877_v29  ;;  %v1297_v7 = vsel %vm1212_vm14, %v1296_v19, %v1272_v35  ;;  %v518_v45 = vsel %vm514_vm0, %v498_v16, %v501_v21 }
 0x11c   : > { %v1276_v60 = vsub.s32 0, %v7569_v1  ;;  %v882_v18 = vsel %vm7457_vm1, %v7136_v39, %v879_v36  ;;  %v520_v31 = vsel %vm516_vm3, %v504_v41, %v519_v33  ;;  %v528_v62 = vsel %vm516_vm3, %v510_v3, %v527_v37 }
 0x11d   : > { %v530_v49 = vshll.u32 %v490_v5, 8  ;;  %6684 = vcosq.f32 %v882_v18  ;;  %v525_v27 = vsel %vm515_vm2, %v522_v44, %v524_v51  ;;  %v529_v15 = vsel %vm515_vm2, %v526_v43, %v528_v62 }
 0x11e   : > { %v6185_v32 = vmin.u32 %v1276_v60, %v7569_v1  ;;  %vm1325_vm13 = vcmp.gt.s32.totalorder %v7399_v52, 0  ;;  %v7591_v16 = vadd.s32 1, %v7312_v58  ;;  %6686 = vsinq.f32 %v882_v18 }
 0x11f   : > { %v7593_v21 = vmul.u32.u64.low %v530_v49, %v529_v15  ;;  %v7594_v30 = vmul.u32.u64.high %v530_v49, %v529_v15, %v7593_v21  ;;  %v7597_v3 = vand.u32 3, %v7520_v40  ;;  %vm7601_vm1 = vcmp.le.f32.partialorder %v1210_v54, 0.7853982 }
 0x120   : > { %v1278_v9 = vclz %v6185_v32  ;;  %v1299_v61 = vsel %vm7601_vm1, 0, %v1297_v7  ;;  %v521_v58 = vsel %vm515_vm2, %v518_v45, %v520_v31  ;;  %v12199_v40 = vand.u32 2139095040, %v7165_v48 }
 0x121   : > { %v7609_v38 = vmul.u32.u64.low %v530_v49, %v525_v27  ;;  %v7610_v2 = vmul.u32.u64.high %v530_v49, %v525_v27, %v7609_v38  ;;  %v12200_v54 = vand.u32 2139095040, %v7167_v20  ;;  %v898_v34 = vand.u32 2147483647, %v7101_v55 }
 0x122   : > { %v7615_v35 = vshrl.u32 %v12199_v40, 23  ;;  %v6186_v41 = vadd.s32 4294967294, %v1278_v9  ;;  %v7623_v25 = vsel %vm1325_vm13, %v7399_v52, 0  ;;  %v7626_v57 = vadd.s32 4294967169, %v7407_v14 }
 0x123   : > { %v7619_v22 = vshrl.u32 %v12200_v54, 23  ;;  %v7629_v29 = vadd.s32 4294967169, %v7495_v50  ;;  %v1266_v56 = vadd.s32 %v7511_v26, %v7504_v53  ;;  %vm893_vm6 = vcmp.eq.s32.totalorder %v7597_v3, 2  ;;  %v12201_v50 = vld [vmem:[#allocation11_spill] sm:$0xff] }
 0x124   : > { %vm6187_vm7 = vcmp.lt.s32.totalorder %v6186_v41, 0  ;;  %v7634_v19 = vadd.s32 3, %v1299_v61  ;;  %v537_v5 = vmul.u32 %v530_v49, %v521_v58  ;;  %vm539_vm4 = vc.u32 %v7594_v30, %v7609_v38 }
 0x125   : > { %v1281_v52 = vsel %vm6187_vm7, 0, %v6186_v41  ;;  %v540_v6 = vadd.s32 1, %v7610_v2  ;;  %v914_v14 = vshrl.u32 %v12182_v4, %v7185_v46  ;;  %v915_v10 = vshll.u32 %v12182_v4, %v12201_v50 }
 0x126   : > { %v1282_v33 = vsub.s32 32, %v1281_v52  ;;  %v1286_v53 = vsub.s32 4294967266, %v1281_v52  ;;  %v905_v26 = vand.u32 8388607, %v898_v34  ;;  %v916_v44 = vshrl.u32 %v12187_v8, %v7185_v46 }
 0x127   : > { %v1283_v51 = vshll.u32 %v7569_v1, %v1281_v52  ;;  %v541_v43 = vsel %vm539_vm4, %v540_v6, %v7610_v2  ;;  %v919_v37 = vshrl.u32 %v12179_v42, %v7185_v46  ;;  %v925_v36 = vshrl.u32 %v12181_v59, %v7185_v46  ;;  %v6685_v60 = vpop.eup %6684 }
 0x128   : > { %vm890_vm5 = vcmp.eq.s32.totalorder %v7597_v3, 0  ;;  %v1284_v7 = vshrl.u32 %v1266_v56, %v1282_v33  ;;  %v1287_v45 = vadd.s32 127, %v1286_v53  ;;  %v542_v18 = vadd.s32 %v541_v43, %v537_v5  ;;  %v6687_v27 = vpop.eup %6686 }
 0x129   : > { %v922_v31 = vshrl.u32 %v12180_v47, %v7185_v46  ;;  %v894_v62 = vxor.u32 2147483648, %v6685_v60  ;;  %vm484_vm8 = vcmp.lt.s32.totalorder %v7113_v0, 0  ;;  %v918_v1 = vshll.u32 %v12187_v8, %v12201_v50 }
 0x12a   : > { %v924_v49 = vshll.u32 %v12180_v47, %v12201_v50  ;;  %v928_v32 = vshrl.u32 %v12191_v17, %v7185_v46  ;;  %v1285_v15 = vor.u32 %v1284_v7, %v1283_v51  ;;  %v1288_v21 = vshll.u32 %v1287_v45, 23  ;;  %v12204_v51 = vld [vmem:[#allocation13_spill] sm:$0xff] }
 0x12b   : > { %v543_v9 = vadd.s32 536870912, %v542_v18  ;;  %v921_v61 = vshll.u32 %v12179_v42, %v12201_v50  ;;  %v906_v58 = vor.u32 8388608, %v905_v26  ;;  %v917_v2 = vor.u32 %v916_v44, %v915_v10 }
 0x12c   : > { %v926_v40 = vor.u32 %v925_v36, %v924_v49  ;;  %v927_v54 = vshll.u32 %v12181_v59, %v12201_v50  ;;  %v1289_v41 = vor.u32 4788187, %v1288_v21  ;;  %v920_v5 = vor.u32 %v919_v37, %v918_v1 }
 0x12d   : > { %v544_v56 = vshrl.u32 %v543_v9, 30  ;;  %v923_v52 = vor.u32 %v922_v31, %v921_v61  ;;  %vm1429_vm9 = vcmp.gt.s32.totalorder %v7402_v13, 0  ;;  %vm889_vm10 = vcmp.lt.s32.totalorder %v7597_v3, 2 }
 0x12e   : > { %v891_v46 = vxor.u32 2147483648, %v6687_v27  ;;  %v895_v6 = vsel %vm893_vm6, %v894_v62, %v6687_v27  ;;  %v1292_v33 = vcvt.s32.f32 %v1285_v15  ;;  %vm7673_vm11 = vcmp.le.f32.partialorder %v482_v28, 0.7853982 }
 0x12f   : > { %v929_v50 = vor.u32 %v928_v32, %v927_v54  ;;  %v1290_v53 = vand.u32 2147483647, %v1289_v41  ;;  %v545_v26 = vshll.u32 %v544_v56, 30  ;;  %v568_v44 = vsub.s32 4, %v544_v56 }
 0x130   : > { %vm933_vm12 = vcmp.lt.s32.totalorder %v12204_v51, 4  ;;  %vm930_vm15 = vcmp.lt.s32.totalorder %v12204_v51, 1  ;;  %vm931_vm0 = vcmp.lt.s32.totalorder %v12204_v51, 2  ;;  %vm932_vm2 = vcmp.lt.s32.totalorder %v12204_v51, 3 }
 0x131   : > { %v939_v43 = vsel %vm933_vm12, %v926_v40, 920167782  ;;  %v1293_v37 = vmul.f32 %v1292_v33, %v1290_v53  ;;  %v7681_v36 = vsub.s32 %v542_v18, %v545_v26  ;;  %v935_v28 = vsel %vm933_vm12, %v923_v52, 2102212464 }
 0x132   : > { %v938_v7 = vsel %vm930_vm15, %v917_v2, %v920_v5  ;;  %v892_v45 = vsel %vm890_vm5, %v6685_v60, %v891_v46  ;;  %v940_v31 = vsel %vm932_vm2, %v923_v52, %v939_v43  ;;  %v942_v62 = vsel %vm930_vm15, %v920_v5, %v923_v52 }
 0x133   : > { %v943_v1 = vsel %vm933_vm12, %v929_v50, 1326507024  ;;  %v1294_v49 = vxor.u32 2147483648, %v1293_v37  ;;  %v548_v32 = vsub.s32 0, %v7681_v36  ;;  %v569_v27 = vsel %vm484_vm8, %v568_v44, %v544_v56  ;;  %v12205_v56 = vld [vmem:[#allocation6_spill] sm:$0xff] }
 0x134   : > { %v934_v15 = vsel %vm930_vm15, %v914_v14, %v917_v2  ;;  %v936_v18 = vsel %vm932_vm2, %v920_v5, %v935_v28  ;;  %v941_v21 = vsel %vm931_vm0, %v938_v7, %v940_v31  ;;  %v944_v60 = vsel %vm932_vm2, %v926_v40, %v943_v1  ;;  %v12206_v28 = vld [vmem:[#allocation18_spill] sm:$0xff] }
 0x135   : > { %v946_v9 = vshll.u32 %v906_v58, 8  ;;  %v1295_v61 = vsel %vm1212_vm14, %v1294_v49, %v1293_v37  ;;  %v6157_v54 = vmin.u32 %v548_v32, %v7681_v36  ;;  %v945_v41 = vsel %vm931_vm0, %v942_v62, %v944_v60 }
 0x136   : > { %v690_v14 = vand.u32 2147483647, %v12205_v56  ;;  %v1298_v2 = vsel %vm7601_vm1, %v7123_v11, %v1295_v61  ;;  %v7706_v5 = vand.u32 3, %v7634_v19  ;;  %v896_v58 = vsel %vm889_vm10, %v892_v45, %v895_v6  ;;  %v12207_v45 = vld [vmem:[#allocation17_spill] sm:$0xff] }
 0x137   : > { %v7708_v52 = vmul.u32.u64.low %v946_v9, %v945_v41  ;;  %v7709_v40 = vmul.u32.u64.high %v946_v9, %v945_v41, %v7708_v52  ;;  %6688 = vcosq.f32 %v1298_v2  ;;  %v550_v46 = vclz %v6157_v54 }
 0x138   : > { %v571_v33 = vsel %vm7673_vm11, 0, %v569_v27  ;;  %6690 = vsinq.f32 %v1298_v2  ;;  %v937_v50 = vsel %vm931_vm0, %v934_v15, %v936_v18  ;;  %v7724_v19 = vsel %vm1429_vm9, %v7402_v13, 0 }
 0x139   : > { %v7717_v12 = vmul.u32.u64.low %v946_v9, %v941_v21  ;;  %v7718_v53 = vmul.u32.u64.high %v946_v9, %v941_v21, %v7717_v12  ;;  %vm886_vm14 = vweird.f32 %v7136_v39  ;;  %v6158_v3 = vadd.s32 4294967294, %v550_v46 }
 0x13a   : > { %v7729_v6 = vand.u32 8388607, %v690_v14  ;;  %v7732_v26 = vshrl.u32 %v7623_v25, 5  ;;  %v7735_v44 = vadd.s32 1, %v7629_v29  ;;  %v7737_v51 = vsel %vm886_vm14, nan, %v896_v58 }
 0x13b   : > { %v538_v43 = vadd.s32 %v7609_v38, %v7594_v30  ;;  %vm1309_vm3 = vcmp.eq.s32.totalorder %v7706_v5, 2  ;;  %vm6159_vm13 = vcmp.lt.s32.totalorder %v6158_v3, 0  ;;  %v7742_v39 = vadd.s32 3, %v571_v33 }
 0x13c   : > { %v953_v13 = vmul.u32 %v946_v9, %v937_v50  ;;  %vm955_vm1 = vc.u32 %v7709_v40, %v7717_v12  ;;  %vm1306_vm6 = vcmp.eq.s32.totalorder %v7706_v5, 0  ;;  %v553_v37 = vsel %vm6159_vm13, 0, %v6158_v3 }
 0x13d   : > { %v956_v29 = vadd.s32 1, %v7718_v53  ;;  %v706_v7 = vshrl.u32 %v12182_v4, %v12206_v28  ;;  %v707_v30 = vshll.u32 %v12182_v4, %v12207_v45  ;;  %vm1305_vm7 = vcmp.lt.s32.totalorder %v7706_v5, 2 }
 0x13e   : > { %v554_v38 = vsub.s32 32, %v553_v37  ;;  %v558_v31 = vsub.s32 4294967266, %v553_v37  ;;  %v698_v62 = vor.u32 8388608, %v7729_v6  ;;  %v708_v1 = vshrl.u32 %v12187_v8, %v12206_v28 }
 0x13f   : > { %vm1302_vm4 = vweird.f32 %v7123_v11  ;;  %v555_v49 = vshll.u32 %v7681_v36, %v553_v37  ;;  %v957_v32 = vsel %vm955_vm1, %v956_v29, %v7718_v53  ;;  %v711_v27 = vshrl.u32 %v12179_v42, %v12206_v28 }
 0x140   : > { %v714_v15 = vshrl.u32 %v12180_v47, %v12206_v28  ;;  %v556_v18 = vshrl.u32 %v538_v43, %v554_v38  ;;  %v559_v21 = vadd.s32 127, %v558_v31  ;;  %v958_v60 = vadd.s32 %v957_v32, %v953_v13 }
 0x141   : > { %v717_v9 = vshrl.u32 %v12181_v59, %v12206_v28  ;;  %v710_v61 = vshll.u32 %v12187_v8, %v12207_v45  ;;  %v713_v36 = vshll.u32 %v12179_v42, %v12207_v45  ;;  %v716_v54 = vshll.u32 %v12180_v47, %v12207_v45  ;;  %v6689_v2 = vpop.eup %6688 }
 0x142   : > { %v720_v41 = vshrl.u32 %v12191_v17, %v12206_v28  ;;  %v557_v52 = vor.u32 %v556_v18, %v555_v49  ;;  %v560_v58 = vshll.u32 %v559_v21, 23  ;;  %vm900_vm5 = vcmp.lt.s32.totalorder %v7101_v55, 0  ;;  %v6691_v50 = vpop.eup %6690  ;;  %v12210_v49 = vld [vmem:[#allocation16_spill] sm:$0xff] }
 0x143   : > { %v959_v46 = vadd.s32 536870912, %v958_v60  ;;  %v709_v33 = vor.u32 %v708_v1, %v707_v30  ;;  %v1310_v53 = vxor.u32 2147483648, %v6689_v2  ;;  %v712_v3 = vor.u32 %v711_v27, %v710_v61 }
 0x144   : > { %v718_v6 = vor.u32 %v717_v9, %v716_v54  ;;  %v719_v43 = vshll.u32 %v12181_v59, %v12207_v45  ;;  %vm1637_vm9 = vcmp.gt.s32.totalorder %v7591_v16, 0  ;;  %v1307_v13 = vxor.u32 2147483648, %v6691_v50 }
 0x145   : > { %v561_v37 = vor.u32 4788187, %v560_v58  ;;  %v960_v29 = vshrl.u32 %v959_v46, 30  ;;  %v715_v28 = vor.u32 %v714_v15, %v713_v36  ;;  %v1311_v38 = vsel %vm1309_vm3, %v1310_v53, %v6691_v50 }
 0x146   : > { %v564_v31 = vcvt.s32.f32 %v557_v52  ;;  %vm7781_vm10 = vcmp.le.f32.partialorder %v898_v34, 0.7853982  ;;  %v721_v1 = vor.u32 %v720_v41, %v719_v43  ;;  %vm722_vm12 = vcmp.lt.s32.totalorder %v12210_v49, 1 }
 0x147   : > { %v1308_v45 = vsel %vm1306_vm6, %v6689_v2, %v1307_v13  ;;  %v562_v32 = vand.u32 2147483647, %v561_v37  ;;  %v961_v27 = vshll.u32 %v960_v29, 30  ;;  %vm725_vm15 = vcmp.lt.s32.totalorder %v12210_v49, 4 }
 0x148   : > { %v1312_v15 = vsel %vm1305_vm7, %v1308_v45, %v1311_v38  ;;  %v984_v18 = vsub.s32 4, %v960_v29  ;;  %vm724_vm0 = vcmp.lt.s32.totalorder %v12210_v49, 3  ;;  %v731_v34 = vsel %vm725_vm15, %v718_v6, 920167782 }
 0x149   : > { %v1313_v21 = vsel %vm1302_vm4, nan, %v1312_v15  ;;  %v565_v9 = vmul.f32 %v564_v31, %v562_v32  ;;  %v7796_v61 = vsub.s32 %v958_v60, %v961_v27  ;;  %v730_v36 = vsel %vm722_vm12, %v709_v33, %v712_v3 }
 0x14a   : > { %v6388_v54 = vpack.c.bf16 %v1313_v21, %v7737_v51  ;;  %vm723_vm2 = vcmp.lt.s32.totalorder %v12210_v49, 2  ;;  %v727_v5 = vsel %vm725_vm15, %v715_v28, 2102212464  ;;  %v732_v41 = vsel %vm724_vm0, %v715_v28, %v731_v34 }
 0x14b   : > { %v566_v2 = vxor.u32 2147483648, %v565_v9  ;;  %v964_v11 = vsub.s32 0, %v7796_v61  ;;  %v726_v60 = vsel %vm722_vm12, %v706_v7, %v709_v33  ;;  %v734_v52 = vsel %vm722_vm12, %v712_v3, %v715_v28 }
 0x14c   : > { %6389 = vmatprep.subr.bf16.mxu1 %v6388_v54  ;;  %v985_v51 = vsel %vm900_vm5, %v984_v18, %v960_v29  ;;  %v733_v58 = vsel %vm723_vm2, %v730_v36, %v732_v41  ;;  %v735_v46 = vsel %vm725_vm15, %v721_v1, 1326507024  ;;  %v738_v50 = vshll.u32 %v698_v62, 8 }
 0x14d   : > { %v567_v53 = vsel %vm484_vm8, %v566_v2, %v565_v9  ;;  %v6173_v43 = vmin.u32 %v964_v11, %v7796_v61  ;;  %v728_v7 = vsel %vm724_vm0, %v712_v3, %v727_v5  ;;  %v736_v33 = vsel %vm724_vm0, %v718_v6, %v735_v46  ;;  %v12211_v2 = vld [vmem:[#allocation5_spill] sm:$0xff] }
 0x14e   : > { %v570_v13 = vsel %vm7673_vm11, %v7113_v0, %v567_v53  ;;  %v737_v37 = vsel %vm723_vm2, %v734_v52, %v736_v33  ;;  %v7829_v29 = vmul.u32.u64.low %v738_v50, %v733_v58  ;;  %v7830_v62 = vmul.u32.u64.high %v738_v50, %v733_v58, %v7829_v29 }
 0x14f   : > { %v7834_v28 = vand.u32 31, %v7724_v19  ;;  %6692 = vcosq.f32 %v570_v13  ;;  %v966_v38 = vclz %v6173_v43  ;;  %v987_v3 = vsel %vm7781_vm10, 0, %v985_v51  ;;  %v12212_v51 = vld [vmem:[#allocation15_spill] sm:$0xff] }
 0x150   : > { %v7841_v10 = vsel %vm1637_vm9, %v7591_v16, 0  ;;  %vm1845_vm8 = vcmp.gt.s32.totalorder %v7735_v44, 0  ;;  %v7844_v6 = vmul.u32.u64.low %v738_v50, %v737_v37  ;;  %v7845_v31 = vmul.u32.u64.high %v738_v50, %v737_v37, %v7844_v6 }
 0x151   : > { %v7848_v1 = vand.u32 31, %v7623_v25  ;;  %v7851_v45 = vshrl.u32 %v7724_v19, 5  ;;  %v6174_v32 = vadd.s32 4294967294, %v966_v38  ;;  %v729_v27 = vsel %vm723_vm2, %v726_v60, %v728_v7 }
 0x152   : > { %6694 = vsinq.f32 %v570_v13  ;;  %v7856_v15 = vand.u32 3, %v7742_v39  ;;  %v991_v16 = vadd.s32 3, %v987_v3  ;;  %v748_v18 = vadd.s32 1, %v7830_v62 }
 0x153   : > { %v7860_v34 = vsub.s32 32, %v7834_v28  ;;  %v7863_v25 = vand.u32 31, %v7841_v10  ;;  %v7866_v19 = vsel %vm1845_vm8, %v7735_v44, 0  ;;  %vm6175_vm11 = vcmp.lt.s32.totalorder %v6174_v32, 0 }
 0x154   : > { %v7869_v49 = vadd.s32 4294967169, %v7619_v22  ;;  %v969_v21 = vsel %vm6175_vm11, 0, %v6174_v32  ;;  %v745_v9 = vmul.u32 %v738_v50, %v729_v27  ;;  %vm747_vm14 = vc.u32 %v7845_v31, %v7829_v29 }
 0x155   : > { %v954_v39 = vadd.s32 %v7717_v12, %v7709_v40  ;;  %v970_v36 = vsub.s32 32, %v969_v21  ;;  %v974_v54 = vsub.s32 4294967266, %v969_v21  ;;  %v749_v5 = vsel %vm747_vm14, %v748_v18, %v7830_v62  ;;  %v12213_v40 = vld [vmem:[#allocation12_spill] sm:$0xff] }
 0x156   : > { %vm581_vm3 = vcmp.eq.s32.totalorder %v7856_v15, 2  ;;  %v7877_v44 = vand.u32 3, %v991_v16  ;;  %v750_v41 = vadd.s32 %v749_v5, %v745_v9  ;;  %v12060_v22 = vand.u32 2147483647, %v12211_v2 }
 0x157   : > { %v971_v11 = vshll.u32 %v7796_v61, %v969_v21  ;;  %v972_v60 = vshrl.u32 %v954_v39, %v970_v36  ;;  %v975_v52 = vadd.s32 127, %v974_v54  ;;  %v1122_v58 = vshrl.u32 %v12182_v4, %v12212_v51 }
 0x158   : > { %v751_v46 = vadd.s32 536870912, %v750_v41  ;;  %v1123_v12 = vshll.u32 %v12182_v4, %v12213_v40  ;;  %v1124_v50 = vshrl.u32 %v12187_v8, %v12212_v51  ;;  %v1127_v53 = vshrl.u32 %v12179_v42, %v12212_v51 }
 0x159   : > { %v6693_v43 = vpop.eup %6692  ;;  %v973_v7 = vor.u32 %v972_v60, %v971_v11  ;;  %v976_v33 = vshll.u32 %v975_v52, 23  ;;  %v1130_v61 = vshrl.u32 %v12180_v47, %v12212_v51  ;;  %v1133_v13 = vshrl.u32 %v12181_v59, %v12212_v51 }
 0x15a   : > { %vm578_vm13 = vcmp.eq.s32.totalorder %v7856_v15, 0  ;;  %vm692_vm1 = vcmp.lt.s32.totalorder %v12205_v56, 0  ;;  %v752_v37 = vshrl.u32 %v751_v46, 30  ;;  %v1113_v62 = vand.u32 8388607, %v12060_v22 }
 0x15b   : > { %v1126_v38 = vshll.u32 %v12187_v8, %v12213_v40  ;;  %v1136_v3 = vshrl.u32 %v12191_v17, %v12212_v51  ;;  %v582_v6 = vxor.u32 2147483648, %v6693_v43  ;;  %v977_v32 = vor.u32 4788187, %v976_v33  ;;  %v12214_v33 = vld [vmem:[#allocation14_spill] sm:$0xff] }
 0x15c   : > { %v1129_v27 = vshll.u32 %v12179_v42, %v12213_v40  ;;  %v1132_v16 = vshll.u32 %v12180_v47, %v12213_v40  ;;  %v6695_v18 = vpop.eup %6694  ;;  %v753_v21 = vshll.u32 %v752_v37, 30  ;;  %v1125_v9 = vor.u32 %v1124_v50, %v1123_v12 }
 0x15d   : > { %v1128_v39 = vor.u32 %v1127_v53, %v1126_v38  ;;  %v1135_v36 = vshll.u32 %v12181_v59, %v12213_v40  ;;  %v978_v54 = vand.u32 2147483647, %v977_v32  ;;  %v980_v5 = vcvt.s32.f32 %v973_v7 }
 0x15e   : > { %v1131_v11 = vor.u32 %v1130_v61, %v1129_v27  ;;  %v1134_v60 = vor.u32 %v1133_v13, %v1132_v16  ;;  %vm577_vm6 = vcmp.lt.s32.totalorder %v7856_v15, 2  ;;  %v7908_v52 = vsub.s32 %v750_v41, %v753_v21 }
 0x15f   : > { %v1114_v51 = vor.u32 8388608, %v1113_v62  ;;  %v1137_v46 = vor.u32 %v1136_v3, %v1135_v36  ;;  %vm1138_vm7 = vcmp.lt.s32.totalorder %v12214_v33, 1  ;;  %v579_v22 = vxor.u32 2147483648, %v6695_v18 }
 0x160   : > { %v583_v12 = vsel %vm581_vm3, %v582_v6, %v6695_v18  ;;  %v981_v50 = vmul.f32 %v980_v5, %v978_v54  ;;  %v776_v53 = vsub.s32 4, %v752_v37  ;;  %v756_v40 = vsub.s32 0, %v7908_v52 }
 0x161   : > { %vm1139_vm4 = vcmp.lt.s32.totalorder %v12214_v33, 2  ;;  %vm1140_vm9 = vcmp.lt.s32.totalorder %v12214_v33, 3  ;;  %vm1141_vm12 = vcmp.lt.s32.totalorder %v12214_v33, 4  ;;  %v1146_v61 = vsel %vm1138_vm7, %v1125_v9, %v1128_v39 }
 0x162   : > { %v982_v41 = vxor.u32 2147483648, %v981_v50  ;;  %v1143_v7 = vsel %vm1141_vm12, %v1131_v11, 2102212464  ;;  %v1147_v13 = vsel %vm1141_vm12, %v1134_v60, 920167782  ;;  %v6165_v62 = vmin.u32 %v756_v40, %v7908_v52 }
 0x163   : > { %v1148_v38 = vsel %vm1140_vm9, %v1131_v11, %v1147_v13  ;;  %v1150_v3 = vsel %vm1138_vm7, %v1128_v39, %v1131_v11  ;;  %v1151_v6 = vsel %vm1141_vm12, %v1137_v46, 1326507024  ;;  %v580_v32 = vsel %vm578_vm13, %v6693_v43, %v579_v22 }
 0x164   : > { %v983_v27 = vsel %vm900_vm5, %v982_v41, %v981_v50  ;;  %v777_v16 = vsel %vm692_vm1, %v776_v53, %v752_v37  ;;  %v1152_v18 = vsel %vm1140_vm9, %v1134_v60, %v1151_v6  ;;  %v758_v36 = vclz %v6165_v62  ;;  %v12217_v50 = vld [vmem:[#allocation8_spill] sm:$0xff] }
 0x165   : > { %v986_v21 = vsel %vm7781_vm10, %v7101_v55, %v983_v27  ;;  %v1149_v54 = vsel %vm1139_vm4, %v1146_v61, %v1148_v38  ;;  %v1154_v5 = vshll.u32 %v1114_v51, 8  ;;  %v1142_v22 = vsel %vm1138_vm7, %v1122_v58, %v1125_v9 }
 0x166   : > { %6696 = vcosq.f32 %v986_v21  ;;  %v1144_v43 = vsel %vm1140_vm9, %v1128_v39, %v1143_v7  ;;  %v1153_v37 = vsel %vm1139_vm4, %v1150_v3, %v1152_v18  ;;  %v6166_v11 = vadd.s32 4294967294, %v758_v36 }
 0x167   : > { %6698 = vsinq.f32 %v986_v21  ;;  %v7943_v60 = vmul.u32.u64.low %v1154_v5, %v1153_v37  ;;  %v7944_v30 = vmul.u32.u64.high %v1154_v5, %v1153_v37, %v7943_v60  ;;  %v584_v46 = vsel %vm577_vm6, %v580_v32, %v583_v12 }
 0x168   : > { %vm7950_vm5 = vcmp.le.f32.partialorder %v690_v14, 0.7853982  ;;  %v7954_v58 = vmul.u32.u64.low %v1154_v5, %v1149_v54  ;;  %v7955_v9 = vmul.u32.u64.high %v1154_v5, %v1149_v54, %v7954_v58  ;;  %v7959_v39 = vadd.s32 1, %v7869_v49 }
 0x169   : > { %vm574_vm10 = vweird.f32 %v7113_v0  ;;  %vm6167_vm15 = vcmp.lt.s32.totalorder %v6166_v11, 0  ;;  %v779_v15 = vsel %vm7950_vm5, 0, %v777_v16  ;;  %vm997_vm0 = vcmp.eq.s32.totalorder %v7877_v44, 2 }
 0x16a   : > { %v761_v12 = vsel %vm6167_vm15, 0, %v6166_v11  ;;  %v1145_v14 = vsel %vm1139_vm4, %v1142_v22, %v1144_v43  ;;  %v1418_v53 = vand.u32 2147483647, %v12217_v50  ;;  %v1436_v40 = vshrl.u32 %v12187_v8, %v7860_v34 }
 0x16b   : > { %v585_v41 = vsel %vm574_vm10, nan, %v584_v46  ;;  %vm994_vm2 = vcmp.eq.s32.totalorder %v7877_v44, 0  ;;  %v746_v0 = vadd.s32 %v7829_v29, %v7845_v31  ;;  %v762_v49 = vsub.s32 32, %v761_v12 }
 0x16c   : > { %v766_v7 = vsub.s32 4294967266, %v761_v12  ;;  %vm993_vm8 = vcmp.lt.s32.totalorder %v7877_v44, 2  ;;  %v7974_v61 = vadd.s32 3, %v779_v15  ;;  %vm1163_vm11 = vc.u32 %v7944_v30, %v7954_v58 }
 0x16d   : > { %v1164_v33 = vadd.s32 1, %v7955_v9  ;;  %v1435_v13 = vshll.u32 %v12182_v4, %v7834_v28  ;;  %vm990_vm14 = vweird.f32 %v7101_v55  ;;  %v763_v62 = vshll.u32 %v7908_v52, %v761_v12 }
 0x16e   : > { %v764_v38 = vshrl.u32 %v746_v0, %v762_v49  ;;  %v767_v29 = vadd.s32 127, %v766_v7  ;;  %v1161_v31 = vmul.u32 %v1154_v5, %v1145_v14  ;;  %v1425_v6 = vand.u32 8388607, %v1418_v53 }
 0x16f   : > { %v1165_v3 = vsel %vm1163_vm11, %v1164_v33, %v7955_v9  ;;  %v1437_v32 = vor.u32 %v1436_v40, %v1435_v13  ;;  %v1439_v27 = vshrl.u32 %v12179_v42, %v7860_v34  ;;  %v1438_v36 = vshll.u32 %v12187_v8, %v7834_v28 }
 0x170   : > { %v765_v16 = vor.u32 %v764_v38, %v763_v62  ;;  %v768_v18 = vshll.u32 %v767_v29, 23  ;;  %v1166_v21 = vadd.s32 %v1165_v3, %v1161_v31  ;;  %v6697_v54 = vpop.eup %6696  ;;  %v1442_v52 = vshrl.u32 %v12180_v47, %v7860_v34 }
 0x171   : > { %v1444_v5 = vshll.u32 %v12180_v47, %v7834_v28  ;;  %v1445_v22 = vshrl.u32 %v12181_v59, %v7860_v34  ;;  %v1448_v43 = vshrl.u32 %v12191_v17, %v7860_v34  ;;  %v6699_v37 = vpop.eup %6698  ;;  %v998_v11 = vxor.u32 2147483648, %v6697_v54 }
 0x172   : > { %v769_v60 = vor.u32 4788187, %v768_v18  ;;  %v1167_v46 = vadd.s32 536870912, %v1166_v21  ;;  %v1441_v9 = vshll.u32 %v12179_v42, %v7834_v28  ;;  %v995_v15 = vxor.u32 2147483648, %v6699_v37 }
 0x173   : > { %v1440_v12 = vor.u32 %v1439_v27, %v1438_v36  ;;  %v1446_v14 = vor.u32 %v1445_v22, %v1444_v5  ;;  %v1447_v40 = vshll.u32 %v12181_v59, %v7834_v28  ;;  %v999_v0 = vsel %vm997_vm0, %v998_v11, %v6699_v37 }
 0x174   : > { %v770_v49 = vand.u32 2147483647, %v769_v60  ;;  %v772_v7 = vcvt.s32.f32 %v765_v16  ;;  %v1168_v33 = vshrl.u32 %v1167_v46, 30  ;;  %v996_v13 = vsel %vm994_vm2, %v6697_v54, %v995_v15 }
 0x175   : > { %v1426_v62 = vor.u32 8388608, %v1425_v6  ;;  %v1443_v38 = vor.u32 %v1442_v52, %v1441_v9  ;;  %v1449_v29 = vor.u32 %v1448_v43, %v1447_v40  ;;  %v1000_v31 = vsel %vm993_vm8, %v996_v13, %v999_v0 }
 0x176   : > { %v773_v3 = vmul.f32 %v772_v7, %v770_v49  ;;  %v1169_v27 = vshll.u32 %v1168_v33, 30  ;;  %vm1453_vm3 = vcmp.lt.s32.totalorder %v7851_v45, 4  ;;  %v1001_v28 = vsel %vm990_vm14, nan, %v1000_v31 }
 0x177   : > { %vm1450_vm13 = vcmp.lt.s32.totalorder %v7851_v45, 1  ;;  %vm1452_vm6 = vcmp.lt.s32.totalorder %v7851_v45, 3  ;;  %v1459_v16 = vsel %vm1453_vm3, %v1446_v14, 920167782  ;;  %v6382_v6 = vpack.c.bf16 %v1001_v28, %v585_v41 }
 0x178   : > { %v774_v18 = vxor.u32 2147483648, %v773_v3  ;;  %v8015_v36 = vsub.s32 %v1166_v21, %v1169_v27  ;;  %v1458_v44 = vsel %vm1450_vm13, %v1437_v32, %v1440_v12  ;;  %v1434_v54 = vshrl.u32 %v12182_v4, %v7860_v34 }
 0x179   : > { %vm1451_vm7 = vcmp.lt.s32.totalorder %v7851_v45, 2  ;;  %v1455_v55 = vsel %vm1453_vm3, %v1443_v38, 2102212464  ;;  %v1460_v52 = vsel %vm1452_vm6, %v1443_v38, %v1459_v16  ;;  %6383 = vmatpush1.bf16.msra.mxu0 %v6382_v6  ;;  %v1192_v5 = vsub.s32 4, %v1168_v33 }
 0x17a   : > { %v775_v41 = vsel %vm692_vm1, %v774_v18, %v773_v3  ;;  %v1172_v21 = vsub.s32 0, %v8015_v36  ;;  %v1462_v22 = vsel %vm1450_vm13, %v1440_v12, %v1443_v38  ;;  %v1461_v43 = vsel %vm1451_vm7, %v1458_v44, %v1460_v52 }
 0x17b   : > { %v778_v34 = vsel %vm7950_vm5, %v12205_v56, %v775_v41  ;;  %v1463_v37 = vsel %vm1453_vm3, %v1449_v29, 1326507024  ;;  %v1466_v11 = vshll.u32 %v1426_v62, 8  ;;  %v1454_v46 = vsel %vm1450_vm13, %v1434_v54, %v1437_v32 }
 0x17c   : > { %v6181_v60 = vmin.u32 %v1172_v21, %v8015_v36  ;;  %v1456_v9 = vsel %vm1452_vm6, %v1440_v12, %v1455_v55  ;;  %v1464_v15 = vsel %vm1452_vm6, %v1446_v14, %v1463_v37  ;;  %6700 = vcosq.f32 %v778_v34 }
 0x17d   : > { %v1465_v51 = vsel %vm1451_vm7, %v1462_v22, %v1464_v15  ;;  %v8047_v40 = vmul.u32.u64.low %v1466_v11, %v1461_v43  ;;  %v8048_v0 = vmul.u32.u64.high %v1466_v11, %v1461_v43, %v8047_v40  ;;  %v8052_v49 = vadd.s32 1, %v7626_v57 }
 0x17e   : > { %v1848_v7 = vand.u32 31, %v7866_v19  ;;  %vm1108_vm1 = vcmp.lt.s32.totalorder %v12211_v2, 0  ;;  %v1174_v32 = vclz %v6181_v60  ;;  %6702 = vsinq.f32 %v778_v34 }
 0x17f   : > { %v1193_v12 = vsel %vm1108_vm1, %v1192_v5, %v1168_v33  ;;  %v8058_v14 = vmul.u32.u64.low %v1466_v11, %v1465_v51  ;;  %v8059_v13 = vmul.u32.u64.high %v1466_v11, %v1465_v51, %v8058_v14  ;;  %v8062_v62 = vshrl.u32 %v7841_v10, 5 }
 0x180   : > { %vm2053_vm4 = vcmp.gt.s32.totalorder %v7959_v39, 0  ;;  %v6182_v38 = vadd.s32 4294967294, %v1174_v32  ;;  %v1457_v57 = vsel %vm1451_vm7, %v1454_v46, %v1456_v9  ;;  %v8068_v29 = vsub.s32 32, %v7863_v25 }
 0x181   : > { %v8071_v31 = vand.u32 3, %v7974_v61  ;;  %v12218_v33 = vand.u32 2147483647, %v12211_v2  ;;  %v1476_v10 = vadd.s32 1, %v8048_v0  ;;  %v8081_v27 = vshrl.u32 %v7866_v19, 5 }
 0x182   : > { %v1849_v28 = vsub.s32 32, %v1848_v7  ;;  %vm6183_vm12 = vcmp.lt.s32.totalorder %v6182_v38, 0  ;;  %v8086_v16 = vsel %vm2053_vm4, %v7959_v39, 0  ;;  %v1473_v6 = vmul.u32 %v1466_v11, %v1457_v57 }
 0x183   : > { %vm8075_vm9 = vcmp.le.f32.partialorder %v12218_v33, 0.7853982  ;;  %v1177_v61 = vsel %vm6183_vm12, 0, %v6182_v38  ;;  %vm1475_vm5 = vc.u32 %v8059_v13, %v8047_v40  ;;  %v1162_v18 = vadd.s32 %v7954_v58, %v7944_v30 }
 0x184   : > { %v1195_v45 = vsel %vm8075_vm9, 0, %v1193_v12  ;;  %v1178_v44 = vsub.s32 32, %v1177_v61  ;;  %v1182_v54 = vsub.s32 4294967266, %v1177_v61  ;;  %v1477_v19 = vsel %vm1475_vm5, %v1476_v10, %v8048_v0 }
 0x185   : > { %vm789_vm10 = vcmp.eq.s32.totalorder %v8071_v31, 2  ;;  %v1199_v55 = vadd.s32 3, %v1195_v45  ;;  %v1478_v52 = vadd.s32 %v1477_v19, %v1473_v6  ;;  %v1834_v41 = vand.u32 2147483647, %v7163_v24 }
 0x186   : > { %v1179_v39 = vshll.u32 %v8015_v36, %v1177_v61  ;;  %v1180_v21 = vshrl.u32 %v1162_v18, %v1178_v44  ;;  %v1183_v5 = vadd.s32 127, %v1182_v54  ;;  %v1852_v22 = vshrl.u32 %v12187_v8, %v1849_v28  ;;  %v6701_v34 = vpop.eup %6700 }
 0x187   : > { %vm786_vm15 = vcmp.eq.s32.totalorder %v8071_v31, 0  ;;  %v1479_v30 = vadd.s32 536870912, %v1478_v52  ;;  %v1851_v58 = vshll.u32 %v12182_v4, %v1848_v7  ;;  %v1855_v43 = vshrl.u32 %v12179_v42, %v1849_v28 }
 0x188   : > { %v1861_v37 = vshrl.u32 %v12181_v59, %v1849_v28  ;;  %v1181_v11 = vor.u32 %v1180_v21, %v1179_v39  ;;  %v1184_v60 = vshll.u32 %v1183_v5, 23  ;;  %v1854_v46 = vshll.u32 %v12187_v8, %v1848_v7  ;;  %v6703_v9 = vpop.eup %6702 }
 0x189   : > { %v1858_v36 = vshrl.u32 %v12180_v47, %v1849_v28  ;;  %v8103_v15 = vshrl.u32 %v1479_v30, 30  ;;  %v1841_v51 = vand.u32 8388607, %v1834_v41  ;;  %v1860_v0 = vshll.u32 %v12180_v47, %v1848_v7 }
 0x18a   : > { %v1864_v32 = vshrl.u32 %v12191_v17, %v1849_v28  ;;  %v790_v12 = vxor.u32 2147483648, %v6701_v34  ;;  %v1185_v14 = vor.u32 4788187, %v1184_v60  ;;  %v1853_v38 = vor.u32 %v1852_v22, %v1851_v58 }
 0x18b   : > { %v1857_v57 = vshll.u32 %v12179_v42, %v1848_v7  ;;  %v1481_v33 = vshll.u32 %v8103_v15, 30  ;;  %v1856_v10 = vor.u32 %v1855_v43, %v1854_v46  ;;  %v1862_v45 = vor.u32 %v1861_v37, %v1860_v0 }
 0x18c   : > { %v1863_v61 = vshll.u32 %v12181_v59, %v1848_v7  ;;  %v787_v6 = vxor.u32 2147483648, %v6703_v9  ;;  %v1186_v18 = vand.u32 2147483647, %v1185_v14  ;;  %v1188_v44 = vcvt.s32.f32 %v1181_v11 }
 0x18d   : > { %v1859_v54 = vor.u32 %v1858_v36, %v1857_v57  ;;  %vm785_vm0 = vcmp.lt.s32.totalorder %v8071_v31, 2  ;;  %v8113_v19 = vand.u32 3, %v1199_v55  ;;  %v8115_v39 = vsub.s32 %v1478_v52, %v1481_v33  ;;  %v12221_v31 = vld [vmem:[#allocation10_spill] sm:$0xff] }
 0x18e   : > { %v1850_v21 = vshrl.u32 %v12182_v4, %v1849_v28  ;;  %v1865_v5 = vor.u32 %v1864_v32, %v1863_v61  ;;  %v791_v22 = vsel %vm789_vm10, %v790_v12, %v6703_v9  ;;  %v1189_v30 = vmul.f32 %v1188_v44, %v1186_v18 }
 0x18f   : > { %v1842_v58 = vor.u32 8388608, %v1841_v51  ;;  %vm1869_vm2 = vcmp.lt.s32.totalorder %v8081_v27, 4  ;;  %v1484_v7 = vsub.s32 0, %v8115_v39  ;;  %vm1866_vm8 = vcmp.lt.s32.totalorder %v8081_v27, 1 }
 0x190   : > { %vm1868_vm11 = vcmp.lt.s32.totalorder %v8081_v27, 3  ;;  %v1875_v55 = vsel %vm1869_vm2, %v1862_v45, 920167782  ;;  %v788_v52 = vsel %vm786_vm15, %v6701_v34, %v787_v6  ;;  %v1190_v43 = vxor.u32 2147483648, %v1189_v30 }
 0x191   : > { %v1874_v28 = vsel %vm1866_vm8, %v1853_v38, %v1856_v10  ;;  %v1876_v37 = vsel %vm1868_vm11, %v1859_v54, %v1875_v55  ;;  %v6193_v11 = vmin.u32 %v1484_v7, %v8115_v39  ;;  %v1871_v60 = vsel %vm1869_vm2, %v1859_v54, 2102212464 }
 0x192   : > { %v1878_v46 = vsel %vm1866_vm8, %v1856_v10, %v1859_v54  ;;  %v1879_v36 = vsel %vm1869_vm2, %v1865_v5, 1326507024  ;;  %v1191_v9 = vsel %vm1108_vm1, %v1190_v43, %v1189_v30  ;;  %v1504_v51 = vsub.s32 4, %v8103_v15 }
 0x193   : > { %vm1867_vm14 = vcmp.lt.s32.totalorder %v8081_v27, 2  ;;  %v1880_v34 = vsel %vm1868_vm11, %v1862_v45, %v1879_v36  ;;  %v1194_v0 = vsel %vm8075_vm9, %v12211_v2, %v1191_v9  ;;  %v1486_v32 = vclz %v6193_v11 }
 0x194   : > { %v1877_v12 = vsel %vm1867_vm14, %v1874_v28, %v1876_v37  ;;  %v1882_v14 = vshll.u32 %v1842_v58, 8  ;;  %6704 = vcosq.f32 %v1194_v0  ;;  %v1870_v57 = vsel %vm1866_vm8, %v1850_v21, %v1853_v38 }
 0x195   : > { %v1872_v33 = vsel %vm1868_vm11, %v1856_v10, %v1871_v60  ;;  %v1881_v61 = vsel %vm1867_vm14, %v1878_v46, %v1880_v34  ;;  %6706 = vsinq.f32 %v1194_v0  ;;  %v6194_v45 = vadd.s32 4294967294, %v1486_v32 }
 0x196   : > { %v8150_v6 = vmul.u32.u64.low %v1882_v14, %v1881_v61  ;;  %v8151_v3 = vmul.u32.u64.high %v1882_v14, %v1881_v61, %v8150_v6  ;;  %v8154_v18 = vand.u32 31, %v8086_v16  ;;  %v792_v44 = vsel %vm785_vm0, %v788_v52, %v791_v22 }
 0x197   : > { %v8158_v54 = vmul.u32.u64.low %v1882_v14, %v1877_v12  ;;  %v8159_v5 = vmul.u32.u64.high %v1882_v14, %v1877_v12, %v8158_v54  ;;  %vm782_vm3 = vweird.f32 %v12205_v56  ;;  %vm1420_vm13 = vcmp.lt.s32.totalorder %v12217_v50, 0 }
 0x198   : > { %vm6195_vm6 = vcmp.lt.s32.totalorder %v6194_v45, 0  ;;  %v1873_v38 = vsel %vm1867_vm14, %v1870_v57, %v1872_v33  ;;  %vm1205_vm7 = vcmp.eq.s32.totalorder %v8113_v19, 2  ;;  %v1474_v10 = vadd.s32 %v8047_v40, %v8059_v13 }
 0x199   : > { %v1489_v21 = vsel %vm6195_vm6, 0, %v6194_v45  ;;  %v1626_v22 = vand.u32 2147483647, %v12221_v31  ;;  %v8170_v30 = vsel %vm782_vm3, nan, %v792_v44  ;;  %vm1202_vm1 = vcmp.eq.s32.totalorder %v8113_v19, 0 }
 0x19a   : > { %v1490_v58 = vsub.s32 32, %v1489_v21  ;;  %v1494_v56 = vsub.s32 4294967266, %v1489_v21  ;;  %v8176_v7 = vsel %vm1420_vm13, %v1504_v51, %v8103_v15  ;;  %vm1201_vm4 = vcmp.lt.s32.totalorder %v8113_v19, 2 }
 0x19b   : > { %v1889_v27 = vmul.u32 %v1882_v14, %v1873_v38  ;;  %vm1891_vm9 = vc.u32 %v8151_v3, %v8158_v54  ;;  %v1892_v40 = vadd.s32 1, %v8159_v5  ;;  %v1644_v13 = vshrl.u32 %v12187_v8, %v8068_v29 }
 0x19c   : > { %vm1198_vm12 = vweird.f32 %v12211_v2  ;;  %v1491_v55 = vshll.u32 %v8115_v39, %v1489_v21  ;;  %v1492_v52 = vshrl.u32 %v1474_v10, %v1490_v58  ;;  %v1495_v43 = vadd.s32 127, %v1494_v56 }
 0x19d   : > { %v1643_v15 = vshll.u32 %v12182_v4, %v7863_v25  ;;  %v1893_v28 = vsel %vm1891_vm9, %v1892_v40, %v8159_v5  ;;  %v1633_v37 = vand.u32 8388607, %v1626_v22  ;;  %v1647_v11 = vshrl.u32 %v12179_v42, %v8068_v29 }
 0x19e   : > { %v1653_v60 = vshrl.u32 %v12181_v59, %v8068_v29  ;;  %v1493_v46 = vor.u32 %v1492_v52, %v1491_v55  ;;  %v1496_v36 = vshll.u32 %v1495_v43, 23  ;;  %v1894_v9 = vadd.s32 %v1893_v28, %v1889_v27  ;;  %v6705_v51 = vpop.eup %6704 }
 0x19f   : > { %v1646_v39 = vshll.u32 %v12187_v8, %v7863_v25  ;;  %vm8199_vm5 = vcmp.le.f32.partialorder %v1418_v53, 0.7853982  ;;  %v1645_v0 = vor.u32 %v1644_v13, %v1643_v15  ;;  %v1650_v32 = vshrl.u32 %v12180_v47, %v8068_v29  ;;  %v6707_v57 = vpop.eup %6706 }
 0x1a0   : > { %v1652_v12 = vshll.u32 %v12180_v47, %v7863_v25  ;;  %v1656_v14 = vshrl.u32 %v12191_v17, %v8068_v29  ;;  %v1206_v33 = vxor.u32 2147483648, %v6705_v51  ;;  %v1497_v61 = vor.u32 4788187, %v1496_v36 }
 0x1a1   : > { %v1895_v45 = vadd.s32 536870912, %v1894_v9  ;;  %v1649_v53 = vshll.u32 %v12179_v42, %v7863_v25  ;;  %v1203_v6 = vxor.u32 2147483648, %v6707_v57  ;;  %v1648_v44 = vor.u32 %v1647_v11, %v1646_v39 }
 0x1a2   : > { %v1654_v5 = vor.u32 %v1653_v60, %v1652_v12  ;;  %v1655_v38 = vshll.u32 %v12181_v59, %v7863_v25  ;;  %vm1533_vm10 = vcmp.gt.s32.totalorder %v7508_v63, 0  ;;  %v1207_v10 = vsel %vm1205_vm7, %v1206_v33, %v6707_v57 }
 0x1a3   : > { %v1498_v21 = vand.u32 2147483647, %v1497_v61  ;;  %v1500_v58 = vcvt.s32.f32 %v1493_v46  ;;  %v1896_v56 = vshrl.u32 %v1895_v45, 30  ;;  %v1204_v27 = vsel %vm1202_vm1, %v6705_v51, %v1203_v6 }
 0x1a4   : > { %v1634_v40 = vor.u32 8388608, %v1633_v37  ;;  %v1651_v13 = vor.u32 %v1650_v32, %v1649_v53  ;;  %v1657_v55 = vor.u32 %v1656_v14, %v1655_v38  ;;  %v1208_v52 = vsel %vm1201_vm4, %v1204_v27, %v1207_v10 }
 0x1a5   : > { %v1501_v43 = vmul.f32 %v1500_v58, %v1498_v21  ;;  %v1897_v15 = vshll.u32 %v1896_v56, 30  ;;  %vm1661_vm15 = vcmp.lt.s32.totalorder %v8062_v62, 4  ;;  %v1209_v25 = vsel %vm1198_vm12, nan, %v1208_v52 }
 0x1a6   : > { %vm1658_vm0 = vcmp.lt.s32.totalorder %v8062_v62, 1  ;;  %vm1660_vm2 = vcmp.lt.s32.totalorder %v8062_v62, 3  ;;  %v1667_v28 = vsel %vm1661_vm15, %v1654_v5, 920167782  ;;  %v6390_v37 = vpack.c.bf16 %v1209_v25, %v8170_v30 }
 0x1a7   : > { %v1502_v11 = vxor.u32 2147483648, %v1501_v43  ;;  %v8228_v60 = vsub.s32 %v1894_v9, %v1897_v15  ;;  %v1666_v19 = vsel %vm1658_vm0, %v1645_v0, %v1648_v44  ;;  %v1920_v46 = vsub.s32 4, %v1896_v56 }
 0x1a8   : > { %v1668_v2 = vsel %vm1660_vm2, %v1651_v13, %v1667_v28  ;;  %v1670_v36 = vsel %vm1658_vm0, %v1648_v44, %v1651_v13  ;;  %v1671_v39 = vsel %vm1661_vm15, %v1657_v55, 1326507024  ;;  %6391 = vmatpush1.bf16.msra.mxu1 %v6390_v37  ;;  %v1507_v30 = vsel %vm8199_vm5, 0, %v8176_v7 }
 0x1a9   : > { %vm1836_vm8 = vcmp.lt.s32.totalorder %v7163_v24, 0  ;;  %v1900_v9 = vsub.s32 0, %v8228_v60  ;;  %vm1659_vm11 = vcmp.lt.s32.totalorder %v8062_v62, 2  ;;  %v1503_v51 = vsel %vm1420_vm13, %v1502_v11, %v1501_v43 }
 0x1aa   : > { %v1663_v32 = vsel %vm1661_vm15, %v1651_v13, 2102212464  ;;  %v1672_v12 = vsel %vm1660_vm2, %v1654_v5, %v1671_v39  ;;  %v1674_v14 = vshll.u32 %v1634_v40, 8  ;;  %v1642_v7 = vshrl.u32 %v12182_v4, %v8068_v29 }
 0x1ab   : > { %v6209_v57 = vmin.u32 %v1900_v9, %v8228_v60  ;;  %v1669_v33 = vsel %vm1659_vm11, %v1666_v19, %v1668_v2  ;;  %v1673_v61 = vsel %vm1659_vm11, %v1670_v36, %v1672_v12  ;;  %v1511_v45 = vadd.s32 3, %v1507_v30 }
 0x1ac   : > { %v1921_v53 = vsel %vm1836_vm8, %v1920_v46, %v1896_v56  ;;  %v8259_v6 = vmul.u32.u64.low %v1674_v14, %v1673_v61  ;;  %v8260_v38 = vmul.u32.u64.high %v1674_v14, %v1673_v61, %v8259_v6  ;;  %v1506_v5 = vsel %vm8199_vm5, %v12217_v50, %v1503_v51 }
 0x1ad   : > { %v1902_v10 = vclz %v6209_v57  ;;  %v1662_v29 = vsel %vm1658_vm0, %v1642_v7, %v1645_v0  ;;  %v1664_v21 = vsel %vm1660_vm2, %v1648_v44, %v1663_v32  ;;  %v8272_v58 = vsel %vm1533_vm10, %v7508_v63, 0 }
 0x1ae   : > { %vm8276_vm14 = vcmp.le.f32.partialorder %v1834_v41, 0.7853982  ;;  %v8280_v34 = vmul.u32.u64.low %v1674_v14, %v1669_v33  ;;  %v8281_v27 = vmul.u32.u64.high %v1674_v14, %v1669_v33, %v8280_v34  ;;  %vm1741_vm3 = vcmp.gt.s32.totalorder %v8052_v49, 0 }
 0x1af   : > { %v8286_v0 = vshrl.u32 %v8086_v16, 5  ;;  %v6210_v44 = vadd.s32 4294967294, %v1902_v10  ;;  %v1923_v63 = vsel %vm8276_vm14, 0, %v1921_v53  ;;  %v2057_v40 = vsub.s32 32, %v8154_v18 }
 0x1b0   : > { %6708 = vcosq.f32 %v1506_v5  ;;  %v8291_v41 = vand.u32 3, %v1511_v45  ;;  %v1665_v13 = vsel %vm1659_vm11, %v1662_v29, %v1664_v21  ;;  %v1890_v55 = vadd.s32 %v8158_v54, %v8151_v3 }
 0x1b1   : > { %6710 = vsinq.f32 %v1506_v5  ;;  %vm6211_vm13 = vcmp.lt.s32.totalorder %v6210_v44, 0  ;;  %vm1683_vm6 = vc.u32 %v8260_v38, %v8280_v34  ;;  %v1927_v52 = vadd.s32 3, %v1923_v63 }
 0x1b2   : > { %v1905_v16 = vsel %vm6211_vm13, 0, %v6210_v44  ;;  %v1684_v43 = vadd.s32 1, %v8281_v27  ;;  %v2042_v15 = vand.u32 2147483647, %v7167_v20  ;;  %v1681_v37 = vmul.u32 %v1674_v14, %v1665_v13 }
 0x1b3   : > { %v1906_v25 = vsub.s32 32, %v1905_v16  ;;  %v1910_v28 = vsub.s32 4294967266, %v1905_v16  ;;  %v2059_v62 = vshll.u32 %v12182_v4, %v8154_v18  ;;  %v1907_v11 = vshll.u32 %v8228_v60, %v1905_v16 }
 0x1b4   : > { %v1685_v3 = vsel %vm1683_vm6, %v1684_v43, %v8281_v27  ;;  %v2060_v54 = vshrl.u32 %v12187_v8, %v2057_v40  ;;  %v2063_v19 = vshrl.u32 %v12179_v42, %v2057_v40  ;;  %v2069_v39 = vshrl.u32 %v12181_v59, %v2057_v40 }
 0x1b5   : > { %v1908_v46 = vshrl.u32 %v1890_v55, %v1906_v25  ;;  %v1911_v2 = vadd.s32 127, %v1910_v28  ;;  %v1686_v36 = vadd.s32 %v1685_v3, %v1681_v37  ;;  %v2049_v30 = vand.u32 8388607, %v2042_v15 }
 0x1b6   : > { %v2062_v9 = vshll.u32 %v12187_v8, %v8154_v18  ;;  %v2066_v51 = vshrl.u32 %v12180_v47, %v2057_v40  ;;  %v2068_v60 = vshll.u32 %v12180_v47, %v8154_v18  ;;  %v2065_v57 = vshll.u32 %v12179_v42, %v8154_v18 }
 0x1b7   : > { %v1909_v32 = vor.u32 %v1908_v46, %v1907_v11  ;;  %v1912_v12 = vshll.u32 %v1911_v2, 23  ;;  %v1687_v14 = vadd.s32 536870912, %v1686_v36  ;;  %v2061_v7 = vor.u32 %v2060_v54, %v2059_v62 }
 0x1b8   : > { %v2064_v33 = vor.u32 %v2063_v19, %v2062_v9  ;;  %v2070_v61 = vor.u32 %v2069_v39, %v2068_v60  ;;  %v2072_v45 = vshrl.u32 %v12191_v17, %v2057_v40  ;;  %v8321_v53 = vsel %vm1741_vm3, %v8052_v49, 0 }
 0x1b9   : > { %v1913_v6 = vor.u32 4788187, %v1912_v12  ;;  %v8323_v5 = vand.u32 3, %v1927_v52  ;;  %v1688_v10 = vshrl.u32 %v1687_v14, 30  ;;  %vm1514_vm7 = vcmp.eq.s32.totalorder %v8291_v41, 0 }
 0x1ba   : > { %v6709_v29 = vpop.eup %6708  ;;  %vm1517_vm1 = vcmp.eq.s32.totalorder %v8291_v41, 2  ;;  %v2058_v21 = vshrl.u32 %v12182_v4, %v2057_v40  ;;  %v2067_v27 = vor.u32 %v2066_v51, %v2065_v57  ;;  %v2071_v44 = vshll.u32 %v12181_v59, %v8154_v18 }
 0x1bb   : > { %vm2074_vm4 = vcmp.lt.s32.totalorder %v8286_v0, 1  ;;  %v6711_v63 = vpop.eup %6710  ;;  %v1914_v49 = vand.u32 2147483647, %v1913_v6  ;;  %v1916_v13 = vcvt.s32.f32 %v1909_v32  ;;  %vm1628_vm9 = vcmp.lt.s32.totalorder %v12221_v31, 0 }
 0x1bc   : > { %v1689_v55 = vshll.u32 %v1688_v10, 30  ;;  %vm2077_vm12 = vcmp.lt.s32.totalorder %v8286_v0, 4  ;;  %v2050_v16 = vor.u32 8388608, %v2049_v30  ;;  %v2073_v52 = vor.u32 %v2072_v45, %v2071_v44 }
 0x1bd   : > { %v2082_v43 = vsel %vm2074_vm4, %v2061_v7, %v2064_v33  ;;  %v2083_v40 = vsel %vm2077_vm12, %v2070_v61, 920167782  ;;  %v1518_v25 = vxor.u32 2147483648, %v6709_v29  ;;  %v1917_v18 = vmul.f32 %v1916_v13, %v1914_v49 }
 0x1be   : > { %v8337_v28 = vsub.s32 %v1686_v36, %v1689_v55  ;;  %vm2076_vm5 = vcmp.lt.s32.totalorder %v8286_v0, 3  ;;  %v1515_v37 = vxor.u32 2147483648, %v6711_v63  ;;  %vm2075_vm10 = vcmp.lt.s32.totalorder %v8286_v0, 2 }
 0x1bf   : > { %v2079_v62 = vsel %vm2077_vm12, %v2067_v27, 2102212464  ;;  %v2084_v11 = vsel %vm2076_vm5, %v2067_v27, %v2083_v40  ;;  %v1918_v3 = vxor.u32 2147483648, %v1917_v18  ;;  %v2086_v46 = vsel %vm2074_vm4, %v2064_v33, %v2067_v27 }
 0x1c0   : > { %v1692_v54 = vsub.s32 0, %v8337_v28  ;;  %v2085_v19 = vsel %vm2075_vm10, %v2082_v43, %v2084_v11  ;;  %v1712_v2 = vsub.s32 4, %v1688_v10  ;;  %v2078_v36 = vsel %vm2074_vm4, %v2058_v21, %v2061_v7 }
 0x1c1   : > { %v2087_v39 = vsel %vm2077_vm12, %v2073_v52, 1326507024  ;;  %v2090_v30 = vshll.u32 %v2050_v16, 8  ;;  %v1919_v9 = vsel %vm1836_vm8, %v1918_v3, %v1917_v18  ;;  %v2080_v60 = vsel %vm2076_vm5, %v2064_v33, %v2079_v62 }
 0x1c2   : > { %v6201_v51 = vmin.u32 %v1692_v54, %v8337_v28  ;;  %v2088_v32 = vsel %vm2076_vm5, %v2070_v61, %v2087_v39  ;;  %v1922_v12 = vsel %vm8276_vm14, %v7163_v24, %v1919_v9  ;;  %v1516_v45 = vsel %vm1514_vm7, %v6709_v29, %v1515_v37 }
 0x1c3   : > { %v2089_v14 = vsel %vm2075_vm10, %v2086_v46, %v2088_v32  ;;  %v8366_v57 = vmul.u32.u64.low %v2090_v30, %v2085_v19  ;;  %v8367_v7 = vmul.u32.u64.high %v2090_v30, %v2085_v19, %v8366_v57  ;;  %v1519_v33 = vsel %vm1517_vm1, %v1518_v25, %v6711_v63 }
 0x1c4   : > { %6712 = vcosq.f32 %v1922_v12  ;;  %v1694_v6 = vclz %v6201_v51  ;;  %v1713_v56 = vsel %vm1628_vm9, %v1712_v2, %v1688_v10  ;;  %v1329_v27 = vsub.s32 32, %v7848_v1 }
 0x1c5   : > { %6714 = vsinq.f32 %v1922_v12  ;;  %v8376_v61 = vmul.u32.u64.low %v2090_v30, %v2089_v14  ;;  %v8377_v21 = vmul.u32.u64.high %v2090_v30, %v2089_v14, %v8376_v61  ;;  %v8381_v44 = vand.u32 31, %v8321_v53 }
 0x1c6   : > { %v6202_v49 = vadd.s32 4294967294, %v1694_v6  ;;  %v2081_v29 = vsel %vm2075_vm10, %v2078_v36, %v2080_v60  ;;  %vm1510_vm15 = vweird.f32 %v12217_v50  ;;  %vm1513_vm0 = vcmp.lt.s32.totalorder %v8291_v41, 2 }
 0x1c7   : > { %vm8389_vm2 = vcmp.le.f32.partialorder %v1626_v22, 0.7853982  ;;  %v2100_v63 = vadd.s32 1, %v8367_v7  ;;  %v1520_v13 = vsel %vm1513_vm0, %v1516_v45, %v1519_v33  ;;  %vm1933_vm8 = vcmp.eq.s32.totalorder %v8323_v5, 2  ;;  %v12228_v22 = vld [vmem:[#allocation7_spill] sm:$0xff] }
 0x1c8   : > { %v1682_v55 = vadd.s32 %v8280_v34, %v8260_v38  ;;  %vm6203_vm11 = vcmp.lt.s32.totalorder %v6202_v49, 0  ;;  %v1715_v0 = vsel %vm8389_vm2, 0, %v1713_v56  ;;  %vm1930_vm14 = vcmp.eq.s32.totalorder %v8323_v5, 0 }
 0x1c9   : > { %v1697_v41 = vsel %vm6203_vm11, 0, %v6202_v49  ;;  %v2097_v16 = vmul.u32 %v2090_v30, %v2081_v29  ;;  %vm2099_vm3 = vc.u32 %v8377_v21, %v8366_v57  ;;  %v1314_v52 = vand.u32 2147483647, %v12228_v22 }
 0x1ca   : > { %vm1929_vm13 = vcmp.lt.s32.totalorder %v8323_v5, 2  ;;  %v1698_v43 = vsub.s32 32, %v1697_v41  ;;  %v1702_v40 = vsub.s32 4294967266, %v1697_v41  ;;  %v2101_v25 = vsel %vm2099_vm3, %v2100_v63, %v8367_v7 }
 0x1cb   : > { %v1332_v38 = vshrl.u32 %v12187_v8, %v1329_v27  ;;  %v1521_v34 = vsel %vm1510_vm15, nan, %v1520_v13  ;;  %vm1926_vm6 = vweird.f32 %v7163_v24  ;;  %v8409_v18 = vadd.s32 3, %v1715_v0 }
 0x1cc   : > { %v2102_v37 = vadd.s32 %v2101_v25, %v2097_v16  ;;  %v1331_v62 = vshll.u32 %v12182_v4, %v7848_v1  ;;  %v1699_v11 = vshll.u32 %v8337_v28, %v1697_v41  ;;  %v1700_v3 = vshrl.u32 %v1682_v55, %v1698_v43 }
 0x1cd   : > { %v1703_v54 = vadd.s32 127, %v1702_v40  ;;  %v1335_v19 = vshrl.u32 %v12179_v42, %v1329_v27  ;;  %v1321_v2 = vand.u32 8388607, %v1314_v52  ;;  %v1334_v50 = vshll.u32 %v12187_v8, %v7848_v1 }
 0x1ce   : > { %v2103_v46 = vadd.s32 536870912, %v2102_v37  ;;  %v1338_v36 = vshrl.u32 %v12180_v47, %v1329_v27  ;;  %v6713_v39 = vpop.eup %6712  ;;  %v1701_v30 = vor.u32 %v1700_v3, %v1699_v11  ;;  %v1333_v51 = vor.u32 %v1332_v38, %v1331_v62 }
 0x1cf   : > { %v1704_v9 = vshll.u32 %v1703_v54, 23  ;;  %v1341_v60 = vshrl.u32 %v12181_v59, %v1329_v27  ;;  %v6715_v28 = vpop.eup %6714  ;;  %v1934_v32 = vxor.u32 2147483648, %v6713_v39  ;;  %v1337_v14 = vshll.u32 %v12179_v42, %v7848_v1 }
 0x1d0   : > { %v2104_v12 = vshrl.u32 %v2103_v46, 30  ;;  %v1344_v7 = vshrl.u32 %v12191_v17, %v1329_v27  ;;  %v1931_v45 = vxor.u32 2147483648, %v6715_v28  ;;  %v1336_v6 = vor.u32 %v1335_v19, %v1334_v50 }
 0x1d1   : > { %v1705_v33 = vor.u32 4788187, %v1704_v9  ;;  %v1340_v56 = vshll.u32 %v12180_v47, %v7848_v1  ;;  %v1935_v61 = vsel %vm1933_vm8, %v1934_v32, %v6715_v28  ;;  %v1339_v29 = vor.u32 %v1338_v36, %v1337_v14 }
 0x1d2   : > { %v2105_v49 = vshll.u32 %v2104_v12, 30  ;;  %v1343_v63 = vshll.u32 %v12181_v59, %v7848_v1  ;;  %v1932_v13 = vsel %vm1930_vm14, %v6713_v39, %v1931_v45  ;;  %v1708_v0 = vcvt.s32.f32 %v1701_v30 }
 0x1d3   : > { %v1706_v55 = vand.u32 2147483647, %v1705_v33  ;;  %v1342_v41 = vor.u32 %v1341_v60, %v1340_v56  ;;  %v1936_v16 = vsel %vm1929_vm13, %v1932_v13, %v1935_v61  ;;  %vm2044_vm7 = vcmp.lt.s32.totalorder %v7167_v20, 0 }
 0x1d4   : > { %v8435_v43 = vsub.s32 %v2102_v37, %v2105_v49  ;;  %v1330_v40 = vshrl.u32 %v12182_v4, %v1329_v27  ;;  %v1345_v25 = vor.u32 %v1344_v7, %v1343_v63  ;;  %v1937_v38 = vsel %vm1926_vm6, nan, %v1936_v16 }
 0x1d5   : > { %v1709_v1 = vmul.f32 %v1708_v0, %v1706_v55  ;;  %v1322_v62 = vor.u32 8388608, %v1321_v2  ;;  %vm1346_vm1 = vcmp.lt.s32.totalorder %v7732_v26, 1  ;;  %v6384_v11 = vpack.c.bf16 %v1937_v38, %v1521_v34 }
 0x1d6   : > { %v2108_v3 = vsub.s32 0, %v8435_v43  ;;  %vm1348_vm4 = vcmp.lt.s32.totalorder %v7732_v26, 3  ;;  %vm1349_vm12 = vcmp.lt.s32.totalorder %v7732_v26, 4  ;;  %v1354_v27 = vsel %vm1346_vm1, %v1333_v51, %v1336_v6 }
 0x1d7   : > { %v1710_v5 = vxor.u32 2147483648, %v1709_v1  ;;  %v1351_v37 = vsel %vm1349_vm12, %v1339_v29, 2102212464  ;;  %v1355_v54 = vsel %vm1349_vm12, %v1342_v41, 920167782  ;;  %6385 = vmatprep.subr.bf16.mxu0 %v6384_v11  ;;  %v1358_v34 = vsel %vm1346_vm1, %v1336_v6, %v1339_v29 }
 0x1d8   : > { %v6217_v24 = vmin.u32 %v2108_v3, %v8435_v43  ;;  %v1356_v19 = vsel %vm1348_vm4, %v1339_v29, %v1355_v54  ;;  %v1359_v46 = vsel %vm1349_vm12, %v1345_v25, 1326507024  ;;  %v2128_v50 = vsub.s32 4, %v2104_v12 }
 0x1d9   : > { %v1711_v2 = vsel %vm1628_vm9, %v1710_v5, %v1709_v1  ;;  %vm1347_vm5 = vcmp.lt.s32.totalorder %v7732_v26, 2  ;;  %v1360_v36 = vsel %vm1348_vm4, %v1342_v41, %v1359_v46  ;;  %v1362_v60 = vshll.u32 %v1322_v62, 8 }
 0x1da   : > { %v1714_v39 = vsel %vm8389_vm2, %v12221_v31, %v1711_v2  ;;  %v2110_v30 = vclz %v6217_v24  ;;  %v1357_v9 = vsel %vm1347_vm5, %v1354_v27, %v1356_v19  ;;  %v1350_v28 = vsel %vm1346_vm1, %v1330_v40, %v1333_v51 }
 0x1db   : > { %6716 = vcosq.f32 %v1714_v39  ;;  %v1352_v32 = vsel %vm1348_vm4, %v1336_v6, %v1351_v37  ;;  %v1361_v14 = vsel %vm1347_vm5, %v1358_v34, %v1360_v36  ;;  %v8471_v33 = vand.u32 31, %v8272_v58 }
 0x1dc   : > { %6718 = vsinq.f32 %v1714_v39  ;;  %v6218_v7 = vadd.s32 4294967294, %v2110_v30  ;;  %v8467_v45 = vmul.u32.u64.low %v1362_v60, %v1361_v14  ;;  %v8468_v10 = vmul.u32.u64.high %v1362_v60, %v1361_v14, %v8467_v45 }
 0x1dd   : > { %v2129_v56 = vsel %vm2044_vm7, %v2128_v50, %v2104_v12  ;;  %v8475_v61 = vmul.u32.u64.low %v1362_v60, %v1357_v9  ;;  %v8476_v49 = vmul.u32.u64.high %v1362_v60, %v1357_v9, %v8475_v61  ;;  %v1745_v51 = vsub.s32 32, %v8381_v44 }
 0x1de   : > { %v8481_v6 = vadd.s32 4294967169, %v7615_v35  ;;  %vm6219_vm9 = vcmp.lt.s32.totalorder %v6218_v7, 0  ;;  %v1353_v29 = vsel %vm1347_vm5, %v1350_v28, %v1352_v32  ;;  %v8486_v63 = vshrl.u32 %v8321_v53, 5 }
 0x1df   : > { %v8489_v13 = vand.u32 3, %v8409_v18  ;;  %vm8493_vm10 = vcmp.le.f32.partialorder %v2042_v15, 0.7853982  ;;  %v2113_v55 = vsel %vm6219_vm9, 0, %v6218_v7  ;;  %v2098_v35 = vadd.s32 %v8366_v57, %v8377_v21 }
 0x1e0   : > { %v2114_v0 = vsub.s32 32, %v2113_v55  ;;  %v2118_v41 = vsub.s32 4294967266, %v2113_v55  ;;  %v2131_v26 = vsel %vm8493_vm10, 0, %v2129_v56  ;;  %v1369_v53 = vmul.u32 %v1362_v60, %v1353_v29 }
 0x1e1   : > { %vm1371_vm15 = vc.u32 %v8468_v10, %v8475_v61  ;;  %v1372_v18 = vadd.s32 1, %v8476_v49  ;;  %v1730_v15 = vand.u32 2147483647, %v7161_v23  ;;  %v2115_v16 = vshll.u32 %v8435_v43, %v2113_v55 }
 0x1e2   : > { %v2116_v40 = vshrl.u32 %v2098_v35, %v2114_v0  ;;  %v2119_v25 = vadd.s32 127, %v2118_v41  ;;  %v1748_v38 = vshrl.u32 %v12187_v8, %v1745_v51  ;;  %vm1725_vm0 = vcmp.eq.s32.totalorder %v8489_v13, 2 }
 0x1e3   : > { %v8508_v57 = vadd.s32 3, %v2131_v26  ;;  %v1373_v21 = vsel %vm1371_vm15, %v1372_v18, %v8476_v49  ;;  %v1751_v1 = vshrl.u32 %v12179_v42, %v1745_v51  ;;  %vm1722_vm2 = vcmp.eq.s32.totalorder %v8489_v13, 0 }
 0x1e4   : > { %v2117_v62 = vor.u32 %v2116_v40, %v2115_v16  ;;  %v2120_v11 = vshll.u32 %v2119_v25, 23  ;;  %v1374_v3 = vadd.s32 %v1373_v21, %v1369_v53  ;;  %v1747_v43 = vshll.u32 %v12182_v4, %v8381_v44  ;;  %v2150_v25 = vld [vmem:[%s12018_s4] sm:$0xff] }
 0x1e5   : > { %v6717_v5 = vpop.eup %6716  ;;  %v1750_v37 = vshll.u32 %v12187_v8, %v8381_v44  ;;  %v1754_v27 = vshrl.u32 %v12180_v47, %v1745_v51  ;;  %v1756_v54 = vshll.u32 %v12180_v47, %v8381_v44  ;;  %v1757_v24 = vshrl.u32 %v12181_v59, %v1745_v51  ;;  %2156 = vperm.xlu1 %6674, %v2150_v25  }
 0x1e6   : > { %v6719_v19 = vpop.eup %6718  ;;  %v2121_v34 = vor.u32 4788187, %v2120_v11  ;;  %v1375_v46 = vadd.s32 536870912, %v1374_v3  ;;  %v1737_v2 = vand.u32 8388607, %v1730_v15  ;;  %v1749_v50 = vor.u32 %v1748_v38, %v1747_v43  ;;  %v2151_v38 = vld [vmem:[%s12018_s4 + $0x8] sm:$0xff] }
 0x1e7   : > { %v1752_v36 = vor.u32 %v1751_v1, %v1750_v37  ;;  %v1753_v39 = vshll.u32 %v12179_v42, %v8381_v44  ;;  %v1758_v30 = vor.u32 %v1757_v24, %v1756_v54  ;;  %v1760_v9 = vshrl.u32 %v12191_v17, %v1745_v51  ;;  %2161 = vperm.xlu0 %6675, %v2151_v38   ;;  %v6296_v54 = vld [vmem:[%s12018_s4 + $0x20] sm:$0xff] }
 0x1e8   : > { %v1726_v60 = vxor.u32 2147483648, %v6717_v5  ;;  %v2122_v28 = vand.u32 2147483647, %v2121_v34  ;;  %v2124_v32 = vcvt.s32.f32 %v2117_v62  ;;  %v8526_v14 = vshrl.u32 %v1375_v46, 30 }
 0x1e9   : > { %v1723_v7 = vxor.u32 2147483648, %v6719_v19  ;;  %v1746_v45 = vshrl.u32 %v12182_v4, %v1745_v51  ;;  %v1755_v56 = vor.u32 %v1754_v27, %v1753_v39  ;;  %v1759_v49 = vshll.u32 %v12181_v59, %v8381_v44  ;;  %v2152_v27 = vld [vmem:[%s12018_s4 + $0x10] sm:$0xff] }
 0x1ea   : > { %v2125_v29 = vmul.f32 %v2124_v32, %v2122_v28  ;;  %v1377_v55 = vshll.u32 %v8526_v14, 30  ;;  %vm1762_vm8 = vcmp.lt.s32.totalorder %v8486_v63, 1  ;;  %vm1765_vm11 = vcmp.lt.s32.totalorder %v8486_v63, 4  ;;  %2166 = vperm.xlu1 %6674, %v2152_v27  }
 0x1eb   : > { %v1738_v35 = vor.u32 8388608, %v1737_v2  ;;  %v1761_v0 = vor.u32 %v1760_v9, %v1759_v49  ;;  %v1770_v41 = vsel %vm1762_vm8, %v1749_v50, %v1752_v36  ;;  %v1771_v26 = vsel %vm1765_vm11, %v1758_v30, 920167782  ;;  %4041 = vperm.xlu0 %6675, %v6296_v54  }
 0x1ec   : > { %v1727_v51 = vsel %vm1725_vm0, %v1726_v60, %v6719_v19  ;;  %v2126_v53 = vxor.u32 2147483648, %v2125_v29  ;;  %v8540_v44 = vsub.s32 %v1374_v3, %v1377_v55  ;;  %vm1764_vm14 = vcmp.lt.s32.totalorder %v8486_v63, 3  ;;  %v2153_v60 = vld [vmem:[%s12018_s4 + $0x18] sm:$0xff]  ;;  %v6297_v55 = vld [vmem:[%s12018_s4 + $0x28] sm:$0xff] }
 0x1ed   : > { %v1724_v18 = vsel %vm1722_vm2, %v6717_v5, %v1723_v7  ;;  %vm1763_vm3 = vcmp.lt.s32.totalorder %v8486_v63, 2  ;;  %v1767_v16 = vsel %vm1765_vm11, %v1755_v56, 2102212464  ;;  %v1772_v40 = vsel %vm1764_vm14, %v1755_v56, %v1771_v26 }
 0x1ee   : > { %v2127_v21 = vsel %vm2044_vm7, %v2126_v53, %v2125_v29  ;;  %v1380_v1 = vsub.s32 0, %v8540_v44  ;;  %v1773_v62 = vsel %vm1763_vm3, %v1770_v41, %v1772_v40  ;;  %v1774_v11 = vsel %vm1762_vm8, %v1752_v36, %v1755_v56  ;;  %v12231_v56 = vld [vmem:[#allocation9_spill] sm:$0xff]  ;;  %2171 = vperm.xlu1 %6674, %v2153_v60  }
 0x1ef   : > { %v2130_v3 = vsel %vm8493_vm10, %v7167_v20, %v2127_v21  ;;  %v1766_v43 = vsel %vm1762_vm8, %v1746_v45, %v1749_v50  ;;  %v1775_v5 = vsel %vm1765_vm11, %v1761_v0, 1326507024  ;;  %v1778_v37 = vshll.u32 %v1738_v35, 8  ;;  %v5914_v35 = vld [vmem:[%s12020_s6] sm:$0x7] }
 0x1f0   : > { %6720 = vcosq.f32 %v2130_v3  ;;  %v6189_v24 = vmin.u32 %v1380_v1, %v8540_v44  ;;  %v1768_v12 = vsel %vm1764_vm14, %v1752_v36, %v1767_v16  ;;  %v1776_v19 = vsel %vm1764_vm14, %v1758_v30, %v1775_v5 }
 0x1f1   : > { %6722 = vsinq.f32 %v2130_v3  ;;  %v1777_v34 = vsel %vm1763_vm3, %v1774_v11, %v1776_v19  ;;  %v8583_v46 = vmul.u32.u64.low %v1778_v37, %v1773_v62  ;;  %v8584_v2 = vmul.u32.u64.high %v1778_v37, %v1773_v62, %v8583_v46 }
 0x1f2   : > { %v8588_v50 = vadd.s32 1, %v8481_v6  ;;  %v8591_v39 = vand.u32 3, %v8508_v57  ;;  %v1382_v9 = vclz %v6189_v24  ;;  %vm1721_vm13 = vcmp.lt.s32.totalorder %v8489_v13, 2  ;;  %v6298_v6 = vld [vmem:[%s12018_s4 + $0x30] sm:$0xff]  ;;  %4046 = vperm.xlu1 %6674, %v6297_v55  }
 0x1f3   : > { %v8594_v36 = vmul.u32.u64.low %v1778_v37, %v1777_v34  ;;  %v8595_v30 = vmul.u32.u64.high %v1778_v37, %v1777_v34, %v8594_v36  ;;  %v8604_v28 = vshrl.u32 %v8272_v58, 5  ;;  %v1728_v57 = vsel %vm1721_vm13, %v1724_v18, %v1727_v51  ;;  %4051 = vperm.xlu0 %6675, %v6298_v6  }
 0x1f4   : > { %v6190_v32 = vadd.s32 4294967294, %v1382_v9  ;;  %v1769_v7 = vsel %vm1763_vm3, %v1766_v43, %v1768_v12  ;;  %v8609_v13 = vsub.s32 32, %v8471_v33  ;;  %vm1718_vm6 = vweird.f32 %v12221_v31 }
 0x1f5   : > { %v1788_v45 = vadd.s32 1, %v8584_v2  ;;  %v1522_v49 = vand.u32 2147483647, %v12231_v56  ;;  %vm1949_vm7 = vcmp.gt.s32.totalorder %v8588_v50, 0  ;;  %vm2137_vm1 = vcmp.lt.s32.totalorder %v8591_v39, 2 }
 0x1f6   : > { %vm2138_vm4 = vcmp.eq.s32.totalorder %v8591_v39, 0  ;;  %vm2141_vm12 = vcmp.eq.s32.totalorder %v8591_v39, 2  ;;  %v1370_v58 = vadd.s32 %v8475_v61, %v8468_v10  ;;  %vm6191_vm5 = vcmp.lt.s32.totalorder %v6190_v32, 0 }
 0x1f7   : > { %v1729_v63 = vsel %vm1718_vm6, nan, %v1728_v57  ;;  %vm2134_vm9 = vweird.f32 %v7167_v20  ;;  %v1385_v31 = vsel %vm6191_vm5, 0, %v6190_v32  ;;  %v1785_v29 = vmul.u32 %v1778_v37, %v1769_v7  ;;  %5917 = vperm.xlu0 %6675, %v5914_v35  }
 0x1f8   : > { %vm1787_vm10 = vc.u32 %v8595_v30, %v8583_v46  ;;  %v1386_v10 = vsub.s32 32, %v1385_v31  ;;  %v1390_v61 = vsub.s32 4294967266, %v1385_v31  ;;  %v1539_v41 = vshll.u32 %v12182_v4, %v8471_v33 }
 0x1f9   : > { %v1789_v0 = vsel %vm1787_vm10, %v1788_v45, %v8584_v2  ;;  %v8634_v51 = vand.u32 8388607, %v1522_v49  ;;  %v1540_v53 = vshrl.u32 %v12187_v8, %v8609_v13  ;;  %v1542_v18 = vshll.u32 %v12187_v8, %v8471_v33 }
 0x1fa   : > { %v1790_v26 = vadd.s32 %v1789_v0, %v1785_v29  ;;  %v6721_v16 = vpop.eup %6720  ;;  %v1387_v40 = vshll.u32 %v8540_v44, %v1385_v31  ;;  %v1388_v25 = vshrl.u32 %v1370_v58, %v1386_v10  ;;  %v1391_v38 = vadd.s32 127, %v1390_v61  ;;  %v6299_v44 = vld [vmem:[%s12018_s4 + $0x38] sm:$0xff] }
 0x1fb   : > { %v1543_v21 = vshrl.u32 %v12179_v42, %v8609_v13  ;;  %v6723_v1 = vpop.eup %6722  ;;  %v2142_v62 = vxor.u32 2147483648, %v6721_v16  ;;  %v1545_v3 = vshll.u32 %v12179_v42, %v8471_v33  ;;  %v1549_v43 = vshrl.u32 %v12181_v59, %v8609_v13  ;;  %4056 = vperm.xlu1 %6674, %v6299_v44  }
 0x1fc   : > { %v1791_v11 = vadd.s32 536870912, %v1790_v26  ;;  %v2139_v5 = vxor.u32 2147483648, %v6723_v1  ;;  %v1389_v37 = vor.u32 %v1388_v25, %v1387_v40  ;;  %v1392_v27 = vshll.u32 %v1391_v38, 23 }
 0x1fd   : > { %v1546_v54 = vshrl.u32 %v12180_v47, %v8609_v13  ;;  %v2143_v24 = vsel %vm2141_vm12, %v2142_v62, %v6723_v1  ;;  %v1548_v19 = vshll.u32 %v12180_v47, %v8471_v33  ;;  %v1552_v34 = vshrl.u32 %v12191_v17, %v8609_v13 }
 0x1fe   : > { %v8654_v12 = vshrl.u32 %v1791_v11, 30  ;;  %v2140_v2 = vsel %vm2138_vm4, %v6721_v16, %v2139_v5  ;;  %v1393_v9 = vor.u32 4788187, %v1392_v27  ;;  %v1541_v36 = vor.u32 %v1540_v53, %v1539_v41 }
 0x1ff   : > { %v1544_v60 = vor.u32 %v1543_v21, %v1542_v18  ;;  %v2144_v6 = vsel %vm2137_vm1, %v2140_v2, %v2143_v24  ;;  %v1550_v32 = vor.u32 %v1549_v43, %v1548_v19  ;;  %v1551_v7 = vshll.u32 %v12181_v59, %v8471_v33 }
 0x200   : > { %v1793_v57 = vshll.u32 %v8654_v12, 30  ;;  %v2145_v45 = vsel %vm2134_vm9, nan, %v2144_v6  ;;  %v1394_v58 = vand.u32 2147483647, %v1393_v9  ;;  %v1396_v31 = vcvt.s32.f32 %v1389_v37 }
 0x201   : > { %v1547_v29 = vor.u32 %v1546_v54, %v1545_v3  ;;  %v1950_v55 = vsel %vm1949_vm7, %v8588_v50, 0  ;;  %v6392_v35 = vpack.c.bf16 %v2145_v45, %v1729_v63  ;;  %v1553_v39 = vor.u32 %v1552_v34, %v1551_v7 }
 0x202   : > { %v1794_v10 = vsub.s32 %v1790_v26, %v1793_v57  ;;  %v1397_v61 = vmul.f32 %v1396_v31, %v1394_v58  ;;  %v1530_v0 = vor.u32 8388608, %v8634_v51  ;;  %vm1557_vm15 = vcmp.lt.s32.totalorder %v8604_v28, 4 }
 0x203   : > { %6393 = vmatprep.subr.bf16.mxu1 %v6392_v35  ;;  %vm1554_vm0 = vcmp.lt.s32.totalorder %v8604_v28, 1  ;;  %vm1556_vm2 = vcmp.lt.s32.totalorder %v8604_v28, 3  ;;  %v1563_v20 = vsel %vm1557_vm15, %v1550_v32, 920167782  ;;  %v8676_v41 = vand.u32 31, %v1950_v55 }
 0x204   : > { %v1796_v33 = vsub.s32 0, %v1794_v10  ;;  %v1562_v50 = vsel %vm1554_vm0, %v1541_v36, %v1544_v60  ;;  %v1564_v63 = vsel %vm1556_vm2, %v1547_v29, %v1563_v20  ;;  %v1559_v53 = vsel %vm1557_vm15, %v1547_v29, 2102212464 }
 0x205   : > { %v1566_v51 = vsel %vm1554_vm0, %v1544_v60, %v1547_v29  ;;  %v1567_v18 = vsel %vm1557_vm15, %v1553_v39, 1326507024  ;;  %v1398_v16 = vxor.u32 2147483648, %v1397_v61  ;;  %v1538_v40 = vshrl.u32 %v12182_v4, %v8609_v13 }
 0x206   : > { %v6205_v26 = vmin.u32 %v1796_v33, %v1794_v10  ;;  %vm1555_vm8 = vcmp.lt.s32.totalorder %v8604_v28, 2  ;;  %v1568_v25 = vsel %vm1556_vm2, %v1550_v32, %v1567_v18  ;;  %v1400_v38 = vsub.s32 4, %v8526_v14 }
 0x207   : > { %v1565_v1 = vsel %vm1555_vm8, %v1562_v50, %v1564_v63  ;;  %v1570_v62 = vshll.u32 %v1530_v0, 8  ;;  %v1558_v11 = vsel %vm1554_vm0, %v1538_v40, %v1541_v36  ;;  %v1560_v3 = vsel %vm1556_vm2, %v1544_v60, %v1559_v53 }
 0x208   : > { %v1798_v21 = vclz %v6205_v26  ;;  %v1569_v13 = vsel %vm1555_vm8, %v1566_v51, %v1568_v25  ;;  %vm1316_vm11 = vcmp.lt.s32.totalorder %v12228_v22, 0  ;;  %v8702_v37 = vshrl.u32 %v1950_v55, 5 }
 0x209   : > { %v8699_v44 = vmul.u32.u64.low %v1570_v62, %v1569_v13  ;;  %v8700_v5 = vmul.u32.u64.high %v1570_v62, %v1569_v13, %v8699_v44  ;;  %v1399_v27 = vsel %vm1316_vm11, %v1398_v16, %v1397_v61  ;;  %v8709_v19 = vsub.s32 32, %v8676_v41 }
 0x20a   : > { %v6206_v43 = vadd.s32 4294967294, %v1798_v21  ;;  %v8704_v54 = vmul.u32.u64.low %v1570_v62, %v1565_v1  ;;  %v8705_v24 = vmul.u32.u64.high %v1570_v62, %v1565_v1, %v8704_v54  ;;  %v1401_v34 = vsel %vm1316_vm11, %v1400_v38, %v8526_v14 }
 0x20b   : > { %v1561_v2 = vsel %vm1555_vm8, %v1558_v11, %v1560_v3  ;;  %vm8716_vm3 = vcmp.le.f32.partialorder %v1314_v52, 0.7853982  ;;  %vm1732_vm13 = vcmp.lt.s32.totalorder %v7161_v23, 0  ;;  %v1816_v60 = vsub.s32 4, %v8654_v12 }
 0x20c   : > { %vm6207_vm14 = vcmp.lt.s32.totalorder %v6206_v43, 0  ;;  %v1402_v6 = vsel %vm8716_vm3, %v12228_v22, %v1399_v27  ;;  %v1786_v14 = vadd.s32 %v8583_v46, %v8595_v30  ;;  %v1403_v52 = vsel %vm8716_vm3, 0, %v1401_v34 }
 0x20d   : > { %v1801_v36 = vsel %vm6207_vm14, 0, %v6206_v43  ;;  %v1577_v32 = vmul.u32 %v1570_v62, %v1561_v2  ;;  %vm1579_vm6 = vc.u32 %v8700_v5, %v8704_v54  ;;  %v1580_v7 = vadd.s32 1, %v8705_v24 }
 0x20e   : > { %v1802_v28 = vsub.s32 32, %v1801_v36  ;;  %v1806_v57 = vsub.s32 4294967266, %v1801_v36  ;;  %v1803_v45 = vshll.u32 %v1794_v10, %v1801_v36  ;;  %v1938_v29 = vand.u32 2147483647, %v7165_v48 }
 0x20f   : > { %6724 = vcosq.f32 %v1402_v6  ;;  %v8736_v46 = vsel %vm1732_vm13, %v1816_v60, %v8654_v12  ;;  %v1581_v30 = vsel %vm1579_vm6, %v1580_v7, %v8705_v24  ;;  %v1965_v55 = vshrl.u32 %v12181_v59, %v8709_v19 }
 0x210   : > { %v1804_v58 = vshrl.u32 %v1786_v14, %v1802_v28  ;;  %v1807_v31 = vadd.s32 127, %v1806_v57  ;;  %v1582_v61 = vadd.s32 %v1581_v30, %v1577_v32  ;;  %v1956_v10 = vshrl.u32 %v12187_v8, %v8709_v19 }
 0x211   : > { %v1959_v0 = vshrl.u32 %v12179_v42, %v8709_v19  ;;  %v1962_v33 = vshrl.u32 %v12180_v47, %v8709_v19  ;;  %v1964_v12 = vshll.u32 %v12180_v47, %v8676_v41  ;;  %v1968_v20 = vshrl.u32 %v12191_v17, %v8709_v19 }
 0x212   : > { %v1805_v35 = vor.u32 %v1804_v58, %v1803_v45  ;;  %v1808_v39 = vshll.u32 %v1807_v31, 23  ;;  %v1583_v63 = vadd.s32 536870912, %v1582_v61  ;;  %v1945_v26 = vand.u32 8388607, %v1938_v29 }
 0x213   : > { %v1955_v53 = vshll.u32 %v12182_v4, %v8676_v41  ;;  %v1958_v51 = vshll.u32 %v12187_v8, %v8676_v41  ;;  %v1961_v18 = vshll.u32 %v12179_v42, %v8676_v41  ;;  %v1966_v16 = vor.u32 %v1965_v55, %v1964_v12 }
 0x214   : > { %v1809_v50 = vor.u32 4788187, %v1808_v39  ;;  %v1967_v40 = vshll.u32 %v12181_v59, %v8676_v41  ;;  %6726 = vsinq.f32 %v1402_v6  ;;  %v1812_v38 = vcvt.s32.f32 %v1805_v35 }
 0x215   : > { %v8761_v21 = vshrl.u32 %v1583_v63, 30  ;;  %v1957_v1 = vor.u32 %v1956_v10, %v1955_v53  ;;  %v1960_v62 = vor.u32 %v1959_v0, %v1958_v51  ;;  %v1963_v11 = vor.u32 %v1962_v33, %v1961_v18 }
 0x216   : > { %v1810_v25 = vand.u32 2147483647, %v1809_v50  ;;  %v1969_v3 = vor.u32 %v1968_v20, %v1967_v40  ;;  %vm8765_vm7 = vcmp.le.f32.partialorder %v1730_v15, 0.7853982  ;;  %vm1973_vm1 = vcmp.lt.s32.totalorder %v8702_v37, 4 }
 0x217   : > { %v1585_v44 = vshll.u32 %v8761_v21, 30  ;;  %v1407_v41 = vadd.s32 3, %v1403_v52  ;;  %v1819_v27 = vsel %vm8765_vm7, 0, %v8736_v46  ;;  %v1946_v24 = vor.u32 8388608, %v1945_v26 }
 0x218   : > { %v1813_v43 = vmul.f32 %v1812_v38, %v1810_v25  ;;  %v1979_v34 = vsel %vm1973_vm1, %v1966_v16, 920167782  ;;  %vm1970_vm4 = vcmp.lt.s32.totalorder %v8702_v37, 1  ;;  %vm1972_vm12 = vcmp.lt.s32.totalorder %v8702_v37, 3 }
 0x219   : > { %v8776_v9 = vsub.s32 %v1582_v61, %v1585_v44  ;;  %v6725_v15 = vpop.eup %6724  ;;  %v1978_v36 = vsel %vm1970_vm4, %v1957_v1, %v1960_v62  ;;  %v1980_v60 = vsel %vm1972_vm12, %v1963_v11, %v1979_v34  ;;  %v1982_v6 = vsel %vm1970_vm4, %v1960_v62, %v1963_v11 }
 0x21a   : > { %v1814_v2 = vxor.u32 2147483648, %v1813_v43  ;;  %v1983_v14 = vsel %vm1973_vm1, %v1969_v3, 1326507024  ;;  %v1954_v52 = vshrl.u32 %v12182_v4, %v8709_v19  ;;  %vm1971_vm5 = vcmp.lt.s32.totalorder %v8702_v37, 2 }
 0x21b   : > { %v1588_v57 = vsub.s32 0, %v8776_v9  ;;  %v1975_v7 = vsel %vm1973_vm1, %v1963_v11, 2102212464  ;;  %v1984_v45 = vsel %vm1972_vm12, %v1966_v16, %v1983_v14  ;;  %v1986_v58 = vshll.u32 %v1946_v24, 8 }
 0x21c   : > { %v1815_v28 = vsel %vm1732_vm13, %v1814_v2, %v1813_v43  ;;  %v1981_v46 = vsel %vm1971_vm5, %v1978_v36, %v1980_v60  ;;  %v1985_v19 = vsel %vm1971_vm5, %v1982_v6, %v1984_v45  ;;  %v1974_v61 = vsel %vm1970_vm4, %v1954_v52, %v1957_v1 }
 0x21d   : > { %v1818_v32 = vsel %vm8765_vm7, %v7161_v23, %v1815_v28  ;;  %v6197_v31 = vmin.u32 %v1588_v57, %v8776_v9  ;;  %v8806_v30 = vmul.u32.u64.low %v1986_v58, %v1985_v19  ;;  %v8807_v55 = vmul.u32.u64.high %v1986_v58, %v1985_v19, %v8806_v30 }
 0x21e   : > { %6728 = vcosq.f32 %v1818_v32  ;;  %v6727_v35 = vpop.eup %6726  ;;  %v1976_v10 = vsel %vm1972_vm12, %v1960_v62, %v1975_v7  ;;  %v1823_v0 = vadd.s32 3, %v1819_v27  ;;  %v1408_v20 = vand.u32 3, %v1407_v41 }
 0x21f   : > { %6730 = vsinq.f32 %v1818_v32  ;;  %v1590_v39 = vclz %v6197_v31  ;;  %v8813_v33 = vmul.u32.u64.low %v1986_v58, %v1981_v46  ;;  %v8814_v12 = vmul.u32.u64.high %v1986_v58, %v1981_v46, %v8813_v33 }
 0x220   : > { %v12061_v63 = vmov 0.0   ;;  %v1411_v26 = vxor.u32 2147483648, %v6727_v35  ;;  %v1414_v53 = vxor.u32 2147483648, %v6725_v15  ;;  %v1977_v51 = vsel %vm1971_vm5, %v1974_v61, %v1976_v10  ;;  %v8849_v61 = vld [vmem:[%s12017_s3 + $0x10] sm:$0xff] }
 0x221   : > { %v6198_v50 = vadd.s32 4294967294, %v1590_v39  ;;  %2251 = vmatprep.mubr.f32.mxu0 %v12061_v63  ;;  %2340 = vmatprep.mubr.f32.mxu1 %v12061_v63  ;;  %vm1995_vm10 = vc.u32 %v8807_v55, %v8813_v33  ;;  %v1824_v18 = vand.u32 3, %v1823_v0  ;;  %v1996_v40 = vadd.s32 1, %v8814_v12 }
 0x222   : > { %vm1410_vm15 = vcmp.eq.s32.totalorder %v1408_v20, 0  ;;  %vm1413_vm0 = vcmp.eq.s32.totalorder %v1408_v20, 2  ;;  %v1993_v38 = vmul.u32 %v1986_v58, %v1977_v51  ;;  %vm1409_vm2 = vcmp.lt.s32.totalorder %v1408_v20, 2 }
 0x223   : > { %vm6199_vm9 = vcmp.lt.s32.totalorder %v6198_v50, 0  ;;  %v1412_v1 = vsel %vm1410_vm15, %v6725_v15, %v1411_v26  ;;  %v1415_v62 = vsel %vm1413_vm0, %v1414_v53, %v6727_v35  ;;  %v1997_v11 = vsel %vm1995_vm10, %v1996_v40, %v8814_v12  ;;  %v8860_v26 = vld [vmem:[%s12017_s3 + $0x18] sm:$0xff] }
 0x224   : > { %v1593_v16 = vsel %vm6199_vm9, 0, %v6198_v50  ;;  %v1998_v43 = vadd.s32 %v1997_v11, %v1993_v38  ;;  %vm1829_vm8 = vcmp.eq.s32.totalorder %v1824_v18, 2  ;;  %v1578_v27 = vadd.s32 %v8704_v54, %v8700_v5 }
 0x225   : > { %v1598_v25 = vsub.s32 4294967266, %v1593_v16  ;;  %v1594_v13 = vsub.s32 32, %v1593_v16  ;;  %v1416_v24 = vsel %vm1409_vm2, %v1412_v1, %v1415_v62  ;;  %vm1406_vm11 = vweird.f32 %v12228_v22  ;;  %v8833_v22 = vld [vmem:[%s12017_s3] sm:$0xff] }
 0x226   : > { %v1999_v36 = vadd.s32 536870912, %v1998_v43  ;;  %vm1826_vm14 = vcmp.eq.s32.totalorder %v1824_v18, 0  ;;  %vm1825_vm3 = vcmp.lt.s32.totalorder %v1824_v18, 2  ;;  %v1417_v28 = vsel %vm1406_vm11, nan, %v1416_v24 }
 0x227   : > { %v1599_v37 = vadd.s32 127, %v1598_v25  ;;  %v1596_v6 = vshrl.u32 %v1578_v27, %v1594_v13  ;;  %vm1822_vm13 = vweird.f32 %v7161_v23  ;;  %v1595_v32 = vshll.u32 %v8776_v9, %v1593_v16  ;;  %v8841_v9 = vld [vmem:[%s12017_s3 + $0x8] sm:$0xff] }
 0x228   : > { %v6729_v3 = vpop.eup %6728  ;;  %v2000_v14 = vshrl.u32 %v1999_v36, 30  ;;  %vm12101_vm6 = vcmask 261120   ;;  %v1994_v12 = vadd.s32 %v8813_v33, %v8807_v55  ;;  %vm1524_vm1 = vcmp.lt.s32.totalorder %v12231_v56, 0 }
 0x229   : > { %v6731_v44 = vpop.eup %6730  ;;  %v1830_v41 = vxor.u32 2147483648, %v6729_v3  ;;  %v1600_v2 = vshll.u32 %v1599_v37, 23  ;;  %v1597_v45 = vor.u32 %v1596_v6, %v1595_v32  ;;  %vm8866_vm4 = vcmp.le.f32.partialorder %v1522_v49, 0.7853982 }
 0x22a   : > { %v1827_v34 = vxor.u32 2147483648, %v6731_v44  ;;  %v2001_v54 = vshll.u32 %v2000_v14, 30  ;;  %v1608_v1 = vsub.s32 4, %v8761_v21  ;;  %vm1940_vm12 = vcmp.lt.s32.totalorder %v7165_v48, 0 }
 0x22b   : > { %v1831_v15 = vsel %vm1829_vm8, %v1830_v41, %v6731_v44  ;;  %v1601_v5 = vor.u32 4788187, %v1600_v2  ;;  %v1604_v19 = vcvt.s32.f32 %v1597_v45  ;;  %vm1939_vm5 = vcmp.le.f32.partialorder %v1938_v29, 0.7853982 }
 0x22c   : > { %v1828_v60 = vsel %vm1826_vm14, %v6729_v3, %v1827_v34  ;;  %v2002_v58 = vsub.s32 %v1998_v43, %v2001_v54  ;;  %v2024_v3 = vsub.s32 4, %v2000_v14  ;;  %v1609_v13 = vsel %vm1524_vm1, %v1608_v1, %v8761_v21 }
 0x22d   : > { %v1832_v57 = vsel %vm1825_vm3, %v1828_v60, %v1831_v15  ;;  %v1602_v31 = vand.u32 2147483647, %v1601_v5  ;;  %v1611_v43 = vsel %vm8866_vm4, 0, %v1609_v13  ;;  %vm1614_vm11 = vweird.f32 %v12231_v56 }
 0x22e   : > { %v1833_v52 = vsel %vm1822_vm13, nan, %v1832_v57  ;;  %v2004_v46 = vsub.s32 0, %v2002_v58  ;;  %v2025_v41 = vsel %vm1940_vm12, %v2024_v3, %v2000_v14  ;;  %v1615_v24 = vadd.s32 3, %v1611_v43 }
 0x22f   : > { %v6386_v7 = vpack.c.bf16 %v1833_v52, %v1417_v28  ;;  %v1605_v30 = vmul.f32 %v1604_v19, %v1602_v31  ;;  %v2027_v34 = vsel %vm1939_vm5, 0, %v2025_v41  ;;  %vm2030_vm14 = vweird.f32 %v7165_v48 }
 0x230   : > { %v6213_v23 = vmin.u32 %v2004_v46, %v2002_v58  ;;  %v2031_v21 = vadd.s32 3, %v2027_v34  ;;  %v1616_v15 = vand.u32 3, %v1615_v24 }
 0x231   : > { %6387 = vmatpush1.bf16.msra.mxu0 %v6386_v7  ;;  %v1606_v10 = vxor.u32 2147483648, %v1605_v30 }
 0x232   : > { %v2006_v35 = vclz %v6213_v23  ;;  %v2032_v28 = vand.u32 3, %v2031_v21  ;;  %vm1618_vm9 = vcmp.eq.s32.totalorder %v1616_v15, 0  ;;  %vm1621_vm10 = vcmp.eq.s32.totalorder %v1616_v15, 2 }
 0x233   : > { %v1607_v53 = vsel %vm1524_vm1, %v1606_v10, %v1605_v30  ;;  %vm1617_vm15 = vcmp.lt.s32.totalorder %v1616_v15, 2 }
 0x234   : > { %6220 = vmatmul.mubr.msk.f32.vlgmr.msra.gmra.mrb[0].mxu0 %vm12101_vm6, %v8833_v22  ;;  %v6214_v39 = vadd.s32 4294967294, %v2006_v35  ;;  %v1610_v25 = vsel %vm8866_vm4, %v12231_v56, %v1607_v53  ;;  %vm2037_vm0 = vcmp.eq.s32.totalorder %v2032_v28, 2  ;;  %vm2034_vm2 = vcmp.eq.s32.totalorder %v2032_v28, 0 }
 0x235   : > { %2257 = vmatprep.mubr.f32.mxu0 %v12061_v63  ;;  %6732 = vcosq.f32 %v1610_v25  ;;  %vm2033_vm8 = vcmp.lt.s32.totalorder %v2032_v28, 2 }
 0x236   : > { %vm6215_vm7 = vcmp.lt.s32.totalorder %v6214_v39, 0  ;;  %6734 = vsinq.f32 %v1610_v25 }
 0x237   : > { %v2009_v0 = vsel %vm6215_vm7, 0, %v6214_v39 }
 0x238   : > { %6221 = vmatmul.mubr.msk.f32.gmra.mrb[2].mxu0 %vm12101_vm6, %v8841_v9  ;;  %v2010_v20 = vsub.s32 32, %v2009_v0  ;;  %v2014_v50 = vsub.s32 4294967266, %v2009_v0  ;;  %v2011_v51 = vshll.u32 %v2002_v58, %v2009_v0 }
 0x239   : > { %2263 = vmatprep.mubr.f32.mxu0 %v12061_v63 }
 0x23a   : > { %v2012_v18 = vshrl.u32 %v1994_v12, %v2010_v20  ;;  %v2015_v55 = vadd.s32 127, %v2014_v50 }
 0x23c   : > { %6222 = vmatmul.mubr.msk.f32.gmra.mrb[4].mxu0 %vm12101_vm6, %v8849_v61  ;;  %v2013_v16 = vor.u32 %v2012_v18, %v2011_v51  ;;  %v2016_v40 = vshll.u32 %v2015_v55, 23 }
 0x23d   : > { %2269 = vmatprep.mubr.f32.mxu0 %v12061_v63 }
 0x23e   : > { %v2017_v38 = vor.u32 4788187, %v2016_v40  ;;  %v2020_v49 = vcvt.s32.f32 %v2013_v16 }
 0x23f   : > { %v6733_v2 = vpop.eup %6732 }
 0x240   : > { %6223 = vmatmul.mubr.msk.f32.gmra.mrb[6].mxu0 %vm12101_vm6, %v8860_v26  ;;  %v2018_v62 = vand.u32 2147483647, %v2017_v38  ;;  %v6735_v36 = vpop.eup %6734  ;;  %v1622_v6 = vxor.u32 2147483648, %v6733_v2 }
 0x241   : > { %4135 = vmatprep.mubr.f32.mxu0 %v12061_v63  ;;  %v1619_v60 = vxor.u32 2147483648, %v6735_v36 }
 0x242   : > { %v2021_v11 = vmul.f32 %v2020_v49, %v2018_v62  ;;  %v1623_v29 = vsel %vm1621_vm10, %v1622_v6, %v6735_v36 }
 0x243   : > { %v1620_v52 = vsel %vm1618_vm9, %v6733_v2, %v1619_v60 }
 0x244   : > { %v2022_v37 = vxor.u32 2147483648, %v2021_v11  ;;  %v1624_v54 = vsel %vm1617_vm15, %v1620_v52, %v1623_v29 }
 0x245   : > { %v1625_v31 = vsel %vm1614_vm11, nan, %v1624_v54 }
 0x246   : > { %v2023_v44 = vsel %vm1940_vm12, %v2022_v37, %v2021_v11 }
 0x247   : > { %v2026_v27 = vsel %vm1939_vm5, %v7165_v48, %v2023_v44 }
 0x248   : > { %6736 = vcosq.f32 %v2026_v27 }
 0x249   : > { %6738 = vsinq.f32 %v2026_v27 }
 0x252   : > { %v6737_v57 = vpop.eup %6736 }
 0x253   : > { %v6739_v32 = vpop.eup %6738  ;;  %v2038_v14 = vxor.u32 2147483648, %v6737_v57 }
 0x254   : > { %v2035_v5 = vxor.u32 2147483648, %v6739_v32 }
 0x255   : > { %v2039_v7 = vsel %vm2037_vm0, %v2038_v14, %v6739_v32 }
 0x256   : > { %v2036_v45 = vsel %vm2034_vm2, %v6737_v57, %v2035_v5 }
 0x257   : > { %v2040_v58 = vsel %vm2033_vm8, %v2036_v45, %v2039_v7 }
 0x258   : > { %v2041_v46 = vsel %vm2030_vm14, nan, %v2040_v58 }
 0x259   : > { %v6394_v19 = vpack.c.bf16 %v2041_v46, %v1625_v31 }
 0x25b   : > { %6395 = vmatpush1.bf16.msra.mxu1 %v6394_v19 }
 0x25e   : > { %6224 = vmatmul.mubr.msk.f32.vlgmr.msra.gmra.mrb[0].mxu1 %vm12101_vm6, %v8833_v22 }
 0x25f   : > { %2346 = vmatprep.mubr.f32.mxu1 %v12061_v63 }
 0x262   : > { %6225 = vmatmul.mubr.msk.f32.gmra.mrb[2].mxu1 %vm12101_vm6, %v8841_v9 }
 0x263   : > { %2352 = vmatprep.mubr.f32.mxu1 %v12061_v63 }
 0x264   : > { %v8900_v48 = vpop.permute.xlu1 %2156 }
 0x266   : > { %6226 = vmatmul.mubr.msk.f32.gmra.mrb[4].mxu1 %vm12101_vm6, %v8849_v61  ;;  %v8910_v39 = vpop.permute.xlu0 %2161 }
 0x267   : > { %2358 = vmatprep.mubr.f32.mxu1 %v12061_v63 }
 0x26a   : > { %6227 = vmatmul.mubr.msk.f32.gmra.mrb[6].mxu1 %vm12101_vm6, %v8860_v26 }
 0x26b   : > { %4224 = vmatprep.mubr.f32.mxu1 %v12061_v63 }
 0x307   : > { %v2253_v56 = vpop.f32.mrb[0].mxu0 }
 0x308   : > { %v8903_v22 = vadd.f32 %v2253_v56, %v8900_v48  ;;  %v2255_v23 = vpop.f32.mrb[1].mxu0 }
 0x309   : > { %v8906_v9 = vadd.f32 %v2255_v23, %v8900_v48 }
 0x30a   : > { %12238 = vst [vmem:[#allocation11_spill] sm:$0xff] %v8903_v22  ;;  %v12067_v30 = vand.u32 2147483647, %v8903_v22  ;;  %v2368_v35 = vand.u32 2139095040, %v8903_v22 }
 0x30b   : > { %v12066_v61 = vand.u32 2147483647, %v8906_v9  ;;  %v2472_v10 = vand.u32 2139095040, %v8906_v9  ;;  %v2259_v0 = vpop.f32.mrb[2].mxu0 }
 0x30c   : > { %v2369_v12 = vshrl.u32 %v2368_v35, 23  ;;  %v8915_v20 = vadd.f32 %v2259_v0, %v8910_v39  ;;  %v8917_v50 = vpop.f32.mrb[3].mxu0  ;;  %v2372_v26 = vand.u32 8388607, %v12067_v30 }
 0x30d   : > { %v2473_v53 = vshrl.u32 %v2472_v10, 23  ;;  %v2476_v51 = vand.u32 8388607, %v12066_v61 }
 0x30e   : > { %12239 = vst [vmem:[#allocation13_spill] sm:$0xff] %v8915_v20  ;;  %v6228_v18 = vadd.s32 4294967169, %v2369_v12  ;;  %v2784_v33 = vand.u32 2139095040, %v8915_v20  ;;  %v2373_v40 = vor.u32 8388608, %v2372_v26 }
 0x30f   : > { %v6232_v55 = vadd.s32 4294967169, %v2473_v53  ;;  %v2477_v25 = vor.u32 8388608, %v2476_v51  ;;  %v8945_v10 = vpop.f32.mrb[4].mxu0 }
 0x310   : > { %v2375_v16 = vadd.s32 1, %v6228_v18  ;;  %v2785_v1 = vshrl.u32 %v2784_v33, 23  ;;  %v8924_v13 = vshll.u32 %v2373_v40, 8 }
 0x311   : > { %v2479_v38 = vadd.s32 1, %v6232_v55  ;;  %v8926_v37 = vshll.u32 %v2477_v25, 8 }
 0x312   : > { %vm2376_vm3 = vcmp.gt.s32.totalorder %v2375_v16, 0  ;;  %v6244_v43 = vadd.s32 4294967169, %v2785_v1 }
 0x313   : > { %v2377_v62 = vsel %vm2376_vm3, %v2375_v16, 0  ;;  %vm2480_vm13 = vcmp.gt.s32.totalorder %v2479_v38, 0 }
 0x314   : > { %v2378_v49 = vshrl.u32 %v2377_v62, 5  ;;  %v2379_v11 = vand.u32 31, %v2377_v62  ;;  %v2481_v3 = vsel %vm2480_vm13, %v2479_v38, 0 }
 0x315   : > { %v8929_v27 = vshrl.u32 %v2481_v3, 5  ;;  %v2483_v24 = vand.u32 31, %v2481_v3 }
 0x316   : > { %v2380_v44 = vsub.s32 32, %v2379_v11  ;;  %v2382_v41 = vshll.u32 %v12182_v4, %v2379_v11  ;;  %v2385_v34 = vshll.u32 %v12187_v8, %v2379_v11  ;;  %v2388_v2 = vshll.u32 %v12179_v42, %v2379_v11 }
 0x317   : > { %v2391_v36 = vshll.u32 %v12180_v47, %v2379_v11  ;;  %v2394_v21 = vshll.u32 %v12181_v59, %v2379_v11  ;;  %vm2397_vm7 = vcmp.lt.s32.totalorder %v2378_v49, 1  ;;  %vm2398_vm1 = vcmp.lt.s32.totalorder %v2378_v49, 2 }
 0x318   : > { %v2383_v15 = vshrl.u32 %v12187_v8, %v2380_v44  ;;  %v2386_v60 = vshrl.u32 %v12179_v42, %v2380_v44  ;;  %v2389_v6 = vshrl.u32 %v12180_v47, %v2380_v44  ;;  %v2381_v28 = vshrl.u32 %v12182_v4, %v2380_v44 }
 0x319   : > { %v2392_v57 = vshrl.u32 %v12181_v59, %v2380_v44  ;;  %v2395_v52 = vshrl.u32 %v12191_v17, %v2380_v44  ;;  %v2484_v5 = vsub.s32 32, %v2483_v24  ;;  %vm2399_vm4 = vcmp.lt.s32.totalorder %v2378_v49, 3 }
 0x31a   : > { %v2384_v29 = vor.u32 %v2383_v15, %v2382_v41  ;;  %v2387_v32 = vor.u32 %v2386_v60, %v2385_v34  ;;  %v2390_v14 = vor.u32 %v2389_v6, %v2388_v2  ;;  %vm2400_vm12 = vcmp.lt.s32.totalorder %v2378_v49, 4 }
 0x31b   : > { %v2393_v54 = vor.u32 %v2392_v57, %v2391_v36  ;;  %v2396_v7 = vor.u32 %v2395_v52, %v2394_v21  ;;  %v2486_v35 = vshll.u32 %v12182_v4, %v2483_v24  ;;  %v2487_v26 = vshrl.u32 %v12187_v8, %v2484_v5 }
 0x31c   : > { %v2401_v45 = vsel %vm2397_vm7, %v2381_v28, %v2384_v29  ;;  %v2402_v58 = vsel %vm2400_vm12, %v2390_v14, 2102212464  ;;  %v2405_v31 = vsel %vm2397_vm7, %v2384_v29, %v2387_v32  ;;  %v2409_v46 = vsel %vm2397_vm7, %v2387_v32, %v2390_v14 }
 0x31d   : > { %v2403_v19 = vsel %vm2399_vm4, %v2387_v32, %v2402_v58  ;;  %v2406_v56 = vsel %vm2400_vm12, %v2393_v54, 920167782  ;;  %v2410_v23 = vsel %vm2400_vm12, %v2396_v7, 1326507024  ;;  %v2489_v53 = vshll.u32 %v12187_v8, %v2483_v24 }
 0x31e   : > { %v2407_v0 = vsel %vm2399_vm4, %v2390_v14, %v2406_v56  ;;  %v2411_v12 = vsel %vm2399_vm4, %v2393_v54, %v2410_v23  ;;  %v2404_v51 = vsel %vm2398_vm1, %v2401_v45, %v2403_v19  ;;  %v2490_v33 = vshrl.u32 %v12179_v42, %v2484_v5 }
 0x31f   : > { %v2408_v18 = vsel %vm2398_vm1, %v2405_v31, %v2407_v0  ;;  %v2412_v55 = vsel %vm2398_vm1, %v2409_v46, %v2411_v12  ;;  %v2488_v1 = vor.u32 %v2487_v26, %v2486_v35  ;;  %v2492_v11 = vshll.u32 %v12179_v42, %v2483_v24 }
 0x320   : > { %v8954_v16 = vmul.u32.u64.low %v8924_v13, %v2412_v55  ;;  %v8955_v40 = vmul.u32.u64.high %v8924_v13, %v2412_v55, %v8954_v16  ;;  %v8958_v25 = vmul.u32.u64.low %v8924_v13, %v2408_v18  ;;  %v8959_v38 = vmul.u32.u64.high %v8924_v13, %v2408_v18, %v8958_v25 }
 0x321   : > { %v2491_v62 = vor.u32 %v2490_v33, %v2489_v53  ;;  %v2493_v3 = vshrl.u32 %v12180_v47, %v2484_v5  ;;  %v2495_v49 = vshll.u32 %v12180_v47, %v2483_v24  ;;  %v2496_v44 = vshrl.u32 %v12181_v59, %v2484_v5 }
 0x322   : > { %v2499_v41 = vshrl.u32 %v12191_v17, %v2484_v5  ;;  %v2791_v34 = vadd.s32 1, %v6244_v43  ;;  %v2420_v2 = vmul.u32 %v8924_v13, %v2404_v51  ;;  %v2485_v36 = vshrl.u32 %v12182_v4, %v2484_v5 }
 0x323   : > { %v2494_v21 = vor.u32 %v2493_v3, %v2492_v11  ;;  %v2498_v15 = vshll.u32 %v12181_v59, %v2483_v24  ;;  %vm2422_vm5 = vc.u32 %v8955_v40, %v8958_v25  ;;  %v2423_v60 = vadd.s32 1, %v8959_v38 }
 0x324   : > { %v2497_v6 = vor.u32 %v2496_v44, %v2495_v49  ;;  %vm2501_vm9 = vcmp.lt.s32.totalorder %v8929_v27, 1  ;;  %vm2503_vm10 = vcmp.lt.s32.totalorder %v8929_v27, 3  ;;  %vm2504_vm15 = vcmp.lt.s32.totalorder %v8929_v27, 4 }
 0x325   : > { %v2500_v28 = vor.u32 %v2499_v41, %v2498_v15  ;;  %v2509_v43 = vsel %vm2501_vm9, %v2488_v1, %v2491_v62  ;;  %v2424_v13 = vsel %vm2422_vm5, %v2423_v60, %v8959_v38  ;;  %v2506_v57 = vsel %vm2504_vm15, %v2494_v21, 2102212464 }
 0x326   : > { %v2510_v52 = vsel %vm2504_vm15, %v2497_v6, 920167782  ;;  %v2513_v29 = vsel %vm2501_vm9, %v2491_v62, %v2494_v21  ;;  %v2425_v24 = vadd.s32 %v2424_v13, %v2420_v2  ;;  %vm2502_vm0 = vcmp.lt.s32.totalorder %v8929_v27, 2 }
 0x327   : > { %v2511_v32 = vsel %vm2503_vm10, %v2494_v21, %v2510_v52  ;;  %v2514_v14 = vsel %vm2504_vm15, %v2500_v28, 1326507024  ;;  %v2505_v5 = vsel %vm2501_vm9, %v2485_v36, %v2488_v1  ;;  %v2507_v54 = vsel %vm2503_vm10, %v2491_v62, %v2506_v57 }
 0x328   : > { %v2512_v7 = vsel %vm2502_vm0, %v2509_v43, %v2511_v32  ;;  %v2515_v45 = vsel %vm2503_vm10, %v2497_v6, %v2514_v14  ;;  %v2426_v58 = vadd.s32 536870912, %v2425_v24  ;;  %v2508_v0 = vsel %vm2502_vm0, %v2505_v5, %v2507_v54 }
 0x329   : > { %v2516_v31 = vsel %vm2502_vm0, %v2513_v29, %v2515_v45  ;;  %v8979_v46 = vmul.u32.u64.low %v8926_v37, %v2512_v7  ;;  %v8980_v19 = vmul.u32.u64.high %v8926_v37, %v2512_v7, %v8979_v46  ;;  %vm2792_vm2 = vcmp.gt.s32.totalorder %v2791_v34, 0 }
 0x32a   : > { %v8983_v56 = vmul.u32.u64.low %v8926_v37, %v2516_v31  ;;  %v8984_v23 = vmul.u32.u64.high %v8926_v37, %v2516_v31, %v8983_v56  ;;  %v8986_v35 = vshrl.u32 %v2426_v58, 30  ;;  %v12063_v27 = vand.u32 2147483647, %v8915_v20 }
 0x32b   : > { %v2527_v26 = vadd.s32 1, %v8980_v19  ;;  %v2524_v53 = vmul.u32 %v8926_v37, %v2508_v0  ;;  %v2793_v51 = vsel %vm2792_vm2, %v2791_v34, 0  ;;  %v8995_v18 = vadd.f32 %v8917_v50, %v8910_v39 }
 0x32c   : > { %v2428_v12 = vshll.u32 %v8986_v35, 30  ;;  %vm2526_vm8 = vc.u32 %v8984_v23, %v8979_v46  ;;  %v2788_v38 = vand.u32 8388607, %v12063_v27  ;;  %v2795_v62 = vand.u32 31, %v2793_v51 }
 0x32d   : > { %v2528_v33 = vsel %vm2526_vm8, %v2527_v26, %v8980_v19  ;;  %v2888_v37 = vand.u32 2139095040, %v8995_v18  ;;  %v2421_v43 = vadd.s32 %v8958_v25, %v8955_v40  ;;  %v9018_v57 = vshrl.u32 %v2793_v51, 5 }
 0x32e   : > { %v8997_v55 = vsub.s32 %v2425_v24, %v2428_v12  ;;  %v2529_v16 = vadd.s32 %v2528_v33, %v2524_v53  ;;  %v2789_v50 = vor.u32 8388608, %v2788_v38  ;;  %v2796_v34 = vsub.s32 32, %v2795_v62 }
 0x32f   : > { %v2889_v15 = vshrl.u32 %v2888_v37, 23  ;;  %v9034_v7 = vadd.s32 %v8979_v46, %v8984_v23  ;;  %v2798_v45 = vshll.u32 %v12182_v4, %v2795_v62  ;;  %v2801_v12 = vshll.u32 %v12187_v8, %v2795_v62 }
 0x330   : > { %v2431_v1 = vsub.s32 0, %v8997_v55  ;;  %v2530_v11 = vadd.s32 536870912, %v2529_v16  ;;  %v9020_v52 = vshll.u32 %v2789_v50, 8  ;;  %v2799_v32 = vshrl.u32 %v12187_v8, %v2796_v34 }
 0x331   : > { %v2342_v41 = vpop.f32.mrb[0].mxu1  ;;  %v2802_v40 = vshrl.u32 %v12179_v42, %v2796_v34  ;;  %v9030_v25 = vadd.s32 4294967169, %v2889_v15  ;;  %v2805_v58 = vshrl.u32 %v12180_v47, %v2796_v34  ;;  %v2797_v53 = vshrl.u32 %v12182_v4, %v2796_v34 }
 0x332   : > { %v6229_v3 = vmin.u32 %v2431_v1, %v8997_v55  ;;  %v9005_v49 = vshrl.u32 %v2530_v11, 30  ;;  %v9008_v2 = vadd.f32 %v2342_v41, %v8900_v48  ;;  %v2344_v21 = vpop.f32.mrb[1].mxu1  ;;  %v9045_v51 = vor.u32 %v2799_v32, %v2798_v45 }
 0x333   : > { %v9012_v6 = vadd.f32 %v2344_v21, %v8900_v48  ;;  %v2804_v46 = vshll.u32 %v12179_v42, %v2795_v62  ;;  %v2807_v38 = vshll.u32 %v12180_v47, %v2795_v62  ;;  %v2808_v1 = vshrl.u32 %v12181_v59, %v2796_v34 }
 0x334   : > { %12240 = vst [vmem:[#allocation6_spill] sm:$0xff] %v9005_v49  ;;  %v2433_v44 = vclz %v6229_v3  ;;  %12241 = vst [vmem:[#allocation18_spill] sm:$0xff] %v9008_v2  ;;  %v2532_v36 = vshll.u32 %v9005_v49, 30  ;;  %v2576_v13 = vand.u32 2139095040, %v9008_v2  ;;  %v12065_v54 = vand.u32 2147483647, %v9008_v2 }
 0x335   : > { %v2680_v24 = vand.u32 2139095040, %v9012_v6  ;;  %v9026_v48 = vpop.f32.mrb[2].mxu1  ;;  %v9057_v3 = vor.u32 %v2805_v58, %v2804_v46  ;;  %v9060_v50 = vshll.u32 %v12181_v59, %v2795_v62  ;;  %v12064_v41 = vand.u32 2147483647, %v9012_v6 }
 0x336   : > { %v6230_v60 = vadd.s32 4294967294, %v2433_v44  ;;  %v9022_v29 = vsub.s32 %v2529_v16, %v2532_v36  ;;  %v2577_v5 = vshrl.u32 %v2576_v13, 23  ;;  %v9038_v31 = vpop.f32.mrb[3].mxu1  ;;  %v9050_v16 = vor.u32 %v2802_v40, %v2801_v12 }
 0x337   : > { %v2681_v0 = vshrl.u32 %v2680_v24, 23  ;;  %v2580_v37 = vand.u32 8388607, %v12065_v54  ;;  %vm2813_vm3 = vcmp.lt.s32.totalorder %v9018_v57, 1  ;;  %v9069_v24 = vor.u32 %v2808_v1, %v2807_v38 }
 0x338   : > { %vm6231_vm11 = vcmp.lt.s32.totalorder %v6230_v60, 0  ;;  %v6236_v56 = vadd.s32 4294967169, %v2577_v5  ;;  %v2535_v26 = vsub.s32 0, %v9022_v29  ;;  %vm2816_vm13 = vcmp.lt.s32.totalorder %v9018_v57, 4 }
 0x339   : > { %v9040_v19 = vsel %vm6231_vm11, 0, %v6230_v60  ;;  %v9048_v23 = vpop.f32.mrb[4].mxu1  ;;  %v6240_v36 = vadd.s32 4294967169, %v2681_v0  ;;  %v9066_v60 = vshrl.u32 %v12191_v17, %v2796_v34  ;;  %v9075_v62 = vsel %vm2813_vm3, %v2797_v53, %v9045_v51 }
 0x33a   : > { %v2583_v33 = vadd.s32 1, %v6236_v56  ;;  %v2437_v11 = vsub.s32 32, %v9040_v19  ;;  %v2441_v44 = vsub.s32 4294967266, %v9040_v19  ;;  %v6233_v15 = vmin.u32 %v2535_v26, %v9022_v29 }
 0x33b   : > { %v2438_v32 = vshll.u32 %v8997_v55, %v9040_v19  ;;  %v2581_v40 = vor.u32 8388608, %v2580_v37  ;;  %v2818_v34 = vsel %vm2816_vm13, %v9057_v3, 2102212464  ;;  %v9086_v56 = vand.u32 8388607, %v12064_v41 }
 0x33c   : > { %vm2584_vm14 = vcmp.gt.s32.totalorder %v2583_v33, 0  ;;  %v2439_v5 = vshrl.u32 %v2421_v43, %v2437_v11  ;;  %v9082_v45 = vadd.s32 127, %v2441_v44  ;;  %v2687_v0 = vadd.s32 1, %v6240_v36  ;;  %v9090_v43 = vpop.f32.mrb[5].mxu0 }
 0x33d   : > { %v2585_v21 = vsel %vm2584_vm14, %v2583_v33, 0  ;;  %v2537_v55 = vclz %v6233_v15  ;;  %12242 = vst [vmem:[#allocation17_spill] sm:$0xff] %v9090_v43  ;;  %vm2815_vm7 = vcmp.lt.s32.totalorder %v9018_v57, 3  ;;  %v2621_v61 = vshll.u32 %v2581_v40, 8 }
 0x33e   : > { %v2587_v13 = vand.u32 31, %v2585_v21  ;;  %v2586_v12 = vshrl.u32 %v2585_v21, 5  ;;  %vm2688_vm1 = vcmp.gt.s32.totalorder %v2687_v0, 0  ;;  %v2443_v40 = vshll.u32 %v9082_v45, 23 }
 0x33f   : > { %v6234_v14 = vadd.s32 4294967294, %v2537_v55  ;;  %vm2814_vm15 = vcmp.lt.s32.totalorder %v9018_v57, 2 }
 0x340   : > { %v2588_v58 = vsub.s32 32, %v2587_v13  ;;  %v2590_v26 = vshll.u32 %v12182_v4, %v2587_v13  ;;  %v2593_v53 = vshll.u32 %v12187_v8, %v2587_v13  ;;  %v2596_v33 = vshll.u32 %v12179_v42, %v2587_v13 }
 0x341   : > { %v2599_v1 = vshll.u32 %v12180_v47, %v2587_v13  ;;  %v2602_v37 = vshll.u32 %v12181_v59, %v2587_v13  ;;  %vm2605_vm4 = vcmp.lt.s32.totalorder %v2586_v12, 1  ;;  %vm2608_vm12 = vcmp.lt.s32.totalorder %v2586_v12, 4 }
 0x342   : > { %v2591_v19 = vshrl.u32 %v12187_v8, %v2588_v58  ;;  %v2594_v46 = vshrl.u32 %v12179_v42, %v2588_v58  ;;  %v2597_v38 = vshrl.u32 %v12180_v47, %v2588_v58  ;;  %v2600_v11 = vshrl.u32 %v12181_v59, %v2588_v58 }
 0x343   : > { %v2603_v44 = vshrl.u32 %v12191_v17, %v2588_v58  ;;  %v2589_v28 = vshrl.u32 %v12182_v4, %v2588_v58  ;;  %vm2607_vm5 = vcmp.lt.s32.totalorder %v2586_v12, 3  ;;  %vm2606_vm9 = vcmp.lt.s32.totalorder %v2586_v12, 2 }
 0x344   : > { %v2592_v36 = vor.u32 %v2591_v19, %v2590_v26  ;;  %v2595_v21 = vor.u32 %v2594_v46, %v2593_v53  ;;  %v2598_v15 = vor.u32 %v2597_v38, %v2596_v33  ;;  %v2601_v63 = vor.u32 %v2600_v11, %v2599_v1 }
 0x345   : > { %v2604_v27 = vor.u32 %v2603_v44, %v2602_v37  ;;  %v2689_v26 = vsel %vm2688_vm1, %v2687_v0, 0  ;;  %vm6235_vm10 = vcmp.lt.s32.totalorder %v6234_v14, 0  ;;  %v2685_v0 = vor.u32 8388608, %v9086_v56 }
 0x346   : > { %v2610_v41 = vsel %vm2608_vm12, %v2598_v15, 2102212464  ;;  %v2613_v54 = vsel %vm2605_vm4, %v2592_v36, %v2595_v21  ;;  %v2614_v30 = vsel %vm2608_vm12, %v2601_v63, 920167782  ;;  %v2617_v49 = vsel %vm2605_vm4, %v2595_v21, %v2598_v15 }
 0x347   : > { %v2615_v13 = vsel %vm2607_vm5, %v2598_v15, %v2614_v30  ;;  %v2618_v43 = vsel %vm2608_vm12, %v2604_v27, 1326507024  ;;  %v2609_v53 = vsel %vm2605_vm4, %v2589_v28, %v2592_v36  ;;  %v2611_v19 = vsel %vm2607_vm5, %v2595_v21, %v2610_v41  ;;  %v9148_v36 = vpop.f32.mrb[5].mxu1 }
 0x348   : > { %v2616_v46 = vsel %vm2606_vm9, %v2613_v54, %v2615_v13  ;;  %v2619_v33 = vsel %vm2607_vm5, %v2601_v63, %v2618_v43  ;;  %v2819_v30 = vsel %vm2815_vm7, %v9050_v16, %v2818_v34  ;;  %v2612_v27 = vsel %vm2606_vm9, %v2609_v53, %v2611_v19 }
 0x349   : > { %v2620_v38 = vsel %vm2606_vm9, %v2617_v49, %v2619_v33  ;;  %v9103_v1 = vmul.u32.u64.low %v2621_v61, %v2616_v46  ;;  %v9104_v11 = vmul.u32.u64.high %v2621_v61, %v2616_v46, %v9103_v1  ;;  %v2691_v28 = vand.u32 31, %v2689_v26 }
 0x34a   : > { %v9108_v58 = vmul.u32.u64.low %v2621_v61, %v2620_v38  ;;  %v9109_v55 = vmul.u32.u64.high %v2621_v61, %v2620_v38, %v9108_v58  ;;  %v2822_v63 = vsel %vm2816_vm13, %v9069_v24, 920167782  ;;  %v9118_v49 = vor.u32 %v2439_v5, %v2438_v32 }
 0x34b   : > { %v9120_v54 = vsel %vm6235_vm10, 0, %v6234_v14  ;;  %v2812_v41 = vor.u32 %v9066_v60, %v9060_v50  ;;  %v2821_v34 = vsel %vm2813_vm3, %v9045_v51, %v9050_v16  ;;  %v2631_v45 = vadd.s32 1, %v9104_v11 }
 0x34c   : > { %v2692_v12 = vsub.s32 32, %v2691_v28  ;;  %v9133_v32 = vsel %vm2814_vm15, %v9075_v62, %v2819_v30  ;;  %v9135_v14 = vor.u32 4788187, %v2443_v40  ;;  %v2628_v5 = vmul.u32 %v2621_v61, %v2612_v27 }
 0x34d   : > { %vm2630_vm0 = vc.u32 %v9109_v55, %v9103_v1  ;;  %v2823_v51 = vsel %vm2815_vm7, %v9057_v3, %v2822_v63  ;;  %v2541_v60 = vsub.s32 32, %v9120_v54  ;;  %v2690_v56 = vshrl.u32 %v2689_v26, 5 }
 0x34e   : > { %v2632_v50 = vsel %vm2630_vm0, %v2631_v45, %v9104_v11  ;;  %v2695_v43 = vshrl.u32 %v12187_v8, %v2692_v12  ;;  %v2694_v62 = vshll.u32 %v12182_v4, %v2691_v28  ;;  %v2697_v44 = vshll.u32 %v12187_v8, %v2691_v28 }
 0x34f   : > { %v2633_v37 = vadd.s32 %v2632_v50, %v2628_v5  ;;  %v2698_v61 = vshrl.u32 %v12179_v42, %v2692_v12  ;;  %v2700_v21 = vshll.u32 %v12179_v42, %v2691_v28  ;;  %v2701_v15 = vshrl.u32 %v12180_v47, %v2692_v12 }
 0x350   : > { %v2703_v13 = vshll.u32 %v12180_v47, %v2691_v28  ;;  %v2704_v53 = vshrl.u32 %v12181_v59, %v2692_v12  ;;  %v2545_v19 = vsub.s32 4294967266, %v9120_v54  ;;  %v2696_v46 = vor.u32 %v2695_v43, %v2694_v62 }
 0x351   : > { %v2634_v26 = vadd.s32 536870912, %v2633_v37  ;;  %v2699_v33 = vor.u32 %v2698_v61, %v2697_v44  ;;  %v2702_v38 = vor.u32 %v2701_v15, %v2700_v21  ;;  %v2706_v40 = vshll.u32 %v12181_v59, %v2691_v28 }
 0x352   : > { %v2705_v11 = vor.u32 %v2704_v53, %v2703_v13  ;;  %v2707_v58 = vshrl.u32 %v12191_v17, %v2692_v12  ;;  %v2445_v30 = vand.u32 2147483647, %v9135_v14  ;;  %v2447_v27 = vcvt.s32.f32 %v9118_v49 }
 0x353   : > { %v9159_v63 = vshrl.u32 %v2634_v26, 30  ;;  %v2725_v45 = vshll.u32 %v2685_v0, 8  ;;  %v2543_v5 = vshrl.u32 %v9034_v7, %v2541_v60  ;;  %vm2712_vm2 = vcmp.lt.s32.totalorder %v2690_v56, 4 }
 0x354   : > { %v2708_v50 = vor.u32 %v2707_v58, %v2706_v40  ;;  %v2824_v43 = vsel %vm2814_vm15, %v2821_v34, %v2823_v51  ;;  %v2546_v44 = vadd.s32 127, %v2545_v19  ;;  %vm2709_vm8 = vcmp.lt.s32.totalorder %v2690_v56, 1 }
 0x355   : > { %v2636_v62 = vshll.u32 %v9159_v63, 30  ;;  %v2714_v28 = vsel %vm2712_vm2, %v2702_v38, 2102212464  ;;  %v2693_v61 = vshrl.u32 %v12182_v4, %v2692_v12  ;;  %v2717_v14 = vsel %vm2709_vm8, %v2696_v46, %v2699_v33 }
 0x356   : > { %v2718_v21 = vsel %vm2712_vm2, %v2705_v11, 920167782  ;;  %v2722_v49 = vsel %vm2712_vm2, %v2708_v50, 1326507024  ;;  %vm2710_vm11 = vcmp.lt.s32.totalorder %v2690_v56, 2  ;;  %vm2711_vm14 = vcmp.lt.s32.totalorder %v2690_v56, 3 }
 0x357   : > { %v9166_v15 = vsub.s32 %v2633_v37, %v2636_v62  ;;  %v2721_v7 = vsel %vm2709_vm8, %v2699_v33, %v2702_v38  ;;  %v2713_v0 = vsel %vm2709_vm8, %v2693_v61, %v2696_v46  ;;  %v2715_v60 = vsel %vm2711_vm14, %v2699_v33, %v2714_v28 }
 0x358   : > { %v2719_v13 = vsel %vm2711_vm14, %v2702_v38, %v2718_v21  ;;  %v2723_v53 = vsel %vm2711_vm14, %v2705_v11, %v2722_v49  ;;  %v2825_v12 = vsel %vm2813_vm3, %v9050_v16, %v9057_v3  ;;  %v2826_v37 = vsel %vm2816_vm13, %v2812_v41, 1326507024 }
 0x359   : > { %v2639_v34 = vsub.s32 0, %v9166_v15  ;;  %v2720_v51 = vsel %vm2710_vm11, %v2717_v14, %v2719_v13  ;;  %vm2367_vm1 = vcmp.lt.s32.totalorder %v8903_v22, 0  ;;  %v2547_v26 = vshll.u32 %v2546_v44, 23 }
 0x35a   : > { %v2724_v19 = vsel %vm2710_vm11, %v2721_v7, %v2723_v53  ;;  %v9178_v46 = vmul.u32.u64.low %v2725_v45, %v2720_v51  ;;  %v9179_v33 = vmul.u32.u64.high %v2725_v45, %v2720_v51, %v9178_v46  ;;  %v2716_v11 = vsel %vm2710_vm11, %v2713_v0, %v2715_v60 }
 0x35b   : > { %v6237_v38 = vmin.u32 %v2639_v34, %v9166_v15  ;;  %v9184_v40 = vmul.u32.u64.low %v2725_v45, %v2724_v19  ;;  %v9185_v58 = vmul.u32.u64.high %v2725_v45, %v2724_v19, %v9184_v40  ;;  %v2827_v16 = vsel %vm2815_vm7, %v9069_v24, %v2826_v37 }
 0x35c   : > { %v9191_v3 = vmul.u32.u64.low %v9020_v52, %v2824_v43  ;;  %v9192_v41 = vmul.u32.u64.high %v9020_v52, %v2824_v43, %v9191_v3  ;;  %v9197_v50 = vadd.f32 %v9026_v48, %v8910_v39  ;;  %v2448_v62 = vmul.f32 %v2447_v27, %v2445_v30 }
 0x35d   : > { %v2641_v44 = vclz %v6237_v38  ;;  %v2542_v56 = vshll.u32 %v9022_v29, %v9120_v54  ;;  %v2828_v28 = vsel %vm2814_vm15, %v2825_v12, %v2827_v16  ;;  %v12244_v61 = vand.u32 2147483647, %v8903_v22 }
 0x35e   : > { %12243 = vst [vmem:[#allocation16_spill] sm:$0xff] %v9197_v50  ;;  %v2548_v43 = vor.u32 4788187, %v2547_v26  ;;  %v2735_v14 = vadd.s32 1, %v9179_v33  ;;  %v9211_v48 = vmul.u32.u64.low %v9020_v52, %v2828_v28  ;;  %v9212_v21 = vmul.u32.u64.high %v9020_v52, %v2828_v28, %v9211_v48 }
 0x35f   : > { %vm9205_vm3 = vcmp.le.f32.partialorder %v12244_v61, 0.7853982  ;;  %v6238_v30 = vadd.s32 4294967294, %v2641_v44  ;;  %v2544_v27 = vor.u32 %v2543_v5, %v2542_v56  ;;  %v2732_v49 = vmul.u32 %v2725_v45, %v2716_v11 }
 0x360   : > { %vm2734_vm13 = vc.u32 %v9185_v58, %v9178_v46  ;;  %v2839_v29 = vadd.s32 1, %v9192_v41  ;;  %v2992_v54 = vand.u32 2139095040, %v9197_v50  ;;  %v2895_v7 = vadd.s32 1, %v9030_v25 }
 0x361   : > { %v2736_v57 = vsel %vm2734_vm13, %v2735_v14, %v9179_v33  ;;  %v2449_v0 = vxor.u32 2147483648, %v2448_v62  ;;  %vm6239_vm7 = vcmp.lt.s32.totalorder %v6238_v30, 0  ;;  %v12247_v13 = vand.u32 2147483647, %v8995_v18  ;;  %v9241_v14 = vpop.permute.xlu1 %2166 }
 0x362   : > { %v2737_v60 = vadd.s32 %v2736_v57, %v2732_v49  ;;  %v2644_v34 = vsel %vm6239_vm7, 0, %v6238_v30  ;;  %v2549_v5 = vand.u32 2147483647, %v2548_v43  ;;  %vm2838_vm4 = vc.u32 %v9212_v21, %v9191_v3 }
 0x363   : > { %v2892_v53 = vand.u32 8388607, %v12247_v13  ;;  %v2993_v45 = vshrl.u32 %v2992_v54, 23  ;;  %v12248_v51 = vsub.s32 4, %v8986_v35  ;;  %v2551_v37 = vcvt.s32.f32 %v2544_v27 }
 0x364   : > { %v2738_v25 = vadd.s32 536870912, %v2737_v60  ;;  %v2836_v26 = vmul.u32 %v9020_v52, %v9133_v32  ;;  %v2840_v19 = vsel %vm2838_vm4, %v2839_v29, %v9192_v41  ;;  %v12070_v33 = vand.u32 2147483647, %v9197_v50 }
 0x365   : > { %v2452_v12 = vsel %vm2367_vm1, %v12248_v51, %v8986_v35  ;;  %v6252_v38 = vadd.s32 4294967169, %v2993_v45  ;;  %vm2896_vm12 = vcmp.gt.s32.totalorder %v2895_v7, 0  ;;  %v2450_v11 = vsel %vm2367_vm1, %v2449_v0, %v2448_v62 }
 0x366   : > { %v2649_v40 = vsub.s32 4294967266, %v2644_v34  ;;  %vm2471_vm5 = vcmp.lt.s32.totalorder %v8906_v9, 0  ;;  %v9236_v16 = vshrl.u32 %v2738_v25, 30  ;;  %v2841_v35 = vadd.s32 %v2840_v19, %v2836_v26 }
 0x367   : > { %v2645_v44 = vsub.s32 32, %v2644_v34  ;;  %v2552_v56 = vmul.f32 %v2551_v37, %v2549_v5  ;;  %v2999_v28 = vadd.s32 1, %v6252_v38  ;;  %v2893_v61 = vor.u32 8388608, %v2892_v53  ;;  %v9269_v37 = vpop.f32.mrb[6].mxu0 }
 0x368   : > { %12249 = vst [vmem:[#allocation5_spill] sm:$0xff] %v9236_v16  ;;  %v2454_v52 = vsel %vm9205_vm3, 0, %v2452_v12  ;;  %v2740_v32 = vshll.u32 %v9236_v16, 30  ;;  %v2842_v41 = vadd.s32 536870912, %v2841_v35  ;;  %v2897_v43 = vsel %vm2896_vm12, %v2895_v7, 0 }
 0x369   : > { %v2453_v62 = vsel %vm9205_vm3, %v8903_v22, %v2450_v11  ;;  %v2629_v48 = vadd.s32 %v9103_v1, %v9109_v55  ;;  %v2996_v30 = vand.u32 8388607, %v12070_v33  ;;  %vm3000_vm9 = vcmp.gt.s32.totalorder %v2999_v28, 0 }
 0x36a   : > { %v2650_v27 = vadd.s32 127, %v2649_v40  ;;  %v9250_v49 = vsub.s32 %v2737_v60, %v2740_v32  ;;  %v9252_v57 = vshrl.u32 %v2842_v41, 30  ;;  %v9256_v29 = vadd.f32 %v8945_v10, %v9241_v14 }
 0x36b   : > { %v2647_v54 = vshrl.u32 %v2629_v48, %v2645_v44  ;;  %v2553_v7 = vxor.u32 2147483648, %v2552_v56  ;;  %v3001_v24 = vsel %vm3000_vm9, %v2999_v28, 0  ;;  %v9258_v0 = vand.u32 31, %v2897_v43 }
 0x36c   : > { %12250 = vst [vmem:[#allocation15_spill] sm:$0xff] %v9256_v29  ;;  %6740 = vcosq.f32 %v2453_v62  ;;  %v9260_v1 = vadd.s32 3, %v2454_v52  ;;  %v2743_v55 = vsub.s32 0, %v9250_v49  ;;  %v2844_v13 = vshll.u32 %v9252_v57, 30 }
 0x36d   : > { %6742 = vsinq.f32 %v2453_v62  ;;  %v2646_v60 = vshll.u32 %v9166_v15, %v2644_v34  ;;  %v2997_v53 = vor.u32 8388608, %v2996_v30  ;;  %v3003_v5 = vand.u32 31, %v3001_v24 }
 0x36e   : > { %12251 = vst [vmem:[#allocation12_spill] sm:$0xff] %v9260_v1  ;;  %v2651_v45 = vshll.u32 %v2650_v27, 23  ;;  %v6241_v51 = vmin.u32 %v2743_v55, %v9250_v49  ;;  %v9267_v12 = vsub.s32 %v2841_v35, %v2844_v13  ;;  %v9275_v26 = vsel %vm2471_vm5, %v2553_v7, %v2552_v56 }
 0x36f   : > { %v9271_v25 = vor.u32 %v2647_v54, %v2646_v60  ;;  %v3004_v19 = vsub.s32 32, %v3003_v5  ;;  %v9278_v15 = vsub.s32 32, %v9258_v0  ;;  %v2733_v34 = vadd.s32 %v9178_v46, %v9185_v58 }
 0x370   : > { %v2745_v38 = vclz %v6241_v51  ;;  %v2847_v11 = vsub.s32 0, %v9267_v12  ;;  %v9283_v40 = vshll.u32 %v2893_v61, 8  ;;  %v9287_v35 = vadd.s32 %v9191_v3, %v9212_v21 }
 0x371   : > { %v9289_v44 = vshll.u32 %v2997_v53, 8  ;;  %v9291_v56 = vshrl.u32 %v2897_v43, 5  ;;  %v9295_v28 = vshll.u32 %v12182_v4, %v9258_v0  ;;  %v9297_v52 = vor.u32 4788187, %v2651_v45 }
 0x372   : > { %v6242_v46 = vadd.s32 4294967294, %v2745_v38  ;;  %v6245_v58 = vmin.u32 %v2847_v11, %v9267_v12  ;;  %v9302_v61 = vshll.u32 %v12187_v8, %v9258_v0  ;;  %v2655_v3 = vcvt.s32.f32 %v9271_v25 }
 0x373   : > { %v3007_v21 = vshrl.u32 %v12187_v8, %v3004_v19  ;;  %v3010_v32 = vshrl.u32 %v12179_v42, %v3004_v19  ;;  %v9309_v41 = vshrl.u32 %v12182_v4, %v9278_v15  ;;  %v3006_v62 = vshll.u32 %v12182_v4, %v3003_v5 }
 0x374   : > { %vm6243_vm10 = vcmp.lt.s32.totalorder %v6242_v46, 0  ;;  %v2849_v43 = vclz %v6245_v58  ;;  %v3013_v48 = vshrl.u32 %v12180_v47, %v3004_v19  ;;  %v3009_v27 = vshll.u32 %v12187_v8, %v3003_v5 }
 0x375   : > { %v2748_v30 = vsel %vm6243_vm10, 0, %v6242_v46  ;;  %v3015_v54 = vshll.u32 %v12180_v47, %v3003_v5  ;;  %v3016_v7 = vshrl.u32 %v12181_v59, %v3004_v19  ;;  %v3002_v53 = vshrl.u32 %v3001_v24, 5 }
 0x376   : > { %v9316_v55 = vpop.eup %6740  ;;  %v2753_v13 = vsub.s32 4294967266, %v2748_v30  ;;  %v6246_v60 = vadd.s32 4294967294, %v2849_v43  ;;  %v3012_v45 = vshll.u32 %v12179_v42, %v3003_v5  ;;  %v3008_v25 = vor.u32 %v3007_v21, %v3006_v62  ;;  %v9330_v62 = vpop.f32.mrb[6].mxu1 }
 0x377   : > { %12252 = vst [vmem:[#allocation14_spill] sm:$0xff] %v9316_v55  ;;  %v9319_v51 = vpop.eup %6742  ;;  %v3011_v38 = vor.u32 %v3010_v32, %v3009_v27  ;;  %v3017_v11 = vor.u32 %v3016_v7, %v3015_v54  ;;  %v3019_v46 = vshrl.u32 %v12191_v17, %v3004_v19  ;;  %v3018_v10 = vshll.u32 %v12181_v59, %v3003_v5 }
 0x378   : > { %12253 = vst [vmem:[#allocation8_spill] sm:$0xff] %v9319_v51  ;;  %v2754_v58 = vadd.s32 127, %v2753_v13  ;;  %vm6247_vm15 = vcmp.lt.s32.totalorder %v6246_v60, 0  ;;  %v3014_v33 = vor.u32 %v3013_v48, %v3012_v45  ;;  %v2749_v22 = vsub.s32 32, %v2748_v30  ;;  %12254 = vst [vmem:[#allocation10_spill] sm:$0xff] %v9330_v62 }
 0x379   : > { %v9323_v1 = vsel %vm6247_vm15, 0, %v6246_v60  ;;  %v2903_v24 = vshrl.u32 %v12187_v8, %v9278_v15  ;;  %v2906_v43 = vshrl.u32 %v12179_v42, %v9278_v15  ;;  %v2653_v21 = vand.u32 2147483647, %v9297_v52 }
 0x37a   : > { %v3020_v32 = vor.u32 %v3019_v46, %v3018_v10  ;;  %vm3021_vm0 = vcmp.lt.s32.totalorder %v3002_v53, 1  ;;  %vm3024_vm2 = vcmp.lt.s32.totalorder %v3002_v53, 4  ;;  %v2857_v48 = vsub.s32 4294967266, %v9323_v1 }
 0x37b   : > { %v3005_v5 = vshrl.u32 %v12182_v4, %v3004_v19  ;;  %v3029_v27 = vsel %vm3021_vm0, %v3008_v25, %v3011_v38  ;;  %v3030_v54 = vsel %vm3024_vm2, %v3017_v11, 920167782  ;;  %v2750_v7 = vshll.u32 %v9250_v49, %v2748_v30 }
 0x37c   : > { %v2755_v13 = vshll.u32 %v2754_v58, 23  ;;  %vm3023_vm8 = vcmp.lt.s32.totalorder %v3002_v53, 3  ;;  %v3026_v60 = vsel %vm3024_vm2, %v3014_v33, 2102212464  ;;  %v2751_v52 = vshrl.u32 %v2733_v34, %v2749_v22 }
 0x37d   : > { %vm3022_vm11 = vcmp.lt.s32.totalorder %v3002_v53, 2  ;;  %v3031_v10 = vsel %vm3023_vm8, %v3014_v33, %v3030_v54  ;;  %v3033_v45 = vsel %vm3021_vm0, %v3011_v38, %v3014_v33  ;;  %v2858_v46 = vadd.s32 127, %v2857_v48 }
 0x37e   : > { %v3025_v55 = vsel %vm3021_vm0, %v3005_v5, %v3008_v25  ;;  %v3032_v19 = vsel %vm3022_vm11, %v3029_v27, %v3031_v10  ;;  %v3034_v51 = vsel %vm3024_vm2, %v3020_v32, 1326507024  ;;  %v3027_v16 = vsel %vm3023_vm8, %v3011_v38, %v3026_v60 }
 0x37f   : > { %v3035_v62 = vsel %vm3023_vm8, %v3017_v11, %v3034_v51  ;;  %v9343_v49 = vmul.u32.u64.low %v9289_v44, %v3032_v19  ;;  %v9344_v30 = vmul.u32.u64.high %v9289_v44, %v3032_v19, %v9343_v49  ;;  %v2756_v58 = vor.u32 4788187, %v2755_v13 }
 0x380   : > { %v2853_v22 = vsub.s32 32, %v9323_v1  ;;  %v3036_v34 = vsel %vm3022_vm11, %v3033_v45, %v3035_v62  ;;  %v2904_v33 = vor.u32 %v2903_v24, %v9295_v28  ;;  %v2656_v48 = vmul.f32 %v2655_v3, %v2653_v21 }
 0x381   : > { %v2752_v25 = vor.u32 %v2751_v52, %v2750_v7  ;;  %v9351_v5 = vmul.u32.u64.low %v9289_v44, %v3036_v34  ;;  %v9352_v27 = vmul.u32.u64.high %v9289_v44, %v3036_v34, %v9351_v5  ;;  %v2859_v38 = vshll.u32 %v2858_v46, 23 }
 0x382   : > { %v3028_v51 = vsel %vm3022_vm11, %v3025_v55, %v3027_v16  ;;  %v2909_v11 = vshrl.u32 %v12180_v47, %v9278_v15  ;;  %v2912_v32 = vshrl.u32 %v12181_v59, %v9278_v15  ;;  %v3047_v54 = vadd.s32 1, %v9344_v30 }
 0x383   : > { %v2908_v28 = vshll.u32 %v12179_v42, %v9258_v0  ;;  %v2911_v3 = vshll.u32 %v12180_v47, %v9258_v0  ;;  %v2915_v24 = vshrl.u32 %v12191_v17, %v9278_v15  ;;  %vm2575_vm14 = vcmp.lt.s32.totalorder %v9008_v2, 0 }
 0x384   : > { %v12255_v16 = vand.u32 2147483647, %v8906_v9  ;;  %v2757_v53 = vand.u32 2147483647, %v2756_v58  ;;  %v2855_v21 = vshrl.u32 %v9287_v35, %v2853_v22  ;;  %v2907_v62 = vor.u32 %v2906_v43, %v9302_v61 }
 0x385   : > { %v2914_v7 = vshll.u32 %v12181_v59, %v9258_v0  ;;  %v3044_v13 = vmul.u32 %v9289_v44, %v3028_v51  ;;  %vm3046_vm3 = vc.u32 %v9352_v27, %v9343_v49  ;;  %v2910_v15 = vor.u32 %v2909_v11, %v2908_v28 }
 0x386   : > { %vm9369_vm1 = vcmp.le.f32.partialorder %v12255_v16, 0.7853982  ;;  %v2913_v60 = vor.u32 %v2912_v32, %v2911_v3  ;;  %v2759_v52 = vcvt.s32.f32 %v2752_v25  ;;  %v2854_v10 = vshll.u32 %v9267_v12, %v9323_v1 }
 0x387   : > { %v3048_v45 = vsel %vm3046_vm3, %v3047_v54, %v9344_v30  ;;  %v2916_v46 = vor.u32 %v2915_v24, %v2914_v7  ;;  %v2657_v35 = vxor.u32 2147483648, %v2656_v48  ;;  %v2860_v19 = vor.u32 4788187, %v2859_v38 }
 0x388   : > { %v3049_v61 = vadd.s32 %v3048_v45, %v3044_v13  ;;  %vm2917_vm13 = vcmp.lt.s32.totalorder %v9291_v56, 1  ;;  %v12258_v0 = vand.u32 2147483647, %v9008_v2  ;;  %v2760_v43 = vmul.f32 %v2759_v52, %v2757_v53 }
 0x389   : > { %v2856_v58 = vor.u32 %v2855_v21, %v2854_v10  ;;  %vm2920_vm4 = vcmp.lt.s32.totalorder %v9291_v56, 4  ;;  %v2925_v1 = vsel %vm2917_vm13, %v2904_v33, %v2907_v62  ;;  %vm2919_vm12 = vcmp.lt.s32.totalorder %v9291_v56, 3 }
 0x38a   : > { %vm9386_vm7 = vcmp.le.f32.partialorder %v12258_v0, 0.7853982  ;;  %v3050_v12 = vadd.s32 536870912, %v3049_v61  ;;  %v2922_v30 = vsel %vm2920_vm4, %v2910_v15, 2102212464  ;;  %vm2918_vm9 = vcmp.lt.s32.totalorder %v9291_v56, 2 }
 0x38b   : > { %v2926_v22 = vsel %vm2920_vm4, %v2913_v60, 920167782  ;;  %v2929_v25 = vsel %vm2917_vm13, %v2907_v62, %v2910_v15  ;;  %v2930_v5 = vsel %vm2920_vm4, %v2916_v46, 1326507024  ;;  %vm12112_vm10 = vcmp.lt.s32.totalorder %v9012_v6, 0 }
 0x38c   : > { %v2927_v34 = vsel %vm2919_vm12, %v2910_v15, %v2926_v22  ;;  %v2861_v38 = vand.u32 2147483647, %v2860_v19  ;;  %v9398_v51 = vshrl.u32 %v3050_v12, 30  ;;  %v2921_v11 = vsel %vm2917_vm13, %v9309_v41, %v2904_v33 }
 0x38d   : > { %v2928_v32 = vsel %vm2918_vm9, %v2925_v1, %v2927_v34  ;;  %v2923_v54 = vsel %vm2919_vm12, %v2907_v62, %v2922_v30  ;;  %v2931_v28 = vsel %vm2919_vm12, %v2913_v60, %v2930_v5  ;;  %v2658_v16 = vsel %vm2575_vm14, %v2657_v35, %v2656_v48 }
 0x38e   : > { %v9406_v3 = vmul.u32.u64.low %v9283_v40, %v2928_v32  ;;  %v9407_v24 = vmul.u32.u64.high %v9283_v40, %v2928_v32, %v9406_v3  ;;  %v2557_v53 = vsel %vm9369_vm1, %v8906_v9, %v9275_v26  ;;  %vm2783_vm15 = vcmp.lt.s32.totalorder %v8915_v20, 0 }
 0x38f   : > { %v3052_v41 = vshll.u32 %v9398_v51, 30  ;;  %v2932_v33 = vsel %vm2918_vm9, %v2929_v25, %v2931_v28  ;;  %v12261_v21 = vand.u32 2147483647, %v9012_v6  ;;  %v2863_v7 = vcvt.s32.f32 %v2856_v58  ;;  %v9469_v28 = vpop.f32.mrb[7].mxu0 }
 0x390   : > { %v9427_v48 = vmul.u32.u64.low %v9283_v40, %v2932_v33  ;;  %v9428_v13 = vmul.u32.u64.high %v9283_v40, %v2932_v33, %v9427_v48  ;;  %v9432_v26 = vadd.f32 %v9038_v31, %v8910_v39  ;;  %v12265_v15 = vsub.s32 4, %v9159_v63 }
 0x391   : > { %vm9422_vm0 = vcmp.le.f32.partialorder %v12261_v21, 0.7853982  ;;  %v9441_v52 = vsub.s32 %v3049_v61, %v3052_v41  ;;  %v2924_v10 = vsel %vm2918_vm9, %v2921_v11, %v2923_v54  ;;  %v3200_v45 = vand.u32 2139095040, %v9256_v29 }
 0x392   : > { %12264 = vst [vmem:[#allocation7_spill] sm:$0xff] %v9432_v26  ;;  %v9439_v60 = vsel %vm2575_vm14, %v12265_v15, %v9159_v63  ;;  %6744 = vcosq.f32 %v2557_v53  ;;  %v2761_v46 = vxor.u32 2147483648, %v2760_v43  ;;  %v2864_v35 = vmul.f32 %v2863_v7, %v2861_v38 }
 0x393   : > { %v2943_v39 = vadd.s32 1, %v9407_v24  ;;  %v2661_v31 = vsel %vm9386_vm7, %v9008_v2, %v2658_v16  ;;  %v3055_v19 = vsub.s32 0, %v9441_v52  ;;  %v12078_v63 = vand.u32 2147483647, %v9432_v26 }
 0x394   : > { %v3096_v61 = vand.u32 2139095040, %v9432_v26  ;;  %6746 = vsinq.f32 %v2557_v53  ;;  %v2867_v56 = vsub.s32 4, %v9252_v57  ;;  %v2940_v0 = vmul.u32 %v9283_v40, %v2924_v10 }
 0x395   : > { %vm2942_vm2 = vc.u32 %v9428_v13, %v9406_v3  ;;  %v12266_v58 = vand.u32 2147483647, %v8915_v20  ;;  %v6253_v12 = vmin.u32 %v3055_v19, %v9441_v52  ;;  %v3201_v34 = vshrl.u32 %v3200_v45, 23 }
 0x396   : > { %v2944_v30 = vsel %vm2942_vm2, %v2943_v39, %v9407_v24  ;;  %v3097_v22 = vshrl.u32 %v3096_v61, 23  ;;  %6748 = vcosq.f32 %v2661_v31  ;;  %v2762_v25 = vsel %vm12112_vm10, %v2761_v46, %v2760_v43 }
 0x397   : > { %vm9459_vm8 = vcmp.le.f32.partialorder %v12266_v58, 0.7853982  ;;  %v2865_v40 = vxor.u32 2147483648, %v2864_v35  ;;  %v2945_v5 = vadd.s32 %v2944_v30, %v2940_v0  ;;  %v3057_v38 = vclz %v6253_v12 }
 0x398   : > { %v6256_v11 = vadd.s32 4294967169, %v3097_v22  ;;  %v3100_v32 = vand.u32 8388607, %v12078_v63  ;;  %v6260_v54 = vadd.s32 4294967169, %v3201_v34  ;;  %6750 = vsinq.f32 %v2661_v31 }
 0x399   : > { %v9477_v16 = vsel %vm2783_vm15, %v2867_v56, %v9252_v57  ;;  %v2946_v43 = vadd.s32 536870912, %v2945_v5  ;;  %v9482_v53 = vsel %vm9422_vm0, %v9012_v6, %v2762_v25  ;;  %v6254_v41 = vadd.s32 4294967294, %v3057_v38 }
 0x39a   : > { %v3103_v33 = vadd.s32 1, %v6256_v11  ;;  %v3207_v21 = vadd.s32 1, %v6260_v54  ;;  %v2866_v7 = vsel %vm2783_vm15, %v2865_v40, %v2864_v35  ;;  %v3045_v48 = vadd.s32 %v9343_v49, %v9352_v27 }
 0x39b   : > { %v9488_v15 = vshrl.u32 %v2946_v43, 30  ;;  %v12077_v57 = vand.u32 2147483647, %v9256_v29  ;;  %vm6255_vm11 = vcmp.lt.s32.totalorder %v6254_v41, 0  ;;  %v3101_v10 = vor.u32 8388608, %v3100_v32 }
 0x39c   : > { %vm3104_vm14 = vcmp.gt.s32.totalorder %v3103_v33, 0  ;;  %vm3208_vm3 = vcmp.gt.s32.totalorder %v3207_v21, 0  ;;  %v9491_v45 = vpop.eup %6744  ;;  %6752 = vcosq.f32 %v9482_v53  ;;  %v3060_v46 = vsel %vm6255_vm11, 0, %v6254_v41 }
 0x39d   : > { %v2948_v39 = vshll.u32 %v9488_v15, 30  ;;  %v3105_v31 = vsel %vm3104_vm14, %v3103_v33, 0  ;;  %v3061_v35 = vsub.s32 32, %v3060_v46  ;;  %v3065_v19 = vsub.s32 4294967266, %v3060_v46 }
 0x39e   : > { %v9495_v61 = vshrl.u32 %v3105_v31, 5  ;;  %v9497_v49 = vsel %vm3208_vm3, %v3207_v21, 0  ;;  %v9499_v27 = vpop.eup %6746  ;;  %v9504_v56 = vsel %vm9459_vm8, %v8915_v20, %v2866_v7  ;;  %v3107_v12 = vand.u32 31, %v3105_v31 }
 0x39f   : > { %v9507_v58 = vsub.s32 %v2945_v5, %v2948_v39  ;;  %v3066_v30 = vadd.s32 127, %v3065_v19  ;;  %v2941_v22 = vadd.s32 %v9406_v3, %v9428_v13  ;;  %v9511_v34 = vshll.u32 %v3101_v10, 8 }
 0x3a0   : > { %v9515_v25 = vand.u32 8388607, %v12077_v57  ;;  %v9517_v40 = vpop.eup %6748  ;;  %v3062_v38 = vshll.u32 %v9441_v52, %v3060_v46  ;;  %v3108_v32 = vsub.s32 32, %v3107_v12  ;;  %v9522_v5 = vand.u32 31, %v9497_v49 }
 0x3a1   : > { %12269 = vst [vmem:[#allocation9_spill] sm:$0xff] %v9517_v40  ;;  %v2951_v11 = vsub.s32 0, %v9507_v58  ;;  %v3063_v54 = vshrl.u32 %v3045_v48, %v3061_v35  ;;  %v3067_v43 = vshll.u32 %v3066_v30, 23  ;;  %v3110_v3 = vshll.u32 %v12182_v4, %v3107_v12 }
 0x3a2   : > { %vm3125_vm13 = vcmp.lt.s32.totalorder %v9495_v61, 1  ;;  %v9526_v13 = vpop.eup %6750  ;;  %v3111_v33 = vshrl.u32 %v12187_v8, %v3108_v32  ;;  %v3113_v52 = vshll.u32 %v12187_v8, %v3107_v12  ;;  %v3114_v21 = vshrl.u32 %v12179_v42, %v3108_v32 }
 0x3a3   : > { %12270 = vst [vmem:[#allocation19_spill] sm:$0xff] %v9526_v13  ;;  %v6249_v41 = vmin.u32 %v2951_v11, %v9507_v58  ;;  %v3116_v7 = vshll.u32 %v12179_v42, %v3107_v12  ;;  %v3117_v10 = vshrl.u32 %v12180_v47, %v3108_v32  ;;  %v3119_v48 = vshll.u32 %v12180_v47, %v3107_v12 }
 0x3a4   : > { %v3120_v46 = vshrl.u32 %v12181_v59, %v3108_v32  ;;  %v3068_v39 = vor.u32 4788187, %v3067_v43  ;;  %v3112_v35 = vor.u32 %v3111_v33, %v3110_v3  ;;  %v3115_v19 = vor.u32 %v3114_v21, %v3113_v52  ;;  %v9548_v3 = vpop.f32.mrb[7].mxu1 }
 0x3a5   : > { %v2953_v31 = vclz %v6249_v41  ;;  %v3118_v30 = vor.u32 %v3117_v10, %v3116_v7  ;;  %v3122_v57 = vshll.u32 %v12181_v59, %v3107_v12  ;;  %v3123_v63 = vshrl.u32 %v12191_v17, %v3108_v32 }
 0x3a6   : > { %v3121_v11 = vor.u32 %v3120_v46, %v3119_v48  ;;  %v9538_v24 = vpop.eup %6752  ;;  %v3109_v2 = vshrl.u32 %v12182_v4, %v3108_v32  ;;  %vm3126_vm4 = vcmp.lt.s32.totalorder %v9495_v61, 2  ;;  %vm3128_vm12 = vcmp.lt.s32.totalorder %v9495_v61, 4 }
 0x3a7   : > { %12271 = vst [vmem:[#allocation20_spill] sm:$0xff] %v9538_v24  ;;  %v6250_v0 = vadd.s32 4294967294, %v2953_v31  ;;  %v3124_v40 = vor.u32 %v3123_v63, %v3122_v57  ;;  %vm3127_vm9 = vcmp.lt.s32.totalorder %v9495_v61, 3  ;;  %v3130_v43 = vsel %vm3128_vm12, %v3118_v30, 2102212464 }
 0x3a8   : > { %v3133_v12 = vsel %vm3125_vm13, %v3112_v35, %v3115_v19  ;;  %v3129_v41 = vsel %vm3125_vm13, %v3109_v2, %v3112_v35  ;;  %v3131_v32 = vsel %vm3127_vm9, %v3115_v19, %v3130_v43  ;;  %v3134_v63 = vsel %vm3128_vm12, %v3121_v11, 920167782 }
 0x3a9   : > { %vm6251_vm15 = vcmp.lt.s32.totalorder %v6250_v0, 0  ;;  %v3064_v57 = vor.u32 %v3063_v54, %v3062_v38  ;;  %v3069_v33 = vand.u32 2147483647, %v3068_v39  ;;  %v3135_v21 = vsel %vm3127_vm9, %v3118_v30, %v3134_v63 }
 0x3aa   : > { %v2956_v52 = vsel %vm6251_vm15, 0, %v6250_v0  ;;  %v3136_v48 = vsel %vm3126_vm4, %v3133_v12, %v3135_v21  ;;  %v3137_v2 = vsel %vm3125_vm13, %v3115_v19, %v3118_v30  ;;  %v3132_v46 = vsel %vm3126_vm4, %v3129_v41, %v3131_v32 }
 0x3ab   : > { %v2957_v7 = vsub.s32 32, %v2956_v52  ;;  %v2961_v10 = vsub.s32 4294967266, %v2956_v52  ;;  %v3138_v31 = vsel %vm3128_vm12, %v3124_v40, 1326507024  ;;  %v2958_v54 = vshll.u32 %v9507_v58, %v2956_v52 }
 0x3ac   : > { %v9567_v38 = vmul.u32.u64.low %v9511_v34, %v3136_v48  ;;  %v9568_v0 = vmul.u32.u64.high %v9511_v34, %v3136_v48, %v9567_v38  ;;  %v3139_v43 = vsel %vm3127_vm9, %v3121_v11, %v3138_v31  ;;  %v3071_v12 = vcvt.s32.f32 %v3064_v57 }
 0x3ad   : > { %v2959_v39 = vshrl.u32 %v2941_v22, %v2957_v7  ;;  %v2962_v35 = vadd.s32 127, %v2961_v10  ;;  %v3140_v19 = vsel %vm3126_vm4, %v3137_v2, %v3139_v43  ;;  %v3212_v30 = vsub.s32 32, %v9522_v5 }
 0x3ae   : > { %v9579_v40 = vadd.f32 %v9048_v23, %v9241_v14  ;;  %v3205_v63 = vor.u32 8388608, %v9515_v25  ;;  %v9583_v58 = vshrl.u32 %v9497_v49, 5  ;;  %v9585_v22 = vmul.f32 %v3071_v12, %v3069_v33 }
 0x3af   : > { %v2960_v41 = vor.u32 %v2959_v39, %v2958_v54  ;;  %v2963_v32 = vshll.u32 %v2962_v35, 23  ;;  %v9588_v11 = vmul.u32.u64.low %v9511_v34, %v3140_v19  ;;  %v9589_v57 = vmul.u32.u64.high %v9511_v34, %v3140_v19, %v9588_v11 }
 0x3b0   : > { %12272 = vst [vmem:[#allocation21_spill] sm:$0xff] %v9579_v40  ;;  %v3148_v61 = vmul.u32 %v9511_v34, %v3132_v46  ;;  %v3151_v21 = vadd.s32 1, %v9568_v0  ;;  %v3214_v23 = vshll.u32 %v12182_v4, %v9522_v5  ;;  %v3215_v7 = vshrl.u32 %v12187_v8, %v3212_v30 }
 0x3b1   : > { %v2964_v52 = vor.u32 4788187, %v2963_v32  ;;  %v2967_v25 = vcvt.s32.f32 %v2960_v41  ;;  %v3217_v49 = vshll.u32 %v12187_v8, %v9522_v5  ;;  %v3218_v33 = vshrl.u32 %v12179_v42, %v3212_v30 }
 0x3b2   : > { %v3221_v10 = vshrl.u32 %v12180_v47, %v3212_v30  ;;  %v3220_v34 = vshll.u32 %v12179_v42, %v9522_v5  ;;  %v3223_v2 = vshll.u32 %v12180_v47, %v9522_v5  ;;  %v3224_v46 = vshrl.u32 %v12181_v59, %v3212_v30 }
 0x3b3   : > { %v2965_v48 = vand.u32 2147483647, %v2964_v52  ;;  %vm3150_vm2 = vc.u32 %v9589_v57, %v9567_v38  ;;  %v3216_v31 = vor.u32 %v3215_v7, %v3214_v23  ;;  %v3219_v54 = vor.u32 %v3218_v33, %v3217_v49 }
 0x3b4   : > { %v3226_v39 = vshll.u32 %v12181_v59, %v9522_v5  ;;  %v3152_v35 = vsel %vm3150_vm2, %v3151_v21, %v9568_v0  ;;  %v3222_v43 = vor.u32 %v3221_v10, %v3220_v34  ;;  %v3225_v12 = vor.u32 %v3224_v46, %v3223_v2 }
 0x3b5   : > { %v3227_v19 = vshrl.u32 %v12191_v17, %v3212_v30  ;;  %vm2991_vm11 = vcmp.lt.s32.totalorder %v9197_v50, 0  ;;  %v3153_v41 = vadd.s32 %v3152_v35, %v3148_v61  ;;  %v3245_v32 = vshll.u32 %v3205_v63, 8 }
 0x3b6   : > { %v3408_v52 = vand.u32 2139095040, %v9579_v40  ;;  %vm2887_vm14 = vcmp.lt.s32.totalorder %v8995_v18, 0  ;;  %v2968_v23 = vmul.f32 %v2967_v25, %v2965_v48  ;;  %vm3229_vm3 = vcmp.lt.s32.totalorder %v9583_v58, 1 }
 0x3b7   : > { %v3228_v7 = vor.u32 %v3227_v19, %v3226_v39  ;;  %vm3232_vm13 = vcmp.lt.s32.totalorder %v9583_v58, 4  ;;  %v3154_v5 = vadd.s32 536870912, %v3153_v41  ;;  %vm3231_vm4 = vcmp.lt.s32.totalorder %v9583_v58, 3 }
 0x3b8   : > { %v3237_v0 = vsel %vm3229_vm3, %v3216_v31, %v3219_v54  ;;  %v3238_v63 = vsel %vm3232_vm13, %v3225_v12, 920167782  ;;  %v12273_v61 = vand.u32 2147483647, %v9197_v50  ;;  %v3073_v25 = vxor.u32 2147483648, %v9585_v22 }
 0x3b9   : > { %vm3230_vm9 = vcmp.lt.s32.totalorder %v9583_v58, 2  ;;  %v3234_v49 = vsel %vm3232_vm13, %v3222_v43, 2102212464  ;;  %v3239_v33 = vsel %vm3231_vm4, %v3222_v43, %v3238_v63  ;;  %v12276_v10 = vand.u32 2147483647, %v8995_v18 }
 0x3ba   : > { %vm9624_vm12 = vcmp.le.f32.partialorder %v12273_v61, 0.7853982  ;;  %v9640_v34 = vshrl.u32 %v3154_v5, 30  ;;  %v3213_v2 = vshrl.u32 %v12182_v4, %v3212_v30  ;;  %v3240_v46 = vsel %vm3230_vm9, %v3237_v0, %v3239_v33  ;;  %v12280_v33 = vld [vmem:[#allocation17_spill] sm:$0xff] }
 0x3bb   : > { %vm9636_vm15 = vcmp.le.f32.partialorder %v12276_v10, 0.7853982  ;;  %v3241_v39 = vsel %vm3229_vm3, %v3219_v54, %v3222_v43  ;;  %v2969_v35 = vxor.u32 2147483648, %v2968_v23  ;;  %v3242_v19 = vsel %vm3232_vm13, %v3228_v7, 1326507024 }
 0x3bc   : > { %12279 = vst [vmem:[#allocation22_spill] sm:$0xff] %v9640_v34  ;;  %v9649_v63 = vmul.u32.u64.low %v3245_v32, %v3240_v46  ;;  %v9650_v61 = vmul.u32.u64.high %v3245_v32, %v3240_v46, %v9649_v63  ;;  %v3156_v10 = vshll.u32 %v9640_v34, 30  ;;  %v3233_v5 = vsel %vm3229_vm3, %v3213_v2, %v3216_v31 }
 0x3bd   : > { %v3235_v30 = vsel %vm3231_vm4, %v3219_v54, %v3234_v49  ;;  %v3243_v0 = vsel %vm3231_vm4, %v3225_v12, %v3242_v19  ;;  %6754 = vsinq.f32 %v9482_v53  ;;  %v3409_v7 = vshrl.u32 %v3408_v52, 23 }
 0x3be   : > { %v3244_v43 = vsel %vm3230_vm9, %v3241_v39, %v3243_v0  ;;  %v9665_v46 = vadd.f32 %v12280_v33, %v9241_v14  ;;  %6756 = vcosq.f32 %v9504_v56  ;;  %v9668_v11 = vsub.s32 %v3153_v41, %v3156_v10 }
 0x3bf   : > { %v9670_v31 = vmul.u32.u64.low %v3245_v32, %v3244_v43  ;;  %v9671_v2 = vmul.u32.u64.high %v3245_v32, %v3244_v43, %v9670_v31  ;;  %v3074_v54 = vsel %vm2991_vm11, %v3073_v25, %v9585_v22  ;;  %v3236_v53 = vsel %vm3230_vm9, %v3233_v5, %v3235_v30 }
 0x3c0   : > { %v3255_v12 = vadd.s32 1, %v9650_v61  ;;  %v6268_v52 = vadd.s32 4294967169, %v3409_v7  ;;  %v12281_v49 = vsub.s32 4, %v9398_v51  ;;  %v2970_v39 = vsel %vm2887_vm14, %v2969_v35, %v2968_v23 }
 0x3c1   : > { %v3159_v19 = vsub.s32 0, %v9668_v11  ;;  %v12282_v10 = vand.u32 2147483647, %v9579_v40  ;;  %v2870_v58 = vsel %vm9459_vm8, 0, %v9477_v16  ;;  %6758 = vsinq.f32 %v9504_v56 }
 0x3c2   : > { %v3076_v41 = vsel %vm2991_vm11, %v12281_v49, %v9398_v51  ;;  %v3415_v25 = vadd.s32 1, %v6268_v52  ;;  %v3304_v5 = vand.u32 2139095040, %v9665_v46  ;;  %v3077_v51 = vsel %vm9624_vm12, %v9197_v50, %v3074_v54 }
 0x3c3   : > { %v3412_v22 = vand.u32 8388607, %v12282_v10  ;;  %v6257_v23 = vmin.u32 %v3159_v19, %v9668_v11  ;;  %v3252_v35 = vmul.u32 %v3245_v32, %v3236_v53  ;;  %vm3254_vm2 = vc.u32 %v9671_v2, %v9649_v63 }
 0x3c4   : > { %v3078_v30 = vsel %vm9624_vm12, 0, %v3076_v41  ;;  %v9705_v1 = vsel %vm9636_vm15, %v8995_v18, %v2970_v39  ;;  %v3256_v16 = vsel %vm3254_vm2, %v3255_v12, %v9650_v61  ;;  %vm3416_vm8 = vcmp.gt.s32.totalorder %v3415_v25, 0 }
 0x3c5   : > { %v3161_v56 = vclz %v6257_v23  ;;  %v3257_v0 = vadd.s32 %v3256_v16, %v3252_v35  ;;  %v3413_v43 = vor.u32 8388608, %v3412_v22  ;;  %v3417_v7 = vsel %vm3416_vm8, %v3415_v25, 0 }
 0x3c6   : > { %v12283_v32 = vsel %vm9386_vm7, 0, %v9439_v60  ;;  %6760 = vcosq.f32 %v3077_v51  ;;  %v3419_v21 = vand.u32 31, %v3417_v7  ;;  %v3305_v31 = vshrl.u32 %v3304_v5, 23 }
 0x3c7   : > { %v9712_v33 = vadd.s32 3, %v12283_v32  ;;  %v9714_v54 = vadd.s32 3, %v2870_v58  ;;  %6762 = vsinq.f32 %v3077_v51  ;;  %v6258_v53 = vadd.s32 4294967294, %v3161_v56  ;;  %v9716_v61 = vpop.eup %6754 }
 0x3c8   : > { %v3258_v52 = vadd.s32 536870912, %v3257_v0  ;;  %12286 = vst [vmem:[#allocation24_spill] sm:$0xff] %v9716_v61  ;;  %v9718_v12 = vadd.s32 3, %v3078_v30  ;;  %6764 = vcosq.f32 %v9705_v1  ;;  %v3149_v44 = vadd.s32 %v9567_v38, %v9589_v57  ;;  %v9723_v49 = vpop.eup %6756 }
 0x3c9   : > { %12284 = vst [vmem:[#allocation17_spill] sm:$0xff] %v9712_v33  ;;  %12285 = vst [vmem:[#allocation23_spill] sm:$0xff] %v9714_v54  ;;  %v3420_v60 = vsub.s32 32, %v3419_v21  ;;  %vm6259_vm7 = vcmp.lt.s32.totalorder %v6258_v53, 0  ;;  %v9727_v39 = vshll.u32 %v3413_v43, 8  ;;  %v6264_v25 = vadd.s32 4294967169, %v3305_v31 }
 0x3ca   : > { %12287 = vst [vmem:[#allocation25_spill] sm:$0xff] %v9718_v12  ;;  %12288 = vst [vmem:[#allocation26_spill] sm:$0xff] %v9723_v49  ;;  %v9725_v41 = vshrl.u32 %v3258_v52, 30  ;;  %v3164_v10 = vsel %vm6259_vm7, 0, %v6258_v53  ;;  %v3418_v38 = vshrl.u32 %v3417_v7, 5  ;;  %v3422_v57 = vshll.u32 %v12182_v4, %v3419_v21 }
 0x3cb   : > { %v3423_v22 = vshrl.u32 %v12187_v8, %v3420_v60  ;;  %v3426_v58 = vshrl.u32 %v12179_v42, %v3420_v60  ;;  %v3169_v5 = vsub.s32 4294967266, %v3164_v10  ;;  %v9734_v23 = vpop.eup %6758  ;;  %v3425_v35 = vshll.u32 %v12187_v8, %v3419_v21 }
 0x3cc   : > { %v3260_v51 = vshll.u32 %v9725_v41, 30  ;;  %12289 = vst [vmem:[#allocation27_spill] sm:$0xff] %v9734_v23  ;;  %v3428_v30 = vshll.u32 %v12179_v42, %v3419_v21  ;;  %v3429_v16 = vshrl.u32 %v12180_v47, %v3420_v60  ;;  %v3431_v56 = vshll.u32 %v12180_v47, %v3419_v21 }
 0x3cd   : > { %v3170_v43 = vadd.s32 127, %v3169_v5  ;;  %v3432_v31 = vshrl.u32 %v12181_v59, %v3420_v60  ;;  %v3434_v53 = vshll.u32 %v12181_v59, %v3419_v21  ;;  %v3165_v7 = vsub.s32 32, %v3164_v10 }
 0x3ce   : > { %v9740_v32 = vsub.s32 %v3257_v0, %v3260_v51  ;;  %v3424_v52 = vor.u32 %v3423_v22, %v3422_v57  ;;  %v3427_v19 = vor.u32 %v3426_v58, %v3425_v35  ;;  %v3435_v50 = vshrl.u32 %v12191_v17, %v3420_v60 }
 0x3cf   : > { %v3430_v13 = vor.u32 %v3429_v16, %v3428_v30  ;;  %v12290_v33 = vand.u32 2147483647, %v9665_v46  ;;  %v9750_v5 = vadd.f32 %v9148_v36, %v9241_v14  ;;  %v3421_v51 = vshrl.u32 %v12182_v4, %v3420_v60 }
 0x3d0   : > { %v3263_v12 = vsub.s32 0, %v9740_v32  ;;  %v9752_v0 = vpop.eup %6760  ;;  %v3433_v21 = vor.u32 %v3432_v31, %v3431_v56  ;;  %v3436_v20 = vor.u32 %v3435_v50, %v3434_v53  ;;  %v3311_v22 = vadd.s32 1, %v6264_v25 }
 0x3d1   : > { %v3308_v49 = vand.u32 8388607, %v12290_v33  ;;  %12291 = vst [vmem:[#allocation28_spill] sm:$0xff] %v9752_v0  ;;  %v9755_v58 = vpop.eup %6762  ;;  %v3166_v57 = vshll.u32 %v9668_v11, %v3164_v10  ;;  %v3171_v35 = vshll.u32 %v3170_v43, 23  ;;  %vm3437_vm11 = vcmp.lt.s32.totalorder %v3418_v38, 1 }
 0x3d2   : > { %12292 = vst [vmem:[#allocation29_spill] sm:$0xff] %v9755_v58  ;;  %v6261_v30 = vmin.u32 %v3263_v12, %v9740_v32  ;;  %v9759_v33 = vpop.eup %6764  ;;  %v3167_v16 = vshrl.u32 %v3149_v44, %v3165_v7  ;;  %vm3438_vm3 = vcmp.lt.s32.totalorder %v3418_v38, 2  ;;  %vm3440_vm13 = vcmp.lt.s32.totalorder %v3418_v38, 4 }
 0x3d3   : > { %v3445_v36 = vsel %vm3437_vm11, %v3424_v52, %v3427_v19  ;;  %vm3439_vm4 = vcmp.lt.s32.totalorder %v3418_v38, 3  ;;  %v3442_v60 = vsel %vm3440_vm13, %v3430_v13, 2102212464  ;;  %v3446_v50 = vsel %vm3440_vm13, %v3433_v21, 920167782 }
 0x3d4   : > { %v3265_v14 = vclz %v6261_v30  ;;  %v3447_v25 = vsel %vm3439_vm4, %v3430_v13, %v3446_v50  ;;  %v3449_v56 = vsel %vm3437_vm11, %v3427_v19, %v3430_v13  ;;  %v3450_v31 = vsel %vm3440_vm13, %v3436_v20, 1326507024 }
 0x3d5   : > { %vm3312_vm12 = vcmp.gt.s32.totalorder %v3311_v22, 0  ;;  %v3172_v11 = vor.u32 4788187, %v3171_v35  ;;  %v3441_v12 = vsel %vm3437_vm11, %v3421_v51, %v3424_v52  ;;  %v3448_v43 = vsel %vm3438_vm3, %v3445_v36, %v3447_v25  ;;  %v9776_v51 = vpop.permute.xlu1 %2171 }
 0x3d6   : > { %v6262_v10 = vadd.s32 4294967294, %v3265_v14  ;;  %v3443_v44 = vsel %vm3439_vm4, %v3427_v19, %v3442_v60  ;;  %v3451_v53 = vsel %vm3439_vm4, %v3433_v21, %v3450_v31  ;;  %v3168_v30 = vor.u32 %v3167_v16, %v3166_v57 }
 0x3d7   : > { %v9766_v7 = vmul.u32.u64.low %v9727_v39, %v3448_v43  ;;  %v9767_v0 = vmul.u32.u64.high %v9727_v39, %v3448_v43, %v9766_v7  ;;  %v3452_v50 = vsel %vm3438_vm3, %v3449_v56, %v3451_v53  ;;  %v3313_v13 = vsel %vm3312_vm12, %v3311_v22, 0 }
 0x3d8   : > { %vm6263_vm9 = vcmp.lt.s32.totalorder %v6262_v10, 0  ;;  %6766 = vsinq.f32 %v9705_v1  ;;  %v9773_v35 = vmul.u32.u64.low %v9727_v39, %v3452_v50  ;;  %v9774_v52 = vmul.u32.u64.high %v9727_v39, %v3452_v50, %v9773_v35  ;;  %v12294_v1 = vld [vmem:[#allocation10_spill] sm:$0xff] }
 0x3d9   : > { %v3268_v20 = vsel %vm6263_vm9, 0, %v6262_v10  ;;  %v3173_v19 = vand.u32 2147483647, %v3172_v11  ;;  %v3444_v36 = vsel %vm3438_vm3, %v3441_v12, %v3443_v44  ;;  %v3309_v14 = vor.u32 8388608, %v3308_v49 }
 0x3da   : > { %v3273_v21 = vsub.s32 4294967266, %v3268_v20  ;;  %v3463_v57 = vadd.s32 1, %v9767_v0  ;;  %v3315_v16 = vand.u32 31, %v3313_v13  ;;  %v9782_v22 = vadd.f32 %v9269_v37, %v9776_v51 }
 0x3db   : > { %v9786_v60 = vadd.f32 %v12294_v1, %v9776_v51  ;;  %v3175_v25 = vcvt.s32.f32 %v3168_v30  ;;  %v3253_v56 = vadd.s32 %v9649_v63, %v9671_v2  ;;  %v3269_v11 = vsub.s32 32, %v3268_v20 }
 0x3dc   : > { %12293 = vst [vmem:[#allocation30_spill] sm:$0xff] %v9782_v22  ;;  %v3274_v31 = vadd.s32 127, %v3273_v21  ;;  %v3460_v49 = vmul.u32 %v9727_v39, %v3444_v36  ;;  %vm3462_vm2 = vc.u32 %v9774_v52, %v9766_v7  ;;  %v3316_v10 = vsub.s32 32, %v3315_v16 }
 0x3dd   : > { %v3176_v37 = vmul.f32 %v3175_v25, %v3173_v19  ;;  %v3464_v43 = vsel %vm3462_vm2, %v3463_v57, %v9767_v0  ;;  %v9796_v44 = vshll.u32 %v3309_v14, 8  ;;  %vm12111_vm8 = vcmp.lt.s32.totalorder %v9432_v26, 0 }
 0x3de   : > { %v3270_v63 = vshll.u32 %v9740_v32, %v3268_v20  ;;  %v3465_v2 = vadd.s32 %v3464_v43, %v3460_v49  ;;  %v3314_v53 = vshrl.u32 %v3313_v13, 5  ;;  %v3319_v30 = vshrl.u32 %v12187_v8, %v3316_v10 }
 0x3df   : > { %v3275_v39 = vshll.u32 %v3274_v31, 23  ;;  %v3318_v50 = vshll.u32 %v12182_v4, %v3315_v16  ;;  %v3321_v35 = vshll.u32 %v12187_v8, %v3315_v16  ;;  %v3322_v19 = vshrl.u32 %v12179_v42, %v3316_v10 }
 0x3e0   : > { %v3271_v21 = vshrl.u32 %v3253_v56, %v3269_v11  ;;  %v3466_v36 = vadd.s32 536870912, %v3465_v2  ;;  %v3324_v0 = vshll.u32 %v12179_v42, %v3315_v16  ;;  %v3325_v14 = vshrl.u32 %v12180_v47, %v3316_v10 }
 0x3e1   : > { %v12295_v57 = vand.u32 2147483647, %v9432_v26  ;;  %v12296_v32 = vmov 0  ;;  %v3320_v13 = vor.u32 %v3319_v30, %v3318_v50  ;;  %v3323_v20 = vor.u32 %v3322_v19, %v3321_v35 }
 0x3e2   : > { %v3327_v1 = vshll.u32 %v12180_v47, %v3315_v16  ;;  %v3328_v25 = vshrl.u32 %v12181_v59, %v3316_v10  ;;  %v9814_v31 = vpop.eup %6766  ;;  %v9816_v56 = vshrl.u32 %v3466_v36, 30  ;;  %v3326_v11 = vor.u32 %v3325_v14, %v3324_v0 }
 0x3e3   : > { %vm9808_vm7 = vcmp.le.f32.partialorder %v12295_v57, 0.7853982  ;;  %v3330_v49 = vshll.u32 %v12181_v59, %v3315_v16  ;;  %v3331_v43 = vshrl.u32 %v12191_v17, %v3316_v10  ;;  %v3177_v38 = vxor.u32 2147483648, %v3176_v37 }
 0x3e4   : > { %v12297_v32 = vsel %vm9808_vm7, 4294967295, %v12296_v32  ;;  %vm3199_vm11 = vcmp.lt.s32.totalorder %v9256_v29, 0  ;;  %v3276_v57 = vor.u32 4788187, %v3275_v39  ;;  %v3329_v12 = vor.u32 %v3328_v25, %v3327_v1 }
 0x3e5   : > { %12298 = vst [vmem:[#allocation10_spill] sm:$0xff] %v12297_v32  ;;  %vm3333_vm3 = vcmp.lt.s32.totalorder %v3314_v53, 1  ;;  %v3272_v30 = vor.u32 %v3271_v21, %v3270_v63  ;;  %v3468_v50 = vshll.u32 %v9816_v56, 30  ;;  %v3332_v35 = vor.u32 %v3331_v43, %v3330_v49 }
 0x3e6   : > { %vm3336_vm13 = vcmp.lt.s32.totalorder %v3314_v53, 4  ;;  %vm3334_vm4 = vcmp.lt.s32.totalorder %v3314_v53, 2  ;;  %vm3335_vm12 = vcmp.lt.s32.totalorder %v3314_v53, 3  ;;  %v3341_v19 = vsel %vm3333_vm3, %v3320_v13, %v3323_v20 }
 0x3e7   : > { %v3342_v36 = vsel %vm3336_vm13, %v3329_v12, 920167782  ;;  %v9824_v16 = vsub.s32 %v3465_v2, %v3468_v50  ;;  %v3317_v0 = vshrl.u32 %v12182_v4, %v3316_v10  ;;  %v3338_v14 = vsel %vm3336_vm13, %v3326_v11, 2102212464 }
 0x3e8   : > { %v3343_v39 = vsel %vm3335_vm12, %v3326_v11, %v3342_v36  ;;  %v3178_v63 = vsel %vm12111_vm8, %v3177_v38, %v3176_v37  ;;  %v3277_v21 = vand.u32 2147483647, %v3276_v57  ;;  %v3345_v25 = vsel %vm3333_vm3, %v3323_v20, %v3326_v11 }
 0x3e9   : > { %v3344_v1 = vsel %vm3334_vm4, %v3341_v19, %v3343_v39  ;;  %v3279_v49 = vcvt.s32.f32 %v3272_v30  ;;  %v3471_v43 = vsub.s32 0, %v9824_v16  ;;  %v3337_v2 = vsel %vm3333_vm3, %v3317_v0, %v3320_v13 }
 0x3ea   : > { %v3346_v50 = vsel %vm3336_vm13, %v3332_v35, 1326507024  ;;  %v3339_v10 = vsel %vm3335_vm12, %v3323_v20, %v3338_v14  ;;  %v9839_v36 = vmul.u32.u64.low %v9796_v44, %v3344_v1  ;;  %v9840_v23 = vmul.u32.u64.high %v9796_v44, %v3344_v1, %v9839_v36 }
 0x3eb   : > { %v3347_v58 = vsel %vm3335_vm12, %v3329_v12, %v3346_v50  ;;  %v9846_v38 = vsel %vm9808_vm7, %v9432_v26, %v3178_v63  ;;  %vm3407_vm9 = vcmp.lt.s32.totalorder %v9579_v40, 0  ;;  %v6269_v37 = vmin.u32 %v3471_v43, %v9824_v16 }
 0x3ec   : > { %v3348_v13 = vsel %vm3334_vm4, %v3345_v25, %v3347_v58  ;;  %v9853_v20 = vadd.f32 %v9469_v28, %v9776_v51  ;;  %v3280_v12 = vmul.f32 %v3279_v49, %v3277_v21  ;;  %v3512_v30 = vand.u32 2139095040, %v9750_v5 }
 0x3ed   : > { %v9856_v11 = vmul.u32.u64.low %v9796_v44, %v3348_v13  ;;  %v9857_v57 = vmul.u32.u64.high %v9796_v44, %v3348_v13, %v9856_v11  ;;  %v12299_v35 = vsub.s32 4, %v9725_v41  ;;  %v3473_v0 = vclz %v6269_v37 }
 0x3ee   : > { %v3340_v58 = vsel %vm3334_vm4, %v3337_v2, %v3339_v10  ;;  %v3616_v28 = vand.u32 2139095040, %v9782_v22  ;;  %6768 = vcosq.f32 %v9846_v38  ;;  %v3359_v14 = vadd.s32 1, %v9840_v23 }
 0x3ef   : > { %v9865_v19 = vsel %vm3199_vm11, %v12299_v35, %v9725_v41  ;;  %v3513_v39 = vshrl.u32 %v3512_v30, 23  ;;  %v12300_v63 = vand.u32 2147483647, %v9750_v5  ;;  %v6270_v1 = vadd.s32 4294967294, %v3473_v0 }
 0x3f0   : > { %v3491_v25 = vsub.s32 4, %v9816_v56  ;;  %v12090_v49 = vand.u32 2147483647, %v9782_v22  ;;  %v3617_v41 = vshrl.u32 %v3616_v28, 23  ;;  %v3281_v43 = vxor.u32 2147483648, %v3280_v12 }
 0x3f1   : > { %v3516_v21 = vand.u32 8388607, %v12300_v63  ;;  %v3356_v53 = vmul.u32 %v9796_v44, %v3340_v58  ;;  %vm3358_vm2 = vc.u32 %v9857_v57, %v9839_v36  ;;  %v6272_v2 = vadd.s32 4294967169, %v3513_v39 }
 0x3f2   : > { %v3461_v50 = vadd.s32 %v9766_v7, %v9774_v52  ;;  %vm6271_vm3 = vcmp.lt.s32.totalorder %v6270_v1, 0  ;;  %v3360_v10 = vsel %vm3358_vm2, %v3359_v14, %v9840_v23  ;;  %v6276_v37 = vadd.s32 4294967169, %v3617_v41 }
 0x3f3   : > { %v3476_v13 = vsel %vm6271_vm3, 0, %v6270_v1  ;;  %v3361_v11 = vadd.s32 %v3360_v10, %v3356_v53  ;;  %v3517_v30 = vor.u32 8388608, %v3516_v21  ;;  %v3519_v35 = vadd.s32 1, %v6272_v2 }
 0x3f4   : > { %v3477_v0 = vsub.s32 32, %v3476_v13  ;;  %v3481_v28 = vsub.s32 4294967266, %v3476_v13  ;;  %v9883_v44 = vand.u32 8388607, %v12090_v49  ;;  %v3623_v58 = vadd.s32 1, %v6276_v37 }
 0x3f5   : > { %v9887_v39 = vsel %vm3199_vm11, %v3281_v43, %v3280_v12  ;;  %v9892_v23 = vsel %vm3407_vm9, %v3491_v25, %v9816_v56  ;;  %v3362_v7 = vadd.s32 536870912, %v3361_v11  ;;  %vm3520_vm13 = vcmp.gt.s32.totalorder %v3519_v35, 0 }
 0x3f6   : > { %v3479_v52 = vshrl.u32 %v3461_v50, %v3477_v0  ;;  %v3482_v14 = vadd.s32 127, %v3481_v28  ;;  %v3521_v63 = vsel %vm3520_vm13, %v3519_v35, 0  ;;  %vm3624_vm4 = vcmp.gt.s32.totalorder %v3623_v58, 0 }
 0x3f7   : > { %v3478_v21 = vshll.u32 %v9824_v16, %v3476_v13  ;;  %v9895_v1 = vshrl.u32 %v3362_v7, 30  ;;  %v3523_v41 = vand.u32 31, %v3521_v63  ;;  %v3625_v53 = vsel %vm3624_vm4, %v3623_v58, 0 }
 0x3f8   : > { %v3483_v2 = vshll.u32 %v3482_v14, 23  ;;  %v9897_v12 = vshll.u32 %v3517_v30, 8  ;;  %v3621_v43 = vor.u32 8388608, %v9883_v44  ;;  %v9901_v25 = vpop.eup %6768  ;;  %v3522_v37 = vshrl.u32 %v3521_v63, 5 }
 0x3f9   : > { %12301 = vst [vmem:[#allocation31_spill] sm:$0xff] %v9895_v1  ;;  %12302 = vst [vmem:[#allocation32_spill] sm:$0xff] %v9901_v25  ;;  %v3480_v10 = vor.u32 %v3479_v52, %v3478_v21  ;;  %v3364_v50 = vshll.u32 %v9895_v1, 30  ;;  %v3524_v35 = vsub.s32 32, %v3523_v41  ;;  %v3526_v16 = vshll.u32 %v12182_v4, %v3523_v41 }
 0x3fa   : > { %v3484_v0 = vor.u32 4788187, %v3483_v2  ;;  %v3529_v13 = vshll.u32 %v12187_v8, %v3523_v41  ;;  %v9906_v28 = vand.u32 31, %v3625_v53  ;;  %v3532_v7 = vshll.u32 %v12179_v42, %v3523_v41 }
 0x3fb   : > { %v9908_v30 = vsub.s32 %v3361_v11, %v3364_v50  ;;  %v3527_v44 = vshrl.u32 %v12187_v8, %v3524_v35  ;;  %v3530_v58 = vshrl.u32 %v12179_v42, %v3524_v35  ;;  %v3533_v52 = vshrl.u32 %v12180_v47, %v3524_v35 }
 0x3fc   : > { %v3535_v14 = vshll.u32 %v12180_v47, %v3523_v41  ;;  %v3536_v63 = vshrl.u32 %v12181_v59, %v3524_v35  ;;  %v3538_v21 = vshll.u32 %v12181_v59, %v3523_v41  ;;  %v3539_v11 = vshrl.u32 %v12191_v17, %v3524_v35 }
 0x3fd   : > { %v3367_v2 = vsub.s32 0, %v9908_v30  ;;  %v3528_v49 = vor.u32 %v3527_v44, %v3526_v16  ;;  %v3531_v56 = vor.u32 %v3530_v58, %v3529_v13  ;;  %v3487_v50 = vcvt.s32.f32 %v3480_v10 }
 0x3fe   : > { %v3525_v1 = vshrl.u32 %v12182_v4, %v3524_v35  ;;  %v3534_v54 = vor.u32 %v3533_v52, %v3532_v7  ;;  %v3537_v25 = vor.u32 %v3536_v63, %v3535_v14  ;;  %v3485_v32 = vand.u32 2147483647, %v3484_v0 }
 0x3ff   : > { %v6265_v26 = vmin.u32 %v3367_v2, %v9908_v30  ;;  %v3540_v24 = vor.u32 %v3539_v11, %v3538_v21  ;;  %vm3541_vm11 = vcmp.lt.s32.totalorder %v3522_v37, 1  ;;  %vm3542_vm12 = vcmp.lt.s32.totalorder %v3522_v37, 2 }
 0x400   : > { %vm3543_vm2 = vcmp.lt.s32.totalorder %v3522_v37, 3  ;;  %vm3544_vm3 = vcmp.lt.s32.totalorder %v3522_v37, 4  ;;  %v3549_v41 = vsel %vm3541_vm11, %v3528_v49, %v3531_v56  ;;  %v3545_v61 = vsel %vm3541_vm11, %v3525_v1, %v3528_v49 }
 0x401   : > { %v3369_v34 = vclz %v6265_v26  ;;  %v3546_v16 = vsel %vm3544_vm3, %v3534_v54, 2102212464  ;;  %v3550_v13 = vsel %vm3544_vm3, %v3537_v25, 920167782  ;;  %v3553_v35 = vsel %vm3541_vm11, %v3531_v56, %v3534_v54 }
 0x402   : > { %v3547_v44 = vsel %vm3543_vm2, %v3531_v56, %v3546_v16  ;;  %v3551_v10 = vsel %vm3543_vm2, %v3534_v54, %v3550_v13  ;;  %v3554_v58 = vsel %vm3544_vm3, %v3540_v24, 1326507024  ;;  %v9923_v7 = vmul.f32 %v3487_v50, %v3485_v32 }
 0x403   : > { %v3357_v0 = vadd.s32 %v9839_v36, %v9857_v57  ;;  %v6266_v52 = vadd.s32 4294967294, %v3369_v34  ;;  %v3552_v14 = vsel %vm3542_vm12, %v3549_v41, %v3551_v10  ;;  %v3548_v63 = vsel %vm3542_vm12, %v3545_v61, %v3547_v44 }
 0x404   : > { %v3555_v26 = vsel %vm3543_vm2, %v3537_v25, %v3554_v58  ;;  %v9931_v49 = vmul.u32.u64.low %v9897_v12, %v3552_v14  ;;  %v9932_v1 = vmul.u32.u64.high %v9897_v12, %v3552_v14, %v9931_v49  ;;  %v9936_v54 = vshrl.u32 %v3625_v53, 5 }
 0x405   : > { %vm6267_vm13 = vcmp.lt.s32.totalorder %v6266_v52, 0  ;;  %v3556_v24 = vsel %vm3542_vm12, %v3553_v35, %v3555_v26  ;;  %v9938_v32 = vshll.u32 %v3621_v43, 8  ;;  %v3628_v61 = vsub.s32 32, %v9906_v28 }
 0x406   : > { %v3372_v36 = vsel %vm6267_vm13, 0, %v6266_v52  ;;  %v9941_v34 = vmul.u32.u64.low %v9897_v12, %v3556_v24  ;;  %v9942_v57 = vmul.u32.u64.high %v9897_v12, %v3556_v24, %v9941_v34  ;;  %v3489_v56 = vxor.u32 2147483648, %v9923_v7 }
 0x407   : > { %v3373_v25 = vsub.s32 32, %v3372_v36  ;;  %v3377_v21 = vsub.s32 4294967266, %v3372_v36  ;;  %v3564_v2 = vmul.u32 %v9897_v12, %v3548_v63  ;;  %v3374_v37 = vshll.u32 %v9908_v30, %v3372_v36 }
 0x408   : > { %v3567_v53 = vadd.s32 1, %v9932_v1  ;;  %v3630_v43 = vshll.u32 %v12182_v4, %v9906_v28  ;;  %v3631_v11 = vshrl.u32 %v12187_v8, %v3628_v61  ;;  %v3633_v16 = vshll.u32 %v12187_v8, %v9906_v28 }
 0x409   : > { %v3375_v50 = vshrl.u32 %v3357_v0, %v3373_v25  ;;  %v3378_v41 = vadd.s32 127, %v3377_v21  ;;  %v3634_v13 = vshrl.u32 %v12179_v42, %v3628_v61  ;;  %vm3566_vm4 = vc.u32 %v9942_v57, %v9931_v49 }
 0x40a   : > { %v3632_v12 = vor.u32 %v3631_v11, %v3630_v43  ;;  %v3636_v30 = vshll.u32 %v12179_v42, %v9906_v28  ;;  %v3637_v44 = vshrl.u32 %v12180_v47, %v3628_v61  ;;  %v3568_v58 = vsel %vm3566_vm4, %v3567_v53, %v9932_v1 }
 0x40b   : > { %v3376_v10 = vor.u32 %v3375_v50, %v3374_v37  ;;  %v3379_v35 = vshll.u32 %v3378_v41, 23  ;;  %v3635_v0 = vor.u32 %v3634_v13, %v3633_v16  ;;  %v3569_v52 = vadd.s32 %v3568_v58, %v3564_v2 }
 0x40c   : > { %v3638_v14 = vor.u32 %v3637_v44, %v3636_v30  ;;  %v3639_v63 = vshll.u32 %v12180_v47, %v9906_v28  ;;  %v3640_v26 = vshrl.u32 %v12181_v59, %v3628_v61  ;;  %v12303_v24 = vand.u32 2147483647, %v9256_v29 }
 0x40d   : > { %v3380_v34 = vor.u32 4788187, %v3379_v35  ;;  %v3629_v25 = vshrl.u32 %v12182_v4, %v3628_v61  ;;  %v3642_v1 = vshll.u32 %v12181_v59, %v9906_v28  ;;  %v3643_v21 = vshrl.u32 %v12191_v17, %v3628_v61 }
 0x40e   : > { %vm9966_vm11 = vcmp.le.f32.partialorder %v12303_v24, 0.7853982  ;;  %v12306_v2 = vand.u32 2147483647, %v9579_v40  ;;  %v3383_v53 = vcvt.s32.f32 %v3376_v10  ;;  %v3570_v43 = vadd.s32 536870912, %v3569_v52 }
 0x40f   : > { %v3641_v11 = vor.u32 %v3640_v26, %v3639_v63  ;;  %vm3645_vm2 = vcmp.lt.s32.totalorder %v9936_v54, 1  ;;  %v3381_v50 = vand.u32 2147483647, %v3380_v34  ;;  %v3644_v41 = vor.u32 %v3643_v21, %v3642_v1 }
 0x410   : > { %vm9976_vm12 = vcmp.le.f32.partialorder %v12306_v2, 0.7853982  ;;  %vm3647_vm3 = vcmp.lt.s32.totalorder %v9936_v54, 3  ;;  %vm3648_vm13 = vcmp.lt.s32.totalorder %v9936_v54, 4  ;;  %vm12104_vm4 = vcmp.lt.s32.totalorder %v9665_v46, 0 }
 0x411   : > { %v9984_v28 = vshrl.u32 %v3570_v43, 30  ;;  %v3649_v61 = vsel %vm3645_vm2, %v3629_v25, %v3632_v12  ;;  %v3650_v16 = vsel %vm3648_vm13, %v3638_v14, 2102212464  ;;  %v3653_v13 = vsel %vm3645_vm2, %v3632_v12, %v3635_v0 }
 0x412   : > { %v3384_v30 = vmul.f32 %v3383_v53, %v3381_v50  ;;  %v3651_v44 = vsel %vm3647_vm3, %v3635_v0, %v3650_v16  ;;  %v3654_v10 = vsel %vm3648_vm13, %v3641_v11, 920167782  ;;  %v3657_v35 = vsel %vm3645_vm2, %v3635_v0, %v3638_v14 }
 0x413   : > { %v3572_v58 = vshll.u32 %v9984_v28, 30  ;;  %vm3646_vm6 = vcmp.lt.s32.totalorder %v9936_v54, 2  ;;  %v3655_v63 = vsel %vm3647_vm3, %v3638_v14, %v3654_v10  ;;  %v3658_v26 = vsel %vm3648_vm13, %v3644_v41, 1326507024 }
 0x414   : > { %v3490_v24 = vsel %vm3407_vm9, %v3489_v56, %v9923_v7  ;;  %v3652_v34 = vsel %vm3646_vm6, %v3649_v61, %v3651_v44  ;;  %v3656_v12 = vsel %vm3646_vm6, %v3653_v13, %v3655_v63  ;;  %v3659_v25 = vsel %vm3647_vm3, %v3641_v11, %v3658_v26 }
 0x415   : > { %v9997_v1 = vsub.s32 %v3569_v52, %v3572_v58  ;;  %v3660_v0 = vsel %vm3646_vm6, %v3657_v35, %v3659_v25  ;;  %v10000_v21 = vmul.u32.u64.low %v9938_v32, %v3656_v12  ;;  %v10001_v2 = vmul.u32.u64.high %v9938_v32, %v3656_v12, %v10000_v21 }
 0x416   : > { %v3385_v53 = vxor.u32 2147483648, %v3384_v30  ;;  %v10004_v14 = vmul.u32.u64.low %v9938_v32, %v3660_v0  ;;  %v10005_v43 = vmul.u32.u64.high %v9938_v32, %v3660_v0, %v10004_v14  ;;  %v3824_v50 = vand.u32 2139095040, %v9786_v60 }
 0x417   : > { %6770 = vsinq.f32 %v9846_v38  ;;  %v3286_v7 = vsel %vm9966_vm11, 0, %v9865_v19  ;;  %v12309_v54 = vand.u32 2147483647, %v9665_v46  ;;  %v3575_v52 = vsub.s32 0, %v9997_v1 }
 0x418   : > { %v3285_v11 = vsel %vm9966_vm11, %v9256_v29, %v9887_v39  ;;  %v3494_v38 = vsel %vm9976_vm12, 0, %v9892_v23  ;;  %v3825_v41 = vshrl.u32 %v3824_v50, 23  ;;  %v3720_v19 = vand.u32 2139095040, %v9853_v20 }
 0x419   : > { %vm10014_vm6 = vcmp.le.f32.partialorder %v12309_v54, 0.7853982  ;;  %v3493_v61 = vsel %vm9976_vm12, %v9579_v40, %v3490_v24  ;;  %v6273_v16 = vmin.u32 %v3575_v52, %v9997_v1  ;;  %v3668_v13 = vmul.u32 %v9938_v32, %v3652_v34 }
 0x41a   : > { %v3671_v44 = vadd.s32 1, %v10001_v2  ;;  %v3386_v39 = vsel %vm12104_vm4, %v3385_v53, %v3384_v30  ;;  %vm3670_vm9 = vc.u32 %v10005_v43, %v10000_v21  ;;  %v6284_v36 = vadd.s32 4294967169, %v3825_v41 }
 0x41b   : > { %v12312_v23 = vand.u32 2147483647, %v9786_v60  ;;  %6772 = vcosq.f32 %v3285_v11  ;;  %v3577_v35 = vclz %v6273_v16  ;;  %v3721_v58 = vshrl.u32 %v3720_v19, 23 }
 0x41c   : > { %v3672_v37 = vsel %vm3670_vm9, %v3671_v44, %v10001_v2  ;;  %6774 = vsinq.f32 %v3285_v11  ;;  %v10039_v63 = vadd.s32 3, %v3286_v7  ;;  %v3831_v26 = vadd.s32 1, %v6284_v36 }
 0x41d   : > { %v3828_v10 = vand.u32 8388607, %v12312_v23  ;;  %v3673_v32 = vadd.s32 %v3672_v37, %v3668_v13  ;;  %6776 = vcosq.f32 %v3493_v61  ;;  %v10041_v24 = vadd.s32 3, %v3494_v38 }
 0x41e   : > { %v3389_v30 = vsel %vm10014_vm6, %v9665_v46, %v3386_v39  ;;  %v6274_v34 = vadd.s32 4294967294, %v3577_v35  ;;  %6778 = vsinq.f32 %v3493_v61  ;;  %vm3832_vm11 = vcmp.gt.s32.totalorder %v3831_v26, 0 }
 0x41f   : > { %12313 = vst [vmem:[#allocation33_spill] sm:$0xff] %v10041_v24  ;;  %v3674_v12 = vadd.s32 536870912, %v3673_v32  ;;  %v3829_v25 = vor.u32 8388608, %v3828_v10  ;;  %v3833_v0 = vsel %vm3832_vm11, %v3831_v26, 0  ;;  %v12102_v2 = vand.u32 2147483647, %v9853_v20 }
 0x420   : > { %vm6275_vm12 = vcmp.lt.s32.totalorder %v6274_v34, 0  ;;  %v6280_v53 = vadd.s32 4294967169, %v3721_v58  ;;  %6780 = vcosq.f32 %v3389_v30  ;;  %v3835_v7 = vand.u32 31, %v3833_v0 }
 0x421   : > { %v3580_v14 = vsel %vm6275_vm12, 0, %v6274_v34  ;;  %v10047_v50 = vshrl.u32 %v3674_v12, 30  ;;  %v10049_v54 = vpop.eup %6770  ;;  %6782 = vsinq.f32 %v3389_v30  ;;  %v3565_v52 = vadd.s32 %v9931_v49, %v9942_v57 }
 0x422   : > { %v3581_v11 = vsub.s32 32, %v3580_v14  ;;  %v3585_v38 = vsub.s32 4294967266, %v3580_v14  ;;  %v10054_v41 = vadd.s32 %v10000_v21, %v10005_v43  ;;  %v3836_v61 = vsub.s32 32, %v3835_v7 }
 0x423   : > { %v3676_v19 = vshll.u32 %v10047_v50, 30  ;;  %v10057_v16 = vshll.u32 %v3829_v25, 8  ;;  %v10061_v39 = vand.u32 8388607, %v12102_v2  ;;  %v3727_v36 = vadd.s32 1, %v6280_v53 }
 0x424   : > { %v3583_v13 = vshrl.u32 %v3565_v52, %v3581_v11  ;;  %v3586_v44 = vadd.s32 127, %v3585_v38  ;;  %v3582_v23 = vshll.u32 %v9997_v1, %v3580_v14  ;;  %v3834_v57 = vshrl.u32 %v3833_v0, 5 }
 0x425   : > { %v10064_v49 = vsub.s32 %v3673_v32, %v3676_v19  ;;  %v3839_v21 = vshrl.u32 %v12187_v8, %v3836_v61  ;;  %v10067_v43 = vpop.eup %6772  ;;  %v3838_v35 = vshll.u32 %v12182_v4, %v3835_v7  ;;  %v3841_v37 = vshll.u32 %v12187_v8, %v3835_v7 }
 0x426   : > { %12314 = vst [vmem:[#allocation34_spill] sm:$0xff] %v10067_v43  ;;  %v3587_v10 = vshll.u32 %v3586_v44, 23  ;;  %v3842_v58 = vshrl.u32 %v12179_v42, %v3836_v61  ;;  %v10072_v26 = vpop.eup %6774  ;;  %v3584_v30 = vor.u32 %v3583_v13, %v3582_v23  ;;  %v3844_v1 = vshll.u32 %v12179_v42, %v3835_v7 }
 0x427   : > { %v3679_v34 = vsub.s32 0, %v10064_v49  ;;  %v3845_v32 = vshrl.u32 %v12180_v47, %v3836_v61  ;;  %v10077_v12 = vpop.eup %6776  ;;  %v3840_v0 = vor.u32 %v3839_v21, %v3838_v35  ;;  %vm3728_vm2 = vcmp.gt.s32.totalorder %v3727_v36, 0 }
 0x428   : > { %12315 = vst [vmem:[#allocation35_spill] sm:$0xff] %v10077_v12  ;;  %v3588_v25 = vor.u32 4788187, %v3587_v10  ;;  %v3843_v53 = vor.u32 %v3842_v58, %v3841_v37  ;;  %v10079_v14 = vpop.eup %6778  ;;  %v3847_v38 = vshll.u32 %v12180_v47, %v3835_v7  ;;  %v3848_v19 = vshrl.u32 %v12181_v59, %v3836_v61 }
 0x429   : > { %12316 = vst [vmem:[#allocation36_spill] sm:$0xff] %v10079_v14  ;;  %v6277_v52 = vmin.u32 %v3679_v34, %v10064_v49  ;;  %v3846_v11 = vor.u32 %v3845_v32, %v3844_v1  ;;  %v3837_v44 = vshrl.u32 %v12182_v4, %v3836_v61  ;;  %v3850_v23 = vshll.u32 %v12181_v59, %v3835_v7 }
 0x42a   : > { %v3589_v13 = vand.u32 2147483647, %v3588_v25  ;;  %v3851_v2 = vshrl.u32 %v12191_v17, %v3836_v61  ;;  %v10087_v10 = vpop.eup %6780  ;;  %v3591_v21 = vcvt.s32.f32 %v3584_v30  ;;  %v3849_v37 = vor.u32 %v3848_v19, %v3847_v38 }
 0x42b   : > { %v3681_v35 = vclz %v6277_v52  ;;  %vm3856_vm3 = vcmp.lt.s32.totalorder %v3834_v57, 4  ;;  %v10089_v58 = vpop.eup %6782  ;;  %vm3853_vm13 = vcmp.lt.s32.totalorder %v3834_v57, 1  ;;  %vm3855_vm9 = vcmp.lt.s32.totalorder %v3834_v57, 3 }
 0x42c   : > { %v3852_v34 = vor.u32 %v3851_v2, %v3850_v23  ;;  %v3858_v1 = vsel %vm3856_vm3, %v3846_v11, 2102212464  ;;  %vm12110_vm11 = vcmp.lt.s32.totalorder %v9750_v5, 0  ;;  %v3592_v32 = vmul.f32 %v3591_v21, %v3589_v13  ;;  %v12317_v21 = vld [vmem:[#allocation6_spill] sm:$0xff] }
 0x42d   : > { %v6278_v25 = vadd.s32 4294967294, %v3681_v35  ;;  %v3861_v7 = vsel %vm3853_vm13, %v3840_v0, %v3843_v53  ;;  %v3862_v61 = vsel %vm3856_vm3, %v3849_v37, 920167782  ;;  %vm3854_vm12 = vcmp.lt.s32.totalorder %v3834_v57, 2 }
 0x42e   : > { %v3857_v40 = vsel %vm3853_vm13, %v3837_v44, %v3840_v0  ;;  %v3859_v30 = vsel %vm3855_vm9, %v3843_v53, %v3858_v1  ;;  %v3863_v52 = vsel %vm3855_vm9, %v3846_v11, %v3862_v61  ;;  %v3865_v38 = vsel %vm3853_vm13, %v3843_v53, %v3846_v11 }
 0x42f   : > { %vm6279_vm4 = vcmp.lt.s32.totalorder %v6278_v25, 0  ;;  %v3864_v2 = vsel %vm3854_vm12, %v3861_v7, %v3863_v52  ;;  %v3866_v19 = vsel %vm3856_vm3, %v3852_v34, 1326507024  ;;  %v10101_v13 = vadd.f32 %v9548_v3, %v9776_v51 }
 0x430   : > { %v3684_v23 = vsel %vm6279_vm4, 0, %v6278_v25  ;;  %v3867_v12 = vsel %vm3855_vm9, %v3849_v37, %v3866_v19  ;;  %v3593_v0 = vxor.u32 2147483648, %v3592_v32  ;;  %v3729_v61 = vsel %vm3728_vm2, %v3727_v36, 0 }
 0x431   : > { %v3685_v44 = vsub.s32 32, %v3684_v23  ;;  %v3689_v1 = vsub.s32 4294967266, %v3684_v23  ;;  %v3860_v14 = vsel %vm3854_vm12, %v3857_v40, %v3859_v30  ;;  %v3868_v53 = vsel %vm3854_vm12, %v3865_v38, %v3867_v12 }
 0x432   : > { %v10108_v11 = vmul.u32.u64.low %v10057_v16, %v3864_v2  ;;  %v10109_v34 = vmul.u32.u64.high %v10057_v16, %v3864_v2, %v10108_v11  ;;  %v12318_v37 = vand.u32 2147483647, %v9750_v5  ;;  %vm3615_vm3 = vcmp.lt.s32.totalorder %v9782_v22, 0 }
 0x433   : > { %v3686_v51 = vshll.u32 %v10064_v49, %v3684_v23  ;;  %v3687_v36 = vshrl.u32 %v10054_v41, %v3685_v44  ;;  %v3690_v40 = vadd.s32 127, %v3689_v1  ;;  %v3725_v57 = vor.u32 8388608, %v10061_v39 }
 0x434   : > { %vm10114_vm4 = vcmp.le.f32.partialorder %v12318_v37, 0.7853982  ;;  %v10123_v12 = vmul.u32.u64.low %v10057_v16, %v3868_v53  ;;  %v10124_v25 = vmul.u32.u64.high %v10057_v16, %v3868_v53, %v10123_v12  ;;  %v3731_v7 = vand.u32 31, %v3729_v61 }
 0x435   : > { %v3688_v52 = vor.u32 %v3687_v36, %v3686_v51  ;;  %v3691_v2 = vshll.u32 %v3690_v40, 23  ;;  %v3699_v38 = vsub.s32 4, %v10047_v50  ;;  %v3876_v19 = vmul.u32 %v10057_v16, %v3860_v14 }
 0x436   : > { %v3594_v49 = vsel %vm12110_vm11, %v3593_v0, %v3592_v32  ;;  %v3879_v41 = vadd.s32 1, %v10109_v34  ;;  %v3730_v23 = vshrl.u32 %v3729_v61, 5  ;;  %v3732_v39 = vsub.s32 32, %v3731_v7 }
 0x437   : > { %v3692_v44 = vor.u32 4788187, %v3691_v2  ;;  %v3695_v1 = vcvt.s32.f32 %v3688_v52  ;;  %v3734_v53 = vshll.u32 %v12182_v4, %v3731_v7  ;;  %v3737_v37 = vshll.u32 %v12187_v8, %v3731_v7 }
 0x438   : > { %v12321_v51 = vand.u32 2147483647, %v9782_v22  ;;  %vm3878_vm13 = vc.u32 %v10124_v25, %v10108_v11  ;;  %v3735_v16 = vshrl.u32 %v12187_v8, %v3732_v39  ;;  %v3740_v14 = vshll.u32 %v12179_v42, %v3731_v7 }
 0x439   : > { %v3743_v32 = vshll.u32 %v12180_v47, %v3731_v7  ;;  %v3693_v0 = vand.u32 2147483647, %v3692_v44  ;;  %v3880_v61 = vsel %vm3878_vm13, %v3879_v41, %v10109_v34  ;;  %v3738_v40 = vshrl.u32 %v12179_v42, %v3732_v39 }
 0x43a   : > { %vm10136_vm2 = vcmp.le.f32.partialorder %v12321_v51, 0.7853982  ;;  %v3741_v12 = vshrl.u32 %v12180_v47, %v3732_v39  ;;  %v3881_v52 = vadd.s32 %v3880_v61, %v3876_v19  ;;  %v3736_v2 = vor.u32 %v3735_v16, %v3734_v53 }
 0x43b   : > { %v3744_v51 = vshrl.u32 %v12181_v59, %v3732_v39  ;;  %v3746_v30 = vshll.u32 %v12181_v59, %v3731_v7  ;;  %v3696_v35 = vmul.f32 %v3695_v1, %v3693_v0  ;;  %v3739_v24 = vor.u32 %v3738_v40, %v3737_v37 }
 0x43c   : > { %v3742_v29 = vor.u32 %v3741_v12, %v3740_v14  ;;  %v3747_v43 = vshrl.u32 %v12191_v17, %v3732_v39  ;;  %v3597_v44 = vsel %vm10114_vm4, %v9750_v5, %v3594_v49  ;;  %v10157_v34 = vsel %vm3615_vm3, %v3699_v38, %v10047_v50 }
 0x43d   : > { %v3882_v19 = vadd.s32 536870912, %v3881_v52  ;;  %v3745_v41 = vor.u32 %v3744_v51, %v3743_v32  ;;  %vm3749_vm9 = vcmp.lt.s32.totalorder %v3730_v23, 1  ;;  %vm3752_vm12 = vcmp.lt.s32.totalorder %v3730_v23, 4 }
 0x43e   : > { %v3748_v53 = vor.u32 %v3747_v43, %v3746_v30  ;;  %v3765_v7 = vshll.u32 %v3725_v57, 8  ;;  %vm3823_vm13 = vcmp.lt.s32.totalorder %v9786_v60, 0  ;;  %vm3751_vm11 = vcmp.lt.s32.totalorder %v3730_v23, 3 }
 0x43f   : > { %v3883_v1 = vshrl.u32 %v3882_v19, 30  ;;  %v3757_v37 = vsel %vm3749_vm9, %v3736_v2, %v3739_v24  ;;  %v3758_v16 = vsel %vm3752_vm12, %v3745_v41, 920167782  ;;  %v3697_v49 = vxor.u32 2147483648, %v3696_v35 }
 0x440   : > { %vm3750_vm8 = vcmp.lt.s32.totalorder %v3730_v23, 2  ;;  %v3754_v14 = vsel %vm3752_vm12, %v3742_v29, 2102212464  ;;  %v3759_v50 = vsel %vm3751_vm11, %v3742_v29, %v3758_v16  ;;  %v3733_v43 = vshrl.u32 %v12182_v4, %v3732_v39 }
 0x441   : > { %v3884_v38 = vshll.u32 %v3883_v1, 30  ;;  %v3760_v30 = vsel %vm3750_vm8, %v3757_v37, %v3759_v50  ;;  %v3761_v57 = vsel %vm3749_vm9, %v3739_v24, %v3742_v29  ;;  %v3762_v0 = vsel %vm3752_vm12, %v3748_v53, 1326507024 }
 0x442   : > { %v10171_v61 = vmul.u32.u64.low %v3765_v7, %v3760_v30  ;;  %v10172_v40 = vmul.u32.u64.high %v3765_v7, %v3760_v30, %v10171_v61  ;;  %v12324_v12 = vand.u32 2147483647, %v9786_v60  ;;  %v3753_v19 = vsel %vm3749_vm9, %v3733_v43, %v3736_v2 }
 0x443   : > { %v10180_v39 = vsub.s32 %v3881_v52, %v3884_v38  ;;  %v3755_v29 = vsel %vm3751_vm11, %v3739_v24, %v3754_v14  ;;  %v3763_v37 = vsel %vm3751_vm11, %v3745_v41, %v3762_v0  ;;  %6784 = vcosq.f32 %v3597_v44 }
 0x444   : > { %vm10176_vm10 = vcmp.le.f32.partialorder %v12324_v12, 0.7853982  ;;  %v3698_v53 = vsel %vm3615_vm3, %v3697_v49, %v3696_v35  ;;  %v3907_v16 = vsub.s32 4, %v3883_v1  ;;  %v3764_v50 = vsel %vm3750_vm8, %v3761_v57, %v3763_v37 }
 0x445   : > { %6786 = vsinq.f32 %v3597_v44  ;;  %v3887_v30 = vsub.s32 0, %v10180_v39  ;;  %v10189_v12 = vmul.u32.u64.low %v3765_v7, %v3764_v50  ;;  %v10190_v32 = vmul.u32.u64.high %v3765_v7, %v3764_v50, %v10189_v12 }
 0x446   : > { %v3756_v52 = vsel %vm3750_vm8, %v3753_v19, %v3755_v29  ;;  %v3775_v2 = vadd.s32 1, %v10172_v40  ;;  %v3928_v24 = vand.u32 2139095040, %v10101_v13  ;;  %v12327_v41 = vsub.s32 4, %v12317_v21 }
 0x447   : > { %v3701_v44 = vsel %vm10136_vm2, %v9782_v22, %v3698_v53  ;;  %v3877_v49 = vadd.s32 %v10108_v11, %v10124_v25  ;;  %v6285_v23 = vmin.u32 %v3887_v30, %v10180_v39  ;;  %v10210_v38 = vsel %vm3823_vm13, %v3907_v16, %v3883_v1 }
 0x448   : > { %v2556_v35 = vsel %vm2471_vm5, %v12327_v41, %v12317_v21  ;;  %v3929_v43 = vshrl.u32 %v3928_v24, 23  ;;  %v12328_v57 = vand.u32 2147483647, %v10101_v13  ;;  %v3772_v29 = vmul.u32 %v3765_v7, %v3756_v52 }
 0x449   : > { %v2558_v14 = vsel %vm9369_vm1, 0, %v2556_v35  ;;  %v3889_v19 = vclz %v6285_v23  ;;  %vm3774_vm5 = vc.u32 %v10190_v32, %v10171_v61  ;;  %v2971_v11 = vsub.s32 4, %v9488_v15 }
 0x44a   : > { %v3932_v21 = vand.u32 8388607, %v12328_v57  ;;  %v2562_v0 = vadd.s32 3, %v2558_v14  ;;  %v3776_v25 = vsel %vm3774_vm5, %v3775_v2, %v10172_v40  ;;  %v6288_v37 = vadd.s32 4294967169, %v3929_v43 }
 0x44b   : > { %v2566_v53 = vxor.u32 2147483648, %v9499_v27  ;;  %6788 = vcosq.f32 %v3701_v44  ;;  %v6286_v1 = vadd.s32 4294967294, %v3889_v19  ;;  %v3777_v16 = vadd.s32 %v3776_v25, %v3772_v29 }
 0x44c   : > { %v2563_v55 = vand.u32 3, %v2562_v0  ;;  %v2569_v50 = vxor.u32 2147483648, %v9491_v45  ;;  %6790 = vsinq.f32 %v3701_v44  ;;  %v3933_v30 = vor.u32 8388608, %v3932_v21 }
 0x44d   : > { %v3935_v12 = vadd.s32 1, %v6288_v37  ;;  %vm6287_vm1 = vcmp.lt.s32.totalorder %v6286_v1, 0  ;;  %v3778_v52 = vadd.s32 536870912, %v3777_v16  ;;  %v2972_v40 = vsel %vm2887_vm14, %v2971_v11, %v9488_v15  ;;  %v10225_v2 = vpop.eup %6784 }
 0x44e   : > { %vm2565_vm8 = vcmp.eq.s32.totalorder %v2563_v55, 0  ;;  %v3892_v24 = vsel %vm6287_vm1, 0, %v6286_v1  ;;  %vm2568_vm3 = vcmp.eq.s32.totalorder %v2563_v55, 2  ;;  %v10234_v57 = vadd.s32 %v10171_v61, %v10190_v32 }
 0x44f   : > { %vm3936_vm11 = vcmp.gt.s32.totalorder %v3935_v12, 0  ;;  %v2567_v41 = vsel %vm2565_vm8, %v9491_v45, %v2566_v53  ;;  %v10228_v35 = vpop.eup %6786  ;;  %v3893_v44 = vsub.s32 32, %v3892_v24  ;;  %v3897_v23 = vsub.s32 4294967266, %v3892_v24 }
 0x450   : > { %v10230_v14 = vshrl.u32 %v3778_v52, 30  ;;  %v2570_v43 = vsel %vm2568_vm3, %v2569_v50, %v9499_v27  ;;  %v3937_v21 = vsel %vm3936_vm11, %v3935_v12, 0  ;;  %vm2564_vm14 = vcmp.lt.s32.totalorder %v2563_v55, 2 }
 0x451   : > { %v2974_v15 = vsel %vm9636_vm15, 0, %v2972_v40  ;;  %v3894_v0 = vshll.u32 %v10180_v39, %v3892_v24  ;;  %v3895_v45 = vshrl.u32 %v3877_v49, %v3893_v44  ;;  %v3898_v19 = vadd.s32 127, %v3897_v23 }
 0x452   : > { %v3780_v29 = vshll.u32 %v10230_v14, 30  ;;  %v3939_v11 = vand.u32 31, %v3937_v21  ;;  %v10240_v25 = vshll.u32 %v3933_v30, 8  ;;  %v10242_v37 = vsel %vm2564_vm14, %v2567_v41, %v2570_v43 }
 0x453   : > { %v3896_v32 = vor.u32 %v3895_v45, %v3894_v0  ;;  %v3899_v61 = vshll.u32 %v3898_v19, 23  ;;  %v2978_v55 = vadd.s32 3, %v2974_v15  ;;  %v3938_v48 = vshrl.u32 %v3937_v21, 5 }
 0x454   : > { %v10245_v53 = vsub.s32 %v3777_v16, %v3780_v29  ;;  %v3940_v1 = vsub.s32 32, %v3939_v11  ;;  %v3942_v39 = vshll.u32 %v12182_v4, %v3939_v11  ;;  %v3945_v49 = vshll.u32 %v12187_v8, %v3939_v11 }
 0x455   : > { %v10249_v50 = vpop.eup %6788  ;;  %v3900_v12 = vor.u32 4788187, %v3899_v61  ;;  %v3903_v30 = vcvt.s32.f32 %v3896_v32  ;;  %v3948_v40 = vshll.u32 %v12179_v42, %v3939_v11  ;;  %v3951_v23 = vshll.u32 %v12180_v47, %v3939_v11 }
 0x456   : > { %v3783_v52 = vsub.s32 0, %v10245_v53  ;;  %v10253_v24 = vpop.eup %6790  ;;  %v3943_v16 = vshrl.u32 %v12187_v8, %v3940_v1  ;;  %v3946_v41 = vshrl.u32 %v12179_v42, %v3940_v1  ;;  %v3949_v44 = vshrl.u32 %v12180_v47, %v3940_v1 }
 0x457   : > { %v3901_v43 = vand.u32 2147483647, %v3900_v12  ;;  %v3952_v15 = vshrl.u32 %v12181_v59, %v3940_v1  ;;  %v3954_v0 = vshll.u32 %v12181_v59, %v3939_v11  ;;  %v3955_v32 = vshrl.u32 %v12191_v17, %v3940_v1  ;;  %v12329_v12 = vld [vmem:[#allocation5_spill] sm:$0xff] }
 0x458   : > { %v6281_v21 = vmin.u32 %v3783_v52, %v10245_v53  ;;  %v3944_v45 = vor.u32 %v3943_v16, %v3942_v39  ;;  %v3947_v19 = vor.u32 %v3946_v41, %v3945_v49  ;;  %v3950_v29 = vor.u32 %v3949_v44, %v3948_v40 }
 0x459   : > { %v3953_v7 = vor.u32 %v3952_v15, %v3951_v23  ;;  %v2979_v27 = vand.u32 3, %v2978_v55  ;;  %v2985_v42 = vxor.u32 2147483648, %v9759_v33  ;;  %v3904_v8 = vmul.f32 %v3903_v30, %v3901_v43 }
 0x45a   : > { %v3785_v61 = vclz %v6281_v21  ;;  %v3956_v22 = vor.u32 %v3955_v32, %v3954_v0  ;;  %vm3957_vm15 = vcmp.lt.s32.totalorder %v3938_v48, 1  ;;  %v2763_v47 = vsub.s32 4, %v12329_v12 }
 0x45b   : > { %vm3959_vm9 = vcmp.lt.s32.totalorder %v3938_v48, 3  ;;  %vm3960_vm12 = vcmp.lt.s32.totalorder %v3938_v48, 4  ;;  %v3965_v11 = vsel %vm3957_vm15, %v3944_v45, %v3947_v19  ;;  %vm2561_vm5 = vweird.f32 %v8906_v9 }
 0x45c   : > { %v6282_v52 = vadd.s32 4294967294, %v3785_v61  ;;  %v3941_v39 = vshrl.u32 %v12182_v4, %v3940_v1  ;;  %v3962_v49 = vsel %vm3960_vm12, %v3950_v29, 2102212464  ;;  %v3966_v40 = vsel %vm3960_vm12, %v3953_v7, 920167782 }
 0x45d   : > { %v3970_v16 = vsel %vm3960_vm12, %v3956_v22, 1326507024  ;;  %vm3958_vm8 = vcmp.lt.s32.totalorder %v3938_v48, 2  ;;  %v3967_v55 = vsel %vm3959_vm9, %v3950_v29, %v3966_v40  ;;  %v3969_v30 = vsel %vm3957_vm15, %v3947_v19, %v3950_v29 }
 0x45e   : > { %vm6283_vm1 = vcmp.lt.s32.totalorder %v6282_v52, 0  ;;  %vm2977_vm11 = vweird.f32 %v8995_v18  ;;  %v3961_v44 = vsel %vm3957_vm15, %v3941_v39, %v3944_v45  ;;  %v3968_v23 = vsel %vm3958_vm8, %v3965_v11, %v3967_v55 }
 0x45f   : > { %v3788_v41 = vsel %vm6283_vm1, 0, %v6282_v52  ;;  %v3971_v43 = vsel %vm3959_vm9, %v3953_v7, %v3970_v16  ;;  %v3905_v21 = vxor.u32 2147483648, %v3904_v8  ;;  %v3963_v22 = vsel %vm3959_vm9, %v3947_v19, %v3962_v49 }
 0x460   : > { %v3789_v1 = vsub.s32 32, %v3788_v41  ;;  %v3793_v15 = vsub.s32 4294967266, %v3788_v41  ;;  %v3790_v0 = vshll.u32 %v10245_v53, %v3788_v41  ;;  %v3972_v32 = vsel %vm3958_vm8, %v3969_v30, %v3971_v43 }
 0x461   : > { %v10278_v29 = vmul.u32.u64.low %v10240_v25, %v3968_v23  ;;  %v10279_v61 = vmul.u32.u64.high %v10240_v25, %v3968_v23, %v10278_v29  ;;  %v10284_v11 = vmul.u32.u64.low %v10240_v25, %v3972_v32  ;;  %v10285_v7 = vmul.u32.u64.high %v10240_v25, %v3972_v32, %v10284_v11  ;;  %v12337_v32 = vld [vmem:[#allocation20_spill] sm:$0xff] }
 0x462   : > { %v3791_v45 = vshrl.u32 %v10234_v57, %v3789_v1  ;;  %v3794_v52 = vadd.s32 127, %v3793_v15  ;;  %v3964_v39 = vsel %vm3958_vm8, %v3961_v44, %v3963_v22  ;;  %vm2980_vm3 = vcmp.lt.s32.totalorder %v2979_v27, 2  ;;  %v12336_v15 = vld [vmem:[#allocation22_spill] sm:$0xff] }
 0x463   : > { %vm2981_vm14 = vcmp.eq.s32.totalorder %v2979_v27, 0  ;;  %vm2984_vm15 = vcmp.eq.s32.totalorder %v2979_v27, 2  ;;  %v12330_v49 = vxor.u32 2147483648, %v9814_v31  ;;  %vm3719_vm9 = vcmp.lt.s32.totalorder %v9853_v20, 0 }
 0x464   : > { %v3792_v53 = vor.u32 %v3791_v45, %v3790_v0  ;;  %v3795_v19 = vshll.u32 %v3794_v52, 23  ;;  %v2986_v16 = vsel %vm2984_vm15, %v2985_v42, %v9814_v31  ;;  %v3983_v57 = vadd.s32 1, %v10279_v61  ;;  %v12338_v45 = vld [vmem:[#allocation7_spill] sm:$0xff] }
 0x465   : > { %v2983_v40 = vsel %vm2981_vm14, %v9759_v33, %v12330_v49  ;;  %v2572_v48 = vsel %vm2561_vm5, nan, %v10242_v37  ;;  %vm12331_vm12 = vcmp.lt.s32.totalorder %v9012_v6, 0  ;;  %v3906_v30 = vsel %vm3823_vm13, %v3905_v21, %v3904_v8  ;;  %v12335_v21 = vld [vmem:[#allocation24_spill] sm:$0xff] }
 0x466   : > { %v2987_v55 = vsel %vm2980_vm3, %v2983_v40, %v2986_v16  ;;  %v2764_v27 = vsel %vm12331_vm12, %v2763_v47, %v12329_v12  ;;  %v12332_v33 = vand.u32 2147483647, %v9853_v20  ;;  %v3796_v31 = vor.u32 4788187, %v3795_v19  ;;  %v12341_v19 = vld [vmem:[#allocation8_spill] sm:$0xff] }
 0x467   : > { %v3980_v41 = vmul.u32 %v10240_v25, %v3964_v39  ;;  %vm3982_vm5 = vc.u32 %v10285_v7, %v10278_v29  ;;  %v3799_v9 = vcvt.s32.f32 %v3792_v53  ;;  %v2988_v47 = vsel %vm2977_vm11, nan, %v2987_v55  ;;  %v12340_v39 = vld [vmem:[#allocation12_spill] sm:$0xff] }
 0x468   : > { %vm10304_vm1 = vcmp.le.f32.partialorder %v12332_v33, 0.7853982  ;;  %v3984_v37 = vsel %vm3982_vm5, %v3983_v57, %v10279_v61  ;;  %v2766_v8 = vsel %vm9422_vm0, 0, %v2764_v27  ;;  %v3797_v12 = vand.u32 2147483647, %v3796_v31  ;;  %v12342_v57 = vld [vmem:[#allocation14_spill] sm:$0xff] }
 0x469   : > { %v3985_v44 = vadd.s32 %v3984_v37, %v3980_v41  ;;  %v6396_v23 = vpack.c.bf16 %v2988_v47, %v2572_v48  ;;  %v2770_v43 = vadd.s32 3, %v2766_v8  ;;  %v10319_v25 = vsel %vm10176_vm10, %v9786_v60, %v3906_v30  ;;  %v12344_v8 = vld [vmem:[#allocation32_spill] sm:$0xff]  ;;  %v12350_v27 = vld [vmem:[#allocation17_spill] sm:$0xff] }
 0x46a   : > { %vm2769_vm13 = vweird.f32 %v9012_v6  ;;  %v2774_v1 = vxor.u32 2147483648, %v12335_v21  ;;  %v3179_v22 = vsub.s32 4, %v12336_v15  ;;  %v3800_v18 = vmul.f32 %v3799_v9, %v3797_v12 }
 0x46b   : > { %v3986_v0 = vadd.s32 536870912, %v3985_v44  ;;  %6397 = vmatprep.subr.bf16.mxu0 %v6396_v23  ;;  %v2771_v62 = vand.u32 3, %v2770_v43  ;;  %v2777_v61 = vxor.u32 2147483648, %v12337_v32  ;;  %vm12339_vm0 = vcmp.lt.s32.totalorder %v12338_v45, 0  ;;  %v12345_v23 = vld [vmem:[#allocation11_spill] sm:$0xff] }
 0x46c   : > { %v3180_v52 = vsel %vm12339_vm0, %v3179_v22, %v12336_v15  ;;  %v3190_v11 = vxor.u32 2147483648, %v10049_v54  ;;  %v2459_v53 = vand.u32 3, %v12340_v39  ;;  %v2462_v49 = vxor.u32 2147483648, %v12341_v19 }
 0x46d   : > { %v3801_v40 = vxor.u32 2147483648, %v3800_v18  ;;  %v10331_v16 = vshrl.u32 %v3986_v0, 30  ;;  %vm2773_vm8 = vcmp.eq.s32.totalorder %v2771_v62, 0  ;;  %vm3185_vm11 = vweird.f32 %v12338_v45 }
 0x46e   : > { %v2465_v48 = vxor.u32 2147483648, %v12342_v57  ;;  %vm2772_vm3 = vcmp.lt.s32.totalorder %v2771_v62, 2  ;;  %v2775_v55 = vsel %vm2773_vm8, %v12337_v32, %v2774_v1  ;;  %vm2776_vm14 = vcmp.eq.s32.totalorder %v2771_v62, 2  ;;  %v12346_v62 = vld [vmem:[#allocation23_spill] sm:$0xff] }
 0x46f   : > { %v3182_v30 = vsel %vm9808_vm7, 0, %v3180_v52  ;;  %v3802_v33 = vsel %vm3719_vm9, %v3801_v40, %v3800_v18  ;;  %v3988_v31 = vshll.u32 %v10331_v16, 30  ;;  %v2778_v41 = vsel %vm2776_vm14, %v2777_v61, %v12335_v21  ;;  %v12347_v52 = vld [vmem:[#allocation27_spill] sm:$0xff] }
 0x470   : > { %v3186_v9 = vadd.s32 3, %v3182_v30  ;;  %v3805_v37 = vsel %vm10304_vm1, %v9853_v20, %v3802_v33  ;;  %v2779_v47 = vsel %vm2772_vm3, %v2775_v55, %v2778_v41  ;;  %v3193_v12 = vxor.u32 2147483648, %v12344_v8  ;;  %v12351_v33 = vld [vmem:[#allocation19_spill] sm:$0xff]  ;;  %v12352_v41 = vld [vmem:[#allocation9_spill] sm:$0xff] }
 0x471   : > { %vm2457_vm15 = vweird.f32 %v12345_v23  ;;  %v10347_v43 = vsub.s32 %v3985_v44, %v3988_v31  ;;  %vm2460_vm7 = vcmp.lt.s32.totalorder %v2459_v53, 2  ;;  %vm2461_vm12 = vcmp.eq.s32.totalorder %v2459_v53, 0 }
 0x472   : > { %v3187_v1 = vand.u32 3, %v3186_v9  ;;  %6792 = vcosq.f32 %v3805_v37  ;;  %v2780_v15 = vsel %vm2769_vm13, nan, %v2779_v47  ;;  %v2463_v21 = vsel %vm2461_vm12, %v12342_v57, %v2462_v49  ;;  %v12348_v57 = vld [vmem:[#allocation13_spill] sm:$0xff] }
 0x473   : > { %vm2464_vm5 = vcmp.eq.s32.totalorder %v2459_v53, 2  ;;  %v3991_v22 = vsub.s32 0, %v10347_v43  ;;  %v2875_v32 = vand.u32 3, %v12346_v62  ;;  %6794 = vsinq.f32 %v3805_v37 }
 0x474   : > { %vm3189_vm0 = vcmp.eq.s32.totalorder %v3187_v1, 0  ;;  %vm3192_vm8 = vcmp.eq.s32.totalorder %v3187_v1, 2  ;;  %v2466_v18 = vsel %vm2464_vm5, %v2465_v48, %v12341_v19  ;;  %vm3188_vm3 = vcmp.lt.s32.totalorder %v3187_v1, 2  ;;  %v12349_v48 = vld [vmem:[#allocation26_spill] sm:$0xff] }
 0x475   : > { %v3191_v44 = vsel %vm3189_vm0, %v12344_v8, %v3190_v11  ;;  %v3194_v0 = vsel %vm3192_vm8, %v3193_v12, %v10049_v54  ;;  %v6289_v6 = vmin.u32 %v3991_v22, %v10347_v43  ;;  %v2878_v39 = vxor.u32 2147483648, %v12347_v52  ;;  %v12353_v8 = vld [vmem:[#allocation25_spill] sm:$0xff] }
 0x476   : > { %v3195_v61 = vsel %vm3188_vm3, %v3191_v44, %v3194_v0  ;;  %v2467_v40 = vsel %vm2460_vm7, %v2463_v21, %v2466_v18  ;;  %vm2873_vm13 = vweird.f32 %v12348_v57  ;;  %vm2877_vm14 = vcmp.eq.s32.totalorder %v2875_v32, 0 }
 0x477   : > { %v3196_v49 = vsel %vm3185_vm11, nan, %v3195_v61  ;;  %v3993_v19 = vclz %v6289_v6  ;;  %v2879_v54 = vsel %vm2877_vm14, %v12349_v48, %v2878_v39  ;;  %v2881_v55 = vxor.u32 2147483648, %v12349_v48  ;;  %v12358_v48 = vld [vmem:[#allocation16_spill] sm:$0xff] }
 0x478   : > { %v6404_v11 = vpack.c.bf16 %v3196_v49, %v2780_v15  ;;  %vm2880_vm12 = vcmp.eq.s32.totalorder %v2875_v32, 2  ;;  %v2667_v30 = vand.u32 3, %v12350_v27  ;;  %v2670_v31 = vxor.u32 2147483648, %v12351_v33  ;;  %v12356_v49 = vld [vmem:[#allocation28_spill] sm:$0xff] }
 0x479   : > { %v2673_v9 = vxor.u32 2147483648, %v12352_v41  ;;  %v6290_v45 = vadd.s32 4294967294, %v3993_v19  ;;  %v2468_v53 = vsel %vm2457_vm15, nan, %v2467_v40  ;;  %vm2876_vm11 = vcmp.lt.s32.totalorder %v2875_v32, 2  ;;  %v12354_v32 = vld [vmem:[#allocation18_spill] sm:$0xff] }
 0x47a   : > { %6405 = vmatprep.subr.bf16.mxu1 %v6404_v11  ;;  %v2882_v37 = vsel %vm2880_vm12, %v2881_v55, %v12347_v52  ;;  %vm2669_vm7 = vcmp.eq.s32.totalorder %v2667_v30, 0  ;;  %vm2672_vm5 = vcmp.eq.s32.totalorder %v2667_v30, 2  ;;  %v3083_v12 = vand.u32 3, %v12353_v8  ;;  %v12355_v52 = vld [vmem:[#allocation29_spill] sm:$0xff] }
 0x47b   : > { %v2883_v47 = vsel %vm2876_vm11, %v2879_v54, %v2882_v37  ;;  %vm6291_vm0 = vcmp.lt.s32.totalorder %v6290_v45, 0  ;;  %v2671_v15 = vsel %vm2669_vm7, %v12352_v41, %v2670_v31  ;;  %v2674_v21 = vsel %vm2672_vm5, %v2673_v9, %v12351_v33 }
 0x47c   : > { %v2884_v1 = vsel %vm2873_vm13, nan, %v2883_v47  ;;  %v10376_v22 = vpop.eup %6792  ;;  %v3981_v23 = vadd.s32 %v10278_v29, %v10285_v7  ;;  %v3996_v18 = vsel %vm6291_vm0, 0, %v6290_v45  ;;  %vm2668_vm15 = vcmp.lt.s32.totalorder %v2667_v30, 2  ;;  %v12357_v29 = vld [vmem:[#allocation31_spill] sm:$0xff] }
 0x47d   : > { %v6398_v44 = vpack.c.bf16 %v2884_v1, %v2468_v53  ;;  %v3997_v0 = vsub.s32 32, %v3996_v18  ;;  %v4001_v62 = vsub.s32 4294967266, %v3996_v18  ;;  %vm2665_vm8 = vweird.f32 %v12354_v32  ;;  %v6795_v57 = vpop.eup %6794 }
 0x47e   : > { %v2675_v6 = vsel %vm2668_vm15, %v2671_v15, %v2674_v21  ;;  %v3998_v61 = vshll.u32 %v10347_v43, %v3996_v18  ;;  %vm3085_vm3 = vcmp.eq.s32.totalorder %v3083_v12, 0  ;;  %v3086_v39 = vxor.u32 2147483648, %v12355_v52 }
 0x47f   : > { %6399 = vmatpush1.bf16.msra.mxu0 %v6398_v44  ;;  %v3089_v40 = vxor.u32 2147483648, %v12356_v49  ;;  %v3999_v19 = vshrl.u32 %v3981_v23, %v3997_v0  ;;  %v4002_v11 = vadd.s32 127, %v4001_v62  ;;  %vm3088_vm13 = vcmp.eq.s32.totalorder %v3083_v12, 2 }
 0x480   : > { %v3387_v7 = vsub.s32 4, %v12357_v29  ;;  %vm3081_vm14 = vweird.f32 %v12358_v48  ;;  %vm3084_vm12 = vcmp.lt.s32.totalorder %v3083_v12, 2  ;;  %v3087_v54 = vsel %vm3085_vm3, %v12356_v49, %v3086_v39 }
 0x481   : > { %v3090_v55 = vsel %vm3088_vm13, %v3089_v40, %v12355_v52  ;;  %v4000_v43 = vor.u32 %v3999_v19, %v3998_v61  ;;  %v4003_v27 = vshll.u32 %v4002_v11, 23  ;;  %vm12359_vm11 = vcmp.lt.s32.totalorder %v9665_v46, 0 }
 0x482   : > { %v3091_v30 = vsel %vm3084_vm12, %v3087_v54, %v3090_v55  ;;  %v3388_v33 = vsel %vm12359_vm11, %v3387_v7, %v12357_v29  ;;  %vm3927_vm7 = vcmp.lt.s32.totalorder %v10101_v13, 0  ;;  %v2676_v31 = vsel %vm2665_vm8, nan, %v2675_v6 }
 0x483   : > { %v3092_v41 = vsel %vm3081_vm14, nan, %v3091_v30  ;;  %v3390_v9 = vsel %vm10014_vm6, 0, %v3388_v33  ;;  %v3803_v45 = vsub.s32 4, %v10230_v14  ;;  %6796 = vsinq.f32 %v10319_v25 }
 0x484   : > { %v12360_v53 = vand.u32 2147483647, %v10101_v13  ;;  %v4004_v47 = vor.u32 4788187, %v4003_v27  ;;  %v6406_v8 = vpack.c.bf16 %v3092_v41, %v2676_v31  ;;  %v3394_v12 = vadd.s32 3, %v3390_v9  ;;  %v12366_v9 = vld [vmem:[#allocation34_spill] sm:$0xff] }
 0x485   : > { %vm3393_vm0 = vweird.f32 %v9665_v46  ;;  %v3398_v1 = vxor.u32 2147483648, %v10089_v58  ;;  %v3401_v56 = vxor.u32 2147483648, %v10087_v10  ;;  %v3804_v15 = vsel %vm3719_vm9, %v3803_v45, %v10230_v14 }
 0x486   : > { %vm10400_vm5 = vcmp.le.f32.partialorder %v12360_v53, 0.7853982  ;;  %v3595_v21 = vsub.s32 4, %v9984_v28  ;;  %v4005_v23 = vand.u32 2147483647, %v4004_v47  ;;  %v4007_v18 = vcvt.s32.f32 %v4000_v43  ;;  %6407 = vmatpush1.bf16.msra.mxu1 %v6406_v8 }
 0x487   : > { %v3395_v44 = vand.u32 3, %v3394_v12  ;;  %v3806_v0 = vsel %vm10304_vm1, 0, %v3804_v15  ;;  %vm3809_vm6 = vweird.f32 %v9853_v20  ;;  %v3814_v32 = vxor.u32 2147483648, %v6795_v57 }
 0x488   : > { %v3810_v62 = vadd.s32 3, %v3806_v0  ;;  %vm12363_vm15 = vcmp.lt.s32.totalorder %v9750_v5, 0  ;;  %v4008_v61 = vmul.f32 %v4007_v18, %v4005_v23  ;;  %v3817_v14 = vxor.u32 2147483648, %v10376_v22 }
 0x489   : > { %v3596_v6 = vsel %vm12363_vm15, %v3595_v21, %v9984_v28  ;;  %vm3397_vm8 = vcmp.eq.s32.totalorder %v3395_v44, 0  ;;  %vm3400_vm9 = vcmp.eq.s32.totalorder %v3395_v44, 2  ;;  %vm3396_vm1 = vcmp.lt.s32.totalorder %v3395_v44, 2  ;;  %v12369_v21 = vld [vmem:[#allocation36_spill] sm:$0xff]  ;;  %v12370_v44 = vld [vmem:[#allocation30_spill] sm:$0xff] }
 0x48a   : > { %v3399_v52 = vsel %vm3397_vm8, %v10087_v10, %v3398_v1  ;;  %v3402_v39 = vsel %vm3400_vm9, %v3401_v56, %v10089_v58  ;;  %v3811_v49 = vand.u32 3, %v3810_v62  ;;  %v3598_v42 = vsel %vm10114_vm4, 0, %v3596_v6  ;;  %v12368_v56 = vld [vmem:[#allocation33_spill] sm:$0xff]  ;;  %v12371_v62 = vld [vmem:[#allocation35_spill] sm:$0xff] }
 0x48b   : > { %v4009_v40 = vxor.u32 2147483648, %v4008_v61  ;;  %v3602_v19 = vadd.s32 3, %v3598_v42  ;;  %v4011_v11 = vsub.s32 4, %v10331_v16  ;;  %v3403_v29 = vsel %vm3396_vm1, %v3399_v52, %v3402_v39 }
 0x48c   : > { %vm3812_vm3 = vcmp.lt.s32.totalorder %v3811_v49, 2  ;;  %vm3813_vm13 = vcmp.eq.s32.totalorder %v3811_v49, 0  ;;  %vm3816_vm14 = vcmp.eq.s32.totalorder %v3811_v49, 2  ;;  %v3606_v54 = vxor.u32 2147483648, %v10228_v35 }
 0x48d   : > { %v4010_v28 = vsel %vm3927_vm7, %v4009_v40, %v4008_v61  ;;  %v3815_v10 = vsel %vm3813_vm13, %v10376_v22, %v3814_v32  ;;  %v3818_v7 = vsel %vm3816_vm14, %v3817_v14, %v6795_v57  ;;  %v3603_v58 = vand.u32 3, %v3602_v19  ;;  %v10433_v43 = vpop.eup %6796 }
 0x48e   : > { %v4013_v3 = vsel %vm10400_vm5, %v10101_v13, %v4010_v28  ;;  %v3819_v48 = vsel %vm3812_vm3, %v3815_v10, %v3818_v7  ;;  %v4012_v55 = vsel %vm3927_vm7, %v4011_v11, %v10331_v16  ;;  %v3404_v27 = vsel %vm3393_vm0, nan, %v3403_v29  ;;  %v6292_v10 = vld [vmem:[%s12017_s3 + $0x20] sm:$0xff] }
 0x48f   : > { %6798 = vcosq.f32 %v4013_v3  ;;  %v3820_v22 = vsel %vm3809_vm6, nan, %v3819_v48  ;;  %v3609_v57 = vxor.u32 2147483648, %v10225_v2  ;;  %v12364_v30 = vsel %vm10136_vm2, 0, %v10157_v34 }
 0x490   : > { %v3706_v33 = vadd.s32 3, %v12364_v30  ;;  %v12365_v16 = vsel %vm10176_vm10, 0, %v10210_v38  ;;  %6800 = vsinq.f32 %v4013_v3  ;;  %v6400_v41 = vpack.c.bf16 %v3820_v22, %v3404_v27  ;;  %v12373_v27 = vld [vmem:[#allocation21_spill] sm:$0xff] }
 0x491   : > { %v3914_v31 = vadd.s32 3, %v12365_v16  ;;  %6802 = vcosq.f32 %v10319_v25  ;;  %vm3605_vm4 = vcmp.eq.s32.totalorder %v3603_v58, 0  ;;  %v4014_v46 = vsel %vm10400_vm5, 0, %v4012_v55 }
 0x492   : > { %v3291_v20 = vand.u32 3, %v10039_v63  ;;  %6401 = vmatprep.subr.bf16.mxu0 %v6400_v41  ;;  %vm3608_vm12 = vcmp.eq.s32.totalorder %v3603_v58, 2  ;;  %v4018_v36 = vadd.s32 3, %v4014_v46  ;;  %v3294_v34 = vxor.u32 2147483648, %v10072_v26 }
 0x493   : > { %v3297_v51 = vxor.u32 2147483648, %v12366_v9  ;;  %v3607_v38 = vsel %vm3605_vm4, %v10225_v2, %v3606_v54  ;;  %v3610_v45 = vsel %vm3608_vm12, %v3609_v57, %v10228_v35  ;;  %vm3601_vm11 = vweird.f32 %v9750_v5  ;;  %v12367_v2 = vld [vmem:[#allocation15_spill] sm:$0xff] }
 0x494   : > { %vm3293_vm10 = vcmp.eq.s32.totalorder %v3291_v20, 0  ;;  %vm3296_vm2 = vcmp.eq.s32.totalorder %v3291_v20, 2  ;;  %vm3604_vm7 = vcmp.lt.s32.totalorder %v3603_v58, 2  ;;  %v4019_v53 = vand.u32 3, %v4018_v36 }
 0x495   : > { %v3295_v25 = vsel %vm3293_vm10, %v12366_v9, %v3294_v34  ;;  %v3298_v63 = vsel %vm3296_vm2, %v3297_v51, %v10072_v26  ;;  %v3707_v37 = vand.u32 3, %v3706_v33  ;;  %v3710_v47 = vxor.u32 2147483648, %v10253_v24 }
 0x496   : > { %v3713_v8 = vxor.u32 2147483648, %v10249_v50  ;;  %v3611_v12 = vsel %vm3604_vm7, %v3607_v38, %v3610_v45  ;;  %vm4017_vm5 = vweird.f32 %v10101_v13  ;;  %vm3289_vm0 = vweird.f32 %v12367_v2  ;;  %v6293_v13 = vld [vmem:[%s12017_s3 + $0x28] sm:$0xff] }
 0x497   : > { %vm3292_vm6 = vcmp.lt.s32.totalorder %v3291_v20, 2  ;;  %vm3708_vm15 = vcmp.lt.s32.totalorder %v3707_v37, 2  ;;  %vm3709_vm8 = vcmp.eq.s32.totalorder %v3707_v37, 0  ;;  %vm3712_vm9 = vcmp.eq.s32.totalorder %v3707_v37, 2 }
 0x498   : > { %v3299_v35 = vsel %vm3292_vm6, %v3295_v25, %v3298_v63  ;;  %v3711_v1 = vsel %vm3709_vm8, %v10249_v50, %v3710_v47  ;;  %v3714_v26 = vsel %vm3712_vm9, %v3713_v8, %v10253_v24  ;;  %v3499_v15 = vand.u32 3, %v12368_v56 }
 0x499   : > { %v3502_v23 = vxor.u32 2147483648, %v12369_v21  ;;  %v6799_v18 = vpop.eup %6798  ;;  %vm4024_vm1 = vcmp.eq.s32.totalorder %v4019_v53, 2  ;;  %vm3705_vm3 = vweird.f32 %v12370_v44  ;;  %v3715_v0 = vsel %vm3708_vm15, %v3711_v1, %v3714_v26 }
 0x49a   : > { %v3505_v32 = vxor.u32 2147483648, %v12371_v62  ;;  %v6801_v6 = vpop.eup %6800  ;;  %v4025_v61 = vxor.u32 2147483648, %v6799_v18  ;;  %v3300_v14 = vsel %vm3289_vm0, nan, %v3299_v35  ;;  %v3716_v52 = vsel %vm3705_vm3, nan, %v3715_v0 }
 0x49b   : > { %v3915_v50 = vand.u32 3, %v3914_v31  ;;  %v6803_v39 = vpop.eup %6802  ;;  %v4022_v24 = vxor.u32 2147483648, %v6801_v6  ;;  %v6402_v49 = vpack.c.bf16 %v3716_v52, %v3300_v14  ;;  %vm3501_vm13 = vcmp.eq.s32.totalorder %v3499_v15, 0  ;;  %v10509_v31 = vpop.permute.xlu0 %4041 }
 0x49c   : > { %vm3504_vm14 = vcmp.eq.s32.totalorder %v3499_v15, 2  ;;  %vm4021_vm4 = vcmp.eq.s32.totalorder %v4019_v53, 0  ;;  %v4026_v42 = vsel %vm4024_vm1, %v4025_v61, %v6801_v6  ;;  %v3503_v40 = vsel %vm3501_vm13, %v12371_v62, %v3502_v23 }
 0x49d   : > { %v3506_v19 = vsel %vm3504_vm14, %v3505_v32, %v12369_v21  ;;  %v3612_v11 = vsel %vm3601_vm11, nan, %v3611_v12  ;;  %vm4020_vm12 = vcmp.lt.s32.totalorder %v4019_v53, 2  ;;  %v4023_v29 = vsel %vm4021_vm4, %v6799_v18, %v4022_v24  ;;  %6403 = vmatpush1.bf16.msra.mxu0 %v6402_v49 }
 0x49e   : > { %v3918_v28 = vxor.u32 2147483648, %v10433_v43  ;;  %v4027_v7 = vsel %vm4020_vm12, %v4023_v29, %v4026_v42  ;;  %vm3500_vm10 = vcmp.lt.s32.totalorder %v3499_v15, 2  ;;  %vm3917_vm2 = vcmp.eq.s32.totalorder %v3915_v50, 0 }
 0x49f   : > { %v3921_v58 = vxor.u32 2147483648, %v6803_v39  ;;  %v4028_v3 = vsel %vm4017_vm5, nan, %v4027_v7  ;;  %v3507_v48 = vsel %vm3500_vm10, %v3503_v40, %v3506_v19  ;;  %vm3920_vm7 = vcmp.eq.s32.totalorder %v3915_v50, 2 }
 0x4a0   : > { %v3919_v54 = vsel %vm3917_vm2, %v6803_v39, %v3918_v28  ;;  %v6408_v5 = vpack.c.bf16 %v4028_v3, %v3612_v11  ;;  %vm3916_vm11 = vcmp.lt.s32.totalorder %v3915_v50, 2  ;;  %vm12372_vm0 = vcmask 261120  }
 0x4a1   : > { %v3922_v55 = vsel %vm3920_vm7, %v3921_v58, %v10433_v43  ;;  %6300 = vmatmul.mubr.msk.f32.vlgmr.msra.gmra.mrb[8].mxu0 %vm12372_vm0, %v6292_v10  ;;  %vm3497_vm6 = vweird.f32 %v12373_v27  ;;  %vm3913_vm15 = vweird.f32 %v9786_v60  ;;  %v12374_v57 = vmov 0.0   ;;  %vm12375_vm5 = vmmov %vm12372_vm0  ;;  %v6294_v60 = vld [vmem:[%s12017_s3 + $0x30] sm:$0xff]  ;;  %v6295_v43 = vld [vmem:[%s12017_s3 + $0x38] sm:$0xff] }
 0x4a2   : > { %v3923_v22 = vsel %vm3916_vm11, %v3919_v54, %v3922_v55  ;;  %4141 = vmatprep.mubr.f32.mxu0 %v12374_v57  ;;  %6409 = vmatprep.subr.bf16.mxu1 %v6408_v5  ;;  %v3508_v30 = vsel %vm3497_vm6, nan, %v3507_v48  ;;  %vm12376_vm8 = vmmov %vm12372_vm0  ;;  %v12384_v49 = vmov 2475754826   ;;  %v12385_v40 = vmov 2131351028  }
 0x4a3   : > { %v3924_v33 = vsel %vm3913_vm15, nan, %v3923_v22  ;;  %vm12377_vm9 = vmmov %vm12372_vm0  ;;  %v12386_v11 = vmov 2102212464  }
 0x4a4   : > { %v6410_v16 = vpack.c.bf16 %v3924_v33, %v3508_v30  ;;  %vm12378_vm1 = vmmov %vm12372_vm0 }
 0x4a5   : > { %6301 = vmatmul.mubr.msk.f32.gmra.mrb[10].mxu0 %vm12375_vm5, %v6293_v13  ;;  %vm12379_vm3 = vmmov %vm12372_vm0 }
 0x4a6   : > { %6411 = vmatpush1.bf16.msra.mxu1 %v6410_v16  ;;  %4147 = vmatprep.mubr.f32.mxu0 %v12374_v57  ;;  %vm12380_vm13 = vmmov %vm12372_vm0 }
 0x4a7   : > { %vm12381_vm14 = vmmov %vm12372_vm0 }
 0x4a9   : > { %6304 = vmatmul.mubr.msk.f32.vlgmr.msra.gmra.mrb[8].mxu1 %vm12376_vm8, %v6292_v10  ;;  %6302 = vmatmul.mubr.msk.f32.gmra.mrb[12].mxu0 %vm12377_vm9, %v6294_v60 }
 0x4aa   : > { %4230 = vmatprep.mubr.f32.mxu1 %v12374_v57  ;;  %4153 = vmatprep.mubr.f32.mxu0 %v12374_v57 }
 0x4ad   : > { %6305 = vmatmul.mubr.msk.f32.gmra.mrb[10].mxu1 %vm12378_vm1, %v6293_v13  ;;  %6303 = vmatmul.mubr.msk.f32.gmra.mrb[14].mxu0 %vm12379_vm3, %v6295_v43 }
 0x4ae   : > { %4236 = vmatprep.mubr.f32.mxu1 %v12374_v57  ;;  %5987 = vmatprep.mubr.f32.mxu0 %v12374_v57 }
 0x4b1   : > { %6306 = vmatmul.mubr.msk.f32.gmra.mrb[12].mxu1 %vm12380_vm13, %v6294_v60 }
 0x4b2   : > { %4242 = vmatprep.mubr.f32.mxu1 %v12374_v57 }
 0x4b5   : > { %6307 = vmatmul.mubr.msk.f32.gmra.mrb[14].mxu1 %vm12381_vm14, %v6295_v43 }
 0x4b6   : > { %6058 = vmatprep.mubr.f32.mxu1 %v12374_v57 }
 0x574   : > { %v4137_v41 = vpop.f32.mrb[8].mxu0 }
 0x575   : > { %v10512_v46 = vadd.f32 %v4137_v41, %v10509_v31  ;;  %v4139_v20 = vpop.f32.mrb[9].mxu0 }
 0x576   : > { %v10515_v36 = vadd.f32 %v4139_v20, %v10509_v31 }
 0x577   : > { %12382 = vst [vmem:[#allocation6_spill] sm:$0xff] %v10512_v46  ;;  %v4249_v34 = vand.u32 2147483647, %v10512_v46  ;;  %v4252_v9 = vand.u32 2139095040, %v10512_v46 }
 0x578   : > { %v4356_v51 = vand.u32 2139095040, %v10515_v36  ;;  %v10520_v38 = vpop.f32.mrb[10].mxu0  ;;  %v4353_v53 = vand.u32 2147483647, %v10515_v36 }
 0x579   : > { %v4253_v45 = vshrl.u32 %v4252_v9, 23  ;;  %v10522_v25 = vpop.f32.mrb[11].mxu0  ;;  %v4256_v63 = vand.u32 8388607, %v4249_v34 }
 0x57a   : > { %v4357_v37 = vshrl.u32 %v4356_v51, 23  ;;  %v4360_v56 = vand.u32 8388607, %v4353_v53 }
 0x57b   : > { %v6308_v47 = vadd.s32 4294967169, %v4253_v45  ;;  %v4257_v26 = vor.u32 8388608, %v4256_v63 }
 0x57c   : > { %v4226_v8 = vpop.f32.mrb[8].mxu1  ;;  %v6312_v12 = vadd.s32 4294967169, %v4357_v37  ;;  %v4361_v61 = vor.u32 8388608, %v4360_v56  ;;  %v10555_v5 = vpop.f32.mrb[12].mxu0 }
 0x57d   : > { %v4259_v2 = vadd.s32 1, %v6308_v47  ;;  %v10528_v35 = vadd.f32 %v4226_v8, %v10509_v31  ;;  %v10530_v1 = vpop.f32.mrb[9].mxu1  ;;  %v10540_v6 = vshll.u32 %v4257_v26, 8 }
 0x57e   : > { %v4363_v15 = vadd.s32 1, %v6312_v12 }
 0x57f   : > { %12383 = vst [vmem:[#allocation5_spill] sm:$0xff] %v10528_v35  ;;  %vm4260_vm4 = vcmp.gt.s32.totalorder %v4259_v2, 0  ;;  %v4457_v21 = vand.u32 2147483647, %v10528_v35  ;;  %v4460_v23 = vand.u32 2139095040, %v10528_v35 }
 0x580   : > { %v4261_v18 = vsel %vm4260_vm4, %v4259_v2, 0  ;;  %vm4364_vm12 = vcmp.gt.s32.totalorder %v4363_v15, 0  ;;  %v10536_v44 = vpop.f32.mrb[10].mxu1 }
 0x581   : > { %v4263_v0 = vand.u32 31, %v4261_v18  ;;  %v10538_v62 = vpop.f32.mrb[11].mxu1  ;;  %v4262_v32 = vshrl.u32 %v4261_v18, 5  ;;  %v4461_v52 = vshrl.u32 %v4460_v23, 23  ;;  %v4464_v50 = vand.u32 8388607, %v4457_v21  ;;  %v10566_v23 = vpop.permute.xlu1 %4046 }
 0x582   : > { %v4365_v39 = vsel %vm4364_vm12, %v4363_v15, 0 }
 0x583   : > { %v4264_v14 = vsub.s32 32, %v4263_v0  ;;  %v4266_v24 = vshll.u32 %v12182_v4, %v4263_v0  ;;  %v4269_v42 = vshll.u32 %v12384_v49, %v4263_v0  ;;  %v4272_v19 = vshll.u32 %v12385_v40, %v4263_v0 }
 0x584   : > { %v4275_v29 = vshll.u32 %v12386_v11, %v4263_v0  ;;  %v4278_v58 = vshll.u32 %v12181_v59, %v4263_v0  ;;  %vm4281_vm10 = vcmp.lt.s32.totalorder %v4262_v32, 1  ;;  %v6316_v57 = vadd.s32 4294967169, %v4461_v52 }
 0x585   : > { %v4267_v28 = vshrl.u32 %v12384_v49, %v4264_v14  ;;  %v4270_v10 = vshrl.u32 %v12385_v40, %v4264_v14  ;;  %v4273_v7 = vshrl.u32 %v12386_v11, %v4264_v14  ;;  %v4265_v3 = vshrl.u32 %v12182_v4, %v4264_v14 }
 0x586   : > { %v4276_v48 = vshrl.u32 %v12181_v59, %v4264_v14  ;;  %v4279_v54 = vshrl.u32 %v12191_v17, %v4264_v14  ;;  %vm4283_vm2 = vcmp.lt.s32.totalorder %v4262_v32, 3  ;;  %vm4284_vm7 = vcmp.lt.s32.totalorder %v4262_v32, 4 }
 0x587   : > { %v4268_v55 = vor.u32 %v4267_v28, %v4266_v24  ;;  %v4271_v27 = vor.u32 %v4270_v10, %v4269_v42  ;;  %v4274_v22 = vor.u32 %v4273_v7, %v4272_v19  ;;  %v4467_v51 = vadd.s32 1, %v6316_v57 }
 0x588   : > { %v4277_v13 = vor.u32 %v4276_v48, %v4275_v29  ;;  %v4280_v30 = vor.u32 %v4279_v54, %v4278_v58  ;;  %vm4282_vm11 = vcmp.lt.s32.totalorder %v4262_v32, 2  ;;  %v4465_v37 = vor.u32 8388608, %v4464_v50 }
 0x589   : > { %v4285_v33 = vsel %vm4281_vm10, %v4265_v3, %v4268_v55  ;;  %v4286_v16 = vsel %vm4284_vm7, %v4274_v22, 2102212464  ;;  %v4289_v60 = vsel %vm4281_vm10, %v4268_v55, %v4271_v27  ;;  %v4293_v43 = vsel %vm4281_vm10, %v4271_v27, %v4274_v22 }
 0x58a   : > { %v4287_v41 = vsel %vm4283_vm2, %v4271_v27, %v4286_v16  ;;  %v4290_v20 = vsel %vm4284_vm7, %v4277_v13, 920167782  ;;  %v4294_v9 = vsel %vm4284_vm7, %v4280_v30, 1326507024  ;;  %vm4468_vm0 = vcmp.gt.s32.totalorder %v4467_v51, 0 }
 0x58b   : > { %v4291_v45 = vsel %vm4283_vm2, %v4274_v22, %v4290_v20  ;;  %v4295_v63 = vsel %vm4283_vm2, %v4277_v13, %v4294_v9  ;;  %v4288_v47 = vsel %vm4282_vm11, %v4285_v33, %v4287_v41  ;;  %v4469_v18 = vsel %vm4468_vm0, %v4467_v51, 0 }
 0x58c   : > { %v4292_v8 = vsel %vm4282_vm11, %v4289_v60, %v4291_v45  ;;  %v4296_v12 = vsel %vm4282_vm11, %v4293_v43, %v4295_v63  ;;  %v10568_v0 = vand.u32 31, %v4365_v39  ;;  %v4471_v32 = vand.u32 31, %v4469_v18  ;;  %v10603_v60 = vpop.f32.mrb[12].mxu1 }
 0x58d   : > { %v10558_v2 = vmul.u32.u64.low %v10540_v6, %v4296_v12  ;;  %v10559_v26 = vmul.u32.u64.high %v10540_v6, %v4296_v12, %v10558_v2  ;;  %v10562_v56 = vmul.u32.u64.low %v10540_v6, %v4292_v8  ;;  %v10563_v15 = vmul.u32.u64.high %v10540_v6, %v4292_v8, %v10562_v56 }
 0x58e   : > { %v10570_v14 = vshll.u32 %v4361_v61, 8  ;;  %v10574_v52 = vadd.f32 %v10530_v1, %v10509_v31  ;;  %v10578_v50 = vadd.f32 %v10520_v38, %v10566_v23  ;;  %v4304_v24 = vmul.u32 %v10540_v6, %v4288_v47 }
 0x58f   : > { %v4470_v42 = vshrl.u32 %v4469_v18, 5  ;;  %v10581_v19 = vshll.u32 %v4465_v37, 8  ;;  %v10583_v29 = vshrl.u32 %v4365_v39, 5  ;;  %vm4306_vm6 = vc.u32 %v10559_v26, %v10562_v56 }
 0x590   : > { %12387 = vst [vmem:[#allocation24_spill] sm:$0xff] %v10574_v52  ;;  %12388 = vst [vmem:[#allocation22_spill] sm:$0xff] %v10578_v50  ;;  %v4307_v61 = vadd.s32 1, %v10563_v15  ;;  %v4472_v28 = vsub.s32 32, %v4471_v32  ;;  %v10589_v31 = vsub.s32 32, %v10568_v0  ;;  %v4474_v1 = vshll.u32 %v12182_v4, %v4471_v32 }
 0x591   : > { %v4477_v38 = vshll.u32 %v12384_v49, %v4471_v32  ;;  %v4480_v6 = vshll.u32 %v12385_v40, %v4471_v32  ;;  %v4483_v10 = vshll.u32 %v12386_v11, %v4471_v32  ;;  %v4486_v27 = vshll.u32 %v12181_v59, %v4471_v32 }
 0x592   : > { %v4308_v39 = vsel %vm4306_vm6, %v4307_v61, %v10563_v15  ;;  %v4473_v7 = vshrl.u32 %v12182_v4, %v4472_v28  ;;  %v4475_v58 = vshrl.u32 %v12384_v49, %v4472_v28  ;;  %v4478_v3 = vshrl.u32 %v12385_v40, %v4472_v28 }
 0x593   : > { %v4309_v48 = vadd.s32 %v4308_v39, %v4304_v24  ;;  %v4481_v54 = vshrl.u32 %v12386_v11, %v4472_v28  ;;  %v4484_v55 = vshrl.u32 %v12181_v59, %v4472_v28  ;;  %v4487_v13 = vshrl.u32 %v12191_v17, %v4472_v28 }
 0x594   : > { %v4476_v22 = vor.u32 %v4475_v58, %v4474_v1  ;;  %v4479_v57 = vor.u32 %v4478_v3, %v4477_v38  ;;  %vm4489_vm15 = vcmp.lt.s32.totalorder %v4470_v42, 1  ;;  %vm4490_vm5 = vcmp.lt.s32.totalorder %v4470_v42, 2 }
 0x595   : > { %v4310_v30 = vadd.s32 536870912, %v4309_v48  ;;  %v4482_v33 = vor.u32 %v4481_v54, %v4480_v6  ;;  %v4485_v16 = vor.u32 %v4484_v55, %v4483_v10  ;;  %v4488_v43 = vor.u32 %v4487_v13, %v4486_v27 }
 0x596   : > { %vm4491_vm8 = vcmp.lt.s32.totalorder %v4470_v42, 3  ;;  %vm4492_vm9 = vcmp.lt.s32.totalorder %v4470_v42, 4  ;;  %v4493_v41 = vsel %vm4489_vm15, %v4473_v7, %v4476_v22  ;;  %v4497_v51 = vsel %vm4489_vm15, %v4476_v22, %v4479_v57 }
 0x597   : > { %v10606_v20 = vshrl.u32 %v4310_v30, 30  ;;  %v4494_v9 = vsel %vm4492_vm9, %v4482_v33, 2102212464  ;;  %v4498_v45 = vsel %vm4492_vm9, %v4485_v16, 920167782  ;;  %v4501_v47 = vsel %vm4489_vm15, %v4479_v57, %v4482_v33 }
 0x598   : > { %v4495_v63 = vsel %vm4491_vm8, %v4479_v57, %v4494_v9  ;;  %v4499_v37 = vsel %vm4491_vm8, %v4482_v33, %v4498_v45  ;;  %v4502_v8 = vsel %vm4492_vm9, %v4488_v43, 1326507024  ;;  %v12119_v15 = vand.u32 2147483647, %v10574_v52 }
 0x599   : > { %v4312_v12 = vshll.u32 %v10606_v20, 30  ;;  %v4500_v2 = vsel %vm4490_vm5, %v4497_v51, %v4499_v37  ;;  %v4564_v18 = vand.u32 2139095040, %v10574_v52  ;;  %v4503_v32 = vsel %vm4491_vm8, %v4485_v16, %v4502_v8 }
 0x59a   : > { %v10615_v24 = vmul.u32.u64.low %v10581_v19, %v4500_v2  ;;  %v10616_v61 = vmul.u32.u64.high %v10581_v19, %v4500_v2, %v10615_v24  ;;  %vm4385_vm1 = vcmp.lt.s32.totalorder %v10583_v29, 1  ;;  %v4496_v1 = vsel %vm4490_vm5, %v4493_v41, %v4495_v63 }
 0x59b   : > { %v10620_v28 = vsub.s32 %v4309_v48, %v4312_v12  ;;  %v4504_v38 = vsel %vm4490_vm5, %v4501_v47, %v4503_v32  ;;  %v4370_v6 = vshll.u32 %v12182_v4, %v10568_v0  ;;  %v4371_v7 = vshrl.u32 %v12384_v49, %v10589_v31 }
 0x59c   : > { %v10627_v10 = vmul.u32.u64.low %v10581_v19, %v4504_v38  ;;  %v10628_v39 = vmul.u32.u64.high %v10581_v19, %v4504_v38, %v10627_v10  ;;  %v4373_v58 = vshll.u32 %v12384_v49, %v10568_v0  ;;  %v4374_v48 = vshrl.u32 %v12385_v40, %v10589_v31 }
 0x59d   : > { %v4315_v3 = vsub.s32 0, %v10620_v28  ;;  %v4376_v42 = vshll.u32 %v12385_v40, %v10568_v0  ;;  %v4377_v54 = vshrl.u32 %v12386_v11, %v10589_v31  ;;  %v4512_v55 = vmul.u32 %v10581_v19, %v4496_v1 }
 0x59e   : > { %v4515_v27 = vadd.s32 1, %v10616_v61  ;;  %v4379_v22 = vshll.u32 %v12386_v11, %v10568_v0  ;;  %v4380_v57 = vshrl.u32 %v12181_v59, %v10589_v31  ;;  %v4372_v30 = vor.u32 %v4371_v7, %v4370_v6 }
 0x59f   : > { %v6309_v13 = vmin.u32 %v4315_v3, %v10620_v28  ;;  %v4375_v33 = vor.u32 %v4374_v48, %v4373_v58  ;;  %v4378_v16 = vor.u32 %v4377_v54, %v4376_v42  ;;  %vm4514_vm3 = vc.u32 %v10628_v39, %v10615_v24 }
 0x5a0   : > { %v4381_v43 = vor.u32 %v4380_v57, %v4379_v22  ;;  %v4382_v19 = vshll.u32 %v12181_v59, %v10568_v0  ;;  %v4383_v41 = vshrl.u32 %v12191_v17, %v10589_v31  ;;  %v4516_v51 = vsel %vm4514_vm3, %v4515_v27, %v10616_v61 }
 0x5a1   : > { %v4317_v9 = vclz %v6309_v13  ;;  %vm4386_vm13 = vcmp.lt.s32.totalorder %v10583_v29, 2  ;;  %vm4387_vm14 = vcmp.lt.s32.totalorder %v10583_v29, 3  ;;  %v4305_v45 = vadd.s32 %v10562_v56, %v10559_v26 }
 0x5a2   : > { %v4517_v63 = vadd.s32 %v4516_v51, %v4512_v55  ;;  %v4384_v37 = vor.u32 %v4383_v41, %v4382_v19  ;;  %vm4388_vm4 = vcmp.lt.s32.totalorder %v10583_v29, 4  ;;  %v4393_v0 = vsel %vm4385_vm1, %v4372_v30, %v4375_v33 }
 0x5a3   : > { %v6310_v47 = vadd.s32 4294967294, %v4317_v9  ;;  %v4394_v8 = vsel %vm4388_vm4, %v4381_v43, 920167782  ;;  %v4397_v12 = vsel %vm4385_vm1, %v4375_v33, %v4378_v16  ;;  %v4369_v32 = vshrl.u32 %v12182_v4, %v10589_v31 }
 0x5a4   : > { %v4518_v2 = vadd.s32 536870912, %v4517_v63  ;;  %v4395_v61 = vsel %vm4387_vm14, %v4378_v16, %v4394_v8  ;;  %v4398_v26 = vsel %vm4388_vm4, %v4384_v37, 1326507024  ;;  %v4390_v56 = vsel %vm4388_vm4, %v4378_v16, 2102212464 }
 0x5a5   : > { %vm6311_vm12 = vcmp.lt.s32.totalorder %v6310_v47, 0  ;;  %v4399_v1 = vsel %vm4387_vm14, %v4381_v43, %v4398_v26  ;;  %v4565_v38 = vshrl.u32 %v4564_v18, 23  ;;  %v4396_v7 = vsel %vm4386_vm13, %v4393_v0, %v4395_v61 }
 0x5a6   : > { %v4320_v6 = vsel %vm6311_vm12, 0, %v6310_v47  ;;  %v10670_v10 = vshrl.u32 %v4518_v2, 30  ;;  %v4400_v58 = vsel %vm4386_vm13, %v4397_v12, %v4399_v1  ;;  %v4389_v48 = vsel %vm4385_vm1, %v4369_v32, %v4372_v30  ;;  %v10705_v2 = vpop.f32.mrb[13].mxu0 }
 0x5a7   : > { %v4321_v31 = vsub.s32 32, %v4320_v6  ;;  %v4325_v3 = vsub.s32 4294967266, %v4320_v6  ;;  %v6320_v42 = vadd.s32 4294967169, %v4565_v38  ;;  %v4391_v18 = vsel %vm4387_vm14, %v4375_v33, %v4390_v56 }
 0x5a8   : > { %v4520_v54 = vshll.u32 %v10670_v10, 30  ;;  %v10682_v55 = vmul.u32.u64.low %v10570_v14, %v4400_v58  ;;  %v10683_v27 = vmul.u32.u64.high %v10570_v14, %v4400_v58, %v10682_v55  ;;  %v4668_v16 = vand.u32 2139095040, %v10578_v50 }
 0x5a9   : > { %v4326_v22 = vadd.s32 127, %v4325_v3  ;;  %v10686_v57 = vmul.u32.u64.low %v10570_v14, %v4396_v7  ;;  %v10687_v13 = vmul.u32.u64.high %v10570_v14, %v4396_v7, %v10686_v57  ;;  %v4323_v43 = vshrl.u32 %v4305_v45, %v4321_v31 }
 0x5aa   : > { %v10691_v30 = vsub.s32 %v4517_v63, %v4520_v54  ;;  %v4571_v19 = vadd.s32 1, %v6320_v42  ;;  %v4392_v33 = vsel %vm4386_vm13, %v4389_v48, %v4391_v18  ;;  %v4568_v9 = vand.u32 8388607, %v12119_v15 }
 0x5ab   : > { %v4327_v41 = vshll.u32 %v4326_v22, 23  ;;  %v4322_v51 = vshll.u32 %v10620_v28, %v4320_v6  ;;  %vm4410_vm10 = vc.u32 %v10683_v27, %v10686_v57  ;;  %v4411_v47 = vadd.s32 1, %v10687_v13 }
 0x5ac   : > { %v4523_v37 = vsub.s32 0, %v10691_v30  ;;  %vm4572_vm2 = vcmp.gt.s32.totalorder %v4571_v19, 0  ;;  %v4665_v45 = vand.u32 2147483647, %v10578_v50  ;;  %v4669_v63 = vshrl.u32 %v4668_v16, 23 }
 0x5ad   : > { %v4324_v0 = vor.u32 %v4323_v43, %v4322_v51  ;;  %v4408_v8 = vmul.u32 %v10570_v14, %v4392_v33  ;;  %v4573_v12 = vsel %vm4572_vm2, %v4571_v19, 0  ;;  %v4328_v28 = vor.u32 4788187, %v4327_v41 }
 0x5ae   : > { %v6317_v29 = vmin.u32 %v4523_v37, %v10691_v30  ;;  %v4412_v32 = vsel %vm4410_vm10, %v4411_v47, %v10687_v13  ;;  %v4569_v61 = vor.u32 8388608, %v4568_v9  ;;  %v4575_v26 = vand.u32 31, %v4573_v12 }
 0x5af   : > { %v4413_v1 = vadd.s32 %v4412_v32, %v4408_v8  ;;  %v4513_v38 = vadd.s32 %v10615_v24, %v10628_v39  ;;  %v4331_v7 = vcvt.s32.f32 %v4324_v0  ;;  %v6324_v3 = vadd.s32 4294967169, %v4669_v63 }
 0x5b0   : > { %v4525_v56 = vclz %v6317_v29  ;;  %v4576_v6 = vsub.s32 32, %v4575_v26  ;;  %v4329_v48 = vand.u32 2147483647, %v4328_v28  ;;  %v10711_v42 = vshll.u32 %v4569_v61, 8 }
 0x5b1   : > { %v4414_v31 = vadd.s32 536870912, %v4413_v1  ;;  %v10715_v54 = vand.u32 8388607, %v4665_v45  ;;  %v4574_v22 = vshrl.u32 %v4573_v12, 5  ;;  %v4578_v13 = vshll.u32 %v12182_v4, %v4575_v26 }
 0x5b2   : > { %v6318_v58 = vadd.s32 4294967294, %v4525_v56  ;;  %v4579_v14 = vshrl.u32 %v12384_v49, %v4576_v6  ;;  %v4582_v55 = vshrl.u32 %v12385_v40, %v4576_v6  ;;  %v4585_v24 = vshrl.u32 %v12386_v11, %v4576_v6 }
 0x5b3   : > { %v10717_v18 = vshrl.u32 %v4414_v31, 30  ;;  %v4588_v16 = vshrl.u32 %v12181_v59, %v4576_v6  ;;  %v4581_v41 = vshll.u32 %v12384_v49, %v4575_v26  ;;  %v4584_v33 = vshll.u32 %v12385_v40, %v4575_v26 }
 0x5b4   : > { %vm6319_vm7 = vcmp.lt.s32.totalorder %v6318_v58, 0  ;;  %v4580_v51 = vor.u32 %v4579_v14, %v4578_v13  ;;  %v4587_v37 = vshll.u32 %v12386_v11, %v4575_v26  ;;  %v4675_v47 = vadd.s32 1, %v6324_v3 }
 0x5b5   : > { %v4528_v39 = vsel %vm6319_vm7, 0, %v6318_v58  ;;  %v4416_v9 = vshll.u32 %v10717_v18, 30  ;;  %v4583_v29 = vor.u32 %v4582_v55, %v4581_v41  ;;  %v4586_v8 = vor.u32 %v4585_v24, %v4584_v33 }
 0x5b6   : > { %v4529_v43 = vsub.s32 32, %v4528_v39  ;;  %v4533_v19 = vsub.s32 4294967266, %v4528_v39  ;;  %v4589_v28 = vor.u32 %v4588_v16, %v4587_v37  ;;  %v4590_v32 = vshll.u32 %v12181_v59, %v4575_v26 }
 0x5b7   : > { %v10727_v12 = vsub.s32 %v4413_v1, %v4416_v9  ;;  %v4591_v61 = vshrl.u32 %v12191_v17, %v4576_v6  ;;  %v4332_v56 = vmul.f32 %v4331_v7, %v4329_v48  ;;  %v4530_v58 = vshll.u32 %v10691_v30, %v4528_v39 }
 0x5b8   : > { %v4531_v63 = vshrl.u32 %v4513_v38, %v4529_v43  ;;  %v4534_v0 = vadd.s32 127, %v4533_v19  ;;  %v4577_v14 = vshrl.u32 %v12182_v4, %v4576_v6  ;;  %vm4593_vm11 = vcmp.lt.s32.totalorder %v4574_v22, 1 }
 0x5b9   : > { %v4419_v13 = vsub.s32 0, %v10727_v12  ;;  %v4592_v3 = vor.u32 %v4591_v61, %v4590_v32  ;;  %vm4594_vm0 = vcmp.lt.s32.totalorder %v4574_v22, 2  ;;  %vm4595_vm6 = vcmp.lt.s32.totalorder %v4574_v22, 3 }
 0x5ba   : > { %v4535_v31 = vshll.u32 %v4534_v0, 23  ;;  %v4532_v38 = vor.u32 %v4531_v63, %v4530_v58  ;;  %vm4596_vm15 = vcmp.lt.s32.totalorder %v4574_v22, 4  ;;  %v4601_v1 = vsel %vm4593_vm11, %v4580_v51, %v4583_v29 }
 0x5bb   : > { %v6313_v55 = vmin.u32 %v4419_v13, %v10727_v12  ;;  %v4598_v26 = vsel %vm4596_vm15, %v4586_v8, 2102212464  ;;  %v4602_v24 = vsel %vm4596_vm15, %v4589_v28, 920167782  ;;  %v4605_v16 = vsel %vm4593_vm11, %v4583_v29, %v4586_v8 }
 0x5bc   : > { %v4536_v7 = vor.u32 4788187, %v4535_v31  ;;  %v4597_v48 = vsel %vm4593_vm11, %v4577_v14, %v4580_v51  ;;  %v4603_v30 = vsel %vm4595_vm6, %v4586_v8, %v4602_v24  ;;  %v4606_v39 = vsel %vm4596_vm15, %v4592_v3, 1326507024 }
 0x5bd   : > { %v4421_v43 = vclz %v6313_v55  ;;  %v4604_v6 = vsel %vm4594_vm0, %v4601_v1, %v4603_v30  ;;  %v4607_v19 = vsel %vm4595_vm6, %v4589_v28, %v4606_v39  ;;  %vm4676_vm5 = vcmp.gt.s32.totalorder %v4675_v47, 0 }
 0x5be   : > { %v4599_v41 = vsel %vm4595_vm6, %v4583_v29, %v4598_v26  ;;  %v4608_v33 = vsel %vm4594_vm0, %v4605_v16, %v4607_v19  ;;  %v10738_v9 = vmul.u32.u64.low %v10711_v42, %v4604_v6  ;;  %v10739_v37 = vmul.u32.u64.high %v10711_v42, %v4604_v6, %v10738_v9  ;;  %v10747_v29 = vpop.f32.mrb[13].mxu1 }
 0x5bf   : > { %v6314_v63 = vadd.s32 4294967294, %v4421_v43  ;;  %v10743_v0 = vmul.u32.u64.low %v10711_v42, %v4608_v33  ;;  %v10744_v32 = vmul.u32.u64.high %v10711_v42, %v4608_v33, %v10743_v0  ;;  %v4677_v51 = vsel %vm4676_vm5, %v4675_v47, 0 }
 0x5c0   : > { %v4679_v8 = vand.u32 31, %v4677_v51  ;;  %v4333_v61 = vxor.u32 2147483648, %v4332_v56  ;;  %v4537_v58 = vand.u32 2147483647, %v4536_v7  ;;  %v4600_v28 = vsel %vm4594_vm0, %v4597_v48, %v4599_v41 }
 0x5c1   : > { %vm6315_vm8 = vcmp.lt.s32.totalorder %v6314_v63, 0  ;;  %v4619_v14 = vadd.s32 1, %v10739_v37  ;;  %v4673_v13 = vor.u32 8388608, %v10715_v54  ;;  %vm4251_vm9 = vcmp.lt.s32.totalorder %v10512_v46, 0 }
 0x5c2   : > { %v4424_v31 = vsel %vm6315_vm8, 0, %v6314_v63  ;;  %v4680_v3 = vsub.s32 32, %v4679_v8  ;;  %v4539_v1 = vcvt.s32.f32 %v4532_v38  ;;  %v10754_v47 = vadd.f32 %v10522_v25, %v10566_v23 }
 0x5c3   : > { %v4429_v55 = vsub.s32 4294967266, %v4424_v31  ;;  %v4335_v26 = vsub.s32 4, %v10606_v20  ;;  %v4409_v22 = vadd.s32 %v10686_v57, %v10683_v27  ;;  %v4616_v24 = vmul.u32 %v10711_v42, %v4600_v28 }
 0x5c4   : > { %vm4618_vm1 = vc.u32 %v10744_v32, %v10738_v9  ;;  %v10764_v54 = vsel %vm4251_vm9, %v4333_v61, %v4332_v56  ;;  %v10766_v38 = vmul.f32 %v4539_v1, %v4537_v58  ;;  %v4678_v48 = vshrl.u32 %v4677_v51, 5 }
 0x5c5   : > { %v4430_v16 = vadd.s32 127, %v4429_v55  ;;  %v4620_v25 = vsel %vm4618_vm1, %v4619_v14, %v10739_v37  ;;  %v4683_v30 = vshrl.u32 %v12384_v49, %v4680_v3  ;;  %v10770_v39 = vshll.u32 %v4673_v13, 8 }
 0x5c6   : > { %v4621_v7 = vadd.s32 %v4620_v25, %v4616_v24  ;;  %v4425_v27 = vsub.s32 32, %v4424_v31  ;;  %v4682_v57 = vshll.u32 %v12182_v4, %v4679_v8  ;;  %v4685_v42 = vshll.u32 %v12384_v49, %v4679_v8 }
 0x5c7   : > { %v4686_v43 = vshrl.u32 %v12385_v40, %v4680_v3  ;;  %v4431_v56 = vshll.u32 %v4430_v16, 23  ;;  %v4688_v19 = vshll.u32 %v12385_v40, %v4679_v8  ;;  %v4689_v41 = vshrl.u32 %v12386_v11, %v4680_v3 }
 0x5c8   : > { %v4622_v6 = vadd.s32 536870912, %v4621_v7  ;;  %v4684_v33 = vor.u32 %v4683_v30, %v4682_v57  ;;  %v4691_v63 = vshll.u32 %v12386_v11, %v4679_v8  ;;  %v4692_v0 = vshrl.u32 %v12181_v59, %v4680_v3 }
 0x5c9   : > { %v4687_v37 = vor.u32 %v4686_v43, %v4685_v42  ;;  %v4690_v61 = vor.u32 %v4689_v41, %v4688_v19  ;;  %v4694_v58 = vshll.u32 %v12181_v59, %v4679_v8  ;;  %v4695_v28 = vshrl.u32 %v12191_v17, %v4680_v3 }
 0x5ca   : > { %v10779_v51 = vshrl.u32 %v4622_v6, 30  ;;  %v4426_v14 = vshll.u32 %v10727_v12, %v4424_v31  ;;  %v4681_v13 = vshrl.u32 %v12182_v4, %v4680_v3  ;;  %v4693_v1 = vor.u32 %v4692_v0, %v4691_v63 }
 0x5cb   : > { %v10787_v55 = vadd.f32 %v10536_v44, %v10566_v23  ;;  %vm10791_vm3 = vcmp.le.f32.partialorder %v4249_v34, 0.7853982  ;;  %v4696_v8 = vor.u32 %v4695_v28, %v4694_v58  ;;  %vm4697_vm13 = vcmp.lt.s32.totalorder %v4678_v48, 1 }
 0x5cc   : > { %12389 = vst [vmem:[#allocation20_spill] sm:$0xff] %v10779_v51  ;;  %v4624_v16 = vshll.u32 %v10779_v51, 30  ;;  %vm4700_vm14 = vcmp.lt.s32.totalorder %v4678_v48, 4  ;;  %v4427_v25 = vshrl.u32 %v4409_v22, %v4425_v27  ;;  %v4432_v12 = vor.u32 4788187, %v4431_v56 }
 0x5cd   : > { %12390 = vst [vmem:[#allocation7_spill] sm:$0xff] %v10787_v55  ;;  %v4702_v31 = vsel %vm4700_vm14, %v4690_v61, 2102212464  ;;  %v4705_v3 = vsel %vm4697_vm13, %v4684_v33, %v4687_v37  ;;  %vm4699_vm4 = vcmp.lt.s32.totalorder %v4678_v48, 3  ;;  %v4706_v44 = vsel %vm4700_vm14, %v4693_v1, 920167782 }
 0x5ce   : > { %v10796_v30 = vsub.s32 %v4621_v7, %v4624_v16  ;;  %v4709_v57 = vsel %vm4697_vm13, %v4687_v37, %v4690_v61  ;;  %vm4698_vm12 = vcmp.lt.s32.totalorder %v4678_v48, 2  ;;  %v4701_v42 = vsel %vm4697_vm13, %v4681_v13, %v4684_v33 }
 0x5cf   : > { %v4707_v34 = vsel %vm4699_vm4, %v4690_v61, %v4706_v44  ;;  %v4710_v43 = vsel %vm4700_vm14, %v4696_v8, 1326507024  ;;  %v4703_v19 = vsel %vm4699_vm4, %v4687_v37, %v4702_v31  ;;  %v4428_v0 = vor.u32 %v4427_v25, %v4426_v14 }
 0x5d0   : > { %v4627_v6 = vsub.s32 0, %v10796_v30  ;;  %v4708_v41 = vsel %vm4698_vm12, %v4705_v3, %v4707_v34  ;;  %v4711_v63 = vsel %vm4699_vm4, %v4693_v1, %v4710_v43  ;;  %v4541_v7 = vxor.u32 2147483648, %v10766_v38 }
 0x5d1   : > { %v4712_v58 = vsel %vm4698_vm12, %v4709_v57, %v4711_v63  ;;  %v10800_v22 = vmul.u32.u64.low %v10770_v39, %v4708_v41  ;;  %v10801_v27 = vmul.u32.u64.high %v10770_v39, %v4708_v41, %v10800_v22  ;;  %v4433_v61 = vand.u32 2147483647, %v4432_v12 }
 0x5d2   : > { %v6321_v56 = vmin.u32 %v4627_v6, %v10796_v30  ;;  %v10807_v48 = vmul.u32.u64.low %v10770_v39, %v4712_v58  ;;  %v10808_v33 = vmul.u32.u64.high %v10770_v39, %v4712_v58, %v10807_v48  ;;  %v4704_v28 = vsel %vm4698_vm12, %v4701_v42, %v4703_v19 }
 0x5d3   : > { %v4876_v37 = vand.u32 2139095040, %v10787_v55  ;;  %v12117_v14 = vand.u32 2147483647, %v10754_v47  ;;  %v4336_v13 = vsel %vm4251_vm9, %v4335_v26, %v10606_v20  ;;  %vm4459_vm10 = vcmp.lt.s32.totalorder %v10528_v35, 0 }
 0x5d4   : > { %v4543_v1 = vsub.s32 4, %v10670_v10  ;;  %v4629_v16 = vclz %v6321_v56  ;;  %v4337_v8 = vsel %vm10791_vm3, %v10512_v46, %v10764_v54  ;;  %v4435_v25 = vcvt.s32.f32 %v4428_v0  ;;  %v10853_v0 = vpop.f32.mrb[14].mxu0 }
 0x5d5   : > { %v4723_v12 = vadd.s32 1, %v10801_v27  ;;  %v4877_v31 = vshrl.u32 %v4876_v37, 23  ;;  %v4542_v3 = vsel %vm4459_vm10, %v4541_v7, %v10766_v38  ;;  %v4720_v20 = vmul.u32 %v10770_v39, %v4704_v28 }
 0x5d6   : > { %v6322_v44 = vadd.s32 4294967294, %v4629_v16  ;;  %vm4722_vm2 = vc.u32 %v10808_v33, %v10800_v22  ;;  %v4436_v26 = vmul.f32 %v4435_v25, %v4433_v61  ;;  %v12118_v42 = vand.u32 2147483647, %v10787_v55 }
 0x5d7   : > { %v4724_v57 = vsel %vm4722_vm2, %v4723_v12, %v10801_v27  ;;  %v6332_v54 = vadd.s32 4294967169, %v4877_v31  ;;  %v4772_v43 = vand.u32 2139095040, %v10754_v47  ;;  %v4338_v6 = vsel %vm10791_vm3, 0, %v4336_v13 }
 0x5d8   : > { %vm6323_vm7 = vcmp.lt.s32.totalorder %v6322_v44, 0  ;;  %v4725_v34 = vadd.s32 %v4724_v57, %v4720_v20  ;;  %vm10837_vm11 = vcmp.le.f32.partialorder %v4457_v21, 0.7853982  ;;  %6804 = vcosq.f32 %v4337_v8 }
 0x5d9   : > { %v10841_v39 = vsel %vm6323_vm7, 0, %v6322_v44  ;;  %v4883_v19 = vadd.s32 1, %v6332_v54  ;;  %v10846_v41 = vsel %vm4459_vm10, %v4543_v1, %v10670_v10  ;;  %v10851_v24 = vsel %vm10837_vm11, %v10528_v35, %v4542_v3 }
 0x5da   : > { %v4726_v63 = vadd.s32 536870912, %v4725_v34  ;;  %v4437_v21 = vxor.u32 2147483648, %v4436_v26  ;;  %v4880_v58 = vand.u32 8388607, %v12118_v42  ;;  %v10859_v27 = vand.u32 8388607, %v12117_v14 }
 0x5db   : > { %vm4884_vm0 = vcmp.gt.s32.totalorder %v4883_v19, 0  ;;  %v4637_v10 = vsub.s32 4294967266, %v10841_v39  ;;  %v4773_v48 = vshrl.u32 %v4772_v43, 23  ;;  %6806 = vsinq.f32 %v4337_v8 }
 0x5dc   : > { %v10862_v7 = vshrl.u32 %v4726_v63, 30  ;;  %v4885_v56 = vsel %vm4884_vm0, %v4883_v19, 0  ;;  %v10864_v61 = vadd.s32 3, %v4338_v6  ;;  %vm4355_vm6 = vcmp.lt.s32.totalorder %v10515_v36, 0 }
 0x5dd   : > { %v4887_v28 = vand.u32 31, %v4885_v56  ;;  %v4546_v37 = vsel %vm10837_vm11, 0, %v10846_v41  ;;  %6808 = vcosq.f32 %v10851_v24  ;;  %v4617_v13 = vadd.s32 %v10738_v9, %v10744_v32 }
 0x5de   : > { %12395 = vst [vmem:[#allocation12_spill] sm:$0xff] %v10864_v61  ;;  %v4728_v1 = vshll.u32 %v10862_v7, 30  ;;  %v10876_v16 = vsel %vm4355_vm6, %v4437_v21, %v4436_v26  ;;  %v4881_v8 = vor.u32 8388608, %v4880_v58  ;;  %v4633_v31 = vsub.s32 32, %v10841_v39 }
 0x5df   : > { %v4888_v25 = vsub.s32 32, %v4887_v28  ;;  %v4638_v3 = vadd.s32 127, %v4637_v10  ;;  %v6328_v20 = vadd.s32 4294967169, %v4773_v48  ;;  %v4890_v57 = vshll.u32 %v12182_v4, %v4887_v28 }
 0x5e0   : > { %v10880_v44 = vsub.s32 %v4725_v34, %v4728_v1  ;;  %v4893_v32 = vshll.u32 %v12384_v49, %v4887_v28  ;;  %v4886_v43 = vshrl.u32 %v4885_v56, 5  ;;  %v4896_v6 = vshll.u32 %v12385_v40, %v4887_v28 }
 0x5e1   : > { %v4891_v9 = vshrl.u32 %v12384_v49, %v4888_v25  ;;  %v4894_v54 = vshrl.u32 %v12385_v40, %v4888_v25  ;;  %v4897_v19 = vshrl.u32 %v12386_v11, %v4888_v25  ;;  %v4899_v34 = vshll.u32 %v12386_v11, %v4887_v28 }
 0x5e2   : > { %v4731_v26 = vsub.s32 0, %v10880_v44  ;;  %v4900_v58 = vshrl.u32 %v12181_v59, %v4888_v25  ;;  %v10891_v10 = vpop.eup %6804  ;;  %v4639_v48 = vshll.u32 %v4638_v3, 23  ;;  %v10894_v14 = vshll.u32 %v4881_v8, 8 }
 0x5e3   : > { %v4892_v63 = vor.u32 %v4891_v9, %v4890_v57  ;;  %v4895_v21 = vor.u32 %v4894_v54, %v4893_v32  ;;  %12396 = vst [vmem:[#allocation8_spill] sm:$0xff] %v10891_v10  ;;  %v10898_v56 = vadd.f32 %v10538_v62, %v10566_v23  ;;  %v4898_v42 = vor.u32 %v4897_v19, %v4896_v6 }
 0x5e4   : > { %v6325_v1 = vmin.u32 %v4731_v26, %v10880_v44  ;;  %v4901_v15 = vor.u32 %v4900_v58, %v4899_v34  ;;  %v4902_v57 = vshll.u32 %v12181_v59, %v4887_v28  ;;  %v4903_v9 = vshrl.u32 %v12191_v17, %v4888_v25 }
 0x5e5   : > { %v4634_v32 = vshll.u32 %v10796_v30, %v10841_v39  ;;  %vm4667_vm15 = vcmp.lt.s32.totalorder %v10578_v50, 0  ;;  %vm4905_vm5 = vcmp.lt.s32.totalorder %v4886_v43, 1  ;;  %v4779_v54 = vadd.s32 1, %v6328_v20  ;;  %v10905_v8 = vpop.eup %6806 }
 0x5e6   : > { %v4733_v3 = vclz %v6325_v1  ;;  %12397 = vst [vmem:[#allocation14_spill] sm:$0xff] %v10905_v8  ;;  %vm10909_vm8 = vcmp.le.f32.partialorder %v4353_v53, 0.7853982  ;;  %v4635_v23 = vshrl.u32 %v4617_v13, %v4633_v31  ;;  %v4904_v28 = vor.u32 %v4903_v9, %v4902_v57  ;;  %v10926_v1 = vpop.f32.mrb[14].mxu1 }
 0x5e7   : > { %vm4908_vm9 = vcmp.lt.s32.totalorder %v4886_v43, 4  ;;  %v4913_v26 = vsel %vm4905_vm5, %v4892_v63, %v4895_v21  ;;  %v10914_v6 = vpop.eup %6808  ;;  %v4640_v30 = vor.u32 4788187, %v4639_v48  ;;  %vm4907_vm1 = vcmp.lt.s32.totalorder %v4886_v43, 3  ;;  %v11087_v8 = vpop.f32.mrb[15].mxu1 }
 0x5e8   : > { %12400 = vst [vmem:[#allocation10_spill] sm:$0xff] %v10914_v6  ;;  %v6326_v39 = vadd.s32 4294967294, %v4733_v3  ;;  %v4914_v19 = vsel %vm4908_vm9, %v4901_v15, 920167782  ;;  %vm10918_vm3 = vcmp.le.f32.partialorder %v4665_v45, 0.7853982  ;;  %v4917_v31 = vsel %vm4905_vm5, %v4895_v21, %v4898_v42 }
 0x5e9   : > { %vm4906_vm13 = vcmp.lt.s32.totalorder %v4886_v43, 2  ;;  %v4910_v53 = vsel %vm4908_vm9, %v4898_v42, 2102212464  ;;  %v4915_v13 = vsel %vm4907_vm1, %v4898_v42, %v4914_v19  ;;  %v4889_v34 = vshrl.u32 %v12182_v4, %v4888_v25 }
 0x5ea   : > { %vm6327_vm14 = vcmp.lt.s32.totalorder %v6326_v39, 0  ;;  %v4916_v58 = vsel %vm4906_vm13, %v4913_v26, %v4915_v13  ;;  %v4918_v48 = vsel %vm4908_vm9, %v4904_v28, 1326507024  ;;  %v4636_v57 = vor.u32 %v4635_v23, %v4634_v32 }
 0x5eb   : > { %v4751_v45 = vsub.s32 4, %v10862_v7  ;;  %v4919_v9 = vsel %vm4907_vm1, %v4901_v15, %v4918_v48  ;;  %vm4780_vm4 = vcmp.gt.s32.totalorder %v4779_v54, 0  ;;  %v10930_v3 = vsel %vm6327_vm14, 0, %v6326_v39 }
 0x5ec   : > { %v4909_v19 = vsel %vm4905_vm5, %v4889_v34, %v4892_v63  ;;  %v4911_v42 = vsel %vm4907_vm1, %v4895_v21, %v4910_v53  ;;  %v4920_v12 = vsel %vm4906_vm13, %v4917_v31, %v4919_v9  ;;  %6810 = vsinq.f32 %v10851_v24 }
 0x5ed   : > { %v10936_v25 = vmul.u32.u64.low %v10894_v14, %v4920_v12  ;;  %v10937_v26 = vmul.u32.u64.high %v10894_v14, %v4920_v12, %v10936_v25  ;;  %v10940_v28 = vmul.u32.u64.low %v10894_v14, %v4916_v58  ;;  %v10941_v32 = vmul.u32.u64.high %v10894_v14, %v4916_v58, %v10940_v28 }
 0x5ee   : > { %v10949_v15 = vadd.s32 3, %v4546_v37  ;;  %v4641_v63 = vand.u32 2147483647, %v4640_v30  ;;  %v4781_v21 = vsel %vm4780_vm4, %v4779_v54, 0  ;;  %v4741_v23 = vsub.s32 4294967266, %v10930_v3 }
 0x5ef   : > { %v10955_v12 = vsel %vm4667_vm15, %v4751_v45, %v10862_v7  ;;  %v4912_v39 = vsel %vm4906_vm13, %v4909_v19, %v4911_v42  ;;  %v4783_v53 = vand.u32 31, %v4781_v21  ;;  %v10962_v38 = vsel %vm10909_vm8, %v10515_v36, %v10876_v16 }
 0x5f0   : > { %12403 = vst [vmem:[#allocation32_spill] sm:$0xff] %v10949_v15  ;;  %v4643_v41 = vcvt.s32.f32 %v4636_v57  ;;  %v4721_v24 = vadd.s32 %v10800_v22, %v10808_v33  ;;  %v12404_v37 = vor.u32 8388608, %v10859_v27  ;;  %vm4930_vm12 = vc.u32 %v10937_v26, %v10940_v28 }
 0x5f1   : > { %v4931_v7 = vadd.s32 1, %v10941_v32  ;;  %v4784_v43 = vsub.s32 32, %v4783_v53  ;;  %v4737_v16 = vsub.s32 32, %v10930_v3  ;;  %v4754_v22 = vsel %vm10918_vm3, 0, %v10955_v12 }
 0x5f2   : > { %v10968_v54 = vshll.u32 %v12404_v37, 8  ;;  %v10974_v13 = vmul.f32 %v4643_v41, %v4641_v63  ;;  %v4928_v33 = vmul.u32 %v10894_v14, %v4912_v39  ;;  %v4742_v27 = vadd.s32 127, %v4741_v23 }
 0x5f3   : > { %v4932_v31 = vsel %vm4930_vm12, %v4931_v7, %v10941_v32  ;;  %v4787_v34 = vshrl.u32 %v12384_v49, %v4784_v43  ;;  %v4790_v58 = vshrl.u32 %v12385_v40, %v4784_v43  ;;  %v4786_v57 = vshll.u32 %v12182_v4, %v4783_v53 }
 0x5f4   : > { %v4933_v48 = vadd.s32 %v4932_v31, %v4928_v33  ;;  %v4789_v45 = vshll.u32 %v12384_v49, %v4783_v53  ;;  %v4793_v9 = vshrl.u32 %v12386_v11, %v4784_v43  ;;  %v4782_v19 = vshrl.u32 %v4781_v21, 5  ;;  %v10995_v21 = vpop.permute.xlu0 %4051 }
 0x5f5   : > { %v4792_v42 = vshll.u32 %v12385_v40, %v4783_v53  ;;  %v4795_v25 = vshll.u32 %v12386_v11, %v4783_v53  ;;  %v4796_v14 = vshrl.u32 %v12181_v59, %v4784_v43  ;;  %v4788_v32 = vor.u32 %v4787_v34, %v4786_v57 }
 0x5f6   : > { %v4934_v63 = vadd.s32 536870912, %v4933_v48  ;;  %v4791_v23 = vor.u32 %v4790_v58, %v4789_v45  ;;  %v4980_v12 = vand.u32 2139095040, %v10898_v56  ;;  %v4798_v37 = vshll.u32 %v12181_v59, %v4783_v53  ;;  %v10993_v33 = vpop.eup %6810 }
 0x5f7   : > { %v4794_v39 = vor.u32 %v4793_v9, %v4792_v42  ;;  %v4797_v41 = vor.u32 %v4796_v14, %v4795_v25  ;;  %v4799_v7 = vshrl.u32 %v12191_v17, %v4784_v43  ;;  %12405 = vst [vmem:[#allocation11_spill] sm:$0xff] %v10993_v33  ;;  %v4645_v31 = vxor.u32 2147483648, %v10974_v13 }
 0x5f8   : > { %v4738_v30 = vshll.u32 %v10880_v44, %v10930_v3  ;;  %v4739_v35 = vshrl.u32 %v4721_v24, %v4737_v16  ;;  %v11000_v34 = vshrl.u32 %v4934_v63, 30  ;;  %vm12161_vm10 = vcmp.lt.s32.totalorder %v10574_v52, 0 }
 0x5f9   : > { %v4743_v58 = vshll.u32 %v4742_v27, 23  ;;  %v4800_v57 = vor.u32 %v4799_v7, %v4798_v37  ;;  %vm4801_vm2 = vcmp.lt.s32.totalorder %v4782_v19, 1  ;;  %v11005_v53 = vadd.f32 %v10555_v5, %v10995_v21 }
 0x5fa   : > { %v4936_v45 = vshll.u32 %v11000_v34, 30  ;;  %vm4804_vm7 = vcmp.lt.s32.totalorder %v4782_v19, 4  ;;  %v4809_v9 = vsel %vm4801_vm2, %v4788_v32, %v4791_v23  ;;  %v4981_v42 = vshrl.u32 %v4980_v12, 23 }
 0x5fb   : > { %12406 = vst [vmem:[#allocation23_spill] sm:$0xff] %v11005_v53  ;;  %v4785_v44 = vshrl.u32 %v12182_v4, %v4784_v43  ;;  %vm4803_vm11 = vcmp.lt.s32.totalorder %v4782_v19, 3  ;;  %v4806_v3 = vsel %vm4804_vm7, %v4794_v39, 2102212464  ;;  %v4810_v24 = vsel %vm4804_vm7, %v4797_v41, 920167782 }
 0x5fc   : > { %v11010_v16 = vsub.s32 %v4933_v48, %v4936_v45  ;;  %vm4802_vm0 = vcmp.lt.s32.totalorder %v4782_v19, 2  ;;  %v4811_v27 = vsel %vm4803_vm11, %v4794_v39, %v4810_v24  ;;  %v4813_v25 = vsel %vm4801_vm2, %v4791_v23, %v4794_v39 }
 0x5fd   : > { %v4740_v14 = vor.u32 %v4739_v35, %v4738_v30  ;;  %v4744_v5 = vor.u32 4788187, %v4743_v58  ;;  %v4812_v63 = vsel %vm4802_vm0, %v4809_v9, %v4811_v27  ;;  %v4814_v37 = vsel %vm4804_vm7, %v4800_v57, 1326507024  ;;  %v11028_v58 = vpop.f32.mrb[15].mxu0 }
 0x5fe   : > { %v4939_v7 = vsub.s32 0, %v11010_v16  ;;  %v4805_v12 = vsel %vm4801_vm2, %v4785_v44, %v4788_v32  ;;  %v4807_v6 = vsel %vm4803_vm11, %v4791_v23, %v4806_v3  ;;  %v4815_v43 = vsel %vm4803_vm11, %v4797_v41, %v4814_v37 }
 0x5ff   : > { %v4816_v33 = vsel %vm4802_vm0, %v4813_v25, %v4815_v43  ;;  %v11018_v48 = vmul.u32.u64.low %v10968_v54, %v4812_v63  ;;  %v11019_v45 = vmul.u32.u64.high %v10968_v54, %v4812_v63, %v11018_v48  ;;  %v6336_v24 = vadd.s32 4294967169, %v4981_v42 }
 0x600   : > { %6812 = vcosq.f32 %v10962_v38  ;;  %v6333_v35 = vmin.u32 %v4939_v7, %v11010_v16  ;;  %v11025_v30 = vmul.u32.u64.low %v10968_v54, %v4816_v33  ;;  %v11026_v39 = vmul.u32.u64.high %v10968_v54, %v4816_v33, %v11025_v30 }
 0x601   : > { %6814 = vsinq.f32 %v10962_v38  ;;  %v11031_v32 = vadd.s32 3, %v4754_v22  ;;  %v4808_v23 = vsel %vm4802_vm0, %v4805_v12, %v4807_v6  ;;  %v4987_v41 = vadd.s32 1, %v6336_v24 }
 0x602   : > { %v11037_v57 = vsel %vm12161_vm10, %v4645_v31, %v10974_v13  ;;  %v4745_v9 = vand.u32 2147483647, %v4744_v5  ;;  %v4941_v42 = vclz %v6333_v35  ;;  %v12408_v44 = vand.u32 2147483647, %v10898_v56 }
 0x603   : > { %12407 = vst [vmem:[#allocation27_spill] sm:$0xff] %v11031_v32  ;;  %v4747_v3 = vcvt.s32.f32 %v4740_v14  ;;  %v4827_v27 = vadd.s32 1, %v11019_v45  ;;  %vm4988_vm5 = vcmp.gt.s32.totalorder %v4987_v41, 0  ;;  %v5084_v38 = vand.u32 2139095040, %v11005_v53 }
 0x604   : > { %v4984_v33 = vand.u32 8388607, %v12408_v44  ;;  %v6334_v22 = vadd.s32 4294967294, %v4941_v42  ;;  %v4824_v6 = vmul.u32 %v10968_v54, %v4808_v23  ;;  %vm4826_vm9 = vc.u32 %v11026_v39, %v11018_v48 }
 0x605   : > { %v4989_v19 = vsel %vm4988_vm5, %v4987_v41, 0  ;;  %v4929_v13 = vadd.s32 %v10940_v28, %v10937_v26  ;;  %v4828_v31 = vsel %vm4826_vm9, %v4827_v27, %v11019_v45  ;;  %v11051_v14 = vadd.f32 %v10603_v60, %v10995_v21 }
 0x606   : > { %v4991_v25 = vand.u32 31, %v4989_v19  ;;  %v11053_v5 = vmul.f32 %v4747_v3, %v4745_v9  ;;  %vm6335_vm1 = vcmp.lt.s32.totalorder %v6334_v22, 0  ;;  %v4829_v63 = vadd.s32 %v4828_v31, %v4824_v6 }
 0x607   : > { %12409 = vst [vmem:[#allocation13_spill] sm:$0xff] %v11051_v14  ;;  %v4985_v37 = vor.u32 8388608, %v4984_v33  ;;  %v4944_v54 = vsel %vm6335_vm1, 0, %v6334_v22  ;;  %v5085_v43 = vshrl.u32 %v5084_v38, 23  ;;  %v4990_v28 = vshrl.u32 %v4989_v19, 5 }
 0x608   : > { %v4992_v7 = vsub.s32 32, %v4991_v25  ;;  %v4945_v24 = vsub.s32 32, %v4944_v54  ;;  %v4949_v35 = vsub.s32 4294967266, %v4944_v54  ;;  %v4830_v26 = vadd.s32 536870912, %v4829_v63 }
 0x609   : > { %v4994_v45 = vshll.u32 %v12182_v4, %v4991_v25  ;;  %v4997_v60 = vshll.u32 %v12384_v49, %v4991_v25  ;;  %v5000_v44 = vshll.u32 %v12385_v40, %v4991_v25  ;;  %v5003_v22 = vshll.u32 %v12386_v11, %v4991_v25 }
 0x60a   : > { %v4995_v30 = vshrl.u32 %v12384_v49, %v4992_v7  ;;  %v4998_v23 = vshrl.u32 %v12385_v40, %v4992_v7  ;;  %v11060_v41 = vpop.eup %6812  ;;  %v4950_v9 = vadd.s32 127, %v4949_v35  ;;  %v11062_v42 = vshrl.u32 %v4830_v26, 30 }
 0x60b   : > { %v5001_v33 = vshrl.u32 %v12386_v11, %v4992_v7  ;;  %v11066_v3 = vpop.eup %6814  ;;  %v4947_v27 = vshrl.u32 %v4929_v13, %v4945_v24  ;;  %v5004_v6 = vshrl.u32 %v12181_v59, %v4992_v7  ;;  %v5006_v26 = vshll.u32 %v12181_v59, %v4991_v25 }
 0x60c   : > { %v4996_v38 = vor.u32 %v4995_v30, %v4994_v45  ;;  %v4951_v19 = vshll.u32 %v4950_v9, 23  ;;  %v4832_v31 = vshll.u32 %v11062_v42, 30  ;;  %v4999_v12 = vor.u32 %v4998_v23, %v4997_v60 }
 0x60d   : > { %v5002_v15 = vor.u32 %v5001_v33, %v5000_v44  ;;  %v5005_v35 = vor.u32 %v5004_v6, %v5003_v22  ;;  %v5007_v32 = vshrl.u32 %v12191_v17, %v4992_v7  ;;  %v11073_v10 = vshll.u32 %v4985_v37, 8 }
 0x60e   : > { %v12410_v46 = vand.u32 2147483647, %v10574_v52  ;;  %v12411_v13 = vmov 0  ;;  %v4946_v24 = vshll.u32 %v11010_v16, %v4944_v54  ;;  %v11082_v45 = vsub.s32 %v4829_v63, %v4832_v31 }
 0x60f   : > { %v4993_v30 = vshrl.u32 %v12182_v4, %v4992_v7  ;;  %v6340_v60 = vadd.s32 4294967169, %v5085_v43  ;;  %v4952_v23 = vor.u32 4788187, %v4951_v19  ;;  %v5008_v9 = vor.u32 %v5007_v32, %v5006_v26 }
 0x610   : > { %vm11077_vm13 = vcmp.le.f32.partialorder %v12410_v46, 0.7853982  ;;  %vm5009_vm14 = vcmp.lt.s32.totalorder %v4990_v28, 1  ;;  %vm5012_vm4 = vcmp.lt.s32.totalorder %v4990_v28, 4  ;;  %v4948_v25 = vor.u32 %v4947_v27, %v4946_v24 }
 0x611   : > { %v12412_v13 = vsel %vm11077_vm13, 4294967295, %v12411_v13  ;;  %v4835_v37 = vsub.s32 0, %v11082_v45  ;;  %v5014_v44 = vsel %vm5012_vm4, %v5002_v15, 2102212464  ;;  %v5017_v33 = vsel %vm5009_vm14, %v4996_v38, %v4999_v12 }
 0x612   : > { %12413 = vst [vmem:[#allocation26_spill] sm:$0xff] %v12412_v13  ;;  %vm5011_vm12 = vcmp.lt.s32.totalorder %v4990_v28, 3  ;;  %v5018_v46 = vsel %vm5012_vm4, %v5005_v35, 920167782  ;;  %v5021_v22 = vsel %vm5009_vm14, %v4999_v12, %v5002_v15  ;;  %v5022_v6 = vsel %vm5012_vm4, %v5008_v9, 1326507024 }
 0x613   : > { %v6329_v16 = vmin.u32 %v4835_v37, %v11082_v45  ;;  %vm5010_vm2 = vcmp.lt.s32.totalorder %v4990_v28, 2  ;;  %v5013_v63 = vsel %vm5009_vm14, %v4993_v30, %v4996_v38  ;;  %v5019_v54 = vsel %vm5011_vm12, %v5002_v15, %v5018_v46 }
 0x614   : > { %v4953_v7 = vand.u32 2147483647, %v4952_v23  ;;  %v5015_v43 = vsel %vm5011_vm12, %v4999_v12, %v5014_v44  ;;  %v5020_v19 = vsel %vm5010_vm2, %v5017_v33, %v5019_v54  ;;  %v5023_v32 = vsel %vm5011_vm12, %v5005_v35, %v5022_v6 }
 0x615   : > { %v4955_v31 = vcvt.s32.f32 %v4948_v25  ;;  %v4837_v26 = vclz %v6329_v16  ;;  %v5024_v27 = vsel %vm5010_vm2, %v5021_v22, %v5023_v32  ;;  %v5091_v24 = vadd.s32 1, %v6340_v60 }
 0x616   : > { %v11090_v61 = vmul.u32.u64.low %v11073_v10, %v5024_v27  ;;  %v11091_v51 = vmul.u32.u64.high %v11073_v10, %v5024_v27, %v11090_v61  ;;  %v11094_v9 = vmul.u32.u64.low %v11073_v10, %v5020_v19  ;;  %v11095_v37 = vmul.u32.u64.high %v11073_v10, %v5020_v19, %v11094_v9 }
 0x617   : > { %v6330_v15 = vadd.s32 4294967294, %v4837_v26  ;;  %v5016_v28 = vsel %vm5010_vm2, %v5013_v63, %v5015_v43  ;;  %v12414_v12 = vand.u32 2147483647, %v11005_v53  ;;  %vm5092_vm7 = vcmp.gt.s32.totalorder %v5091_v24, 0 }
 0x618   : > { %v11104_v35 = vsel %vm11077_vm13, %v10574_v52, %v11037_v57  ;;  %v11107_v61 = vmul.f32 %v4955_v31, %v4953_v7  ;;  %v5093_v60 = vsel %vm5092_vm7, %v5091_v24, 0  ;;  %v4825_v33 = vadd.s32 %v11018_v48, %v11026_v39 }
 0x619   : > { %v5088_v38 = vand.u32 8388607, %v12414_v12  ;;  %vm6331_vm11 = vcmp.lt.s32.totalorder %v6330_v15, 0  ;;  %v5095_v25 = vand.u32 31, %v5093_v60  ;;  %v5032_v22 = vmul.u32 %v11073_v10, %v5016_v28 }
 0x61a   : > { %v4840_v46 = vsel %vm6331_vm11, 0, %v6330_v15  ;;  %vm5034_vm0 = vc.u32 %v11091_v51, %v11094_v9  ;;  %v5035_v16 = vadd.s32 1, %v11095_v37  ;;  %v4957_v54 = vxor.u32 2147483648, %v11107_v61 }
 0x61b   : > { %v4841_v57 = vsub.s32 32, %v4840_v46  ;;  %v4845_v6 = vsub.s32 4294967266, %v4840_v46  ;;  %v5089_v63 = vor.u32 8388608, %v5088_v38  ;;  %v5094_v7 = vshrl.u32 %v5093_v60, 5 }
 0x61c   : > { %v5096_v43 = vsub.s32 32, %v5095_v25  ;;  %v5098_v19 = vshll.u32 %v12182_v4, %v5095_v25  ;;  %v5036_v48 = vsel %vm5034_vm0, %v5035_v16, %v11095_v37  ;;  %v5101_v39 = vshll.u32 %v12384_v49, %v5095_v25 }
 0x61d   : > { %v4846_v32 = vadd.s32 127, %v4845_v6  ;;  %v5104_v10 = vshll.u32 %v12385_v40, %v5095_v25  ;;  %v4843_v31 = vshrl.u32 %v4825_v33, %v4841_v57  ;;  %v5037_v26 = vadd.s32 %v5036_v48, %v5032_v22 }
 0x61e   : > { %v5099_v27 = vshrl.u32 %v12384_v49, %v5096_v43  ;;  %v5102_v24 = vshrl.u32 %v12385_v40, %v5096_v43  ;;  %v5105_v28 = vshrl.u32 %v12386_v11, %v5096_v43  ;;  %v5107_v12 = vshll.u32 %v12386_v11, %v5095_v25 }
 0x61f   : > { %v4847_v15 = vshll.u32 %v4846_v32, 23  ;;  %v5108_v38 = vshrl.u32 %v12181_v59, %v5096_v43  ;;  %v5038_v60 = vadd.s32 536870912, %v5037_v26  ;;  %v11127_v16 = vshll.u32 %v5089_v63, 8 }
 0x620   : > { %v5100_v6 = vor.u32 %v5099_v27, %v5098_v19  ;;  %v5103_v37 = vor.u32 %v5102_v24, %v5101_v39  ;;  %v4842_v44 = vshll.u32 %v11082_v45, %v4840_v46  ;;  %v5106_v33 = vor.u32 %v5105_v28, %v5104_v10 }
 0x621   : > { %v5109_v22 = vor.u32 %v5108_v38, %v5107_v12  ;;  %v5292_v57 = vand.u32 2139095040, %v11051_v14  ;;  %vm4875_vm5 = vcmp.lt.s32.totalorder %v10787_v55, 0  ;;  %v4848_v32 = vor.u32 4788187, %v4847_v15 }
 0x622   : > { %v11132_v48 = vshrl.u32 %v5038_v60, 30  ;;  %v5110_v23 = vshll.u32 %v12181_v59, %v5095_v25  ;;  %v5111_v30 = vshrl.u32 %v12191_v17, %v5096_v43  ;;  %v4844_v13 = vor.u32 %v4843_v31, %v4842_v44 }
 0x623   : > { %v5097_v19 = vshrl.u32 %v12182_v4, %v5096_v43  ;;  %vm5113_vm9 = vcmp.lt.s32.totalorder %v5094_v7, 1  ;;  %vm5116_vm1 = vcmp.lt.s32.totalorder %v5094_v7, 4  ;;  %v12416_v10 = vand.u32 2147483647, %v10787_v55 }
 0x624   : > { %12415 = vst [vmem:[#allocation17_spill] sm:$0xff] %v11132_v48  ;;  %v5040_v45 = vshll.u32 %v11132_v48, 30  ;;  %v5112_v46 = vor.u32 %v5111_v30, %v5110_v23  ;;  %v5118_v63 = vsel %vm5116_vm1, %v5106_v33, 2102212464  ;;  %v5121_v39 = vsel %vm5113_vm9, %v5100_v6, %v5103_v37 }
 0x625   : > { %vm11140_vm14 = vcmp.le.f32.partialorder %v12416_v10, 0.7853982  ;;  %vm5114_vm4 = vcmp.lt.s32.totalorder %v5094_v7, 2  ;;  %vm5115_vm12 = vcmp.lt.s32.totalorder %v5094_v7, 3  ;;  %v5122_v25 = vsel %vm5116_vm1, %v5109_v22, 920167782 }
 0x626   : > { %v5125_v24 = vsel %vm5113_vm9, %v5103_v37, %v5106_v33  ;;  %v4849_v44 = vand.u32 2147483647, %v4848_v32  ;;  %v11144_v31 = vsub.s32 %v5037_v26, %v5040_v45  ;;  %v5123_v43 = vsel %vm5115_vm12, %v5106_v33, %v5122_v25 }
 0x627   : > { %v5126_v15 = vsel %vm5116_vm1, %v5112_v46, 1326507024  ;;  %v5117_v28 = vsel %vm5113_vm9, %v5097_v19, %v5100_v6  ;;  %v5119_v12 = vsel %vm5115_vm12, %v5103_v37, %v5118_v63  ;;  %v5124_v30 = vsel %vm5114_vm4, %v5121_v39, %v5123_v43 }
 0x628   : > { %v5127_v23 = vsel %vm5115_vm12, %v5109_v22, %v5126_v15  ;;  %v5043_v38 = vsub.s32 0, %v11144_v31  ;;  %v11150_v10 = vmul.u32.u64.low %v11127_v16, %v5124_v30  ;;  %v11151_v48 = vmul.u32.u64.high %v11127_v16, %v5124_v30, %v11150_v10 }
 0x629   : > { %v5128_v60 = vsel %vm5114_vm4, %v5125_v24, %v5127_v23  ;;  %v4851_v52 = vcvt.s32.f32 %v4844_v13  ;;  %v5293_v33 = vshrl.u32 %v5292_v57, 23  ;;  %6816 = vcosq.f32 %v11104_v35 }
 0x62a   : > { %v11155_v26 = vmul.u32.u64.low %v11127_v16, %v5128_v60  ;;  %v11156_v32 = vmul.u32.u64.high %v11127_v16, %v5128_v60, %v11155_v26  ;;  %v12419_v6 = vxor.u32 2147483648, %v11053_v5  ;;  %v6337_v22 = vmin.u32 %v5043_v38, %v11144_v31 }
 0x62b   : > { %v5120_v19 = vsel %vm5114_vm4, %v5117_v28, %v5119_v12  ;;  %v4958_v13 = vsel %vm4875_vm5, %v4957_v54, %v11107_v61  ;;  %v12420_v45 = vsub.s32 4, %v11000_v34  ;;  %vm4771_vm2 = vcmp.lt.s32.totalorder %v10754_v47, 0 }
 0x62c   : > { %v4750_v37 = vsel %vm4667_vm15, %v12419_v6, %v11053_v5  ;;  %v4852_v46 = vmul.f32 %v4851_v52, %v4849_v44  ;;  %v6348_v63 = vadd.s32 4294967169, %v5293_v33  ;;  %v5045_v39 = vclz %v6337_v22 }
 0x62d   : > { %v4960_v57 = vsel %vm4875_vm5, %v12420_v45, %v11000_v34  ;;  %v5139_v5 = vadd.s32 1, %v11151_v48  ;;  %v12421_v7 = vand.u32 2147483647, %v11051_v14  ;;  %v11180_v24 = vadd.f32 %v10705_v2, %v10995_v21 }
 0x62e   : > { %6818 = vsinq.f32 %v11104_v35  ;;  %v5136_v61 = vmul.u32 %v11127_v16, %v5120_v19  ;;  %vm5138_vm15 = vc.u32 %v11156_v32, %v11150_v10  ;;  %v5299_v34 = vadd.s32 1, %v6348_v63 }
 0x62f   : > { %v5296_v25 = vand.u32 8388607, %v12421_v7  ;;  %v4753_v52 = vsel %vm10918_vm3, %v10578_v50, %v4750_v37  ;;  %v4962_v54 = vsel %vm11140_vm14, 0, %v4960_v57  ;;  %v6338_v44 = vadd.s32 4294967294, %v5045_v39 }
 0x630   : > { %v5140_v43 = vsel %vm5138_vm15, %v5139_v5, %v11151_v48  ;;  %v11195_v2 = vsel %vm11140_vm14, %v10787_v55, %v4958_v13  ;;  %v4853_v35 = vxor.u32 2147483648, %v4852_v46  ;;  %vm5300_vm7 = vcmp.gt.s32.totalorder %v5299_v34, 0 }
 0x631   : > { %v5141_v16 = vadd.s32 %v5140_v43, %v5136_v61  ;;  %vm6339_vm11 = vcmp.lt.s32.totalorder %v6338_v44, 0  ;;  %v5297_v15 = vor.u32 8388608, %v5296_v25  ;;  %v5301_v28 = vsel %vm5300_vm7, %v5299_v34, 0 }
 0x632   : > { %v5188_v20 = vand.u32 2139095040, %v11180_v24  ;;  %6820 = vcosq.f32 %v4753_v52  ;;  %v5048_v12 = vsel %vm6339_vm11, 0, %v6338_v44  ;;  %v5303_v23 = vand.u32 31, %v5301_v28 }
 0x633   : > { %v5142_v30 = vadd.s32 536870912, %v5141_v16  ;;  %6822 = vsinq.f32 %v4753_v52  ;;  %v11198_v38 = vadd.s32 3, %v4962_v54  ;;  %v5049_v48 = vsub.s32 32, %v5048_v12  ;;  %v11205_v6 = vpop.eup %6816 }
 0x634   : > { %v5053_v60 = vsub.s32 4294967266, %v5048_v12  ;;  %6824 = vcosq.f32 %v11195_v2  ;;  %v5033_v27 = vadd.s32 %v11094_v9, %v11091_v51  ;;  %v5304_v33 = vsub.s32 32, %v5303_v23 }
 0x635   : > { %12422 = vst [vmem:[#allocation19_spill] sm:$0xff] %v11198_v38  ;;  %v11203_v26 = vshrl.u32 %v5142_v30, 30  ;;  %v11209_v37 = vsel %vm4771_vm2, %v4853_v35, %v4852_v46  ;;  %v11211_v19 = vshll.u32 %v5297_v15, 8  ;;  %v5189_v13 = vshrl.u32 %v5188_v20, 23 }
 0x636   : > { %v5054_v22 = vadd.s32 127, %v5053_v60  ;;  %v5306_v57 = vshll.u32 %v12182_v4, %v5303_v23  ;;  %v5307_v63 = vshrl.u32 %v12384_v49, %v5304_v33  ;;  %v5309_v51 = vshll.u32 %v12384_v49, %v5303_v23 }
 0x637   : > { %v5144_v45 = vshll.u32 %v11203_v26, 30  ;;  %v5051_v9 = vshrl.u32 %v5033_v27, %v5049_v48  ;;  %v5310_v5 = vshrl.u32 %v12385_v40, %v5304_v33  ;;  %v5313_v7 = vshrl.u32 %v12386_v11, %v5304_v33 }
 0x638   : > { %v5055_v39 = vshll.u32 %v5054_v22, 23  ;;  %v11219_v46 = vpop.eup %6818  ;;  %v5312_v61 = vshll.u32 %v12385_v40, %v5303_v23  ;;  %v5315_v34 = vshll.u32 %v12386_v11, %v5303_v23  ;;  %v5316_v52 = vshrl.u32 %v12181_v59, %v5304_v33 }
 0x639   : > { %v11221_v25 = vsub.s32 %v5141_v16, %v5144_v45  ;;  %v5050_v54 = vshll.u32 %v11144_v31, %v5048_v12  ;;  %v5302_v43 = vshrl.u32 %v5301_v28, 5  ;;  %v5308_v35 = vor.u32 %v5307_v63, %v5306_v57 }
 0x63a   : > { %v5056_v44 = vor.u32 4788187, %v5055_v39  ;;  %vm5083_vm3 = vcmp.lt.s32.totalorder %v11005_v53, 0  ;;  %v5311_v20 = vor.u32 %v5310_v5, %v5309_v51  ;;  %v5314_v30 = vor.u32 %v5313_v7, %v5312_v61 }
 0x63b   : > { %v5147_v15 = vsub.s32 0, %v11221_v25  ;;  %v5317_v48 = vor.u32 %v5316_v52, %v5315_v34  ;;  %v5052_v16 = vor.u32 %v5051_v9, %v5050_v54  ;;  %v5318_v60 = vshll.u32 %v12181_v59, %v5303_v23 }
 0x63c   : > { %v5319_v27 = vshrl.u32 %v12191_v17, %v5304_v33  ;;  %v6344_v22 = vadd.s32 4294967169, %v5189_v13  ;;  %v11231_v45 = vpop.eup %6820  ;;  %v12424_v31 = vand.u32 2147483647, %v10754_v47  ;;  %v5057_v12 = vand.u32 2147483647, %v5056_v44 }
 0x63d   : > { %12423 = vst [vmem:[#allocation9_spill] sm:$0xff] %v11231_v45  ;;  %v6341_v57 = vmin.u32 %v5147_v15, %v11221_v25  ;;  %v5167_v63 = vsub.s32 4, %v11203_v26  ;;  %v5305_v51 = vshrl.u32 %v12182_v4, %v5304_v33  ;;  %v11242_v9 = vpop.eup %6822  ;;  %vm5321_vm5 = vcmp.lt.s32.totalorder %v5302_v43, 1 }
 0x63e   : > { %vm11235_vm0 = vcmp.le.f32.partialorder %v12424_v31, 0.7853982  ;;  %12427 = vst [vmem:[#allocation25_spill] sm:$0xff] %v11242_v9  ;;  %v5320_v23 = vor.u32 %v5319_v27, %v5318_v60  ;;  %vm5323_vm9 = vcmp.lt.s32.totalorder %v5302_v43, 3  ;;  %vm5324_vm1 = vcmp.lt.s32.totalorder %v5302_v43, 4  ;;  %v11244_v13 = vpop.eup %6824 }
 0x63f   : > { %12428 = vst [vmem:[#allocation18_spill] sm:$0xff] %v11244_v13  ;;  %v5149_v39 = vclz %v6341_v57  ;;  %v5326_v5 = vsel %vm5324_vm1, %v5314_v30, 2102212464  ;;  %v5329_v7 = vsel %vm5321_vm5, %v5308_v35, %v5311_v20  ;;  %v5330_v61 = vsel %vm5324_vm1, %v5317_v48, 920167782 }
 0x640   : > { %v5059_v34 = vcvt.s32.f32 %v5052_v16  ;;  %vm5322_vm14 = vcmp.lt.s32.totalorder %v5302_v43, 2  ;;  %v5331_v52 = vsel %vm5323_vm9, %v5314_v30, %v5330_v61  ;;  %v5333_v54 = vsel %vm5321_vm5, %v5311_v20, %v5314_v30 }
 0x641   : > { %v6342_v44 = vadd.s32 4294967294, %v5149_v39  ;;  %v5325_v15 = vsel %vm5321_vm5, %v5305_v51, %v5308_v35  ;;  %v5332_v33 = vsel %vm5322_vm14, %v5329_v7, %v5331_v52  ;;  %v5334_v31 = vsel %vm5324_vm1, %v5320_v23, 1326507024 }
 0x642   : > { %vm12159_vm4 = vcmp.lt.s32.totalorder %v10898_v56, 0  ;;  %v5327_v60 = vsel %vm5323_vm9, %v5311_v20, %v5326_v5  ;;  %v5335_v27 = vsel %vm5323_vm9, %v5317_v48, %v5334_v31  ;;  %v5060_v16 = vmul.f32 %v5059_v34, %v5057_v12 }
 0x643   : > { %v11252_v57 = vmul.u32.u64.low %v11211_v19, %v5332_v33  ;;  %v11253_v55 = vmul.u32.u64.high %v11211_v19, %v5332_v33, %v11252_v57  ;;  %vm6343_vm12 = vcmp.lt.s32.totalorder %v6342_v44, 0  ;;  %v5336_v30 = vsel %vm5322_vm14, %v5333_v54, %v5335_v27 }
 0x644   : > { %v12136_v35 = vand.u32 2147483647, %v11180_v24  ;;  %v5152_v51 = vsel %vm6343_vm12, 0, %v6342_v44  ;;  %v5168_v23 = vsel %vm5083_vm3, %v5167_v63, %v11203_v26  ;;  %6826 = vsinq.f32 %v11195_v2 }
 0x645   : > { %v11262_v20 = vmul.u32.u64.low %v11211_v19, %v5336_v30  ;;  %v11263_v39 = vmul.u32.u64.high %v11211_v19, %v5336_v30, %v11262_v20  ;;  %v12429_v48 = vand.u32 2147483647, %v11005_v53  ;;  %v5157_v5 = vsub.s32 4294967266, %v5152_v51 }
 0x646   : > { %v5328_v7 = vsel %vm5322_vm14, %v5325_v15, %v5327_v60  ;;  %v4857_v26 = vsel %vm11235_vm0, %v10754_v47, %v11209_v37  ;;  %v5347_v63 = vadd.s32 1, %v11253_v55  ;;  %v5195_v61 = vadd.s32 1, %v6344_v22  ;;  %v11289_v37 = vpop.permute.xlu1 %4056 }
 0x647   : > { %vm11268_vm15 = vcmp.le.f32.partialorder %v12429_v48, 0.7853982  ;;  %v11280_v2 = vadd.f32 %v10747_v29, %v10995_v21  ;;  %v5061_v34 = vxor.u32 2147483648, %v5060_v16  ;;  %v5158_v52 = vadd.s32 127, %v5157_v5  ;;  %v12482_v21 = vld [vmem:[#allocation8_spill] sm:$0xff] }
 0x648   : > { %v5170_v54 = vsel %vm11268_vm15, 0, %v5168_v23  ;;  %v5192_v43 = vand.u32 8388607, %v12136_v35  ;;  %v5153_v44 = vsub.s32 32, %v5152_v51  ;;  %v5344_v15 = vmul.u32 %v11211_v19, %v5328_v7 }
 0x649   : > { %vm5346_vm7 = vc.u32 %v11263_v39, %v11252_v57  ;;  %vm5196_vm11 = vcmp.gt.s32.totalorder %v5195_v61, 0  ;;  %6828 = vcosq.f32 %v4857_v26  ;;  %v12432_v29 = vand.u32 2147483647, %v10898_v56 }
 0x64a   : > { %v5159_v22 = vshll.u32 %v5158_v52, 23  ;;  %v5348_v33 = vsel %vm5346_vm7, %v5347_v63, %v11253_v55  ;;  %v5197_v31 = vsel %vm5196_vm11, %v5195_v61, 0  ;;  %v5137_v19 = vadd.s32 %v11150_v10, %v11156_v32 }
 0x64b   : > { %vm11293_vm5 = vcmp.le.f32.partialorder %v12432_v29, 0.7853982  ;;  %v5349_v60 = vadd.s32 %v5348_v33, %v5344_v15  ;;  %v5199_v27 = vand.u32 31, %v5197_v31  ;;  %v11302_v30 = vadd.f32 %v10853_v0, %v11289_v37 }
 0x64c   : > { %6830 = vsinq.f32 %v4857_v26  ;;  %v5062_v23 = vsel %vm12159_vm4, %v5061_v34, %v5060_v16  ;;  %v11306_v20 = vadd.s32 3, %v5170_v54  ;;  %v5155_v5 = vshrl.u32 %v5137_v19, %v5153_v44 }
 0x64d   : > { %v5350_v55 = vadd.s32 536870912, %v5349_v60  ;;  %v5193_v7 = vor.u32 8388608, %v5192_v43  ;;  %v5200_v63 = vsub.s32 32, %v5199_v27  ;;  %v5154_v10 = vshll.u32 %v11221_v25, %v5152_v51 }
 0x64e   : > { %12435 = vst [vmem:[#allocation29_spill] sm:$0xff] %v11306_v20  ;;  %v5160_v32 = vor.u32 4788187, %v5159_v22  ;;  %v5202_v61 = vshll.u32 %v12182_v4, %v5199_v27  ;;  %v5396_v0 = vand.u32 2139095040, %v11280_v2  ;;  %v5205_v16 = vshll.u32 %v12384_v49, %v5199_v27  ;;  %v11317_v54 = vpop.eup %6826 }
 0x64f   : > { %v11312_v52 = vshrl.u32 %v5350_v55, 30  ;;  %v5203_v26 = vshrl.u32 %v12384_v49, %v5200_v63  ;;  %v5206_v34 = vshrl.u32 %v12385_v40, %v5200_v63  ;;  %12436 = vst [vmem:[#allocation28_spill] sm:$0xff] %v11317_v54  ;;  %v5209_v43 = vshrl.u32 %v12386_v11, %v5200_v63 }
 0x650   : > { %v5211_v44 = vshll.u32 %v12386_v11, %v5199_v27  ;;  %v5212_v25 = vshrl.u32 %v12181_v59, %v5200_v63  ;;  %v5215_v51 = vshrl.u32 %v12191_v17, %v5200_v63  ;;  %v5156_v15 = vor.u32 %v5155_v5, %v5154_v10 }
 0x651   : > { %v5352_v29 = vshll.u32 %v11312_v52, 30  ;;  %v5198_v22 = vshrl.u32 %v5197_v31, 5  ;;  %v5208_v33 = vshll.u32 %v12385_v40, %v5199_v27  ;;  %v5204_v19 = vor.u32 %v5203_v26, %v5202_v61 }
 0x652   : > { %v5207_v55 = vor.u32 %v5206_v34, %v5205_v16  ;;  %v5213_v35 = vor.u32 %v5212_v25, %v5211_v44  ;;  %v5214_v48 = vshll.u32 %v12181_v59, %v5199_v27  ;;  %v5065_v20 = vsel %vm11293_vm5, %v10898_v56, %v5062_v23 }
 0x653   : > { %v11329_v13 = vsub.s32 %v5349_v60, %v5352_v29  ;;  %v5210_v54 = vor.u32 %v5209_v43, %v5208_v33  ;;  %v11331_v38 = vshll.u32 %v5193_v7, 8  ;;  %v11333_v5 = vpop.eup %6828  ;;  %v5161_v10 = vand.u32 2147483647, %v5160_v32 }
 0x654   : > { %v5216_v31 = vor.u32 %v5215_v51, %v5214_v48  ;;  %v5397_v45 = vshrl.u32 %v5396_v0, 23  ;;  %v12437_v61 = vand.u32 2147483647, %v11280_v2  ;;  %v5163_v16 = vcvt.s32.f32 %v5156_v15 }
 0x655   : > { %v5355_v27 = vsub.s32 0, %v11329_v13  ;;  %vm5217_vm9 = vcmp.lt.s32.totalorder %v5198_v22, 1  ;;  %vm5220_vm1 = vcmp.lt.s32.totalorder %v5198_v22, 4  ;;  %v5201_v60 = vshrl.u32 %v12182_v4, %v5200_v63 }
 0x656   : > { %v5400_v26 = vand.u32 8388607, %v12437_v61  ;;  %v11338_v34 = vpop.eup %6830  ;;  %vm5219_vm14 = vcmp.lt.s32.totalorder %v5198_v22, 3  ;;  %v5225_v23 = vsel %vm5217_vm9, %v5204_v19, %v5207_v55  ;;  %v5226_v7 = vsel %vm5220_vm1, %v5213_v35, 920167782 }
 0x657   : > { %vm5291_vm12 = vcmp.lt.s32.totalorder %v11051_v14, 0  ;;  %v6349_v48 = vmin.u32 %v5355_v27, %v11329_v13  ;;  %vm5218_vm7 = vcmp.lt.s32.totalorder %v5198_v22, 2  ;;  %v5222_v32 = vsel %vm5220_vm1, %v5210_v54, 2102212464 }
 0x658   : > { %v5227_v0 = vsel %vm5219_vm14, %v5210_v54, %v5226_v7  ;;  %v5164_v43 = vmul.f32 %v5163_v16, %v5161_v10  ;;  %v5229_v25 = vsel %vm5217_vm9, %v5207_v55, %v5210_v54  ;;  %v5230_v51 = vsel %vm5220_vm1, %v5216_v31, 1326507024 }
 0x659   : > { %v5228_v44 = vsel %vm5218_vm7, %v5225_v23, %v5227_v0  ;;  %v5357_v15 = vclz %v6349_v48  ;;  %v5231_v63 = vsel %vm5219_vm14, %v5213_v35, %v5230_v51  ;;  %v5221_v61 = vsel %vm5217_vm9, %v5201_v60, %v5204_v19 }
 0x65a   : > { %v11349_v29 = vmul.u32.u64.low %v11331_v38, %v5228_v44  ;;  %v11350_v33 = vmul.u32.u64.high %v11331_v38, %v5228_v44, %v11349_v29  ;;  %v5223_v27 = vsel %vm5219_vm14, %v5207_v55, %v5222_v32  ;;  %v5232_v7 = vsel %vm5218_vm7, %v5229_v25, %v5231_v63 }
 0x65b   : > { %v6352_v10 = vadd.s32 4294967169, %v5397_v45  ;;  %6832 = vcosq.f32 %v5065_v20  ;;  %v6350_v16 = vadd.s32 4294967294, %v5357_v15  ;;  %v5375_v35 = vsub.s32 4, %v11312_v52 }
 0x65c   : > { %v11357_v54 = vmul.u32.u64.low %v11331_v38, %v5232_v7  ;;  %v11358_v31 = vmul.u32.u64.high %v11331_v38, %v5232_v7, %v11357_v54  ;;  %6834 = vsinq.f32 %v5065_v20  ;;  %v5500_v48 = vand.u32 2139095040, %v11302_v30 }
 0x65d   : > { %v5403_v23 = vadd.s32 1, %v6352_v10  ;;  %v5345_v19 = vadd.s32 %v11252_v57, %v11263_v39  ;;  %vm6351_vm11 = vcmp.lt.s32.totalorder %v6350_v16, 0  ;;  %v5224_v55 = vsel %vm5218_vm7, %v5221_v61, %v5223_v27 }
 0x65e   : > { %v5243_v45 = vadd.s32 1, %v11350_v33  ;;  %v5165_v60 = vxor.u32 2147483648, %v5164_v43  ;;  %v5360_v32 = vsel %vm6351_vm11, 0, %v6350_v16  ;;  %v5401_v0 = vor.u32 8388608, %v5400_v26 }
 0x65f   : > { %vm5404_vm9 = vcmp.gt.s32.totalorder %v5403_v23, 0  ;;  %v5361_v44 = vsub.s32 32, %v5360_v32  ;;  %v5365_v25 = vsub.s32 4294967266, %v5360_v32  ;;  %v12140_v20 = vand.u32 2147483647, %v11302_v30 }
 0x660   : > { %v5501_v51 = vshrl.u32 %v5500_v48, 23  ;;  %v11370_v15 = vsel %vm5291_vm12, %v5375_v35, %v11312_v52  ;;  %v5240_v57 = vmul.u32 %v11331_v38, %v5224_v55  ;;  %vm5242_vm1 = vc.u32 %v11358_v31, %v11349_v29 }
 0x661   : > { %v5405_v39 = vsel %vm5404_vm9, %v5403_v23, 0  ;;  %v5363_v22 = vshrl.u32 %v5345_v19, %v5361_v44  ;;  %v5366_v63 = vadd.s32 127, %v5365_v25  ;;  %v5244_v26 = vsel %vm5242_vm1, %v5243_v45, %v11350_v33 }
 0x662   : > { %v11376_v61 = vshrl.u32 %v5405_v39, 5  ;;  %v5166_v27 = vsel %vm5083_vm3, %v5165_v60, %v5164_v43  ;;  %v5362_v7 = vshll.u32 %v11329_v13, %v5360_v32  ;;  %v5245_v10 = vadd.s32 %v5244_v26, %v5240_v57 }
 0x663   : > { %v5407_v52 = vand.u32 31, %v5405_v39  ;;  %v5367_v16 = vshll.u32 %v5366_v63, 23  ;;  %v11381_v54 = vshll.u32 %v5401_v0, 8  ;;  %v6356_v38 = vadd.s32 4294967169, %v5501_v51 }
 0x664   : > { %v11385_v35 = vand.u32 8388607, %v12140_v20  ;;  %v5364_v23 = vor.u32 %v5363_v22, %v5362_v7  ;;  %v5246_v48 = vadd.s32 536870912, %v5245_v10  ;;  %vm5425_vm14 = vcmp.lt.s32.totalorder %v11376_v61, 1 }
 0x665   : > { %v5408_v33 = vsub.s32 32, %v5407_v52  ;;  %v11388_v19 = vpop.eup %6832  ;;  %v5368_v43 = vor.u32 4788187, %v5367_v16  ;;  %v5410_v13 = vshll.u32 %v12182_v4, %v5407_v52  ;;  %v5413_v55 = vshll.u32 %v12384_v49, %v5407_v52 }
 0x666   : > { %12438 = vst [vmem:[#allocation31_spill] sm:$0xff] %v11388_v19  ;;  %v5416_v45 = vshll.u32 %v12385_v40, %v5407_v52  ;;  %v11393_v60 = vpop.eup %6834  ;;  %v11395_v32 = vshrl.u32 %v5246_v48, 30  ;;  %v5419_v25 = vshll.u32 %v12386_v11, %v5407_v52  ;;  %v5422_v22 = vshll.u32 %v12181_v59, %v5407_v52 }
 0x667   : > { %12439 = vst [vmem:[#allocation16_spill] sm:$0xff] %v11393_v60  ;;  %v5411_v0 = vshrl.u32 %v12384_v49, %v5408_v33  ;;  %v5414_v44 = vshrl.u32 %v12385_v40, %v5408_v33  ;;  %v5369_v51 = vand.u32 2147483647, %v5368_v43  ;;  %v5417_v57 = vshrl.u32 %v12386_v11, %v5408_v33 }
 0x668   : > { %12440 = vst [vmem:[#allocation34_spill] sm:$0xff] %v11395_v32  ;;  %v5420_v39 = vshrl.u32 %v12181_v59, %v5408_v33  ;;  %v12441_v63 = vand.u32 2147483647, %v11051_v14  ;;  %v5248_v7 = vshll.u32 %v11395_v32, 30  ;;  %v5423_v20 = vshrl.u32 %v12191_v17, %v5408_v33 }
 0x669   : > { %v5412_v16 = vor.u32 %v5411_v0, %v5410_v13  ;;  %v5415_v48 = vor.u32 %v5414_v44, %v5413_v55  ;;  %v5371_v50 = vcvt.s32.f32 %v5364_v23  ;;  %v5418_v43 = vor.u32 %v5417_v57, %v5416_v45 }
 0x66a   : > { %vm11405_vm3 = vcmp.le.f32.partialorder %v12441_v63, 0.7853982  ;;  %v5421_v9 = vor.u32 %v5420_v39, %v5419_v25  ;;  %vm5426_vm7 = vcmp.lt.s32.totalorder %v11376_v61, 2  ;;  %v11412_v19 = vsub.s32 %v5245_v10, %v5248_v7 }
 0x66b   : > { %v5409_v52 = vshrl.u32 %v12182_v4, %v5408_v33  ;;  %v5424_v60 = vor.u32 %v5423_v20, %v5422_v22  ;;  %vm5428_vm11 = vcmp.lt.s32.totalorder %v11376_v61, 4  ;;  %vm5427_vm9 = vcmp.lt.s32.totalorder %v11376_v61, 3 }
 0x66c   : > { %v5430_v63 = vsel %vm5428_vm11, %v5418_v43, 2102212464  ;;  %v5433_v13 = vsel %vm5425_vm14, %v5412_v16, %v5415_v48  ;;  %v5434_v55 = vsel %vm5428_vm11, %v5421_v9, 920167782  ;;  %v5372_v0 = vmul.f32 %v5371_v50, %v5369_v51 }
 0x66d   : > { %v5251_v23 = vsub.s32 0, %v11412_v19  ;;  %v5435_v45 = vsel %vm5427_vm9, %v5418_v43, %v5434_v55  ;;  %v5437_v10 = vsel %vm5425_vm14, %v5415_v48, %v5418_v43  ;;  %v5438_v20 = vsel %vm5428_vm11, %v5424_v60, 1326507024 }
 0x66e   : > { %v5436_v33 = vsel %vm5426_vm7, %v5433_v13, %v5435_v45  ;;  %v5507_v44 = vadd.s32 1, %v6356_v38  ;;  %v11426_v25 = vadd.f32 %v10926_v1, %v11289_v37  ;;  %v5429_v50 = vsel %vm5425_vm14, %v5409_v52, %v5412_v16 }
 0x66f   : > { %v6345_v57 = vmin.u32 %v5251_v23, %v11412_v19  ;;  %v5431_v51 = vsel %vm5427_vm9, %v5415_v48, %v5430_v63  ;;  %v5439_v39 = vsel %vm5427_vm9, %v5421_v9, %v5438_v20  ;;  %v5505_v38 = vor.u32 8388608, %v11385_v35 }
 0x670   : > { %v5440_v22 = vsel %vm5426_vm7, %v5437_v10, %v5439_v39  ;;  %v11434_v7 = vmul.u32.u64.low %v11381_v54, %v5436_v33  ;;  %v11435_v43 = vmul.u32.u64.high %v11381_v54, %v5436_v33, %v11434_v7  ;;  %v5373_v60 = vxor.u32 2147483648, %v5372_v0 }
 0x671   : > { %v5253_v1 = vclz %v6345_v57  ;;  %v11440_v13 = vmul.u32.u64.low %v11381_v54, %v5440_v22  ;;  %v11441_v55 = vmul.u32.u64.high %v11381_v54, %v5440_v22, %v11440_v13  ;;  %v11446_v9 = vsel %vm11268_vm15, %v11005_v53, %v5166_v27 }
 0x672   : > { %v5432_v48 = vsel %vm5426_vm7, %v5429_v50, %v5431_v51  ;;  %vm5508_vm1 = vcmp.gt.s32.totalorder %v5507_v44, 0  ;;  %v5241_v35 = vadd.s32 %v11349_v29, %v11358_v31  ;;  %v11457_v23 = vadd.f32 %v11028_v58, %v11289_v37 }
 0x673   : > { %v6346_v52 = vadd.s32 4294967294, %v5253_v1  ;;  %v5509_v63 = vsel %vm5508_vm1, %v5507_v44, 0  ;;  %v5451_v12 = vadd.s32 1, %v11435_v43  ;;  %v11460_v45 = vshll.u32 %v5505_v38, 8 }
 0x674   : > { %v5511_v27 = vand.u32 31, %v5509_v63  ;;  %v12150_v10 = vand.u32 2147483647, %v11426_v25  ;;  %v11465_v61 = vsel %vm5291_vm12, %v5373_v60, %v5372_v0  ;;  %v5448_v29 = vmul.u32 %v11381_v54, %v5432_v48 }
 0x675   : > { %vm6347_vm15 = vcmp.lt.s32.totalorder %v6346_v52, 0  ;;  %vm5450_vm14 = vc.u32 %v11441_v55, %v11434_v7  ;;  %v5708_v20 = vand.u32 2139095040, %v11426_v25  ;;  %v5510_v51 = vshrl.u32 %v5509_v63, 5 }
 0x676   : > { %v5256_v31 = vsel %vm6347_vm15, 0, %v6346_v52  ;;  %v5452_v58 = vsel %vm5450_vm14, %v5451_v12, %v11435_v43  ;;  %v5512_v33 = vsub.s32 32, %v5511_v27  ;;  %v5514_v0 = vshll.u32 %v12182_v4, %v5511_v27 }
 0x677   : > { %v5257_v44 = vsub.s32 32, %v5256_v31  ;;  %v5261_v57 = vsub.s32 4294967266, %v5256_v31  ;;  %v5453_v50 = vadd.s32 %v5452_v58, %v5448_v29  ;;  %v5258_v39 = vshll.u32 %v11412_v19, %v5256_v31 }
 0x678   : > { %v5515_v22 = vshrl.u32 %v12384_v49, %v5512_v33  ;;  %v5518_v54 = vshrl.u32 %v12385_v40, %v5512_v33  ;;  %v5517_v43 = vshll.u32 %v12384_v49, %v5511_v27  ;;  %v5520_v48 = vshll.u32 %v12385_v40, %v5511_v27 }
 0x679   : > { %v5259_v38 = vshrl.u32 %v5241_v35, %v5257_v44  ;;  %v5262_v60 = vadd.s32 127, %v5261_v57  ;;  %v5454_v1 = vadd.s32 536870912, %v5453_v50  ;;  %v5521_v52 = vshrl.u32 %v12386_v11, %v5512_v33 }
 0x67a   : > { %v5516_v13 = vor.u32 %v5515_v22, %v5514_v0  ;;  %v5523_v63 = vshll.u32 %v12386_v11, %v5511_v27  ;;  %v5524_v31 = vshrl.u32 %v12181_v59, %v5512_v33  ;;  %v5519_v58 = vor.u32 %v5518_v54, %v5517_v43 }
 0x67b   : > { %v5260_v12 = vor.u32 %v5259_v38, %v5258_v39  ;;  %v5263_v19 = vshll.u32 %v5262_v60, 23  ;;  %v11480_v29 = vshrl.u32 %v5454_v1, 30  ;;  %v5522_v16 = vor.u32 %v5521_v52, %v5520_v48 }
 0x67c   : > { %v5526_v35 = vshll.u32 %v12181_v59, %v5511_v27  ;;  %v5527_v44 = vshrl.u32 %v12191_v17, %v5512_v33  ;;  %v5525_v22 = vor.u32 %v5524_v31, %v5523_v63  ;;  %v5712_v53 = vand.u32 8388607, %v12150_v10 }
 0x67d   : > { %12444 = vst [vmem:[#allocation15_spill] sm:$0xff] %v11480_v29  ;;  %v5264_v57 = vor.u32 4788187, %v5263_v19  ;;  %v5456_v0 = vshll.u32 %v11480_v29, 30  ;;  %v5513_v39 = vshrl.u32 %v12182_v4, %v5512_v33  ;;  %vm5529_vm12 = vcmp.lt.s32.totalorder %v5510_v51, 1 }
 0x67e   : > { %v5528_v38 = vor.u32 %v5527_v44, %v5526_v35  ;;  %v5709_v60 = vshrl.u32 %v5708_v20, 23  ;;  %v5267_v32 = vcvt.s32.f32 %v5260_v12  ;;  %vm5532_vm7 = vcmp.lt.s32.totalorder %v5510_v51, 4 }
 0x67f   : > { %v5265_v1 = vand.u32 2147483647, %v5264_v57  ;;  %v11489_v54 = vsub.s32 %v5453_v50, %v5456_v0  ;;  %vm5531_vm11 = vcmp.lt.s32.totalorder %v5510_v51, 3  ;;  %v5534_v27 = vsel %vm5532_vm7, %v5522_v16, 2102212464 }
 0x680   : > { %v5537_v43 = vsel %vm5529_vm12, %v5516_v13, %v5519_v58  ;;  %v5538_v48 = vsel %vm5532_vm7, %v5525_v22, 920167782  ;;  %vm5530_vm9 = vcmp.lt.s32.totalorder %v5510_v51, 2  ;;  %v5541_v19 = vsel %vm5529_vm12, %v5519_v58, %v5522_v16 }
 0x681   : > { %v5459_v52 = vsub.s32 0, %v11489_v54  ;;  %v5539_v63 = vsel %vm5531_vm11, %v5522_v16, %v5538_v48  ;;  %vm12156_vm1 = vcmp.lt.s32.totalorder %v11180_v24, 0  ;;  %v5533_v33 = vsel %vm5529_vm12, %v5513_v39, %v5516_v13 }
 0x682   : > { %v5540_v20 = vsel %vm5530_vm9, %v5537_v43, %v5539_v63  ;;  %v5542_v31 = vsel %vm5532_vm7, %v5528_v38, 1326507024  ;;  %v6364_v12 = vadd.s32 4294967169, %v5709_v60  ;;  %v5268_v50 = vmul.f32 %v5267_v32, %v5265_v1 }
 0x683   : > { %v6353_v35 = vmin.u32 %v5459_v52, %v11489_v54  ;;  %v5535_v44 = vsel %vm5531_vm11, %v5519_v58, %v5534_v27  ;;  %v5543_v57 = vsel %vm5531_vm11, %v5525_v22, %v5542_v31  ;;  %v11508_v13 = vsel %vm11405_vm3, %v11051_v14, %v11465_v61 }
 0x684   : > { %v5544_v0 = vsel %vm5530_vm9, %v5541_v19, %v5543_v57  ;;  %v11500_v10 = vmul.u32.u64.low %v11460_v45, %v5540_v20  ;;  %v11501_v48 = vmul.u32.u64.high %v11460_v45, %v5540_v20, %v11500_v10  ;;  %v5715_v16 = vadd.s32 1, %v6364_v12  ;;  %v12500_v19 = vld [vmem:[#allocation15_spill] sm:$0xff] }
 0x685   : > { %v5461_v32 = vclz %v6353_v35  ;;  %v11511_v39 = vmul.u32.u64.low %v11460_v45, %v5544_v0  ;;  %v11512_v58 = vmul.u32.u64.high %v11460_v45, %v5544_v0, %v11511_v39  ;;  %6836 = vcosq.f32 %v11446_v9 }
 0x686   : > { %v5536_v22 = vsel %vm5530_vm9, %v5533_v33, %v5535_v44  ;;  %v5713_v38 = vor.u32 8388608, %v5712_v53  ;;  %vm5716_vm15 = vcmp.gt.s32.totalorder %v5715_v16, 0  ;;  %6838 = vsinq.f32 %v11446_v9 }
 0x687   : > { %v5269_v60 = vxor.u32 2147483648, %v5268_v50  ;;  %v6354_v1 = vadd.s32 4294967294, %v5461_v32  ;;  %v5717_v27 = vsel %vm5716_vm15, %v5715_v16, 0  ;;  %6840 = vcosq.f32 %v11508_v13 }
 0x688   : > { %v5555_v61 = vadd.s32 1, %v11501_v48  ;;  %v5719_v43 = vand.u32 31, %v5717_v27  ;;  %v12445_v63 = vand.u32 2147483647, %v11180_v24  ;;  %v5449_v53 = vadd.s32 %v11434_v7, %v11441_v55 }
 0x689   : > { %vm6355_vm12 = vcmp.lt.s32.totalorder %v6354_v1, 0  ;;  %v5552_v9 = vmul.u32 %v11460_v45, %v5536_v22  ;;  %vm5554_vm7 = vc.u32 %v11512_v58, %v11500_v10  ;;  %v11532_v31 = vshll.u32 %v5713_v38, 8 }
 0x68a   : > { %vm11522_vm14 = vcmp.le.f32.partialorder %v12445_v63, 0.7853982  ;;  %v5464_v51 = vsel %vm6355_vm12, 0, %v6354_v1  ;;  %v5556_v33 = vsel %vm5554_vm7, %v5555_v61, %v11501_v48  ;;  %v5720_v20 = vsub.s32 32, %v5719_v43 }
 0x68b   : > { %v5270_v12 = vsel %vm12156_vm1, %v5269_v60, %v5268_v50  ;;  %v5465_v35 = vsub.s32 32, %v5464_v51  ;;  %v5469_v44 = vsub.s32 4294967266, %v5464_v51  ;;  %v5557_v57 = vadd.s32 %v5556_v33, %v5552_v9 }
 0x68c   : > { %v5466_v7 = vshll.u32 %v11489_v54, %v5464_v51  ;;  %v11537_v55 = vshrl.u32 %v5717_v27, 5  ;;  %v5723_v45 = vshrl.u32 %v12384_v49, %v5720_v20  ;;  %v5604_v0 = vand.u32 2139095040, %v11457_v23 }
 0x68d   : > { %v5467_v16 = vshrl.u32 %v5449_v53, %v5465_v35  ;;  %v5470_v32 = vadd.s32 127, %v5469_v44  ;;  %v5558_v48 = vadd.s32 536870912, %v5557_v57  ;;  %v5726_v39 = vshrl.u32 %v12385_v40, %v5720_v20 }
 0x68e   : > { %v5722_v22 = vshll.u32 %v12182_v4, %v5719_v43  ;;  %v5725_v50 = vshll.u32 %v12384_v49, %v5719_v43  ;;  %v5728_v38 = vshll.u32 %v12385_v40, %v5719_v43  ;;  %v5729_v60 = vshrl.u32 %v12386_v11, %v5720_v20 }
 0x68f   : > { %v5468_v54 = vor.u32 %v5467_v16, %v5466_v7  ;;  %v5471_v1 = vshll.u32 %v5470_v32, 23  ;;  %v11546_v27 = vshrl.u32 %v5558_v48, 30  ;;  %v5732_v61 = vshrl.u32 %v12181_v59, %v5720_v20  ;;  %v11549_v63 = vpop.eup %6836 }
 0x690   : > { %12448 = vst [vmem:[#allocation33_spill] sm:$0xff] %v11549_v63  ;;  %vm12158_vm11 = vcmp.lt.s32.totalorder %v11280_v2, 0  ;;  %v5724_v53 = vor.u32 %v5723_v45, %v5722_v22  ;;  %v5731_v9 = vshll.u32 %v12386_v11, %v5719_v43  ;;  %v5734_v51 = vshll.u32 %v12181_v59, %v5719_v43  ;;  %v11555_v35 = vpop.eup %6838 }
 0x691   : > { %v5735_v33 = vshrl.u32 %v12191_v17, %v5720_v20  ;;  %12449 = vst [vmem:[#allocation36_spill] sm:$0xff] %v11555_v35  ;;  %v5472_v44 = vor.u32 4788187, %v5471_v1  ;;  %v5560_v7 = vshll.u32 %v11546_v27, 30  ;;  %v5727_v16 = vor.u32 %v5726_v39, %v5725_v50  ;;  %v11558_v48 = vpop.eup %6840 }
 0x692   : > { %v5730_v32 = vor.u32 %v5729_v60, %v5728_v38  ;;  %12450 = vst [vmem:[#allocation30_spill] sm:$0xff] %v11558_v48  ;;  %v5273_v52 = vsel %vm11522_vm14, %v11180_v24, %v5270_v12  ;;  %v5733_v45 = vor.u32 %v5732_v61, %v5731_v9  ;;  %v5605_v14 = vshrl.u32 %v5604_v0, 23 }
 0x693   : > { %v5736_v22 = vor.u32 %v5735_v33, %v5734_v51  ;;  %v12451_v43 = vand.u32 2147483647, %v11280_v2  ;;  %v12452_v63 = vmov 0  ;;  %v5473_v1 = vand.u32 2147483647, %v5472_v44 }
 0x694   : > { %v5475_v35 = vcvt.s32.f32 %v5468_v54  ;;  %v11569_v29 = vsub.s32 %v5557_v57, %v5560_v7  ;;  %v5721_v39 = vshrl.u32 %v12182_v4, %v5720_v20  ;;  %vm5737_vm15 = vcmp.lt.s32.totalorder %v11537_v55, 1 }
 0x695   : > { %vm11565_vm9 = vcmp.le.f32.partialorder %v12451_v43, 0.7853982  ;;  %vm5738_vm12 = vcmp.lt.s32.totalorder %v11537_v55, 2  ;;  %vm5739_vm7 = vcmp.lt.s32.totalorder %v11537_v55, 3  ;;  %vm5740_vm1 = vcmp.lt.s32.totalorder %v11537_v55, 4 }
 0x696   : > { %v12453_v63 = vsel %vm11565_vm9, 4294967295, %v12452_v63  ;;  %v5476_v12 = vmul.f32 %v5475_v35, %v5473_v1  ;;  %v5563_v0 = vsub.s32 0, %v11569_v29  ;;  %v5742_v50 = vsel %vm5740_vm1, %v5730_v32, 2102212464 }
 0x697   : > { %12454 = vst [vmem:[#allocation35_spill] sm:$0xff] %v12453_v63  ;;  %v5745_v38 = vsel %vm5737_vm15, %v5724_v53, %v5727_v16  ;;  %v5741_v60 = vsel %vm5737_vm15, %v5721_v39, %v5724_v53  ;;  %v5746_v61 = vsel %vm5740_vm1, %v5733_v45, 920167782  ;;  %v5749_v54 = vsel %vm5737_vm15, %v5727_v16, %v5730_v32 }
 0x698   : > { %v5750_v57 = vsel %vm5740_vm1, %v5736_v22, 1326507024  ;;  %v5477_v9 = vxor.u32 2147483648, %v5476_v12  ;;  %v6357_v20 = vmin.u32 %v5563_v0, %v11569_v29  ;;  %v5747_v51 = vsel %vm5739_vm7, %v5730_v32, %v5746_v61 }
 0x699   : > { %v5751_v33 = vsel %vm5739_vm7, %v5733_v45, %v5750_v57  ;;  %v5743_v44 = vsel %vm5739_vm7, %v5727_v16, %v5742_v50  ;;  %v5748_v7 = vsel %vm5738_vm12, %v5745_v38, %v5747_v51  ;;  %v6360_v43 = vadd.s32 4294967169, %v5605_v14 }
 0x69a   : > { %v5752_v35 = vsel %vm5738_vm12, %v5749_v54, %v5751_v33  ;;  %v5478_v1 = vsel %vm12158_vm11, %v5477_v9, %v5476_v12  ;;  %v5565_v53 = vclz %v6357_v20  ;;  %6842 = vsinq.f32 %v11508_v13 }
 0x69b   : > { %v11585_v39 = vmul.u32.u64.low %v11532_v31, %v5752_v35  ;;  %v11586_v22 = vmul.u32.u64.high %v11532_v31, %v5752_v35, %v11585_v39  ;;  %v12455_v16 = vsel %vm11405_vm3, 0, %v11370_v15  ;;  %6844 = vcosq.f32 %v5273_v52 }
 0x69c   : > { %v11593_v32 = vadd.s32 3, %v12455_v16  ;;  %v11596_v45 = vmul.u32.u64.low %v11532_v31, %v5748_v7  ;;  %v11597_v0 = vmul.u32.u64.high %v11532_v31, %v5748_v7, %v11596_v45  ;;  %v6358_v14 = vadd.s32 4294967294, %v5565_v53 }
 0x69d   : > { %v5583_v12 = vsub.s32 4, %v11546_v27  ;;  %v5611_v50 = vadd.s32 1, %v6360_v43  ;;  %6846 = vsinq.f32 %v5273_v52  ;;  %v11604_v13 = vsel %vm11565_vm9, %v11280_v2, %v5478_v1 }
 0x69e   : > { %12456 = vst [vmem:[#allocation21_spill] sm:$0xff] %v11593_v32  ;;  %vm5499_vm3 = vcmp.lt.s32.totalorder %v11302_v30, 0  ;;  %v5744_v15 = vsel %vm5738_vm12, %v5741_v60, %v5743_v44  ;;  %vm6359_vm1 = vcmp.lt.s32.totalorder %v6358_v14, 0  ;;  %vm5762_vm15 = vc.u32 %v11586_v22, %v11596_v45 }
 0x69f   : > { %v12457_v26 = vand.u32 2147483647, %v11457_v23  ;;  %vm5612_vm7 = vcmp.gt.s32.totalorder %v5611_v50, 0  ;;  %v5553_v52 = vadd.s32 %v11500_v10, %v11512_v58  ;;  %v5568_v61 = vsel %vm6359_vm1, 0, %v6358_v14 }
 0x6a0   : > { %v5763_v54 = vadd.s32 1, %v11597_v0  ;;  %v5613_v57 = vsel %vm5612_vm7, %v5611_v50, 0  ;;  %v5569_v9 = vsub.s32 32, %v5568_v61  ;;  %v5573_v20 = vsub.s32 4294967266, %v5568_v61 }
 0x6a1   : > { %v5608_v38 = vand.u32 8388607, %v12457_v26  ;;  %v11619_v55 = vsel %vm5499_vm3, %v5583_v12, %v11546_v27  ;;  %v5760_v60 = vmul.u32 %v11532_v31, %v5744_v15  ;;  %6848 = vcosq.f32 %v11604_v13 }
 0x6a2   : > { %v5764_v51 = vsel %vm5762_vm15, %v5763_v54, %v11597_v0  ;;  %v5615_v33 = vand.u32 31, %v5613_v57  ;;  %v11626_v10 = vadd.f32 %v11087_v8, %v11289_v37  ;;  %v5571_v58 = vshrl.u32 %v5553_v52, %v5569_v9 }
 0x6a3   : > { %v5574_v44 = vadd.s32 127, %v5573_v20  ;;  %v5765_v7 = vadd.s32 %v5764_v51, %v5760_v60  ;;  %v5609_v35 = vor.u32 8388608, %v5608_v38  ;;  %v5570_v43 = vshll.u32 %v11569_v29, %v5568_v61  ;;  %v12506_v20 = vld [vmem:[#allocation33_spill] sm:$0xff] }
 0x6a4   : > { %v5614_v1 = vshrl.u32 %v5613_v57, 5  ;;  %v5616_v27 = vsub.s32 32, %v5615_v33  ;;  %v5618_v16 = vshll.u32 %v12182_v4, %v5615_v33  ;;  %v5624_v0 = vshll.u32 %v12385_v40, %v5615_v33  ;;  %v11632_v14 = vpop.eup %6842 }
 0x6a5   : > { %v5575_v31 = vshll.u32 %v5574_v44, 23  ;;  %v5766_v39 = vadd.s32 536870912, %v5765_v7  ;;  %12458 = vst [vmem:[#allocation37_spill] sm:$0xff] %v11632_v14  ;;  %v5572_v8 = vor.u32 %v5571_v58, %v5570_v43  ;;  %v11637_v29 = vpop.eup %6844  ;;  %vm5707_vm12 = vcmp.lt.s32.totalorder %v11426_v25, 0 }
 0x6a6   : > { %v5619_v37 = vshrl.u32 %v12384_v49, %v5616_v27  ;;  %v5622_v12 = vshrl.u32 %v12385_v40, %v5616_v27  ;;  %v5625_v50 = vshrl.u32 %v12386_v11, %v5616_v27  ;;  %v5621_v38 = vshll.u32 %v12384_v49, %v5615_v33 }
 0x6a7   : > { %v5576_v15 = vor.u32 4788187, %v5575_v31  ;;  %v5767_v26 = vshrl.u32 %v5766_v39, 30  ;;  %v5628_v52 = vshrl.u32 %v12181_v59, %v5616_v27  ;;  %v11642_v61 = vpop.eup %6846  ;;  %v5627_v57 = vshll.u32 %v12386_v11, %v5615_v33 }
 0x6a8   : > { %v5626_v54 = vor.u32 %v5625_v50, %v5624_v0  ;;  %v11645_v9 = vshll.u32 %v5609_v35, 8  ;;  %v12459_v60 = vand.u32 2147483647, %v11302_v30  ;;  %v5620_v43 = vor.u32 %v5619_v37, %v5618_v16 }
 0x6a9   : > { %v5577_v58 = vand.u32 2147483647, %v5576_v15  ;;  %v5768_v44 = vshll.u32 %v5767_v26, 30  ;;  %v5623_v31 = vor.u32 %v5622_v12, %v5621_v38  ;;  %v5579_v39 = vcvt.s32.f32 %v5572_v8 }
 0x6aa   : > { %vm11650_vm1 = vcmp.le.f32.partialorder %v12459_v60, 0.7853982  ;;  %v5629_v53 = vor.u32 %v5628_v52, %v5627_v57  ;;  %v5630_v0 = vshll.u32 %v12181_v59, %v5615_v33  ;;  %v5631_v50 = vshrl.u32 %v12191_v17, %v5616_v27 }
 0x6ab   : > { %v12462_v35 = vand.u32 2147483647, %v11426_v25  ;;  %v11662_v60 = vsub.s32 %v5765_v7, %v5768_v44  ;;  %v5617_v48 = vshrl.u32 %v12182_v4, %v5616_v27  ;;  %vm5633_vm7 = vcmp.lt.s32.totalorder %v5614_v1, 1  ;;  %v11665_v16 = vpop.eup %6848 }
 0x6ac   : > { %vm5636_vm11 = vcmp.lt.s32.totalorder %v5614_v1, 4  ;;  %12465 = vst [vmem:[#allocation38_spill] sm:$0xff] %v11665_v16  ;;  %v5580_v8 = vmul.f32 %v5579_v39, %v5577_v58  ;;  %v5791_v37 = vsub.s32 4, %v5767_v26  ;;  %v5632_v12 = vor.u32 %v5631_v50, %v5630_v0 }
 0x6ad   : > { %vm11658_vm15 = vcmp.le.f32.partialorder %v12462_v35, 0.7853982  ;;  %v5638_v33 = vsel %vm5636_vm11, %v5626_v54, 2102212464  ;;  %v5771_v15 = vsub.s32 0, %v11662_v60  ;;  %vm5635_vm4 = vcmp.lt.s32.totalorder %v5614_v1, 3 }
 0x6ae   : > { %v5637_v38 = vsel %vm5633_vm7, %v5617_v48, %v5620_v43  ;;  %v5641_v52 = vsel %vm5633_vm7, %v5620_v43, %v5623_v31  ;;  %v5639_v57 = vsel %vm5635_vm4, %v5623_v31, %v5638_v33  ;;  %v5642_v35 = vsel %vm5636_vm11, %v5629_v53, 920167782 }
 0x6af   : > { %v5645_v14 = vsel %vm5633_vm7, %v5623_v31, %v5626_v54  ;;  %v5646_v7 = vsel %vm5636_vm11, %v5632_v12, 1326507024  ;;  %v6365_v44 = vmin.u32 %v5771_v15, %v11662_v60  ;;  %vm5634_vm10 = vcmp.lt.s32.totalorder %v5614_v1, 2 }
 0x6b0   : > { %v5643_v27 = vsel %vm5635_vm4, %v5626_v54, %v5642_v35  ;;  %v5647_v32 = vsel %vm5635_vm4, %v5629_v53, %v5646_v7  ;;  %v5581_v63 = vxor.u32 2147483648, %v5580_v8  ;;  %v11671_v58 = vsel %vm5707_vm12, %v5791_v37, %v5767_v26 }
 0x6b1   : > { %v5644_v39 = vsel %vm5634_vm10, %v5641_v52, %v5643_v27  ;;  %v5648_v0 = vsel %vm5634_vm10, %v5645_v14, %v5647_v32  ;;  %v5773_v50 = vclz %v6365_v44  ;;  %v5640_v16 = vsel %vm5634_vm10, %v5637_v38, %v5639_v57 }
 0x6b2   : > { %v11674_v48 = vmul.u32.u64.low %v11645_v9, %v5648_v0  ;;  %v11675_v43 = vmul.u32.u64.high %v11645_v9, %v5648_v0, %v11674_v48  ;;  %6850 = vsinq.f32 %v11604_v13  ;;  %v5586_v1 = vsel %vm11650_vm1, 0, %v11619_v55 }
 0x6b3   : > { %v11682_v53 = vmul.u32.u64.low %v11645_v9, %v5644_v39  ;;  %v11683_v54 = vmul.u32.u64.high %v11645_v9, %v5644_v39, %v11682_v53  ;;  %v5761_v26 = vadd.s32 %v11596_v45, %v11586_v22  ;;  %v6366_v32 = vadd.s32 4294967294, %v5773_v50 }
 0x6b4   : > { %v5812_v14 = vand.u32 2139095040, %v11626_v10  ;;  %v12466_v31 = vsub.s32 4, %v10717_v18  ;;  %v5582_v37 = vsel %vm5499_vm3, %v5581_v63, %v5580_v8  ;;  %v5794_v12 = vsel %vm11658_vm15, 0, %v11671_v58 }
 0x6b5   : > { %v5656_v33 = vmul.u32 %v11645_v9, %v5640_v16  ;;  %vm6367_vm10 = vcmp.lt.s32.totalorder %v6366_v32, 0  ;;  %vm5658_vm4 = vc.u32 %v11675_v43, %v11682_v53  ;;  %v12467_v15 = vand.u32 2147483647, %v11626_v10 }
 0x6b6   : > { %v4440_v13 = vsel %vm4355_vm6, %v12466_v31, %v10717_v18  ;;  %v5813_v45 = vshrl.u32 %v5812_v14, 23  ;;  %v5776_v18 = vsel %vm6367_vm10, 0, %v6366_v32  ;;  %v5659_v52 = vadd.s32 1, %v11683_v54 }
 0x6b7   : > { %v4442_v22 = vsel %vm10909_vm8, 0, %v4440_v13  ;;  %v5816_v38 = vand.u32 8388607, %v12467_v15  ;;  %v4855_v8 = vsub.s32 4, %v11062_v42  ;;  %v5777_v57 = vsub.s32 32, %v5776_v18 }
 0x6b8   : > { %v4446_v63 = vadd.s32 3, %v4442_v22  ;;  %v5781_v35 = vsub.s32 4294967266, %v5776_v18  ;;  %v6368_v7 = vadd.s32 4294967169, %v5813_v45  ;;  %v4450_v9 = vxor.u32 2147483648, %v11066_v3 }
 0x6b9   : > { %v5778_v62 = vshll.u32 %v11662_v60, %v5776_v18  ;;  %v5660_v16 = vsel %vm5658_vm4, %v5659_v52, %v11683_v54  ;;  %v4453_v27 = vxor.u32 2147483648, %v11060_v41  ;;  %v5779_v39 = vshrl.u32 %v5761_v26, %v5777_v57 }
 0x6ba   : > { %v4447_v44 = vand.u32 3, %v4446_v63  ;;  %v5782_v0 = vadd.s32 127, %v5781_v35  ;;  %v5661_v50 = vadd.s32 %v5660_v16, %v5656_v33  ;;  %v5819_v48 = vadd.s32 1, %v6368_v7 }
 0x6bb   : > { %v5817_v32 = vor.u32 8388608, %v5816_v38  ;;  %v4856_v14 = vsel %vm4771_vm2, %v4855_v8, %v11062_v42  ;;  %v5780_v31 = vor.u32 %v5779_v39, %v5778_v62  ;;  %v11718_v54 = vsel %vm11650_vm1, %v11302_v30, %v5582_v37 }
 0x6bc   : > { %vm4449_vm6 = vcmp.eq.s32.totalorder %v4447_v44, 0  ;;  %vm4452_vm8 = vcmp.eq.s32.totalorder %v4447_v44, 2  ;;  %v5783_v13 = vshll.u32 %v5782_v0, 23  ;;  %v5662_v22 = vadd.s32 536870912, %v5661_v50  ;;  %v11713_v60 = vpop.eup %6850 }
 0x6bd   : > { %vm5820_vm11 = vcmp.gt.s32.totalorder %v5819_v48, 0  ;;  %v4451_v33 = vsel %vm4449_vm6, %v11060_v41, %v4450_v9  ;;  %v4454_v45 = vsel %vm4452_vm8, %v4453_v27, %v11066_v3  ;;  %v11723_v38 = vadd.s32 %v11682_v53, %v11675_v43 }
 0x6be   : > { %v5821_v26 = vsel %vm5820_vm11, %v5819_v48, 0  ;;  %v5784_v15 = vor.u32 4788187, %v5783_v13  ;;  %v11725_v42 = vshrl.u32 %v5662_v22, 30  ;;  %v4858_v18 = vsel %vm11235_vm0, 0, %v4856_v14 }
 0x6bf   : > { %v5787_v52 = vcvt.s32.f32 %v5780_v31  ;;  %v5823_v63 = vand.u32 31, %v5821_v26  ;;  %v11729_v8 = vshll.u32 %v5817_v32, 8  ;;  %vm4448_vm2 = vcmp.lt.s32.totalorder %v4447_v44, 2 }
 0x6c0   : > { %v5785_v37 = vand.u32 2147483647, %v5784_v15  ;;  %v5664_v57 = vshll.u32 %v11725_v42, 30  ;;  %v5822_v41 = vshrl.u32 %v5821_v26, 5  ;;  %v11732_v35 = vsel %vm4448_vm2, %v4451_v33, %v4454_v45 }
 0x6c1   : > { %v5824_v3 = vsub.s32 32, %v5823_v63  ;;  %v5826_v43 = vshll.u32 %v12182_v4, %v5823_v63  ;;  %v4862_v53 = vadd.s32 3, %v4858_v18  ;;  %v4866_v7 = vxor.u32 2147483648, %v11338_v34 }
 0x6c2   : > { %v5788_v9 = vmul.f32 %v5787_v52, %v5785_v37  ;;  %v11736_v28 = vsub.s32 %v5661_v50, %v5664_v57  ;;  %v5829_v62 = vshll.u32 %v12384_v49, %v5823_v63  ;;  %v5832_v16 = vshll.u32 %v12385_v40, %v5823_v63 }
 0x6c3   : > { %v5827_v44 = vshrl.u32 %v12384_v49, %v5824_v3  ;;  %v5830_v27 = vshrl.u32 %v12385_v40, %v5824_v3  ;;  %v5833_v39 = vshrl.u32 %v12386_v11, %v5824_v3  ;;  %v5835_v0 = vshll.u32 %v12386_v11, %v5823_v63 }
 0x6c4   : > { %v5667_v48 = vsub.s32 0, %v11736_v28  ;;  %v5836_v32 = vshrl.u32 %v12181_v59, %v5824_v3  ;;  %v5838_v14 = vshll.u32 %v12181_v59, %v5823_v63  ;;  %v5839_v50 = vshrl.u32 %v12191_v17, %v5824_v3 }
 0x6c5   : > { %v5825_v31 = vshrl.u32 %v12182_v4, %v5824_v3  ;;  %v5828_v13 = vor.u32 %v5827_v44, %v5826_v43  ;;  %v5831_v22 = vor.u32 %v5830_v27, %v5829_v62  ;;  %v5834_v26 = vor.u32 %v5833_v39, %v5832_v16 }
 0x6c6   : > { %v6361_v49 = vmin.u32 %v5667_v48, %v11736_v28  ;;  %v5837_v40 = vor.u32 %v5836_v32, %v5835_v0  ;;  %v5840_v33 = vor.u32 %v5839_v50, %v5838_v14  ;;  %vm5841_vm0 = vcmp.lt.s32.totalorder %v5822_v41, 1 }
 0x6c7   : > { %v5789_v45 = vxor.u32 2147483648, %v5788_v9  ;;  %vm5844_vm3 = vcmp.lt.s32.totalorder %v5822_v41, 4  ;;  %v5845_v11 = vsel %vm5841_vm0, %v5825_v31, %v5828_v13  ;;  %v5849_v15 = vsel %vm5841_vm0, %v5828_v13, %v5831_v22 }
 0x6c8   : > { %v5669_v18 = vclz %v6361_v49  ;;  %vm5843_vm7 = vcmp.lt.s32.totalorder %v5822_v41, 3  ;;  %v5846_v59 = vsel %vm5844_vm3, %v5834_v26, 2102212464  ;;  %v5850_v17 = vsel %vm5844_vm3, %v5837_v40, 920167782 }
 0x6c9   : > { %vm4445_vm10 = vweird.f32 %v10515_v36  ;;  %vm5842_vm4 = vcmp.lt.s32.totalorder %v5822_v41, 2  ;;  %v5847_v4 = vsel %vm5843_vm7, %v5831_v22, %v5846_v59  ;;  %v5851_v52 = vsel %vm5843_vm7, %v5834_v26, %v5850_v17 }
 0x6ca   : > { %v5853_v63 = vsel %vm5841_vm0, %v5831_v22, %v5834_v26  ;;  %vm4861_vm6 = vweird.f32 %v10754_v47  ;;  %v6362_v37 = vadd.s32 4294967294, %v5669_v18  ;;  %v5848_v57 = vsel %vm5842_vm4, %v5845_v11, %v5847_v4  ;;  %v12468_v26 = vld [vmem:[#allocation20_spill] sm:$0xff] }
 0x6cb   : > { %v5852_v3 = vsel %vm5842_vm4, %v5849_v15, %v5851_v52  ;;  %v5854_v43 = vsel %vm5844_vm3, %v5840_v33, 1326507024  ;;  %v5790_v62 = vsel %vm5707_vm12, %v5789_v45, %v5788_v9  ;;  %v5864_v0 = vmul.u32 %v11729_v8, %v5848_v57  ;;  %v12469_v11 = vld [vmem:[#allocation24_spill] sm:$0xff] }
 0x6cc   : > { %v5855_v16 = vsel %vm5843_vm7, %v5837_v40, %v5854_v43  ;;  %v11758_v44 = vmul.u32.u64.low %v11729_v8, %v5852_v3  ;;  %v11759_v27 = vmul.u32.u64.high %v11729_v8, %v5852_v3, %v11758_v44  ;;  %vm6363_vm8 = vcmp.lt.s32.totalorder %v6362_v37, 0 }
 0x6cd   : > { %v5856_v39 = vsel %vm5842_vm4, %v5853_v63, %v5855_v16  ;;  %v4863_v48 = vand.u32 3, %v4862_v53  ;;  %v5672_v32 = vsel %vm6363_vm8, 0, %v6362_v37  ;;  %v4869_v41 = vxor.u32 2147483648, %v11333_v5 }
 0x6ce   : > { %v11763_v14 = vmul.u32.u64.low %v11729_v8, %v5856_v39  ;;  %v11764_v50 = vmul.u32.u64.high %v11729_v8, %v5856_v39, %v11763_v14  ;;  %v5673_v31 = vsub.s32 32, %v5672_v32  ;;  %v5674_v9 = vshll.u32 %v11736_v28, %v5672_v32 }
 0x6cf   : > { %v5677_v13 = vsub.s32 4294967266, %v5672_v32  ;;  %vm4864_vm12 = vcmp.lt.s32.totalorder %v4863_v48, 2  ;;  %v5867_v22 = vadd.s32 1, %v11759_v27  ;;  %vm4865_vm11 = vcmp.eq.s32.totalorder %v4863_v48, 0  ;;  %v12477_v32 = vld [vmem:[#allocation12_spill] sm:$0xff] }
 0x6d0   : > { %vm4868_vm2 = vcmp.eq.s32.totalorder %v4863_v48, 2  ;;  %v4647_v49 = vsub.s32 4, %v12468_v26  ;;  %v5675_v53 = vshrl.u32 %v11723_v38, %v5673_v31  ;;  %v4867_v33 = vsel %vm4865_vm11, %v11333_v5, %v4866_v7 }
 0x6d1   : > { %v5678_v40 = vadd.s32 127, %v5677_v13  ;;  %v4870_v8 = vsel %vm4868_vm2, %v4869_v41, %v11338_v34  ;;  %vm5866_vm0 = vc.u32 %v11764_v50, %v11758_v44  ;;  %v4456_v28 = vsel %vm4445_vm10, nan, %v11732_v35 }
 0x6d2   : > { %v4871_v45 = vsel %vm4864_vm12, %v4867_v33, %v4870_v8  ;;  %vm12470_vm3 = vcmp.lt.s32.totalorder %v12469_v11, 0  ;;  %v5676_v18 = vor.u32 %v5675_v53, %v5674_v9  ;;  %v5868_v38 = vsel %vm5866_vm0, %v5867_v22, %v11759_v27  ;;  %v12478_v53 = vld [vmem:[#allocation16_spill] sm:$0xff]  ;;  %v12479_v33 = vld [vmem:[#allocation31_spill] sm:$0xff] }
 0x6d3   : > { %v4648_v15 = vsel %vm12470_vm3, %v4647_v49, %v12468_v26  ;;  %v5679_v59 = vshll.u32 %v5678_v40, 23  ;;  %v4872_v5 = vsel %vm4861_vm6, nan, %v4871_v45  ;;  %6852 = vcosq.f32 %v11718_v54 }
 0x6d4   : > { %vm5603_vm7 = vcmp.lt.s32.totalorder %v11457_v23, 0  ;;  %v5869_v34 = vadd.s32 %v5868_v38, %v5864_v0  ;;  %v6412_v7 = vpack.c.bf16 %v4872_v5, %v4456_v28  ;;  %v4650_v35 = vsel %vm11077_vm13, 0, %v4648_v15  ;;  %v12480_v28 = vld [vmem:[#allocation14_spill] sm:$0xff] }
 0x6d5   : > { %6854 = vsinq.f32 %v11718_v54  ;;  %v11791_v17 = vsel %vm11658_vm15, %v11426_v25, %v5790_v62  ;;  %v5680_v4 = vor.u32 4788187, %v5679_v59  ;;  %v4654_v52 = vadd.s32 3, %v4650_v35  ;;  %v12475_v54 = vld [vmem:[#allocation17_spill] sm:$0xff]  ;;  %v12481_v15 = vld [vmem:[#allocation6_spill] sm:$0xff] }
 0x6d6   : > { %v12472_v47 = vand.u32 2147483647, %v11457_v23  ;;  %v5870_v37 = vadd.s32 536870912, %v5869_v34  ;;  %6413 = vmatprep.subr.bf16.mxu0 %v6412_v7  ;;  %v4658_v57 = vxor.u32 2147483648, %v11219_v46  ;;  %v4661_v3 = vxor.u32 2147483648, %v11205_v6 }
 0x6d7   : > { %v5063_v43 = vsub.s32 4, %v12475_v54  ;;  %v5681_v16 = vand.u32 2147483647, %v5680_v4  ;;  %v5683_v27 = vcvt.s32.f32 %v5676_v18  ;;  %v11803_v62 = vadd.s32 %v11758_v44, %v11764_v50 }
 0x6d8   : > { %vm11795_vm10 = vcmp.le.f32.partialorder %v12472_v47, 0.7853982  ;;  %v4655_v39 = vand.u32 3, %v4654_v52  ;;  %v11805_v0 = vshrl.u32 %v5870_v37, 30  ;;  %vm4653_vm13 = vweird.f32 %v12469_v11  ;;  %v12483_v37 = vld [vmem:[#allocation27_spill] sm:$0xff] }
 0x6d9   : > { %vm12476_vm4 = vcmp.lt.s32.totalorder %v10898_v56, 0  ;;  %v4343_v14 = vand.u32 3, %v12477_v32  ;;  %v5684_v41 = vmul.f32 %v5683_v27, %v5681_v16  ;;  %vm5069_vm11 = vweird.f32 %v10898_v56  ;;  %v12485_v27 = vld [vmem:[#allocation22_spill] sm:$0xff]  ;;  %v12487_v56 = vld [vmem:[#allocation32_spill] sm:$0xff] }
 0x6da   : > { %v5064_v48 = vsel %vm12476_vm4, %v5063_v43, %v12475_v54  ;;  %vm4656_vm6 = vcmp.lt.s32.totalorder %v4655_v39, 2  ;;  %vm4657_vm8 = vcmp.eq.s32.totalorder %v4655_v39, 0  ;;  %vm4660_vm12 = vcmp.eq.s32.totalorder %v4655_v39, 2  ;;  %v12486_v39 = vld [vmem:[#allocation9_spill] sm:$0xff] }
 0x6db   : > { %v5872_v31 = vshll.u32 %v11805_v0, 30  ;;  %v4659_v44 = vsel %vm4657_vm8, %v11205_v6, %v4658_v57  ;;  %v4662_v50 = vsel %vm4660_vm12, %v4661_v3, %v11219_v46  ;;  %v5066_v9 = vsel %vm11293_vm5, 0, %v5064_v48  ;;  %v12484_v3 = vld [vmem:[#allocation25_spill] sm:$0xff] }
 0x6dc   : > { %v5685_v13 = vxor.u32 2147483648, %v5684_v41  ;;  %v4663_v22 = vsel %vm4656_vm6, %v4659_v44, %v4662_v50  ;;  %v5070_v26 = vadd.s32 3, %v5066_v9  ;;  %v5074_v40 = vxor.u32 2147483648, %v12478_v53 }
 0x6dd   : > { %v11818_v49 = vsub.s32 %v5869_v34, %v5872_v31  ;;  %v5077_v8 = vxor.u32 2147483648, %v12479_v33  ;;  %v4346_v45 = vxor.u32 2147483648, %v12480_v28  ;;  %vm4341_vm2 = vweird.f32 %v12481_v15  ;;  %v11827_v59 = vpop.eup %6852 }
 0x6de   : > { %v5686_v6 = vsel %vm5603_vm7, %v5685_v13, %v5684_v41  ;;  %v5071_v46 = vand.u32 3, %v5070_v26  ;;  %vm4344_vm5 = vcmp.lt.s32.totalorder %v4343_v14, 2  ;;  %v4349_v18 = vxor.u32 2147483648, %v12482_v21  ;;  %v12488_v13 = vld [vmem:[#allocation11_spill] sm:$0xff] }
 0x6df   : > { %v5875_v38 = vsub.s32 0, %v11818_v49  ;;  %v4664_v5 = vsel %vm4653_vm13, nan, %v4663_v22  ;;  %vm4345_vm0 = vcmp.eq.s32.totalorder %v4343_v14, 0  ;;  %vm4348_vm3 = vcmp.eq.s32.totalorder %v4343_v14, 2  ;;  %v11832_v34 = vpop.eup %6854 }
 0x6e0   : > { %v5689_v7 = vsel %vm11795_vm10, %v11457_v23, %v5686_v6  ;;  %vm5073_vm4 = vcmp.eq.s32.totalorder %v5071_v46, 0  ;;  %vm5076_vm6 = vcmp.eq.s32.totalorder %v5071_v46, 2  ;;  %v4347_v36 = vsel %vm4345_vm0, %v12482_v21, %v4346_v45  ;;  %v12491_v45 = vld [vmem:[#allocation19_spill] sm:$0xff] }
 0x6e1   : > { %v6369_v35 = vmin.u32 %v5875_v38, %v11818_v49  ;;  %vm5072_vm8 = vcmp.lt.s32.totalorder %v5071_v46, 2  ;;  %v5075_v4 = vsel %vm5073_vm4, %v12479_v33, %v5074_v40  ;;  %v5078_v11 = vsel %vm5076_vm6, %v5077_v8, %v12478_v53  ;;  %v12489_v53 = vld [vmem:[#allocation10_spill] sm:$0xff] }
 0x6e2   : > { %v5079_v52 = vsel %vm5072_vm8, %v5075_v4, %v5078_v11  ;;  %v4350_v47 = vsel %vm4348_vm3, %v4349_v18, %v12480_v28  ;;  %v4759_v57 = vand.u32 3, %v12483_v37  ;;  %v4762_v54 = vxor.u32 2147483648, %v12484_v3  ;;  %v12490_v28 = vld [vmem:[#allocation5_spill] sm:$0xff]  ;;  %v12494_v37 = vld [vmem:[#allocation34_spill] sm:$0xff] }
 0x6e3   : > { %v5877_v43 = vclz %v6369_v35  ;;  %v5080_v16 = vsel %vm5069_vm11, nan, %v5079_v52  ;;  %vm4757_vm13 = vweird.f32 %v12485_v27  ;;  %v4765_v48 = vxor.u32 2147483648, %v12486_v39  ;;  %v12492_v35 = vld [vmem:[#allocation28_spill] sm:$0xff]  ;;  %v12493_v52 = vld [vmem:[#allocation18_spill] sm:$0xff] }
 0x6e4   : > { %6856 = vcosq.f32 %v5689_v7  ;;  %v6420_v32 = vpack.c.bf16 %v5080_v16, %v4664_v5  ;;  %v4351_v41 = vsel %vm4344_vm5, %v4347_v36, %v4350_v47  ;;  %vm4761_vm12 = vcmp.eq.s32.totalorder %v4759_v57, 0 }
 0x6e5   : > { %6858 = vsinq.f32 %v5689_v7  ;;  %v6370_v31 = vadd.s32 4294967294, %v5877_v43  ;;  %v4763_v44 = vsel %vm4761_vm12, %v12486_v39, %v4762_v54  ;;  %vm4764_vm0 = vcmp.eq.s32.totalorder %v4759_v57, 2 }
 0x6e6   : > { %6421 = vmatprep.subr.bf16.mxu1 %v6420_v32  ;;  %vm4760_vm3 = vcmp.lt.s32.totalorder %v4759_v57, 2  ;;  %v4766_v50 = vsel %vm4764_vm0, %v4765_v48, %v12484_v3  ;;  %v4551_v9 = vand.u32 3, %v12487_v56  ;;  %v4554_v22 = vxor.u32 2147483648, %v12488_v13 }
 0x6e7   : > { %vm6371_vm11 = vcmp.lt.s32.totalorder %v6370_v31, 0  ;;  %v4352_v26 = vsel %vm4341_vm2, nan, %v4351_v41  ;;  %v4767_v14 = vsel %vm4760_vm3, %v4763_v44, %v4766_v50  ;;  %v4557_v40 = vxor.u32 2147483648, %v12489_v53 }
 0x6e8   : > { %v5880_v33 = vsel %vm6371_vm11, 0, %v6370_v31  ;;  %v4768_v8 = vsel %vm4757_vm13, nan, %v4767_v14  ;;  %vm4549_vm5 = vweird.f32 %v12490_v28  ;;  %v4967_v6 = vand.u32 3, %v12491_v45 }
 0x6e9   : > { %v5881_v46 = vsub.s32 32, %v5880_v33  ;;  %v5885_v21 = vsub.s32 4294967266, %v5880_v33  ;;  %v6414_v18 = vpack.c.bf16 %v4768_v8, %v4352_v26  ;;  %vm4553_vm4 = vcmp.eq.s32.totalorder %v4551_v9, 0 }
 0x6ea   : > { %v5882_v38 = vshll.u32 %v11818_v49, %v5880_v33  ;;  %vm4552_vm6 = vcmp.lt.s32.totalorder %v4551_v9, 2  ;;  %v4555_v15 = vsel %vm4553_vm4, %v12489_v53, %v4554_v22  ;;  %vm4556_vm2 = vcmp.eq.s32.totalorder %v4551_v9, 2 }
 0x6eb   : > { %v5883_v5 = vshrl.u32 %v11803_v62, %v5881_v46  ;;  %v5886_v7 = vadd.s32 127, %v5885_v21  ;;  %6415 = vmatpush1.bf16.msra.mxu0 %v6414_v18  ;;  %v4558_v36 = vsel %vm4556_vm2, %v4557_v40, %v12488_v13  ;;  %v4970_v4 = vxor.u32 2147483648, %v12492_v35  ;;  %v12495_v62 = vld [vmem:[#allocation7_spill] sm:$0xff] }
 0x6ec   : > { %v4559_v11 = vsel %vm4552_vm6, %v4555_v15, %v4558_v36  ;;  %vm4969_vm8 = vcmp.eq.s32.totalorder %v4967_v6, 0  ;;  %v4973_v47 = vxor.u32 2147483648, %v12493_v52  ;;  %v5271_v57 = vsub.s32 4, %v12494_v37 }
 0x6ed   : > { %v5884_v3 = vor.u32 %v5883_v5, %v5882_v38  ;;  %v5887_v49 = vshll.u32 %v5886_v7, 23  ;;  %v4971_v54 = vsel %vm4969_vm8, %v12493_v52, %v4970_v4  ;;  %vm4972_vm13 = vcmp.eq.s32.totalorder %v4967_v6, 2 }
 0x6ee   : > { %v6857_v43 = vpop.eup %6856  ;;  %vm5811_vm12 = vcmp.lt.s32.totalorder %v11626_v10, 0  ;;  %vm4965_vm0 = vweird.f32 %v12495_v62  ;;  %vm4968_vm3 = vcmp.lt.s32.totalorder %v4967_v6, 2  ;;  %v4974_v16 = vsel %vm4972_vm13, %v4973_v47, %v12492_v35 }
 0x6ef   : > { %vm12496_vm11 = vcmp.lt.s32.totalorder %v11180_v24, 0  ;;  %v6859_v39 = vpop.eup %6858  ;;  %v12497_v48 = vand.u32 2147483647, %v11626_v10  ;;  %v5888_v41 = vor.u32 4788187, %v5887_v49  ;;  %v4560_v31 = vsel %vm4549_vm5, nan, %v4559_v11 }
 0x6f0   : > { %v5272_v27 = vsel %vm12496_vm11, %v5271_v57, %v12494_v37  ;;  %v4975_v44 = vsel %vm4968_vm3, %v4971_v54, %v4974_v16  ;;  %v5282_v13 = vxor.u32 2147483648, %v11642_v61  ;;  %v5687_v22 = vsub.s32 4, %v11725_v42  ;;  %v12503_v49 = vld [vmem:[#allocation38_spill] sm:$0xff] }
 0x6f1   : > { %vm11876_vm4 = vcmp.le.f32.partialorder %v12497_v48, 0.7853982  ;;  %v5274_v50 = vsel %vm11522_vm14, 0, %v5272_v27  ;;  %v4976_v56 = vsel %vm4965_vm0, nan, %v4975_v44  ;;  %v5889_v26 = vand.u32 2147483647, %v5888_v41 }
 0x6f2   : > { %v5278_v9 = vadd.s32 3, %v5274_v50  ;;  %v5891_v14 = vcvt.s32.f32 %v5884_v3  ;;  %v6422_v53 = vpack.c.bf16 %v4976_v56, %v4560_v31  ;;  %v5285_v40 = vxor.u32 2147483648, %v11637_v29  ;;  %v12507_v56 = vld [vmem:[#allocation23_spill] sm:$0xff] }
 0x6f3   : > { %vm5277_vm6 = vweird.f32 %v11180_v24  ;;  %v5688_v8 = vsel %vm5603_vm7, %v5687_v22, %v11725_v42  ;;  %v5479_v28 = vsub.s32 4, %v12500_v19  ;;  %vm5693_vm14 = vweird.f32 %v11457_v23 }
 0x6f4   : > { %v5279_v33 = vand.u32 3, %v5278_v9  ;;  %v5892_v45 = vmul.f32 %v5891_v14, %v5889_v26  ;;  %6423 = vmatpush1.bf16.msra.mxu1 %v6422_v53  ;;  %v5690_v6 = vsel %vm11795_vm10, 0, %v5688_v8  ;;  %v5698_v46 = vxor.u32 2147483648, %v6859_v39  ;;  %v12508_v14 = vld [vmem:[#allocation21_spill] sm:$0xff] }
 0x6f5   : > { %v5694_v21 = vadd.s32 3, %v5690_v6  ;;  %v5701_v18 = vxor.u32 2147483648, %v6857_v43  ;;  %vm12501_vm7 = vcmp.lt.s32.totalorder %v11280_v2, 0  ;;  %v5490_v35 = vxor.u32 2147483648, %v11713_v60  ;;  %v12509_v8 = vld [vmem:[#allocation37_spill] sm:$0xff] }
 0x6f6   : > { %vm5281_vm5 = vcmp.eq.s32.totalorder %v5279_v33, 0  ;;  %vm5284_vm2 = vcmp.eq.s32.totalorder %v5279_v33, 2  ;;  %v5893_v38 = vxor.u32 2147483648, %v5892_v45  ;;  %v5480_v42 = vsel %vm12501_vm7, %v5479_v28, %v12500_v19  ;;  %v12510_v28 = vld [vmem:[#allocation30_spill] sm:$0xff] }
 0x6f7   : > { %v5283_v15 = vsel %vm5281_vm5, %v11637_v29, %v5282_v13  ;;  %v5286_v5 = vsel %vm5284_vm2, %v5285_v40, %v11642_v61  ;;  %vm5280_vm8 = vcmp.lt.s32.totalorder %v5279_v33, 2  ;;  %v5695_v7 = vand.u32 3, %v5694_v21 }
 0x6f8   : > { %v5482_v36 = vsel %vm11565_vm9, 0, %v5480_v42  ;;  %v5894_v4 = vsel %vm5811_vm12, %v5893_v38, %v5892_v45  ;;  %v5287_v11 = vsel %vm5280_vm8, %v5283_v15, %v5286_v5  ;;  %v5895_v29 = vsub.s32 4, %v11805_v0 }
 0x6f9   : > { %v5486_v52 = vadd.s32 3, %v5482_v36  ;;  %v5897_v61 = vsel %vm11876_vm4, %v11626_v10, %v5894_v4  ;;  %vm5696_vm10 = vcmp.lt.s32.totalorder %v5695_v7, 2  ;;  %vm5697_vm13 = vcmp.eq.s32.totalorder %v5695_v7, 0 }
 0x6fa   : > { %vm5700_vm0 = vcmp.eq.s32.totalorder %v5695_v7, 2  ;;  %6860 = vcosq.f32 %v5897_v61  ;;  %v5699_v47 = vsel %vm5697_vm13, %v6857_v43, %v5698_v46  ;;  %v5493_v54 = vxor.u32 2147483648, %v12503_v49 }
 0x6fb   : > { %v5702_v37 = vsel %vm5700_vm0, %v5701_v18, %v6859_v39  ;;  %v5487_v57 = vand.u32 3, %v5486_v52  ;;  %6862 = vsinq.f32 %v5897_v61  ;;  %v5896_v62 = vsel %vm5811_vm12, %v5895_v29, %v11805_v0 }
 0x6fc   : > { %v5703_v3 = vsel %vm5696_vm10, %v5699_v47, %v5702_v37  ;;  %v5590_v16 = vadd.s32 3, %v5586_v1  ;;  %6864 = vsinq.f32 %v11791_v17  ;;  %v5288_v43 = vsel %vm5277_vm6, nan, %v5287_v11  ;;  %v12504_v1 = vld [vmem:[#allocation29_spill] sm:$0xff] }
 0x6fd   : > { %v5704_v27 = vsel %vm5693_vm14, nan, %v5703_v3  ;;  %6866 = vcosq.f32 %v11791_v17  ;;  %v5798_v0 = vadd.s32 3, %v5794_v12  ;;  %v5898_v55 = vsel %vm11876_vm4, 0, %v5896_v62  ;;  %v12505_v17 = vld [vmem:[#allocation36_spill] sm:$0xff]  ;;  %v5913_v47 = vld [vmem:[%s12019_s5] sm:$0x7]  ;;  %v5918_v62 = vpop.permute.xlu0 %5917 }
 0x6fe   : > { %v6416_v39 = vpack.c.bf16 %v5704_v27, %v5288_v43  ;;  %vm5489_vm9 = vcmp.eq.s32.totalorder %v5487_v57, 0  ;;  %vm5492_vm1 = vcmp.eq.s32.totalorder %v5487_v57, 2  ;;  %v5902_v51 = vadd.s32 3, %v5898_v55 }
 0x6ff   : > { %v5175_v24 = vand.u32 3, %v12504_v1  ;;  %v5491_v23 = vsel %vm5489_vm9, %v12503_v49, %v5490_v35  ;;  %v5494_v48 = vsel %vm5492_vm1, %v5493_v54, %v11713_v60  ;;  %v5178_v41 = vxor.u32 2147483648, %v12505_v17 }
 0x700   : > { %6417 = vmatprep.subr.bf16.mxu0 %v6416_v39  ;;  %v5181_v31 = vxor.u32 2147483648, %v12506_v20  ;;  %vm5488_vm15 = vcmp.lt.s32.totalorder %v5487_v57, 2  ;;  %v5903_v58 = vand.u32 3, %v5902_v51  ;;  %vm5485_vm11 = vweird.f32 %v11280_v2  ;;  %v12511_v57 = vld [vmem:[#allocation13_spill] sm:$0xff] }
 0x701   : > { %vm5177_vm12 = vcmp.eq.s32.totalorder %v5175_v24, 0  ;;  %vm5180_vm3 = vcmp.eq.s32.totalorder %v5175_v24, 2  ;;  %vm5901_vm4 = vweird.f32 %v11626_v10  ;;  %v5591_v44 = vand.u32 3, %v5590_v16 }
 0x702   : > { %v5179_v12 = vsel %vm5177_vm12, %v12506_v20, %v5178_v41  ;;  %v5182_v32 = vsel %vm5180_vm3, %v5181_v31, %v12505_v17  ;;  %v5594_v50 = vxor.u32 2147483648, %v11832_v34  ;;  %v5495_v60 = vsel %vm5488_vm15, %v5491_v23, %v5494_v48 }
 0x703   : > { %vm5173_vm6 = vweird.f32 %v12507_v56  ;;  %vm5176_vm14 = vcmp.lt.s32.totalorder %v5175_v24, 2  ;;  %vm5589_vm5 = vweird.f32 %v11302_v30  ;;  %vm5904_vm2 = vcmp.lt.s32.totalorder %v5903_v58, 2 }
 0x704   : > { %vm5905_vm7 = vcmp.eq.s32.totalorder %v5903_v58, 0  ;;  %vm5908_vm8 = vcmp.eq.s32.totalorder %v5903_v58, 2  ;;  %vm5593_vm10 = vcmp.eq.s32.totalorder %v5591_v44, 0  ;;  %v6861_v9 = vpop.eup %6860  ;;  %v5183_v13 = vsel %vm5176_vm14, %v5179_v12, %v5182_v32 }
 0x705   : > { %v5595_v22 = vsel %vm5593_vm10, %v11827_v59, %v5594_v50  ;;  %v5597_v26 = vxor.u32 2147483648, %v11827_v59  ;;  %v5383_v53 = vand.u32 3, %v12508_v14  ;;  %v6863_v40 = vpop.eup %6862  ;;  %v5909_v33 = vxor.u32 2147483648, %v6861_v9 }
 0x706   : > { %vm5596_vm13 = vcmp.eq.s32.totalorder %v5591_v44, 2  ;;  %v5386_v19 = vxor.u32 2147483648, %v12509_v8  ;;  %v5389_v45 = vxor.u32 2147483648, %v12510_v28  ;;  %v6865_v6 = vpop.eup %6864  ;;  %v5906_v46 = vxor.u32 2147483648, %v6863_v40 }
 0x707   : > { %vm5592_vm0 = vcmp.lt.s32.totalorder %v5591_v44, 2  ;;  %v5598_v21 = vsel %vm5596_vm13, %v5597_v26, %v11832_v34  ;;  %vm5385_vm9 = vcmp.eq.s32.totalorder %v5383_v53, 0  ;;  %v6867_v18 = vpop.eup %6866  ;;  %v5910_v38 = vsel %vm5908_vm8, %v5909_v33, %v6863_v40 }
 0x708   : > { %v5184_v59 = vsel %vm5173_vm6, nan, %v5183_v13  ;;  %v5599_v15 = vsel %vm5592_vm0, %v5595_v22, %v5598_v21  ;;  %v5387_v5 = vsel %vm5385_vm9, %v12510_v28, %v5386_v19  ;;  %v5907_v42 = vsel %vm5905_vm7, %v6861_v9, %v5906_v46 }
 0x709   : > { %v5600_v7 = vsel %vm5589_vm5, nan, %v5599_v15  ;;  %vm5388_vm1 = vcmp.eq.s32.totalorder %v5383_v53, 2  ;;  %v5799_v63 = vand.u32 3, %v5798_v0  ;;  %v5911_v36 = vsel %vm5904_vm2, %v5907_v42, %v5910_v38 }
 0x70a   : > { %v6418_v34 = vpack.c.bf16 %v5600_v7, %v5184_v59  ;;  %v5390_v35 = vsel %vm5388_vm1, %v5389_v45, %v12509_v8  ;;  %v5802_v4 = vxor.u32 2147483648, %v6865_v6  ;;  %v5496_v11 = vsel %vm5485_vm11, nan, %v5495_v60 }
 0x70b   : > { %v5912_v52 = vsel %vm5901_vm4, nan, %v5911_v36  ;;  %vm5801_vm15 = vcmp.eq.s32.totalorder %v5799_v63, 0  ;;  %vm5384_vm12 = vcmp.lt.s32.totalorder %v5383_v53, 2  ;;  %v5805_v61 = vxor.u32 2147483648, %v6867_v18 }
 0x70c   : > { %v6424_v29 = vpack.c.bf16 %v5912_v52, %v5496_v11  ;;  %6419 = vmatpush1.bf16.msra.mxu0 %v6418_v34  ;;  %v5803_v30 = vsel %vm5801_vm15, %v6867_v18, %v5802_v4  ;;  %v5391_v37 = vsel %vm5384_vm12, %v5387_v5, %v5390_v35  ;;  %vm5804_vm3 = vcmp.eq.s32.totalorder %v5799_v63, 2 }
 0x70d   : > { %vm5800_vm6 = vcmp.lt.s32.totalorder %v5799_v63, 2  ;;  %v5806_v2 = vsel %vm5804_vm3, %v5805_v61, %v6865_v6  ;;  %vm5381_vm11 = vweird.f32 %v12511_v57  ;;  %vm5797_vm4 = vweird.f32 %v11426_v25 }
 0x70e   : > { %6425 = vmatprep.subr.bf16.mxu1 %v6424_v29  ;;  %v5807_v10 = vsel %vm5800_vm6, %v5803_v30, %v5806_v2  ;;  %vm12512_vm14 = vcmask 261120   ;;  %v5392_v3 = vsel %vm5381_vm11, nan, %v5391_v37 }
 0x70f   : > { %6372 = vmatmul.mubr.msk.f32.vlgmr.msra.gmra.mrb[16].mxu0 %vm12512_vm14, %v5913_v47  ;;  %v5808_v49 = vsel %vm5797_vm4, nan, %v5807_v10  ;;  %vm12513_vm5 = vmmov %vm12512_vm14 }
 0x710   : > { %v6426_v54 = vpack.c.bf16 %v5808_v49, %v5392_v3 }
 0x712   : > { %6427 = vmatpush1.bf16.msra.mxu1 %v6426_v54 }
 0x715   : > { %6373 = vmatmul.mubr.msk.f32.vlgmr.msra.gmra.mrb[16].mxu1 %vm12513_vm5, %v5913_v47 }
 0x7e2   : > { %v5989_v16 = vpop.f32.mrb[16].mxu0 }
 0x7e3   : > { %v5990_v43 = vadd.f32 %v5989_v16, %v5918_v62  ;;  %v5991_v27 = vpop.f32.mrb[17].mxu0 }
 0x7e4   : > { %v5992_v0 = vadd.f32 %v5991_v27, %v5918_v62 }
 0x7e6   : > { %v6069_v39 = vcombine.low %v5990_v43, %v5992_v0 }
 0x7e8   : > { %6073 = vst [vmem:[%s272_s16] sm:$0x77] %v6069_v39  ;;  %v6060_v25 = vpop.f32.mrb[16].mxu1 }
 0x7e9   : > { %v6061_v55 = vadd.f32 %v6060_v25, %v5918_v62  ;;  %v6062_v51 = vpop.f32.mrb[17].mxu1 }
 0x7ea   : > { %v6063_v1 = vadd.f32 %v6062_v51, %v5918_v62 }
 0x7ec   : > { %v6070_v24 = vcombine.low %v6061_v55, %v6063_v1 }
 0x7ee   : > { %6074 = vst [vmem:[%s272_s16 + $0x8] sm:$0x77] %v6070_v24 }
 0x7ef   : > { %6881 = shalt.err (!%p6878_p3)
}
 0x7f0   : > { %s6882_s9 = scalar_lea.hbm %s11972_s21, 256  ;;  %s6886_s15 = scalar_lea.hbm %s12021_s7, 512 }
 0x7f1   : > { %p6883_p4 = scmp.ne.s32.totalorder %s11972_s21, %s6882_s9  ;;  %p6887_p9 = scmp.lt.u32.totalorder %s11972_s21, %s12021_s7 }
 0x7f2   : > { %p6888_p10 = scmp.lt.u32.totalorder %s6886_s15, %s6882_s9  ;;  %p6890_p12 = scmp.lt.u32.totalorder %s6882_s9, %s11972_s21 }
 0x7f3   : > { %p6884_p7 = pnand %p6883_p4, %p7020_p5 }
 0x7f4   : > { %p6889_p11 = por %p6888_p10, %p6887_p9 }
 0x7f5   : > { %p6885_p8 = pneg %p6884_p7 }
 0x7f6   : > { %p6891_p13 = por %p6890_p12, %p6889_p11 }
 0x7f8   : > { %p6892_p0 = pnand %p6891_p13, %p6885_p8 }
 0x7fa   : > { %6895 = shalt.err (!%p6892_p0)
}
 0x7fb   : > { %6620 = dma.vmem_to_hbm [thread:$0]  (%p7020_p5), %s11974_s18, 256, %s11972_s21, %s6076_s22  }
 0x7fc PF: > { %p6626_p1 = scmp.ge.s32.totalorder %s6930_s27, 2  ;;  %s6102_s19 = sand.u32 1, %s6918_s24  }
 0x7fd   : > { %s6103_s20 = scalar_lea.sflag [#allocation3], %s6102_s19 }
 0x7fe   : > { %p6623_p2 = pnand %p6626_p1, %p7024_p6 }
 0x800   : > { %6913 = dma.done.wait (!%p6623_p2), %s6103_s20, 256  }
 0x801   : > { %6915 = vsyncadd (!%p6623_p2), %s6103_s20, 4294967040  ;;  %p17_p3 = scmp.ge.s32.totalorder %s7007_s30, 4   ;;  %s12514_s24 = smov %s6922_s25 }
 0x802   : > { %s12515_s25 = smov %s6926_s26  ;;  %s12516_s26 = smov %s7018_s10 }
 0x803   : > { %s12517_s27 = smov %s7007_s30  ;;  %19 = sbr.rel (!%p17_p3) target bundleno = 3 (0x3), region = 85 }
 0x80a   :  { %6108 = vsyncpa [#allocation3], 1 }
 0x80b   :  { %6110 = vsyncpa [#allocation3 + $0x1], 1 }

</bundles_post_ra>
